<compile_context>
chip_gen: v5e
topology: v5e:2x2
jax: 0.10.0
libtpu: 0.0.40
codegen_flags: <defaults>
</compile_context>

<pallas_src>
import functools

import jax
import jax.numpy as jnp
from jax import lax
from jax.experimental import pallas as pl
from jax.experimental.pallas import tpu as pltpu


# ---------------------------------------------------------------------------
# Kernel 1: fused Conv2d(3x3,1,1) + BN(eval) + ReLU + MaxPool(2,2)
# ---------------------------------------------------------------------------

# (output-column parity, dx) -> (which parity-split input: 0=even cols, 1=odd cols,
#                                column offset into that array)
_TAP_SRC = {
    (0, 0): (0, 0), (0, 1): (1, 0), (0, 2): (0, 1),
    (1, 0): (1, 0), (1, 1): (0, 1), (1, 2): (1, 1),
}


def conv_bn_relu_pool_kernel(xe_ref, xo_ref, w_ref, scale_ref, shift_ref,
                             o_ref, *, h_out, w_out, c_in, c_out):
    """One image: conv3x3 + scale/shift + ReLU + 2x2 max-pool, pooled-row by row.

    xe_ref/xo_ref: [1, H+2, W/2+1, c_in]  even / odd columns of the padded input
    w_ref:         [9, c_in, c_out]       3x3 taps, row-major (dy, dx)
    scale/shift:   [1, c_out]             folded conv-bias + eval BatchNorm
    o_ref:         [1, h_out, w_out, c_out]  pooled output (h_out=H/2, w_out=W/2)
    """
    refs = (xe_ref, xo_ref)
    scale = scale_ref[...]                       # [1, c_out]
    shift = shift_ref[...]                       # [1, c_out]

    def pooled_row(i, carry):
        pooled = jnp.full((w_out, c_out), -jnp.inf, dtype=jnp.float32)
        for r in (0, 1):                         # conv row inside the 2x2 window
            for p in (0, 1):                     # conv column parity inside the window
                acc = jnp.zeros((w_out, c_out), dtype=jnp.float32)
                for dy in range(3):
                    row = 2 * i + r + dy         # row in the padded input
                    for dx in range(3):
                        which, off = _TAP_SRC[(p, dx)]
                        x = refs[which][0, pl.ds(row, 1), pl.ds(off, w_out), :]
                        x = x[0]                                 # [w_out, c_in]
                        w = w_ref[dy * 3 + dx]                   # [c_in, c_out]
                        if c_in == 1:
                            # Degenerate K=1 contraction: keep it on the VPU.
                            acc = acc + x * w
                        else:
                            acc = acc + jnp.dot(
                                x, w, preferred_element_type=jnp.float32)
                pooled = jnp.maximum(pooled, acc * scale + shift)
        # ReLU commutes with max (monotonic), so it is applied once, post-pool.
        o_ref[0, pl.ds(i, 1), :, :] = jnp.maximum(pooled, 0.0)[None, :, :]
        return carry

    lax.fori_loop(0, h_out, pooled_row, 0)


def conv_bn_relu_pool(x_nhwc, w_hwio, conv_bias, gamma, beta, rmean, rvar,
                      eps=1e-5):
    """Conv2d(3x3, stride 1, pad 1) + BatchNorm(eval) + ReLU + MaxPool2d(2,2)."""
    B, H, W, Cin = x_nhwc.shape
    kh, kw, _, Cout = w_hwio.shape
    assert (kh, kw) == (3, 3) and H % 2 == 0 and W % 2 == 0
    h_out, w_out = H // 2, W // 2

    # Cheap wrapper-side prep (~1x input bytes, vs. 9x for HBM im2col):
    xp = jnp.pad(x_nhwc, ((0, 0), (1, 1), (1, 1), (0, 0)))   # [B, H+2, W+2, Cin]
    xe = xp[:, :, 0::2, :]                                   # [B, H+2, W/2+1, Cin]
    xo = xp[:, :, 1::2, :]
    wmat = w_hwio.reshape(9, Cin, Cout)

    # Fold conv bias + eval-mode BatchNorm into per-channel scale/shift.
    scale = gamma / jnp.sqrt(rvar + eps)
    shift = (conv_bias - rmean) * scale + beta

    kernel = functools.partial(conv_bn_relu_pool_kernel,
                               h_out=h_out, w_out=w_out, c_in=Cin, c_out=Cout)
    return pl.pallas_call(
        kernel,
        out_shape=jax.ShapeDtypeStruct((B, h_out, w_out, Cout), jnp.float32),
        grid_spec=pltpu.PrefetchScalarGridSpec(
            num_scalar_prefetch=0,
            grid=(B,),
            in_specs=[
                pl.BlockSpec((1, H + 2, w_out + 1, Cin), lambda b: (b, 0, 0, 0)),
                pl.BlockSpec((1, H + 2, w_out + 1, Cin), lambda b: (b, 0, 0, 0)),
                pl.BlockSpec((9, Cin, Cout), lambda b: (0, 0, 0)),
                pl.BlockSpec((1, Cout), lambda b: (0, 0)),
                pl.BlockSpec((1, Cout), lambda b: (0, 0)),
            ],
            out_specs=pl.BlockSpec((1, h_out, w_out, Cout),
                                   lambda b: (b, 0, 0, 0)),
        ),
        compiler_params=pltpu.CompilerParams(
            dimension_semantics=("parallel",)),
    )(xe, xo, wmat, scale.reshape(1, Cout), shift.reshape(1, Cout))


# ---------------------------------------------------------------------------
# Kernel 2: Linear (+ bias + ReLU / Softmax), gridded over N tiles
# ---------------------------------------------------------------------------

def fc_kernel(x_ref, w_ref, b_ref, o_ref, *, act):
    y = jnp.dot(x_ref[...], w_ref[...], preferred_element_type=jnp.float32)
    y = y + b_ref[...]
    if act == "relu":
        y = jnp.maximum(y, 0.0)
    elif act == "softmax":
        y = y - jnp.max(y, axis=1, keepdims=True)
        e = jnp.exp(y)
        y = e / jnp.sum(e, axis=1, keepdims=True)
    o_ref[...] = y


def linear(x, w, b, act, tn=None):
    """y = act(x @ w + b); K un-tiled, grid over N tiles (parallel / megacore)."""
    B, K = x.shape
    _, N = w.shape
    if act == "softmax":
        tn = N                           # softmax reduces over N: single N block
    elif tn is None:
        tn = N if N <= 256 else 256      # fc1: 4 x 6.4 MB weight blocks
    assert N % tn == 0 and (tn % 128 == 0 or tn == N)

    return pl.pallas_call(
        functools.partial(fc_kernel, act=act),
        out_shape=jax.ShapeDtypeStruct((B, N), jnp.float32),
        grid_spec=pltpu.PrefetchScalarGridSpec(
            num_scalar_prefetch=0,
            grid=(N // tn,),
            in_specs=[
                pl.BlockSpec((B, K), lambda j: (0, 0)),     # fetched once
                pl.BlockSpec((K, tn), lambda j: (0, j)),    # weight column tile
                pl.BlockSpec((1, tn), lambda j: (0, j)),
            ],
            out_specs=pl.BlockSpec((B, tn), lambda j: (0, j)),
        ),
        compiler_params=pltpu.CompilerParams(
            dimension_semantics=("parallel",),
            vmem_limit_bytes=48 * 1024 * 1024),
    )(x, w, b.reshape(1, N))


# ---------------------------------------------------------------------------
# Forward pass
# ---------------------------------------------------------------------------

def fold_nchw_flatten_into_fc1(fw1_chw, C, H, W):
    """Permute fc1 input rows from torch's (C,H,W) flatten order to (H,W,C)."""
    N = fw1_chw.shape[1]
    return jnp.transpose(fw1_chw.reshape(C, H, W, N),
                         (1, 2, 0, 3)).reshape(C * H * W, N)


def classifier_forward(x_nchw, p):
    x = jnp.transpose(x_nchw, (0, 2, 3, 1))                 # NCHW -> NHWC boundary
    x = conv_bn_relu_pool(x, p["w1"], p["cb1"], p["g1"], p["be1"], p["m1"], p["v1"])
    x = conv_bn_relu_pool(x, p["w2"], p["cb2"], p["g2"], p["be2"], p["m2"], p["v2"])
    # Flatten directly in NHWC order; fw1's rows were permuted once at param-prep
    # time, so this matches torch's NCHW `out.view(B, -1)` exactly.
    x = x.reshape(x.shape[0], -1)                            # [B, 6272]
    x = linear(x, p["fw1"], p["fb1"], "relu")                # 6272 -> 1024
    x = linear(x, p["fw2"], p["fb2"], "relu")                # 1024 -> 512
    x = linear(x, p["fw3"], p["fb3"], "relu")                # 512  -> 128
    x = linear(x, p["fw4"], p["fb4"], "softmax")             # 128  -> 10
    return x


# ---------------------------------------------------------------------------
# Deterministic parameter construction + demo run
# ---------------------------------------------------------------------------

def make_params(key):
    ks = jax.random.split(key, 16)
    f32 = jnp.float32

    def n(k, shape, scale):
        return (scale * jax.random.normal(k, shape)).astype(f32)

    # fc1 weight generated in torch's (C,H,W) flatten-row layout, then permuted
    # once so the runtime flatten can stay in NHWC order.
    fw1_torch = n(ks[12], (128 * 7 * 7, 1024), 0.01)

    params = {
        # conv1: 1 -> 64
        "w1": n(ks[0], (3, 3, 1, 64), 0.1),
        "cb1": n(ks[1], (64,), 0.05),
        "g1": (1.0 + 0.1 * jax.random.normal(ks[2], (64,))).astype(f32),
        "be1": n(ks[3], (64,), 0.05),
        "m1": n(ks[4], (64,), 0.05),
        "v1": (1.0 + 0.1 * jax.random.uniform(ks[5], (64,))).astype(f32),
        # conv2: 64 -> 128
        "w2": n(ks[6], (3, 3, 64, 128), 0.03),
        "cb2": n(ks[7], (128,), 0.05),
        "g2": (1.0 + 0.1 * jax.random.normal(ks[8], (128,))).astype(f32),
        "be2": n(ks[9], (128,), 0.05),
        "m2": n(ks[10], (128,), 0.05),
        "v2": (1.0 + 0.1 * jax.random.uniform(ks[11], (128,))).astype(f32),
        # fc stack
        "fw1": fold_nchw_flatten_into_fc1(fw1_torch, 128, 7, 7),
        "fb1": jnp.zeros((1024,), f32),
        "fw2": n(ks[13], (1024, 512), 0.02),
        "fb2": jnp.zeros((512,), f32),
        "fw3": n(ks[14], (512, 128), 0.03),
        "fb3": jnp.zeros((128,), f32),
        "fw4": n(ks[15], (128, 10), 0.05),
        "fb4": jnp.zeros((10,), f32),
    }
    return params


if __name__ == "__main__":
    key = jax.random.PRNGKey(0)
    k_x, k_p = jax.random.split(key)

    params = make_params(k_p)
    x = jax.random.normal(k_x, (2, 1, 28, 28), dtype=jnp.float32)  # NCHW, like torch

    fwd = jax.jit(classifier_forward)
    out = fwd(x, params)
    out = jax.block_until_ready(out)

    assert out.shape == (2, 10), out.shape
    row_sums = jnp.sum(out, axis=1)
    assert bool(jnp.all(jnp.abs(row_sums - 1.0) < 1e-4)), row_sums
    assert bool(jnp.all(jnp.isfinite(out)))

    print("KERNEL_OK")
</pallas_src>

<mosaic_0001>
module attributes {stable_mosaic.version = 11 : i64} {
  func.func @conv_bn_relu_pool_kernel(%arg0: i32, %arg1: memref<1x30x15x1xf32, #tpu.memory_space<vmem>>, %arg2: memref<1x30x15x1xf32, #tpu.memory_space<vmem>>, %arg3: memref<9x1x64xf32, #tpu.memory_space<vmem>>, %arg4: memref<1x64xf32, #tpu.memory_space<vmem>>, %arg5: memref<1x64xf32, #tpu.memory_space<vmem>>, %arg6: memref<1x14x14x64xf32, #tpu.memory_space<vmem>>) attributes {dimension_semantics = [#tpu.dimension_semantics<parallel>], iteration_bounds = array<i64: 2>, scalar_prefetch = 0 : i64, scratch_operands = 0 : i64, tpu.core_type = #tpu.core_type<tc>, window_params = [{transform_indices = @transform_0, window_bounds = array<i64: 1, 30, 15, 1>}, {transform_indices = @transform_1, window_bounds = array<i64: 1, 30, 15, 1>}, {pipeline_mode = #tpu.pipeline_mode<synchronous>, transform_indices = @transform_2, window_bounds = array<i64: 9, 1, 64>}, {pipeline_mode = #tpu.pipeline_mode<synchronous>, transform_indices = @transform_3, window_bounds = array<i64: 1, 64>}, {pipeline_mode = #tpu.pipeline_mode<synchronous>, transform_indices = @transform_4, window_bounds = array<i64: 1, 64>}, {transform_indices = @transform_5, window_bounds = array<i64: 1, 14, 14, 64>}]} {
    %c0 = arith.constant 0 : index
    %c0_0 = arith.constant 0 : index
    %0 = vector.load %arg4[%c0, %c0_0] : memref<1x64xf32, #tpu.memory_space<vmem>>, vector<1x64xf32>
    %c0_1 = arith.constant 0 : index
    %c0_2 = arith.constant 0 : index
    %1 = vector.load %arg5[%c0_1, %c0_2] : memref<1x64xf32, #tpu.memory_space<vmem>>, vector<1x64xf32>
    %c0_i32 = arith.constant 0 : i32
    %c14_i32 = arith.constant 14 : i32
    %2 = arith.addi %c0_i32, %c14_i32 : i32
    %c1_i32 = arith.constant 1 : i32
    scf.for %arg7 = %c0_i32 to %2 step %c1_i32  : i32 {
      %cst = arith.constant 0xFF800000 : f32
      %3 = vector.broadcast %cst : f32 to vector<14x64xf32>
      %cst_4 = arith.constant 0.000000e+00 : f32
      %4 = vector.broadcast %cst_4 : f32 to vector<14x64xf32>
      %c2_i32 = arith.constant 2 : i32
      %5 = arith.muli %c2_i32, %arg7 : i32
      %c0_i32_5 = arith.constant 0 : i32
      %6 = arith.addi %5, %c0_i32_5 : i32
      %c0_i32_6 = arith.constant 0 : i32
      %7 = arith.addi %6, %c0_i32_6 : i32
      %c0_7 = arith.constant 0 : index
      %8 = arith.index_cast %7 : i32 to index
      %c0_8 = arith.constant 0 : index
      %c0_9 = arith.constant 0 : index
      %9 = vector.load %arg1[%c0_7, %8, %c0_8, %c0_9] : memref<1x30x15x1xf32, #tpu.memory_space<vmem>>, vector<1x1x14x1xf32>
      %10 = vector.shape_cast %9 : vector<1x1x14x1xf32> to vector<1x14x1xf32>
      %11 = vector.shape_cast %10 : vector<1x14x1xf32> to vector<14x1xf32>
      %c0_10 = arith.constant 0 : index
      %c0_11 = arith.constant 0 : index
      %c0_12 = arith.constant 0 : index
      %12 = vector.load %arg3[%c0_10, %c0_11, %c0_12] : memref<9x1x64xf32, #tpu.memory_space<vmem>>, vector<1x1x64xf32>
      %13 = vector.shape_cast %12 : vector<1x1x64xf32> to vector<1x64xf32>
      %14 = vector.broadcast %11 : vector<14x1xf32> to vector<14x64xf32>
      %15 = vector.broadcast %13 : vector<1x64xf32> to vector<14x64xf32>
      %16 = arith.mulf %14, %15 : vector<14x64xf32>
      %17 = arith.addf %4, %16 : vector<14x64xf32>
      %c0_13 = arith.constant 0 : index
      %18 = arith.index_cast %7 : i32 to index
      %c0_14 = arith.constant 0 : index
      %c0_15 = arith.constant 0 : index
      %19 = vector.load %arg2[%c0_13, %18, %c0_14, %c0_15] : memref<1x30x15x1xf32, #tpu.memory_space<vmem>>, vector<1x1x14x1xf32>
      %20 = vector.shape_cast %19 : vector<1x1x14x1xf32> to vector<1x14x1xf32>
      %21 = vector.shape_cast %20 : vector<1x14x1xf32> to vector<14x1xf32>
      %c1 = arith.constant 1 : index
      %c0_16 = arith.constant 0 : index
      %c0_17 = arith.constant 0 : index
      %22 = vector.load %arg3[%c1, %c0_16, %c0_17] : memref<9x1x64xf32, #tpu.memory_space<vmem>>, vector<1x1x64xf32>
      %23 = vector.shape_cast %22 : vector<1x1x64xf32> to vector<1x64xf32>
      %24 = vector.broadcast %21 : vector<14x1xf32> to vector<14x64xf32>
      %25 = vector.broadcast %23 : vector<1x64xf32> to vector<14x64xf32>
      %26 = arith.mulf %24, %25 : vector<14x64xf32>
      %27 = arith.addf %17, %26 : vector<14x64xf32>
      %c0_18 = arith.constant 0 : index
      %28 = arith.index_cast %7 : i32 to index
      %c1_19 = arith.constant 1 : index
      %c0_20 = arith.constant 0 : index
      %29 = vector.load %arg1[%c0_18, %28, %c1_19, %c0_20] : memref<1x30x15x1xf32, #tpu.memory_space<vmem>>, vector<1x1x14x1xf32>
      %30 = vector.shape_cast %29 : vector<1x1x14x1xf32> to vector<1x14x1xf32>
      %31 = vector.shape_cast %30 : vector<1x14x1xf32> to vector<14x1xf32>
      %c2 = arith.constant 2 : index
      %c0_21 = arith.constant 0 : index
      %c0_22 = arith.constant 0 : index
      %32 = vector.load %arg3[%c2, %c0_21, %c0_22] : memref<9x1x64xf32, #tpu.memory_space<vmem>>, vector<1x1x64xf32>
      %33 = vector.shape_cast %32 : vector<1x1x64xf32> to vector<1x64xf32>
      %34 = vector.broadcast %31 : vector<14x1xf32> to vector<14x64xf32>
      %35 = vector.broadcast %33 : vector<1x64xf32> to vector<14x64xf32>
      %36 = arith.mulf %34, %35 : vector<14x64xf32>
      %37 = arith.addf %27, %36 : vector<14x64xf32>
      %c2_i32_23 = arith.constant 2 : i32
      %38 = arith.muli %c2_i32_23, %arg7 : i32
      %c0_i32_24 = arith.constant 0 : i32
      %39 = arith.addi %38, %c0_i32_24 : i32
      %c1_i32_25 = arith.constant 1 : i32
      %40 = arith.addi %39, %c1_i32_25 : i32
      %c0_26 = arith.constant 0 : index
      %41 = arith.index_cast %40 : i32 to index
      %c0_27 = arith.constant 0 : index
      %c0_28 = arith.constant 0 : index
      %42 = vector.load %arg1[%c0_26, %41, %c0_27, %c0_28] : memref<1x30x15x1xf32, #tpu.memory_space<vmem>>, vector<1x1x14x1xf32>
      %43 = vector.shape_cast %42 : vector<1x1x14x1xf32> to vector<1x14x1xf32>
      %44 = vector.shape_cast %43 : vector<1x14x1xf32> to vector<14x1xf32>
      %c3 = arith.constant 3 : index
      %c0_29 = arith.constant 0 : index
      %c0_30 = arith.constant 0 : index
      %45 = vector.load %arg3[%c3, %c0_29, %c0_30] : memref<9x1x64xf32, #tpu.memory_space<vmem>>, vector<1x1x64xf32>
      %46 = vector.shape_cast %45 : vector<1x1x64xf32> to vector<1x64xf32>
      %47 = vector.broadcast %44 : vector<14x1xf32> to vector<14x64xf32>
      %48 = vector.broadcast %46 : vector<1x64xf32> to vector<14x64xf32>
      %49 = arith.mulf %47, %48 : vector<14x64xf32>
      %50 = arith.addf %37, %49 : vector<14x64xf32>
      %c0_31 = arith.constant 0 : index
      %51 = arith.index_cast %40 : i32 to index
      %c0_32 = arith.constant 0 : index
      %c0_33 = arith.constant 0 : index
      %52 = vector.load %arg2[%c0_31, %51, %c0_32, %c0_33] : memref<1x30x15x1xf32, #tpu.memory_space<vmem>>, vector<1x1x14x1xf32>
      %53 = vector.shape_cast %52 : vector<1x1x14x1xf32> to vector<1x14x1xf32>
      %54 = vector.shape_cast %53 : vector<1x14x1xf32> to vector<14x1xf32>
      %c4 = arith.constant 4 : index
      %c0_34 = arith.constant 0 : index
      %c0_35 = arith.constant 0 : index
      %55 = vector.load %arg3[%c4, %c0_34, %c0_35] : memref<9x1x64xf32, #tpu.memory_space<vmem>>, vector<1x1x64xf32>
      %56 = vector.shape_cast %55 : vector<1x1x64xf32> to vector<1x64xf32>
      %57 = vector.broadcast %54 : vector<14x1xf32> to vector<14x64xf32>
      %58 = vector.broadcast %56 : vector<1x64xf32> to vector<14x64xf32>
      %59 = arith.mulf %57, %58 : vector<14x64xf32>
      %60 = arith.addf %50, %59 : vector<14x64xf32>
      %c0_36 = arith.constant 0 : index
      %61 = arith.index_cast %40 : i32 to index
      %c1_37 = arith.constant 1 : index
      %c0_38 = arith.constant 0 : index
      %62 = vector.load %arg1[%c0_36, %61, %c1_37, %c0_38] : memref<1x30x15x1xf32, #tpu.memory_space<vmem>>, vector<1x1x14x1xf32>
      %63 = vector.shape_cast %62 : vector<1x1x14x1xf32> to vector<1x14x1xf32>
      %64 = vector.shape_cast %63 : vector<1x14x1xf32> to vector<14x1xf32>
      %c5 = arith.constant 5 : index
      %c0_39 = arith.constant 0 : index
      %c0_40 = arith.constant 0 : index
      %65 = vector.load %arg3[%c5, %c0_39, %c0_40] : memref<9x1x64xf32, #tpu.memory_space<vmem>>, vector<1x1x64xf32>
      %66 = vector.shape_cast %65 : vector<1x1x64xf32> to vector<1x64xf32>
      %67 = vector.broadcast %64 : vector<14x1xf32> to vector<14x64xf32>
      %68 = vector.broadcast %66 : vector<1x64xf32> to vector<14x64xf32>
      %69 = arith.mulf %67, %68 : vector<14x64xf32>
      %70 = arith.addf %60, %69 : vector<14x64xf32>
      %c2_i32_41 = arith.constant 2 : i32
      %71 = arith.muli %c2_i32_41, %arg7 : i32
      %c0_i32_42 = arith.constant 0 : i32
      %72 = arith.addi %71, %c0_i32_42 : i32
      %c2_i32_43 = arith.constant 2 : i32
      %73 = arith.addi %72, %c2_i32_43 : i32
      %c0_44 = arith.constant 0 : index
      %74 = arith.index_cast %73 : i32 to index
      %c0_45 = arith.constant 0 : index
      %c0_46 = arith.constant 0 : index
      %75 = vector.load %arg1[%c0_44, %74, %c0_45, %c0_46] : memref<1x30x15x1xf32, #tpu.memory_space<vmem>>, vector<1x1x14x1xf32>
      %76 = vector.shape_cast %75 : vector<1x1x14x1xf32> to vector<1x14x1xf32>
      %77 = vector.shape_cast %76 : vector<1x14x1xf32> to vector<14x1xf32>
      %c6 = arith.constant 6 : index
      %c0_47 = arith.constant 0 : index
      %c0_48 = arith.constant 0 : index
      %78 = vector.load %arg3[%c6, %c0_47, %c0_48] : memref<9x1x64xf32, #tpu.memory_space<vmem>>, vector<1x1x64xf32>
      %79 = vector.shape_cast %78 : vector<1x1x64xf32> to vector<1x64xf32>
      %80 = vector.broadcast %77 : vector<14x1xf32> to vector<14x64xf32>
      %81 = vector.broadcast %79 : vector<1x64xf32> to vector<14x64xf32>
      %82 = arith.mulf %80, %81 : vector<14x64xf32>
      %83 = arith.addf %70, %82 : vector<14x64xf32>
      %c0_49 = arith.constant 0 : index
      %84 = arith.index_cast %73 : i32 to index
      %c0_50 = arith.constant 0 : index
      %c0_51 = arith.constant 0 : index
      %85 = vector.load %arg2[%c0_49, %84, %c0_50, %c0_51] : memref<1x30x15x1xf32, #tpu.memory_space<vmem>>, vector<1x1x14x1xf32>
      %86 = vector.shape_cast %85 : vector<1x1x14x1xf32> to vector<1x14x1xf32>
      %87 = vector.shape_cast %86 : vector<1x14x1xf32> to vector<14x1xf32>
      %c7 = arith.constant 7 : index
      %c0_52 = arith.constant 0 : index
      %c0_53 = arith.constant 0 : index
      %88 = vector.load %arg3[%c7, %c0_52, %c0_53] : memref<9x1x64xf32, #tpu.memory_space<vmem>>, vector<1x1x64xf32>
      %89 = vector.shape_cast %88 : vector<1x1x64xf32> to vector<1x64xf32>
      %90 = vector.broadcast %87 : vector<14x1xf32> to vector<14x64xf32>
      %91 = vector.broadcast %89 : vector<1x64xf32> to vector<14x64xf32>
      %92 = arith.mulf %90, %91 : vector<14x64xf32>
      %93 = arith.addf %83, %92 : vector<14x64xf32>
      %c0_54 = arith.constant 0 : index
      %94 = arith.index_cast %73 : i32 to index
      %c1_55 = arith.constant 1 : index
      %c0_56 = arith.constant 0 : index
      %95 = vector.load %arg1[%c0_54, %94, %c1_55, %c0_56] : memref<1x30x15x1xf32, #tpu.memory_space<vmem>>, vector<1x1x14x1xf32>
      %96 = vector.shape_cast %95 : vector<1x1x14x1xf32> to vector<1x14x1xf32>
      %97 = vector.shape_cast %96 : vector<1x14x1xf32> to vector<14x1xf32>
      %c8 = arith.constant 8 : index
      %c0_57 = arith.constant 0 : index
      %c0_58 = arith.constant 0 : index
      %98 = vector.load %arg3[%c8, %c0_57, %c0_58] : memref<9x1x64xf32, #tpu.memory_space<vmem>>, vector<1x1x64xf32>
      %99 = vector.shape_cast %98 : vector<1x1x64xf32> to vector<1x64xf32>
      %100 = vector.broadcast %97 : vector<14x1xf32> to vector<14x64xf32>
      %101 = vector.broadcast %99 : vector<1x64xf32> to vector<14x64xf32>
      %102 = arith.mulf %100, %101 : vector<14x64xf32>
      %103 = arith.addf %93, %102 : vector<14x64xf32>
      %104 = vector.broadcast %0 : vector<1x64xf32> to vector<14x64xf32>
      %105 = arith.mulf %103, %104 : vector<14x64xf32>
      %106 = vector.broadcast %1 : vector<1x64xf32> to vector<14x64xf32>
      %107 = arith.addf %105, %106 : vector<14x64xf32>
      %108 = arith.maximumf %3, %107 : vector<14x64xf32>
      %cst_59 = arith.constant 0.000000e+00 : f32
      %109 = vector.broadcast %cst_59 : f32 to vector<14x64xf32>
      %c2_i32_60 = arith.constant 2 : i32
      %110 = arith.muli %c2_i32_60, %arg7 : i32
      %c0_i32_61 = arith.constant 0 : i32
      %111 = arith.addi %110, %c0_i32_61 : i32
      %c0_i32_62 = arith.constant 0 : i32
      %112 = arith.addi %111, %c0_i32_62 : i32
      %c0_63 = arith.constant 0 : index
      %113 = arith.index_cast %112 : i32 to index
      %c0_64 = arith.constant 0 : index
      %c0_65 = arith.constant 0 : index
      %114 = vector.load %arg2[%c0_63, %113, %c0_64, %c0_65] : memref<1x30x15x1xf32, #tpu.memory_space<vmem>>, vector<1x1x14x1xf32>
      %115 = vector.shape_cast %114 : vector<1x1x14x1xf32> to vector<1x14x1xf32>
      %116 = vector.shape_cast %115 : vector<1x14x1xf32> to vector<14x1xf32>
      %c0_66 = arith.constant 0 : index
      %c0_67 = arith.constant 0 : index
      %c0_68 = arith.constant 0 : index
      %117 = vector.load %arg3[%c0_66, %c0_67, %c0_68] : memref<9x1x64xf32, #tpu.memory_space<vmem>>, vector<1x1x64xf32>
      %118 = vector.shape_cast %117 : vector<1x1x64xf32> to vector<1x64xf32>
      %119 = vector.broadcast %116 : vector<14x1xf32> to vector<14x64xf32>
      %120 = vector.broadcast %118 : vector<1x64xf32> to vector<14x64xf32>
      %121 = arith.mulf %119, %120 : vector<14x64xf32>
      %122 = arith.addf %109, %121 : vector<14x64xf32>
      %c0_69 = arith.constant 0 : index
      %123 = arith.index_cast %112 : i32 to index
      %c1_70 = arith.constant 1 : index
      %c0_71 = arith.constant 0 : index
      %124 = vector.load %arg1[%c0_69, %123, %c1_70, %c0_71] : memref<1x30x15x1xf32, #tpu.memory_space<vmem>>, vector<1x1x14x1xf32>
      %125 = vector.shape_cast %124 : vector<1x1x14x1xf32> to vector<1x14x1xf32>
      %126 = vector.shape_cast %125 : vector<1x14x1xf32> to vector<14x1xf32>
      %c1_72 = arith.constant 1 : index
      %c0_73 = arith.constant 0 : index
      %c0_74 = arith.constant 0 : index
      %127 = vector.load %arg3[%c1_72, %c0_73, %c0_74] : memref<9x1x64xf32, #tpu.memory_space<vmem>>, vector<1x1x64xf32>
      %128 = vector.shape_cast %127 : vector<1x1x64xf32> to vector<1x64xf32>
      %129 = vector.broadcast %126 : vector<14x1xf32> to vector<14x64xf32>
      %130 = vector.broadcast %128 : vector<1x64xf32> to vector<14x64xf32>
      %131 = arith.mulf %129, %130 : vector<14x64xf32>
      %132 = arith.addf %122, %131 : vector<14x64xf32>
      %c0_75 = arith.constant 0 : index
      %133 = arith.index_cast %112 : i32 to index
      %c1_76 = arith.constant 1 : index
      %c0_77 = arith.constant 0 : index
      %134 = vector.load %arg2[%c0_75, %133, %c1_76, %c0_77] : memref<1x30x15x1xf32, #tpu.memory_space<vmem>>, vector<1x1x14x1xf32>
      %135 = vector.shape_cast %134 : vector<1x1x14x1xf32> to vector<1x14x1xf32>
      %136 = vector.shape_cast %135 : vector<1x14x1xf32> to vector<14x1xf32>
      %c2_78 = arith.constant 2 : index
      %c0_79 = arith.constant 0 : index
      %c0_80 = arith.constant 0 : index
      %137 = vector.load %arg3[%c2_78, %c0_79, %c0_80] : memref<9x1x64xf32, #tpu.memory_space<vmem>>, vector<1x1x64xf32>
      %138 = vector.shape_cast %137 : vector<1x1x64xf32> to vector<1x64xf32>
      %139 = vector.broadcast %136 : vector<14x1xf32> to vector<14x64xf32>
      %140 = vector.broadcast %138 : vector<1x64xf32> to vector<14x64xf32>
      %141 = arith.mulf %139, %140 : vector<14x64xf32>
      %142 = arith.addf %132, %141 : vector<14x64xf32>
      %c2_i32_81 = arith.constant 2 : i32
      %143 = arith.muli %c2_i32_81, %arg7 : i32
      %c0_i32_82 = arith.constant 0 : i32
      %144 = arith.addi %143, %c0_i32_82 : i32
      %c1_i32_83 = arith.constant 1 : i32
      %145 = arith.addi %144, %c1_i32_83 : i32
      %c0_84 = arith.constant 0 : index
      %146 = arith.index_cast %145 : i32 to index
      %c0_85 = arith.constant 0 : index
      %c0_86 = arith.constant 0 : index
      %147 = vector.load %arg2[%c0_84, %146, %c0_85, %c0_86] : memref<1x30x15x1xf32, #tpu.memory_space<vmem>>, vector<1x1x14x1xf32>
      %148 = vector.shape_cast %147 : vector<1x1x14x1xf32> to vector<1x14x1xf32>
      %149 = vector.shape_cast %148 : vector<1x14x1xf32> to vector<14x1xf32>
      %c3_87 = arith.constant 3 : index
      %c0_88 = arith.constant 0 : index
      %c0_89 = arith.constant 0 : index
      %150 = vector.load %arg3[%c3_87, %c0_88, %c0_89] : memref<9x1x64xf32, #tpu.memory_space<vmem>>, vector<1x1x64xf32>
      %151 = vector.shape_cast %150 : vector<1x1x64xf32> to vector<1x64xf32>
      %152 = vector.broadcast %149 : vector<14x1xf32> to vector<14x64xf32>
      %153 = vector.broadcast %151 : vector<1x64xf32> to vector<14x64xf32>
      %154 = arith.mulf %152, %153 : vector<14x64xf32>
      %155 = arith.addf %142, %154 : vector<14x64xf32>
      %c0_90 = arith.constant 0 : index
      %156 = arith.index_cast %145 : i32 to index
      %c1_91 = arith.constant 1 : index
      %c0_92 = arith.constant 0 : index
      %157 = vector.load %arg1[%c0_90, %156, %c1_91, %c0_92] : memref<1x30x15x1xf32, #tpu.memory_space<vmem>>, vector<1x1x14x1xf32>
      %158 = vector.shape_cast %157 : vector<1x1x14x1xf32> to vector<1x14x1xf32>
      %159 = vector.shape_cast %158 : vector<1x14x1xf32> to vector<14x1xf32>
      %c4_93 = arith.constant 4 : index
      %c0_94 = arith.constant 0 : index
      %c0_95 = arith.constant 0 : index
      %160 = vector.load %arg3[%c4_93, %c0_94, %c0_95] : memref<9x1x64xf32, #tpu.memory_space<vmem>>, vector<1x1x64xf32>
      %161 = vector.shape_cast %160 : vector<1x1x64xf32> to vector<1x64xf32>
      %162 = vector.broadcast %159 : vector<14x1xf32> to vector<14x64xf32>
      %163 = vector.broadcast %161 : vector<1x64xf32> to vector<14x64xf32>
      %164 = arith.mulf %162, %163 : vector<14x64xf32>
      %165 = arith.addf %155, %164 : vector<14x64xf32>
      %c0_96 = arith.constant 0 : index
      %166 = arith.index_cast %145 : i32 to index
      %c1_97 = arith.constant 1 : index
      %c0_98 = arith.constant 0 : index
      %167 = vector.load %arg2[%c0_96, %166, %c1_97, %c0_98] : memref<1x30x15x1xf32, #tpu.memory_space<vmem>>, vector<1x1x14x1xf32>
      %168 = vector.shape_cast %167 : vector<1x1x14x1xf32> to vector<1x14x1xf32>
      %169 = vector.shape_cast %168 : vector<1x14x1xf32> to vector<14x1xf32>
      %c5_99 = arith.constant 5 : index
      %c0_100 = arith.constant 0 : index
      %c0_101 = arith.constant 0 : index
      %170 = vector.load %arg3[%c5_99, %c0_100, %c0_101] : memref<9x1x64xf32, #tpu.memory_space<vmem>>, vector<1x1x64xf32>
      %171 = vector.shape_cast %170 : vector<1x1x64xf32> to vector<1x64xf32>
      %172 = vector.broadcast %169 : vector<14x1xf32> to vector<14x64xf32>
      %173 = vector.broadcast %171 : vector<1x64xf32> to vector<14x64xf32>
      %174 = arith.mulf %172, %173 : vector<14x64xf32>
      %175 = arith.addf %165, %174 : vector<14x64xf32>
      %c2_i32_102 = arith.constant 2 : i32
      %176 = arith.muli %c2_i32_102, %arg7 : i32
      %c0_i32_103 = arith.constant 0 : i32
      %177 = arith.addi %176, %c0_i32_103 : i32
      %c2_i32_104 = arith.constant 2 : i32
      %178 = arith.addi %177, %c2_i32_104 : i32
      %c0_105 = arith.constant 0 : index
      %179 = arith.index_cast %178 : i32 to index
      %c0_106 = arith.constant 0 : index
      %c0_107 = arith.constant 0 : index
      %180 = vector.load %arg2[%c0_105, %179, %c0_106, %c0_107] : memref<1x30x15x1xf32, #tpu.memory_space<vmem>>, vector<1x1x14x1xf32>
      %181 = vector.shape_cast %180 : vector<1x1x14x1xf32> to vector<1x14x1xf32>
      %182 = vector.shape_cast %181 : vector<1x14x1xf32> to vector<14x1xf32>
      %c6_108 = arith.constant 6 : index
      %c0_109 = arith.constant 0 : index
      %c0_110 = arith.constant 0 : index
      %183 = vector.load %arg3[%c6_108, %c0_109, %c0_110] : memref<9x1x64xf32, #tpu.memory_space<vmem>>, vector<1x1x64xf32>
      %184 = vector.shape_cast %183 : vector<1x1x64xf32> to vector<1x64xf32>
      %185 = vector.broadcast %182 : vector<14x1xf32> to vector<14x64xf32>
      %186 = vector.broadcast %184 : vector<1x64xf32> to vector<14x64xf32>
      %187 = arith.mulf %185, %186 : vector<14x64xf32>
      %188 = arith.addf %175, %187 : vector<14x64xf32>
      %c0_111 = arith.constant 0 : index
      %189 = arith.index_cast %178 : i32 to index
      %c1_112 = arith.constant 1 : index
      %c0_113 = arith.constant 0 : index
      %190 = vector.load %arg1[%c0_111, %189, %c1_112, %c0_113] : memref<1x30x15x1xf32, #tpu.memory_space<vmem>>, vector<1x1x14x1xf32>
      %191 = vector.shape_cast %190 : vector<1x1x14x1xf32> to vector<1x14x1xf32>
      %192 = vector.shape_cast %191 : vector<1x14x1xf32> to vector<14x1xf32>
      %c7_114 = arith.constant 7 : index
      %c0_115 = arith.constant 0 : index
      %c0_116 = arith.constant 0 : index
      %193 = vector.load %arg3[%c7_114, %c0_115, %c0_116] : memref<9x1x64xf32, #tpu.memory_space<vmem>>, vector<1x1x64xf32>
      %194 = vector.shape_cast %193 : vector<1x1x64xf32> to vector<1x64xf32>
      %195 = vector.broadcast %192 : vector<14x1xf32> to vector<14x64xf32>
      %196 = vector.broadcast %194 : vector<1x64xf32> to vector<14x64xf32>
      %197 = arith.mulf %195, %196 : vector<14x64xf32>
      %198 = arith.addf %188, %197 : vector<14x64xf32>
      %c0_117 = arith.constant 0 : index
      %199 = arith.index_cast %178 : i32 to index
      %c1_118 = arith.constant 1 : index
      %c0_119 = arith.constant 0 : index
      %200 = vector.load %arg2[%c0_117, %199, %c1_118, %c0_119] : memref<1x30x15x1xf32, #tpu.memory_space<vmem>>, vector<1x1x14x1xf32>
      %201 = vector.shape_cast %200 : vector<1x1x14x1xf32> to vector<1x14x1xf32>
      %202 = vector.shape_cast %201 : vector<1x14x1xf32> to vector<14x1xf32>
      %c8_120 = arith.constant 8 : index
      %c0_121 = arith.constant 0 : index
      %c0_122 = arith.constant 0 : index
      %203 = vector.load %arg3[%c8_120, %c0_121, %c0_122] : memref<9x1x64xf32, #tpu.memory_space<vmem>>, vector<1x1x64xf32>
      %204 = vector.shape_cast %203 : vector<1x1x64xf32> to vector<1x64xf32>
      %205 = vector.broadcast %202 : vector<14x1xf32> to vector<14x64xf32>
      %206 = vector.broadcast %204 : vector<1x64xf32> to vector<14x64xf32>
      %207 = arith.mulf %205, %206 : vector<14x64xf32>
      %208 = arith.addf %198, %207 : vector<14x64xf32>
      %209 = vector.broadcast %0 : vector<1x64xf32> to vector<14x64xf32>
      %210 = arith.mulf %208, %209 : vector<14x64xf32>
      %211 = vector.broadcast %1 : vector<1x64xf32> to vector<14x64xf32>
      %212 = arith.addf %210, %211 : vector<14x64xf32>
      %213 = arith.maximumf %108, %212 : vector<14x64xf32>
      %cst_123 = arith.constant 0.000000e+00 : f32
      %214 = vector.broadcast %cst_123 : f32 to vector<14x64xf32>
      %c2_i32_124 = arith.constant 2 : i32
      %215 = arith.muli %c2_i32_124, %arg7 : i32
      %c1_i32_125 = arith.constant 1 : i32
      %216 = arith.addi %215, %c1_i32_125 : i32
      %c0_i32_126 = arith.constant 0 : i32
      %217 = arith.addi %216, %c0_i32_126 : i32
      %c0_127 = arith.constant 0 : index
      %218 = arith.index_cast %217 : i32 to index
      %c0_128 = arith.constant 0 : index
      %c0_129 = arith.constant 0 : index
      %219 = vector.load %arg1[%c0_127, %218, %c0_128, %c0_129] : memref<1x30x15x1xf32, #tpu.memory_space<vmem>>, vector<1x1x14x1xf32>
      %220 = vector.shape_cast %219 : vector<1x1x14x1xf32> to vector<1x14x1xf32>
      %221 = vector.shape_cast %220 : vector<1x14x1xf32> to vector<14x1xf32>
      %c0_130 = arith.constant 0 : index
      %c0_131 = arith.constant 0 : index
      %c0_132 = arith.constant 0 : index
      %222 = vector.load %arg3[%c0_130, %c0_131, %c0_132] : memref<9x1x64xf32, #tpu.memory_space<vmem>>, vector<1x1x64xf32>
      %223 = vector.shape_cast %222 : vector<1x1x64xf32> to vector<1x64xf32>
      %224 = vector.broadcast %221 : vector<14x1xf32> to vector<14x64xf32>
      %225 = vector.broadcast %223 : vector<1x64xf32> to vector<14x64xf32>
      %226 = arith.mulf %224, %225 : vector<14x64xf32>
      %227 = arith.addf %214, %226 : vector<14x64xf32>
      %c0_133 = arith.constant 0 : index
      %228 = arith.index_cast %217 : i32 to index
      %c0_134 = arith.constant 0 : index
      %c0_135 = arith.constant 0 : index
      %229 = vector.load %arg2[%c0_133, %228, %c0_134, %c0_135] : memref<1x30x15x1xf32, #tpu.memory_space<vmem>>, vector<1x1x14x1xf32>
      %230 = vector.shape_cast %229 : vector<1x1x14x1xf32> to vector<1x14x1xf32>
      %231 = vector.shape_cast %230 : vector<1x14x1xf32> to vector<14x1xf32>
      %c1_136 = arith.constant 1 : index
      %c0_137 = arith.constant 0 : index
      %c0_138 = arith.constant 0 : index
      %232 = vector.load %arg3[%c1_136, %c0_137, %c0_138] : memref<9x1x64xf32, #tpu.memory_space<vmem>>, vector<1x1x64xf32>
      %233 = vector.shape_cast %232 : vector<1x1x64xf32> to vector<1x64xf32>
      %234 = vector.broadcast %231 : vector<14x1xf32> to vector<14x64xf32>
      %235 = vector.broadcast %233 : vector<1x64xf32> to vector<14x64xf32>
      %236 = arith.mulf %234, %235 : vector<14x64xf32>
      %237 = arith.addf %227, %236 : vector<14x64xf32>
      %c0_139 = arith.constant 0 : index
      %238 = arith.index_cast %217 : i32 to index
      %c1_140 = arith.constant 1 : index
      %c0_141 = arith.constant 0 : index
      %239 = vector.load %arg1[%c0_139, %238, %c1_140, %c0_141] : memref<1x30x15x1xf32, #tpu.memory_space<vmem>>, vector<1x1x14x1xf32>
      %240 = vector.shape_cast %239 : vector<1x1x14x1xf32> to vector<1x14x1xf32>
      %241 = vector.shape_cast %240 : vector<1x14x1xf32> to vector<14x1xf32>
      %c2_142 = arith.constant 2 : index
      %c0_143 = arith.constant 0 : index
      %c0_144 = arith.constant 0 : index
      %242 = vector.load %arg3[%c2_142, %c0_143, %c0_144] : memref<9x1x64xf32, #tpu.memory_space<vmem>>, vector<1x1x64xf32>
      %243 = vector.shape_cast %242 : vector<1x1x64xf32> to vector<1x64xf32>
      %244 = vector.broadcast %241 : vector<14x1xf32> to vector<14x64xf32>
      %245 = vector.broadcast %243 : vector<1x64xf32> to vector<14x64xf32>
      %246 = arith.mulf %244, %245 : vector<14x64xf32>
      %247 = arith.addf %237, %246 : vector<14x64xf32>
      %c2_i32_145 = arith.constant 2 : i32
      %248 = arith.muli %c2_i32_145, %arg7 : i32
      %c1_i32_146 = arith.constant 1 : i32
      %249 = arith.addi %248, %c1_i32_146 : i32
      %c1_i32_147 = arith.constant 1 : i32
      %250 = arith.addi %249, %c1_i32_147 : i32
      %c0_148 = arith.constant 0 : index
      %251 = arith.index_cast %250 : i32 to index
      %c0_149 = arith.constant 0 : index
      %c0_150 = arith.constant 0 : index
      %252 = vector.load %arg1[%c0_148, %251, %c0_149, %c0_150] : memref<1x30x15x1xf32, #tpu.memory_space<vmem>>, vector<1x1x14x1xf32>
      %253 = vector.shape_cast %252 : vector<1x1x14x1xf32> to vector<1x14x1xf32>
      %254 = vector.shape_cast %253 : vector<1x14x1xf32> to vector<14x1xf32>
      %c3_151 = arith.constant 3 : index
      %c0_152 = arith.constant 0 : index
      %c0_153 = arith.constant 0 : index
      %255 = vector.load %arg3[%c3_151, %c0_152, %c0_153] : memref<9x1x64xf32, #tpu.memory_space<vmem>>, vector<1x1x64xf32>
      %256 = vector.shape_cast %255 : vector<1x1x64xf32> to vector<1x64xf32>
      %257 = vector.broadcast %254 : vector<14x1xf32> to vector<14x64xf32>
      %258 = vector.broadcast %256 : vector<1x64xf32> to vector<14x64xf32>
      %259 = arith.mulf %257, %258 : vector<14x64xf32>
      %260 = arith.addf %247, %259 : vector<14x64xf32>
      %c0_154 = arith.constant 0 : index
      %261 = arith.index_cast %250 : i32 to index
      %c0_155 = arith.constant 0 : index
      %c0_156 = arith.constant 0 : index
      %262 = vector.load %arg2[%c0_154, %261, %c0_155, %c0_156] : memref<1x30x15x1xf32, #tpu.memory_space<vmem>>, vector<1x1x14x1xf32>
      %263 = vector.shape_cast %262 : vector<1x1x14x1xf32> to vector<1x14x1xf32>
      %264 = vector.shape_cast %263 : vector<1x14x1xf32> to vector<14x1xf32>
      %c4_157 = arith.constant 4 : index
      %c0_158 = arith.constant 0 : index
      %c0_159 = arith.constant 0 : index
      %265 = vector.load %arg3[%c4_157, %c0_158, %c0_159] : memref<9x1x64xf32, #tpu.memory_space<vmem>>, vector<1x1x64xf32>
      %266 = vector.shape_cast %265 : vector<1x1x64xf32> to vector<1x64xf32>
      %267 = vector.broadcast %264 : vector<14x1xf32> to vector<14x64xf32>
      %268 = vector.broadcast %266 : vector<1x64xf32> to vector<14x64xf32>
      %269 = arith.mulf %267, %268 : vector<14x64xf32>
      %270 = arith.addf %260, %269 : vector<14x64xf32>
      %c0_160 = arith.constant 0 : index
      %271 = arith.index_cast %250 : i32 to index
      %c1_161 = arith.constant 1 : index
      %c0_162 = arith.constant 0 : index
      %272 = vector.load %arg1[%c0_160, %271, %c1_161, %c0_162] : memref<1x30x15x1xf32, #tpu.memory_space<vmem>>, vector<1x1x14x1xf32>
      %273 = vector.shape_cast %272 : vector<1x1x14x1xf32> to vector<1x14x1xf32>
      %274 = vector.shape_cast %273 : vector<1x14x1xf32> to vector<14x1xf32>
      %c5_163 = arith.constant 5 : index
      %c0_164 = arith.constant 0 : index
      %c0_165 = arith.constant 0 : index
      %275 = vector.load %arg3[%c5_163, %c0_164, %c0_165] : memref<9x1x64xf32, #tpu.memory_space<vmem>>, vector<1x1x64xf32>
      %276 = vector.shape_cast %275 : vector<1x1x64xf32> to vector<1x64xf32>
      %277 = vector.broadcast %274 : vector<14x1xf32> to vector<14x64xf32>
      %278 = vector.broadcast %276 : vector<1x64xf32> to vector<14x64xf32>
      %279 = arith.mulf %277, %278 : vector<14x64xf32>
      %280 = arith.addf %270, %279 : vector<14x64xf32>
      %c2_i32_166 = arith.constant 2 : i32
      %281 = arith.muli %c2_i32_166, %arg7 : i32
      %c1_i32_167 = arith.constant 1 : i32
      %282 = arith.addi %281, %c1_i32_167 : i32
      %c2_i32_168 = arith.constant 2 : i32
      %283 = arith.addi %282, %c2_i32_168 : i32
      %c0_169 = arith.constant 0 : index
      %284 = arith.index_cast %283 : i32 to index
      %c0_170 = arith.constant 0 : index
      %c0_171 = arith.constant 0 : index
      %285 = vector.load %arg1[%c0_169, %284, %c0_170, %c0_171] : memref<1x30x15x1xf32, #tpu.memory_space<vmem>>, vector<1x1x14x1xf32>
      %286 = vector.shape_cast %285 : vector<1x1x14x1xf32> to vector<1x14x1xf32>
      %287 = vector.shape_cast %286 : vector<1x14x1xf32> to vector<14x1xf32>
      %c6_172 = arith.constant 6 : index
      %c0_173 = arith.constant 0 : index
      %c0_174 = arith.constant 0 : index
      %288 = vector.load %arg3[%c6_172, %c0_173, %c0_174] : memref<9x1x64xf32, #tpu.memory_space<vmem>>, vector<1x1x64xf32>
      %289 = vector.shape_cast %288 : vector<1x1x64xf32> to vector<1x64xf32>
      %290 = vector.broadcast %287 : vector<14x1xf32> to vector<14x64xf32>
      %291 = vector.broadcast %289 : vector<1x64xf32> to vector<14x64xf32>
      %292 = arith.mulf %290, %291 : vector<14x64xf32>
      %293 = arith.addf %280, %292 : vector<14x64xf32>
      %c0_175 = arith.constant 0 : index
      %294 = arith.index_cast %283 : i32 to index
      %c0_176 = arith.constant 0 : index
      %c0_177 = arith.constant 0 : index
      %295 = vector.load %arg2[%c0_175, %294, %c0_176, %c0_177] : memref<1x30x15x1xf32, #tpu.memory_space<vmem>>, vector<1x1x14x1xf32>
      %296 = vector.shape_cast %295 : vector<1x1x14x1xf32> to vector<1x14x1xf32>
      %297 = vector.shape_cast %296 : vector<1x14x1xf32> to vector<14x1xf32>
      %c7_178 = arith.constant 7 : index
      %c0_179 = arith.constant 0 : index
      %c0_180 = arith.constant 0 : index
      %298 = vector.load %arg3[%c7_178, %c0_179, %c0_180] : memref<9x1x64xf32, #tpu.memory_space<vmem>>, vector<1x1x64xf32>
      %299 = vector.shape_cast %298 : vector<1x1x64xf32> to vector<1x64xf32>
      %300 = vector.broadcast %297 : vector<14x1xf32> to vector<14x64xf32>
      %301 = vector.broadcast %299 : vector<1x64xf32> to vector<14x64xf32>
      %302 = arith.mulf %300, %301 : vector<14x64xf32>
      %303 = arith.addf %293, %302 : vector<14x64xf32>
      %c0_181 = arith.constant 0 : index
      %304 = arith.index_cast %283 : i32 to index
      %c1_182 = arith.constant 1 : index
      %c0_183 = arith.constant 0 : index
      %305 = vector.load %arg1[%c0_181, %304, %c1_182, %c0_183] : memref<1x30x15x1xf32, #tpu.memory_space<vmem>>, vector<1x1x14x1xf32>
      %306 = vector.shape_cast %305 : vector<1x1x14x1xf32> to vector<1x14x1xf32>
      %307 = vector.shape_cast %306 : vector<1x14x1xf32> to vector<14x1xf32>
      %c8_184 = arith.constant 8 : index
      %c0_185 = arith.constant 0 : index
      %c0_186 = arith.constant 0 : index
      %308 = vector.load %arg3[%c8_184, %c0_185, %c0_186] : memref<9x1x64xf32, #tpu.memory_space<vmem>>, vector<1x1x64xf32>
      %309 = vector.shape_cast %308 : vector<1x1x64xf32> to vector<1x64xf32>
      %310 = vector.broadcast %307 : vector<14x1xf32> to vector<14x64xf32>
      %311 = vector.broadcast %309 : vector<1x64xf32> to vector<14x64xf32>
      %312 = arith.mulf %310, %311 : vector<14x64xf32>
      %313 = arith.addf %303, %312 : vector<14x64xf32>
      %314 = vector.broadcast %0 : vector<1x64xf32> to vector<14x64xf32>
      %315 = arith.mulf %313, %314 : vector<14x64xf32>
      %316 = vector.broadcast %1 : vector<1x64xf32> to vector<14x64xf32>
      %317 = arith.addf %315, %316 : vector<14x64xf32>
      %318 = arith.maximumf %213, %317 : vector<14x64xf32>
      %cst_187 = arith.constant 0.000000e+00 : f32
      %319 = vector.broadcast %cst_187 : f32 to vector<14x64xf32>
      %c2_i32_188 = arith.constant 2 : i32
      %320 = arith.muli %c2_i32_188, %arg7 : i32
      %c1_i32_189 = arith.constant 1 : i32
      %321 = arith.addi %320, %c1_i32_189 : i32
      %c0_i32_190 = arith.constant 0 : i32
      %322 = arith.addi %321, %c0_i32_190 : i32
      %c0_191 = arith.constant 0 : index
      %323 = arith.index_cast %322 : i32 to index
      %c0_192 = arith.constant 0 : index
      %c0_193 = arith.constant 0 : index
      %324 = vector.load %arg2[%c0_191, %323, %c0_192, %c0_193] : memref<1x30x15x1xf32, #tpu.memory_space<vmem>>, vector<1x1x14x1xf32>
      %325 = vector.shape_cast %324 : vector<1x1x14x1xf32> to vector<1x14x1xf32>
      %326 = vector.shape_cast %325 : vector<1x14x1xf32> to vector<14x1xf32>
      %c0_194 = arith.constant 0 : index
      %c0_195 = arith.constant 0 : index
      %c0_196 = arith.constant 0 : index
      %327 = vector.load %arg3[%c0_194, %c0_195, %c0_196] : memref<9x1x64xf32, #tpu.memory_space<vmem>>, vector<1x1x64xf32>
      %328 = vector.shape_cast %327 : vector<1x1x64xf32> to vector<1x64xf32>
      %329 = vector.broadcast %326 : vector<14x1xf32> to vector<14x64xf32>
      %330 = vector.broadcast %328 : vector<1x64xf32> to vector<14x64xf32>
      %331 = arith.mulf %329, %330 : vector<14x64xf32>
      %332 = arith.addf %319, %331 : vector<14x64xf32>
      %c0_197 = arith.constant 0 : index
      %333 = arith.index_cast %322 : i32 to index
      %c1_198 = arith.constant 1 : index
      %c0_199 = arith.constant 0 : index
      %334 = vector.load %arg1[%c0_197, %333, %c1_198, %c0_199] : memref<1x30x15x1xf32, #tpu.memory_space<vmem>>, vector<1x1x14x1xf32>
      %335 = vector.shape_cast %334 : vector<1x1x14x1xf32> to vector<1x14x1xf32>
      %336 = vector.shape_cast %335 : vector<1x14x1xf32> to vector<14x1xf32>
      %c1_200 = arith.constant 1 : index
      %c0_201 = arith.constant 0 : index
      %c0_202 = arith.constant 0 : index
      %337 = vector.load %arg3[%c1_200, %c0_201, %c0_202] : memref<9x1x64xf32, #tpu.memory_space<vmem>>, vector<1x1x64xf32>
      %338 = vector.shape_cast %337 : vector<1x1x64xf32> to vector<1x64xf32>
      %339 = vector.broadcast %336 : vector<14x1xf32> to vector<14x64xf32>
      %340 = vector.broadcast %338 : vector<1x64xf32> to vector<14x64xf32>
      %341 = arith.mulf %339, %340 : vector<14x64xf32>
      %342 = arith.addf %332, %341 : vector<14x64xf32>
      %c0_203 = arith.constant 0 : index
      %343 = arith.index_cast %322 : i32 to index
      %c1_204 = arith.constant 1 : index
      %c0_205 = arith.constant 0 : index
      %344 = vector.load %arg2[%c0_203, %343, %c1_204, %c0_205] : memref<1x30x15x1xf32, #tpu.memory_space<vmem>>, vector<1x1x14x1xf32>
      %345 = vector.shape_cast %344 : vector<1x1x14x1xf32> to vector<1x14x1xf32>
      %346 = vector.shape_cast %345 : vector<1x14x1xf32> to vector<14x1xf32>
      %c2_206 = arith.constant 2 : index
      %c0_207 = arith.constant 0 : index
      %c0_208 = arith.constant 0 : index
      %347 = vector.load %arg3[%c2_206, %c0_207, %c0_208] : memref<9x1x64xf32, #tpu.memory_space<vmem>>, vector<1x1x64xf32>
      %348 = vector.shape_cast %347 : vector<1x1x64xf32> to vector<1x64xf32>
      %349 = vector.broadcast %346 : vector<14x1xf32> to vector<14x64xf32>
      %350 = vector.broadcast %348 : vector<1x64xf32> to vector<14x64xf32>
      %351 = arith.mulf %349, %350 : vector<14x64xf32>
      %352 = arith.addf %342, %351 : vector<14x64xf32>
      %c2_i32_209 = arith.constant 2 : i32
      %353 = arith.muli %c2_i32_209, %arg7 : i32
      %c1_i32_210 = arith.constant 1 : i32
      %354 = arith.addi %353, %c1_i32_210 : i32
      %c1_i32_211 = arith.constant 1 : i32
      %355 = arith.addi %354, %c1_i32_211 : i32
      %c0_212 = arith.constant 0 : index
      %356 = arith.index_cast %355 : i32 to index
      %c0_213 = arith.constant 0 : index
      %c0_214 = arith.constant 0 : index
      %357 = vector.load %arg2[%c0_212, %356, %c0_213, %c0_214] : memref<1x30x15x1xf32, #tpu.memory_space<vmem>>, vector<1x1x14x1xf32>
      %358 = vector.shape_cast %357 : vector<1x1x14x1xf32> to vector<1x14x1xf32>
      %359 = vector.shape_cast %358 : vector<1x14x1xf32> to vector<14x1xf32>
      %c3_215 = arith.constant 3 : index
      %c0_216 = arith.constant 0 : index
      %c0_217 = arith.constant 0 : index
      %360 = vector.load %arg3[%c3_215, %c0_216, %c0_217] : memref<9x1x64xf32, #tpu.memory_space<vmem>>, vector<1x1x64xf32>
      %361 = vector.shape_cast %360 : vector<1x1x64xf32> to vector<1x64xf32>
      %362 = vector.broadcast %359 : vector<14x1xf32> to vector<14x64xf32>
      %363 = vector.broadcast %361 : vector<1x64xf32> to vector<14x64xf32>
      %364 = arith.mulf %362, %363 : vector<14x64xf32>
      %365 = arith.addf %352, %364 : vector<14x64xf32>
      %c0_218 = arith.constant 0 : index
      %366 = arith.index_cast %355 : i32 to index
      %c1_219 = arith.constant 1 : index
      %c0_220 = arith.constant 0 : index
      %367 = vector.load %arg1[%c0_218, %366, %c1_219, %c0_220] : memref<1x30x15x1xf32, #tpu.memory_space<vmem>>, vector<1x1x14x1xf32>
      %368 = vector.shape_cast %367 : vector<1x1x14x1xf32> to vector<1x14x1xf32>
      %369 = vector.shape_cast %368 : vector<1x14x1xf32> to vector<14x1xf32>
      %c4_221 = arith.constant 4 : index
      %c0_222 = arith.constant 0 : index
      %c0_223 = arith.constant 0 : index
      %370 = vector.load %arg3[%c4_221, %c0_222, %c0_223] : memref<9x1x64xf32, #tpu.memory_space<vmem>>, vector<1x1x64xf32>
      %371 = vector.shape_cast %370 : vector<1x1x64xf32> to vector<1x64xf32>
      %372 = vector.broadcast %369 : vector<14x1xf32> to vector<14x64xf32>
      %373 = vector.broadcast %371 : vector<1x64xf32> to vector<14x64xf32>
      %374 = arith.mulf %372, %373 : vector<14x64xf32>
      %375 = arith.addf %365, %374 : vector<14x64xf32>
      %c0_224 = arith.constant 0 : index
      %376 = arith.index_cast %355 : i32 to index
      %c1_225 = arith.constant 1 : index
      %c0_226 = arith.constant 0 : index
      %377 = vector.load %arg2[%c0_224, %376, %c1_225, %c0_226] : memref<1x30x15x1xf32, #tpu.memory_space<vmem>>, vector<1x1x14x1xf32>
      %378 = vector.shape_cast %377 : vector<1x1x14x1xf32> to vector<1x14x1xf32>
      %379 = vector.shape_cast %378 : vector<1x14x1xf32> to vector<14x1xf32>
      %c5_227 = arith.constant 5 : index
      %c0_228 = arith.constant 0 : index
      %c0_229 = arith.constant 0 : index
      %380 = vector.load %arg3[%c5_227, %c0_228, %c0_229] : memref<9x1x64xf32, #tpu.memory_space<vmem>>, vector<1x1x64xf32>
      %381 = vector.shape_cast %380 : vector<1x1x64xf32> to vector<1x64xf32>
      %382 = vector.broadcast %379 : vector<14x1xf32> to vector<14x64xf32>
      %383 = vector.broadcast %381 : vector<1x64xf32> to vector<14x64xf32>
      %384 = arith.mulf %382, %383 : vector<14x64xf32>
      %385 = arith.addf %375, %384 : vector<14x64xf32>
      %c2_i32_230 = arith.constant 2 : i32
      %386 = arith.muli %c2_i32_230, %arg7 : i32
      %c1_i32_231 = arith.constant 1 : i32
      %387 = arith.addi %386, %c1_i32_231 : i32
      %c2_i32_232 = arith.constant 2 : i32
      %388 = arith.addi %387, %c2_i32_232 : i32
      %c0_233 = arith.constant 0 : index
      %389 = arith.index_cast %388 : i32 to index
      %c0_234 = arith.constant 0 : index
      %c0_235 = arith.constant 0 : index
      %390 = vector.load %arg2[%c0_233, %389, %c0_234, %c0_235] : memref<1x30x15x1xf32, #tpu.memory_space<vmem>>, vector<1x1x14x1xf32>
      %391 = vector.shape_cast %390 : vector<1x1x14x1xf32> to vector<1x14x1xf32>
      %392 = vector.shape_cast %391 : vector<1x14x1xf32> to vector<14x1xf32>
      %c6_236 = arith.constant 6 : index
      %c0_237 = arith.constant 0 : index
      %c0_238 = arith.constant 0 : index
      %393 = vector.load %arg3[%c6_236, %c0_237, %c0_238] : memref<9x1x64xf32, #tpu.memory_space<vmem>>, vector<1x1x64xf32>
      %394 = vector.shape_cast %393 : vector<1x1x64xf32> to vector<1x64xf32>
      %395 = vector.broadcast %392 : vector<14x1xf32> to vector<14x64xf32>
      %396 = vector.broadcast %394 : vector<1x64xf32> to vector<14x64xf32>
      %397 = arith.mulf %395, %396 : vector<14x64xf32>
      %398 = arith.addf %385, %397 : vector<14x64xf32>
      %c0_239 = arith.constant 0 : index
      %399 = arith.index_cast %388 : i32 to index
      %c1_240 = arith.constant 1 : index
      %c0_241 = arith.constant 0 : index
      %400 = vector.load %arg1[%c0_239, %399, %c1_240, %c0_241] : memref<1x30x15x1xf32, #tpu.memory_space<vmem>>, vector<1x1x14x1xf32>
      %401 = vector.shape_cast %400 : vector<1x1x14x1xf32> to vector<1x14x1xf32>
      %402 = vector.shape_cast %401 : vector<1x14x1xf32> to vector<14x1xf32>
      %c7_242 = arith.constant 7 : index
      %c0_243 = arith.constant 0 : index
      %c0_244 = arith.constant 0 : index
      %403 = vector.load %arg3[%c7_242, %c0_243, %c0_244] : memref<9x1x64xf32, #tpu.memory_space<vmem>>, vector<1x1x64xf32>
      %404 = vector.shape_cast %403 : vector<1x1x64xf32> to vector<1x64xf32>
      %405 = vector.broadcast %402 : vector<14x1xf32> to vector<14x64xf32>
      %406 = vector.broadcast %404 : vector<1x64xf32> to vector<14x64xf32>
      %407 = arith.mulf %405, %406 : vector<14x64xf32>
      %408 = arith.addf %398, %407 : vector<14x64xf32>
      %c0_245 = arith.constant 0 : index
      %409 = arith.index_cast %388 : i32 to index
      %c1_246 = arith.constant 1 : index
      %c0_247 = arith.constant 0 : index
      %410 = vector.load %arg2[%c0_245, %409, %c1_246, %c0_247] : memref<1x30x15x1xf32, #tpu.memory_space<vmem>>, vector<1x1x14x1xf32>
      %411 = vector.shape_cast %410 : vector<1x1x14x1xf32> to vector<1x14x1xf32>
      %412 = vector.shape_cast %411 : vector<1x14x1xf32> to vector<14x1xf32>
      %c8_248 = arith.constant 8 : index
      %c0_249 = arith.constant 0 : index
      %c0_250 = arith.constant 0 : index
      %413 = vector.load %arg3[%c8_248, %c0_249, %c0_250] : memref<9x1x64xf32, #tpu.memory_space<vmem>>, vector<1x1x64xf32>
      %414 = vector.shape_cast %413 : vector<1x1x64xf32> to vector<1x64xf32>
      %415 = vector.broadcast %412 : vector<14x1xf32> to vector<14x64xf32>
      %416 = vector.broadcast %414 : vector<1x64xf32> to vector<14x64xf32>
      %417 = arith.mulf %415, %416 : vector<14x64xf32>
      %418 = arith.addf %408, %417 : vector<14x64xf32>
      %419 = vector.broadcast %0 : vector<1x64xf32> to vector<14x64xf32>
      %420 = arith.mulf %418, %419 : vector<14x64xf32>
      %421 = vector.broadcast %1 : vector<1x64xf32> to vector<14x64xf32>
      %422 = arith.addf %420, %421 : vector<14x64xf32>
      %423 = arith.maximumf %318, %422 : vector<14x64xf32>
      %cst_251 = arith.constant 0.000000e+00 : f32
      %424 = vector.broadcast %cst_251 : f32 to vector<14x64xf32>
      %425 = arith.maximumf %423, %424 : vector<14x64xf32>
      %426 = vector.shape_cast %425 : vector<14x64xf32> to vector<1x14x64xf32>
      %c0_252 = arith.constant 0 : index
      %427 = arith.index_cast %arg7 : i32 to index
      %c0_253 = arith.constant 0 : index
      %c0_254 = arith.constant 0 : index
      %428 = vector.load %arg6[%c0_252, %427, %c0_253, %c0_254] : memref<1x14x14x64xf32, #tpu.memory_space<vmem>>, vector<1x1x14x64xf32>
      %429 = vector.shape_cast %428 : vector<1x1x14x64xf32> to vector<1x14x64xf32>
      %430 = vector.shape_cast %426 : vector<1x14x64xf32> to vector<1x1x14x64xf32>
      tpu.vector_store %arg6[%c0_252, %427, %c0_253, %c0_254], %430 {strides = array<i32>} : memref<1x14x14x64xf32, #tpu.memory_space<vmem>>, vector<1x1x14x64xf32>,
    }
    %c14_i32_3 = arith.constant 14 : i32
    return
  }
  func.func @transform_0(%arg0: i32) -> (i32, i32, i32, i32) {
    %c0_i32 = arith.constant 0 : i32
    %c0_i32_0 = arith.constant 0 : i32
    %c0_i32_1 = arith.constant 0 : i32
    %c0_i32_2 = arith.constant 0 : i32
    return %arg0, %c0_i32, %c0_i32_0, %c0_i32_1 : i32, i32, i32, i32
  }
  func.func @transform_1(%arg0: i32) -> (i32, i32, i32, i32) {
    %c0_i32 = arith.constant 0 : i32
    %c0_i32_0 = arith.constant 0 : i32
    %c0_i32_1 = arith.constant 0 : i32
    %c0_i32_2 = arith.constant 0 : i32
    return %arg0, %c0_i32, %c0_i32_0, %c0_i32_1 : i32, i32, i32, i32
  }
  func.func @transform_2(%arg0: i32) -> (i32, i32, i32) {
    %c0_i32 = arith.constant 0 : i32
    %c0_i32_0 = arith.constant 0 : i32
    %c0_i32_1 = arith.constant 0 : i32
    %c0_i32_2 = arith.constant 0 : i32
    return %c0_i32, %c0_i32_0, %c0_i32_1 : i32, i32, i32
  }
  func.func @transform_3(%arg0: i32) -> (i32, i32) {
    %c0_i32 = arith.constant 0 : i32
    %c0_i32_0 = arith.constant 0 : i32
    %c0_i32_1 = arith.constant 0 : i32
    return %c0_i32, %c0_i32_0 : i32, i32
  }
  func.func @transform_4(%arg0: i32) -> (i32, i32) {
    %c0_i32 = arith.constant 0 : i32
    %c0_i32_0 = arith.constant 0 : i32
    %c0_i32_1 = arith.constant 0 : i32
    return %c0_i32, %c0_i32_0 : i32, i32
  }
  func.func @transform_5(%arg0: i32) -> (i32, i32, i32, i32) {
    %c0_i32 = arith.constant 0 : i32
    %c0_i32_0 = arith.constant 0 : i32
    %c0_i32_1 = arith.constant 0 : i32
    %c0_i32_2 = arith.constant 0 : i32
    return %arg0, %c0_i32, %c0_i32_0, %c0_i32_1 : i32, i32, i32, i32
  }
}

module attributes {stable_mosaic.version = 11 : i64} {
  func.func @conv_bn_relu_pool_kernel(%arg0: i32, %arg1: memref<1x16x8x64xf32, #tpu.memory_space<vmem>>, %arg2: memref<1x16x8x64xf32, #tpu.memory_space<vmem>>, %arg3: memref<9x64x128xf32, #tpu.memory_space<vmem>>, %arg4: memref<1x128xf32, #tpu.memory_space<vmem>>, %arg5: memref<1x128xf32, #tpu.memory_space<vmem>>, %arg6: memref<1x7x7x128xf32, #tpu.memory_space<vmem>>) attributes {dimension_semantics = [#tpu.dimension_semantics<parallel>], iteration_bounds = array<i64: 2>, scalar_prefetch = 0 : i64, scratch_operands = 0 : i64, tpu.core_type = #tpu.core_type<tc>, window_params = [{transform_indices = @transform_0, window_bounds = array<i64: 1, 16, 8, 64>}, {transform_indices = @transform_1, window_bounds = array<i64: 1, 16, 8, 64>}, {pipeline_mode = #tpu.pipeline_mode<synchronous>, transform_indices = @transform_2, window_bounds = array<i64: 9, 64, 128>}, {pipeline_mode = #tpu.pipeline_mode<synchronous>, transform_indices = @transform_3, window_bounds = array<i64: 1, 128>}, {pipeline_mode = #tpu.pipeline_mode<synchronous>, transform_indices = @transform_4, window_bounds = array<i64: 1, 128>}, {transform_indices = @transform_5, window_bounds = array<i64: 1, 7, 7, 128>}]} {
    %c0 = arith.constant 0 : index
    %c0_0 = arith.constant 0 : index
    %0 = vector.load %arg4[%c0, %c0_0] : memref<1x128xf32, #tpu.memory_space<vmem>>, vector<1x128xf32>
    %c0_1 = arith.constant 0 : index
    %c0_2 = arith.constant 0 : index
    %1 = vector.load %arg5[%c0_1, %c0_2] : memref<1x128xf32, #tpu.memory_space<vmem>>, vector<1x128xf32>
    %c0_i32 = arith.constant 0 : i32
    %c7_i32 = arith.constant 7 : i32
    %2 = arith.addi %c0_i32, %c7_i32 : i32
    %c1_i32 = arith.constant 1 : i32
    scf.for %arg7 = %c0_i32 to %2 step %c1_i32  : i32 {
      %cst = arith.constant 0xFF800000 : f32
      %3 = vector.broadcast %cst : f32 to vector<7x128xf32>
      %cst_4 = arith.constant 0.000000e+00 : f32
      %4 = vector.broadcast %cst_4 : f32 to vector<7x128xf32>
      %c2_i32 = arith.constant 2 : i32
      %5 = arith.muli %c2_i32, %arg7 : i32
      %c0_i32_5 = arith.constant 0 : i32
      %6 = arith.addi %5, %c0_i32_5 : i32
      %c0_i32_6 = arith.constant 0 : i32
      %7 = arith.addi %6, %c0_i32_6 : i32
      %c0_7 = arith.constant 0 : index
      %8 = arith.index_cast %7 : i32 to index
      %c0_8 = arith.constant 0 : index
      %c0_9 = arith.constant 0 : index
      %9 = vector.load %arg1[%c0_7, %8, %c0_8, %c0_9] : memref<1x16x8x64xf32, #tpu.memory_space<vmem>>, vector<1x1x7x64xf32>
      %10 = vector.shape_cast %9 : vector<1x1x7x64xf32> to vector<1x7x64xf32>
      %11 = vector.shape_cast %10 : vector<1x7x64xf32> to vector<7x64xf32>
      %c0_10 = arith.constant 0 : index
      %c0_11 = arith.constant 0 : index
      %c0_12 = arith.constant 0 : index
      %12 = vector.load %arg3[%c0_10, %c0_11, %c0_12] : memref<9x64x128xf32, #tpu.memory_space<vmem>>, vector<1x64x128xf32>
      %13 = vector.shape_cast %12 : vector<1x64x128xf32> to vector<64x128xf32>
      %cst_13 = arith.constant dense<0.000000e+00> : vector<7x128xf32>
      %14 = tpu.matmul %11, %13, %cst_13 {dimension_numbers = #tpu.dot_dimension_numbers<[1], [0], [0], [1], [0, 0, 1, 1], [], []>} : vector<7x64xf32>, vector<64x128xf32>, vector<7x128xf32> -> vector<7x128xf32>
      %15 = arith.addf %4, %14 : vector<7x128xf32>
      %c0_14 = arith.constant 0 : index
      %16 = arith.index_cast %7 : i32 to index
      %c0_15 = arith.constant 0 : index
      %c0_16 = arith.constant 0 : index
      %17 = vector.load %arg2[%c0_14, %16, %c0_15, %c0_16] : memref<1x16x8x64xf32, #tpu.memory_space<vmem>>, vector<1x1x7x64xf32>
      %18 = vector.shape_cast %17 : vector<1x1x7x64xf32> to vector<1x7x64xf32>
      %19 = vector.shape_cast %18 : vector<1x7x64xf32> to vector<7x64xf32>
      %c1 = arith.constant 1 : index
      %c0_17 = arith.constant 0 : index
      %c0_18 = arith.constant 0 : index
      %20 = vector.load %arg3[%c1, %c0_17, %c0_18] : memref<9x64x128xf32, #tpu.memory_space<vmem>>, vector<1x64x128xf32>
      %21 = vector.shape_cast %20 : vector<1x64x128xf32> to vector<64x128xf32>
      %cst_19 = arith.constant dense<0.000000e+00> : vector<7x128xf32>
      %22 = tpu.matmul %19, %21, %cst_19 {dimension_numbers = #tpu.dot_dimension_numbers<[1], [0], [0], [1], [0, 0, 1, 1], [], []>} : vector<7x64xf32>, vector<64x128xf32>, vector<7x128xf32> -> vector<7x128xf32>
      %23 = arith.addf %15, %22 : vector<7x128xf32>
      %c0_20 = arith.constant 0 : index
      %24 = arith.index_cast %7 : i32 to index
      %c1_21 = arith.constant 1 : index
      %c0_22 = arith.constant 0 : index
      %25 = vector.load %arg1[%c0_20, %24, %c1_21, %c0_22] : memref<1x16x8x64xf32, #tpu.memory_space<vmem>>, vector<1x1x7x64xf32>
      %26 = vector.shape_cast %25 : vector<1x1x7x64xf32> to vector<1x7x64xf32>
      %27 = vector.shape_cast %26 : vector<1x7x64xf32> to vector<7x64xf32>
      %c2 = arith.constant 2 : index
      %c0_23 = arith.constant 0 : index
      %c0_24 = arith.constant 0 : index
      %28 = vector.load %arg3[%c2, %c0_23, %c0_24] : memref<9x64x128xf32, #tpu.memory_space<vmem>>, vector<1x64x128xf32>
      %29 = vector.shape_cast %28 : vector<1x64x128xf32> to vector<64x128xf32>
      %cst_25 = arith.constant dense<0.000000e+00> : vector<7x128xf32>
      %30 = tpu.matmul %27, %29, %cst_25 {dimension_numbers = #tpu.dot_dimension_numbers<[1], [0], [0], [1], [0, 0, 1, 1], [], []>} : vector<7x64xf32>, vector<64x128xf32>, vector<7x128xf32> -> vector<7x128xf32>
      %31 = arith.addf %23, %30 : vector<7x128xf32>
      %c2_i32_26 = arith.constant 2 : i32
      %32 = arith.muli %c2_i32_26, %arg7 : i32
      %c0_i32_27 = arith.constant 0 : i32
      %33 = arith.addi %32, %c0_i32_27 : i32
      %c1_i32_28 = arith.constant 1 : i32
      %34 = arith.addi %33, %c1_i32_28 : i32
      %c0_29 = arith.constant 0 : index
      %35 = arith.index_cast %34 : i32 to index
      %c0_30 = arith.constant 0 : index
      %c0_31 = arith.constant 0 : index
      %36 = vector.load %arg1[%c0_29, %35, %c0_30, %c0_31] : memref<1x16x8x64xf32, #tpu.memory_space<vmem>>, vector<1x1x7x64xf32>
      %37 = vector.shape_cast %36 : vector<1x1x7x64xf32> to vector<1x7x64xf32>
      %38 = vector.shape_cast %37 : vector<1x7x64xf32> to vector<7x64xf32>
      %c3 = arith.constant 3 : index
      %c0_32 = arith.constant 0 : index
      %c0_33 = arith.constant 0 : index
      %39 = vector.load %arg3[%c3, %c0_32, %c0_33] : memref<9x64x128xf32, #tpu.memory_space<vmem>>, vector<1x64x128xf32>
      %40 = vector.shape_cast %39 : vector<1x64x128xf32> to vector<64x128xf32>
      %cst_34 = arith.constant dense<0.000000e+00> : vector<7x128xf32>
      %41 = tpu.matmul %38, %40, %cst_34 {dimension_numbers = #tpu.dot_dimension_numbers<[1], [0], [0], [1], [0, 0, 1, 1], [], []>} : vector<7x64xf32>, vector<64x128xf32>, vector<7x128xf32> -> vector<7x128xf32>
      %42 = arith.addf %31, %41 : vector<7x128xf32>
      %c0_35 = arith.constant 0 : index
      %43 = arith.index_cast %34 : i32 to index
      %c0_36 = arith.constant 0 : index
      %c0_37 = arith.constant 0 : index
      %44 = vector.load %arg2[%c0_35, %43, %c0_36, %c0_37] : memref<1x16x8x64xf32, #tpu.memory_space<vmem>>, vector<1x1x7x64xf32>
      %45 = vector.shape_cast %44 : vector<1x1x7x64xf32> to vector<1x7x64xf32>
      %46 = vector.shape_cast %45 : vector<1x7x64xf32> to vector<7x64xf32>
      %c4 = arith.constant 4 : index
      %c0_38 = arith.constant 0 : index
      %c0_39 = arith.constant 0 : index
      %47 = vector.load %arg3[%c4, %c0_38, %c0_39] : memref<9x64x128xf32, #tpu.memory_space<vmem>>, vector<1x64x128xf32>
      %48 = vector.shape_cast %47 : vector<1x64x128xf32> to vector<64x128xf32>
      %cst_40 = arith.constant dense<0.000000e+00> : vector<7x128xf32>
      %49 = tpu.matmul %46, %48, %cst_40 {dimension_numbers = #tpu.dot_dimension_numbers<[1], [0], [0], [1], [0, 0, 1, 1], [], []>} : vector<7x64xf32>, vector<64x128xf32>, vector<7x128xf32> -> vector<7x128xf32>
      %50 = arith.addf %42, %49 : vector<7x128xf32>
      %c0_41 = arith.constant 0 : index
      %51 = arith.index_cast %34 : i32 to index
      %c1_42 = arith.constant 1 : index
      %c0_43 = arith.constant 0 : index
      %52 = vector.load %arg1[%c0_41, %51, %c1_42, %c0_43] : memref<1x16x8x64xf32, #tpu.memory_space<vmem>>, vector<1x1x7x64xf32>
      %53 = vector.shape_cast %52 : vector<1x1x7x64xf32> to vector<1x7x64xf32>
      %54 = vector.shape_cast %53 : vector<1x7x64xf32> to vector<7x64xf32>
      %c5 = arith.constant 5 : index
      %c0_44 = arith.constant 0 : index
      %c0_45 = arith.constant 0 : index
      %55 = vector.load %arg3[%c5, %c0_44, %c0_45] : memref<9x64x128xf32, #tpu.memory_space<vmem>>, vector<1x64x128xf32>
      %56 = vector.shape_cast %55 : vector<1x64x128xf32> to vector<64x128xf32>
      %cst_46 = arith.constant dense<0.000000e+00> : vector<7x128xf32>
      %57 = tpu.matmul %54, %56, %cst_46 {dimension_numbers = #tpu.dot_dimension_numbers<[1], [0], [0], [1], [0, 0, 1, 1], [], []>} : vector<7x64xf32>, vector<64x128xf32>, vector<7x128xf32> -> vector<7x128xf32>
      %58 = arith.addf %50, %57 : vector<7x128xf32>
      %c2_i32_47 = arith.constant 2 : i32
      %59 = arith.muli %c2_i32_47, %arg7 : i32
      %c0_i32_48 = arith.constant 0 : i32
      %60 = arith.addi %59, %c0_i32_48 : i32
      %c2_i32_49 = arith.constant 2 : i32
      %61 = arith.addi %60, %c2_i32_49 : i32
      %c0_50 = arith.constant 0 : index
      %62 = arith.index_cast %61 : i32 to index
      %c0_51 = arith.constant 0 : index
      %c0_52 = arith.constant 0 : index
      %63 = vector.load %arg1[%c0_50, %62, %c0_51, %c0_52] : memref<1x16x8x64xf32, #tpu.memory_space<vmem>>, vector<1x1x7x64xf32>
      %64 = vector.shape_cast %63 : vector<1x1x7x64xf32> to vector<1x7x64xf32>
      %65 = vector.shape_cast %64 : vector<1x7x64xf32> to vector<7x64xf32>
      %c6 = arith.constant 6 : index
      %c0_53 = arith.constant 0 : index
      %c0_54 = arith.constant 0 : index
      %66 = vector.load %arg3[%c6, %c0_53, %c0_54] : memref<9x64x128xf32, #tpu.memory_space<vmem>>, vector<1x64x128xf32>
      %67 = vector.shape_cast %66 : vector<1x64x128xf32> to vector<64x128xf32>
      %cst_55 = arith.constant dense<0.000000e+00> : vector<7x128xf32>
      %68 = tpu.matmul %65, %67, %cst_55 {dimension_numbers = #tpu.dot_dimension_numbers<[1], [0], [0], [1], [0, 0, 1, 1], [], []>} : vector<7x64xf32>, vector<64x128xf32>, vector<7x128xf32> -> vector<7x128xf32>
      %69 = arith.addf %58, %68 : vector<7x128xf32>
      %c0_56 = arith.constant 0 : index
      %70 = arith.index_cast %61 : i32 to index
      %c0_57 = arith.constant 0 : index
      %c0_58 = arith.constant 0 : index
      %71 = vector.load %arg2[%c0_56, %70, %c0_57, %c0_58] : memref<1x16x8x64xf32, #tpu.memory_space<vmem>>, vector<1x1x7x64xf32>
      %72 = vector.shape_cast %71 : vector<1x1x7x64xf32> to vector<1x7x64xf32>
      %73 = vector.shape_cast %72 : vector<1x7x64xf32> to vector<7x64xf32>
      %c7 = arith.constant 7 : index
      %c0_59 = arith.constant 0 : index
      %c0_60 = arith.constant 0 : index
      %74 = vector.load %arg3[%c7, %c0_59, %c0_60] : memref<9x64x128xf32, #tpu.memory_space<vmem>>, vector<1x64x128xf32>
      %75 = vector.shape_cast %74 : vector<1x64x128xf32> to vector<64x128xf32>
      %cst_61 = arith.constant dense<0.000000e+00> : vector<7x128xf32>
      %76 = tpu.matmul %73, %75, %cst_61 {dimension_numbers = #tpu.dot_dimension_numbers<[1], [0], [0], [1], [0, 0, 1, 1], [], []>} : vector<7x64xf32>, vector<64x128xf32>, vector<7x128xf32> -> vector<7x128xf32>
      %77 = arith.addf %69, %76 : vector<7x128xf32>
      %c0_62 = arith.constant 0 : index
      %78 = arith.index_cast %61 : i32 to index
      %c1_63 = arith.constant 1 : index
      %c0_64 = arith.constant 0 : index
      %79 = vector.load %arg1[%c0_62, %78, %c1_63, %c0_64] : memref<1x16x8x64xf32, #tpu.memory_space<vmem>>, vector<1x1x7x64xf32>
      %80 = vector.shape_cast %79 : vector<1x1x7x64xf32> to vector<1x7x64xf32>
      %81 = vector.shape_cast %80 : vector<1x7x64xf32> to vector<7x64xf32>
      %c8 = arith.constant 8 : index
      %c0_65 = arith.constant 0 : index
      %c0_66 = arith.constant 0 : index
      %82 = vector.load %arg3[%c8, %c0_65, %c0_66] : memref<9x64x128xf32, #tpu.memory_space<vmem>>, vector<1x64x128xf32>
      %83 = vector.shape_cast %82 : vector<1x64x128xf32> to vector<64x128xf32>
      %cst_67 = arith.constant dense<0.000000e+00> : vector<7x128xf32>
      %84 = tpu.matmul %81, %83, %cst_67 {dimension_numbers = #tpu.dot_dimension_numbers<[1], [0], [0], [1], [0, 0, 1, 1], [], []>} : vector<7x64xf32>, vector<64x128xf32>, vector<7x128xf32> -> vector<7x128xf32>
      %85 = arith.addf %77, %84 : vector<7x128xf32>
      %86 = vector.broadcast %0 : vector<1x128xf32> to vector<7x128xf32>
      %87 = arith.mulf %85, %86 : vector<7x128xf32>
      %88 = vector.broadcast %1 : vector<1x128xf32> to vector<7x128xf32>
      %89 = arith.addf %87, %88 : vector<7x128xf32>
      %90 = arith.maximumf %3, %89 : vector<7x128xf32>
      %cst_68 = arith.constant 0.000000e+00 : f32
      %91 = vector.broadcast %cst_68 : f32 to vector<7x128xf32>
      %c2_i32_69 = arith.constant 2 : i32
      %92 = arith.muli %c2_i32_69, %arg7 : i32
      %c0_i32_70 = arith.constant 0 : i32
      %93 = arith.addi %92, %c0_i32_70 : i32
      %c0_i32_71 = arith.constant 0 : i32
      %94 = arith.addi %93, %c0_i32_71 : i32
      %c0_72 = arith.constant 0 : index
      %95 = arith.index_cast %94 : i32 to index
      %c0_73 = arith.constant 0 : index
      %c0_74 = arith.constant 0 : index
      %96 = vector.load %arg2[%c0_72, %95, %c0_73, %c0_74] : memref<1x16x8x64xf32, #tpu.memory_space<vmem>>, vector<1x1x7x64xf32>
      %97 = vector.shape_cast %96 : vector<1x1x7x64xf32> to vector<1x7x64xf32>
      %98 = vector.shape_cast %97 : vector<1x7x64xf32> to vector<7x64xf32>
      %c0_75 = arith.constant 0 : index
      %c0_76 = arith.constant 0 : index
      %c0_77 = arith.constant 0 : index
      %99 = vector.load %arg3[%c0_75, %c0_76, %c0_77] : memref<9x64x128xf32, #tpu.memory_space<vmem>>, vector<1x64x128xf32>
      %100 = vector.shape_cast %99 : vector<1x64x128xf32> to vector<64x128xf32>
      %cst_78 = arith.constant dense<0.000000e+00> : vector<7x128xf32>
      %101 = tpu.matmul %98, %100, %cst_78 {dimension_numbers = #tpu.dot_dimension_numbers<[1], [0], [0], [1], [0, 0, 1, 1], [], []>} : vector<7x64xf32>, vector<64x128xf32>, vector<7x128xf32> -> vector<7x128xf32>
      %102 = arith.addf %91, %101 : vector<7x128xf32>
      %c0_79 = arith.constant 0 : index
      %103 = arith.index_cast %94 : i32 to index
      %c1_80 = arith.constant 1 : index
      %c0_81 = arith.constant 0 : index
      %104 = vector.load %arg1[%c0_79, %103, %c1_80, %c0_81] : memref<1x16x8x64xf32, #tpu.memory_space<vmem>>, vector<1x1x7x64xf32>
      %105 = vector.shape_cast %104 : vector<1x1x7x64xf32> to vector<1x7x64xf32>
      %106 = vector.shape_cast %105 : vector<1x7x64xf32> to vector<7x64xf32>
      %c1_82 = arith.constant 1 : index
      %c0_83 = arith.constant 0 : index
      %c0_84 = arith.constant 0 : index
      %107 = vector.load %arg3[%c1_82, %c0_83, %c0_84] : memref<9x64x128xf32, #tpu.memory_space<vmem>>, vector<1x64x128xf32>
      %108 = vector.shape_cast %107 : vector<1x64x128xf32> to vector<64x128xf32>
      %cst_85 = arith.constant dense<0.000000e+00> : vector<7x128xf32>
      %109 = tpu.matmul %106, %108, %cst_85 {dimension_numbers = #tpu.dot_dimension_numbers<[1], [0], [0], [1], [0, 0, 1, 1], [], []>} : vector<7x64xf32>, vector<64x128xf32>, vector<7x128xf32> -> vector<7x128xf32>
      %110 = arith.addf %102, %109 : vector<7x128xf32>
      %c0_86 = arith.constant 0 : index
      %111 = arith.index_cast %94 : i32 to index
      %c1_87 = arith.constant 1 : index
      %c0_88 = arith.constant 0 : index
      %112 = vector.load %arg2[%c0_86, %111, %c1_87, %c0_88] : memref<1x16x8x64xf32, #tpu.memory_space<vmem>>, vector<1x1x7x64xf32>
      %113 = vector.shape_cast %112 : vector<1x1x7x64xf32> to vector<1x7x64xf32>
      %114 = vector.shape_cast %113 : vector<1x7x64xf32> to vector<7x64xf32>
      %c2_89 = arith.constant 2 : index
      %c0_90 = arith.constant 0 : index
      %c0_91 = arith.constant 0 : index
      %115 = vector.load %arg3[%c2_89, %c0_90, %c0_91] : memref<9x64x128xf32, #tpu.memory_space<vmem>>, vector<1x64x128xf32>
      %116 = vector.shape_cast %115 : vector<1x64x128xf32> to vector<64x128xf32>
      %cst_92 = arith.constant dense<0.000000e+00> : vector<7x128xf32>
      %117 = tpu.matmul %114, %116, %cst_92 {dimension_numbers = #tpu.dot_dimension_numbers<[1], [0], [0], [1], [0, 0, 1, 1], [], []>} : vector<7x64xf32>, vector<64x128xf32>, vector<7x128xf32> -> vector<7x128xf32>
      %118 = arith.addf %110, %117 : vector<7x128xf32>
      %c2_i32_93 = arith.constant 2 : i32
      %119 = arith.muli %c2_i32_93, %arg7 : i32
      %c0_i32_94 = arith.constant 0 : i32
      %120 = arith.addi %119, %c0_i32_94 : i32
      %c1_i32_95 = arith.constant 1 : i32
      %121 = arith.addi %120, %c1_i32_95 : i32
      %c0_96 = arith.constant 0 : index
      %122 = arith.index_cast %121 : i32 to index
      %c0_97 = arith.constant 0 : index
      %c0_98 = arith.constant 0 : index
      %123 = vector.load %arg2[%c0_96, %122, %c0_97, %c0_98] : memref<1x16x8x64xf32, #tpu.memory_space<vmem>>, vector<1x1x7x64xf32>
      %124 = vector.shape_cast %123 : vector<1x1x7x64xf32> to vector<1x7x64xf32>
      %125 = vector.shape_cast %124 : vector<1x7x64xf32> to vector<7x64xf32>
      %c3_99 = arith.constant 3 : index
      %c0_100 = arith.constant 0 : index
      %c0_101 = arith.constant 0 : index
      %126 = vector.load %arg3[%c3_99, %c0_100, %c0_101] : memref<9x64x128xf32, #tpu.memory_space<vmem>>, vector<1x64x128xf32>
      %127 = vector.shape_cast %126 : vector<1x64x128xf32> to vector<64x128xf32>
      %cst_102 = arith.constant dense<0.000000e+00> : vector<7x128xf32>
      %128 = tpu.matmul %125, %127, %cst_102 {dimension_numbers = #tpu.dot_dimension_numbers<[1], [0], [0], [1], [0, 0, 1, 1], [], []>} : vector<7x64xf32>, vector<64x128xf32>, vector<7x128xf32> -> vector<7x128xf32>
      %129 = arith.addf %118, %128 : vector<7x128xf32>
      %c0_103 = arith.constant 0 : index
      %130 = arith.index_cast %121 : i32 to index
      %c1_104 = arith.constant 1 : index
      %c0_105 = arith.constant 0 : index
      %131 = vector.load %arg1[%c0_103, %130, %c1_104, %c0_105] : memref<1x16x8x64xf32, #tpu.memory_space<vmem>>, vector<1x1x7x64xf32>
      %132 = vector.shape_cast %131 : vector<1x1x7x64xf32> to vector<1x7x64xf32>
      %133 = vector.shape_cast %132 : vector<1x7x64xf32> to vector<7x64xf32>
      %c4_106 = arith.constant 4 : index
      %c0_107 = arith.constant 0 : index
      %c0_108 = arith.constant 0 : index
      %134 = vector.load %arg3[%c4_106, %c0_107, %c0_108] : memref<9x64x128xf32, #tpu.memory_space<vmem>>, vector<1x64x128xf32>
      %135 = vector.shape_cast %134 : vector<1x64x128xf32> to vector<64x128xf32>
      %cst_109 = arith.constant dense<0.000000e+00> : vector<7x128xf32>
      %136 = tpu.matmul %133, %135, %cst_109 {dimension_numbers = #tpu.dot_dimension_numbers<[1], [0], [0], [1], [0, 0, 1, 1], [], []>} : vector<7x64xf32>, vector<64x128xf32>, vector<7x128xf32> -> vector<7x128xf32>
      %137 = arith.addf %129, %136 : vector<7x128xf32>
      %c0_110 = arith.constant 0 : index
      %138 = arith.index_cast %121 : i32 to index
      %c1_111 = arith.constant 1 : index
      %c0_112 = arith.constant 0 : index
      %139 = vector.load %arg2[%c0_110, %138, %c1_111, %c0_112] : memref<1x16x8x64xf32, #tpu.memory_space<vmem>>, vector<1x1x7x64xf32>
      %140 = vector.shape_cast %139 : vector<1x1x7x64xf32> to vector<1x7x64xf32>
      %141 = vector.shape_cast %140 : vector<1x7x64xf32> to vector<7x64xf32>
      %c5_113 = arith.constant 5 : index
      %c0_114 = arith.constant 0 : index
      %c0_115 = arith.constant 0 : index
      %142 = vector.load %arg3[%c5_113, %c0_114, %c0_115] : memref<9x64x128xf32, #tpu.memory_space<vmem>>, vector<1x64x128xf32>
      %143 = vector.shape_cast %142 : vector<1x64x128xf32> to vector<64x128xf32>
      %cst_116 = arith.constant dense<0.000000e+00> : vector<7x128xf32>
      %144 = tpu.matmul %141, %143, %cst_116 {dimension_numbers = #tpu.dot_dimension_numbers<[1], [0], [0], [1], [0, 0, 1, 1], [], []>} : vector<7x64xf32>, vector<64x128xf32>, vector<7x128xf32> -> vector<7x128xf32>
      %145 = arith.addf %137, %144 : vector<7x128xf32>
      %c2_i32_117 = arith.constant 2 : i32
      %146 = arith.muli %c2_i32_117, %arg7 : i32
      %c0_i32_118 = arith.constant 0 : i32
      %147 = arith.addi %146, %c0_i32_118 : i32
      %c2_i32_119 = arith.constant 2 : i32
      %148 = arith.addi %147, %c2_i32_119 : i32
      %c0_120 = arith.constant 0 : index
      %149 = arith.index_cast %148 : i32 to index
      %c0_121 = arith.constant 0 : index
      %c0_122 = arith.constant 0 : index
      %150 = vector.load %arg2[%c0_120, %149, %c0_121, %c0_122] : memref<1x16x8x64xf32, #tpu.memory_space<vmem>>, vector<1x1x7x64xf32>
      %151 = vector.shape_cast %150 : vector<1x1x7x64xf32> to vector<1x7x64xf32>
      %152 = vector.shape_cast %151 : vector<1x7x64xf32> to vector<7x64xf32>
      %c6_123 = arith.constant 6 : index
      %c0_124 = arith.constant 0 : index
      %c0_125 = arith.constant 0 : index
      %153 = vector.load %arg3[%c6_123, %c0_124, %c0_125] : memref<9x64x128xf32, #tpu.memory_space<vmem>>, vector<1x64x128xf32>
      %154 = vector.shape_cast %153 : vector<1x64x128xf32> to vector<64x128xf32>
      %cst_126 = arith.constant dense<0.000000e+00> : vector<7x128xf32>
      %155 = tpu.matmul %152, %154, %cst_126 {dimension_numbers = #tpu.dot_dimension_numbers<[1], [0], [0], [1], [0, 0, 1, 1], [], []>} : vector<7x64xf32>, vector<64x128xf32>, vector<7x128xf32> -> vector<7x128xf32>
      %156 = arith.addf %145, %155 : vector<7x128xf32>
      %c0_127 = arith.constant 0 : index
      %157 = arith.index_cast %148 : i32 to index
      %c1_128 = arith.constant 1 : index
      %c0_129 = arith.constant 0 : index
      %158 = vector.load %arg1[%c0_127, %157, %c1_128, %c0_129] : memref<1x16x8x64xf32, #tpu.memory_space<vmem>>, vector<1x1x7x64xf32>
      %159 = vector.shape_cast %158 : vector<1x1x7x64xf32> to vector<1x7x64xf32>
      %160 = vector.shape_cast %159 : vector<1x7x64xf32> to vector<7x64xf32>
      %c7_130 = arith.constant 7 : index
      %c0_131 = arith.constant 0 : index
      %c0_132 = arith.constant 0 : index
      %161 = vector.load %arg3[%c7_130, %c0_131, %c0_132] : memref<9x64x128xf32, #tpu.memory_space<vmem>>, vector<1x64x128xf32>
      %162 = vector.shape_cast %161 : vector<1x64x128xf32> to vector<64x128xf32>
      %cst_133 = arith.constant dense<0.000000e+00> : vector<7x128xf32>
      %163 = tpu.matmul %160, %162, %cst_133 {dimension_numbers = #tpu.dot_dimension_numbers<[1], [0], [0], [1], [0, 0, 1, 1], [], []>} : vector<7x64xf32>, vector<64x128xf32>, vector<7x128xf32> -> vector<7x128xf32>
      %164 = arith.addf %156, %163 : vector<7x128xf32>
      %c0_134 = arith.constant 0 : index
      %165 = arith.index_cast %148 : i32 to index
      %c1_135 = arith.constant 1 : index
      %c0_136 = arith.constant 0 : index
      %166 = vector.load %arg2[%c0_134, %165, %c1_135, %c0_136] : memref<1x16x8x64xf32, #tpu.memory_space<vmem>>, vector<1x1x7x64xf32>
      %167 = vector.shape_cast %166 : vector<1x1x7x64xf32> to vector<1x7x64xf32>
      %168 = vector.shape_cast %167 : vector<1x7x64xf32> to vector<7x64xf32>
      %c8_137 = arith.constant 8 : index
      %c0_138 = arith.constant 0 : index
      %c0_139 = arith.constant 0 : index
      %169 = vector.load %arg3[%c8_137, %c0_138, %c0_139] : memref<9x64x128xf32, #tpu.memory_space<vmem>>, vector<1x64x128xf32>
      %170 = vector.shape_cast %169 : vector<1x64x128xf32> to vector<64x128xf32>
      %cst_140 = arith.constant dense<0.000000e+00> : vector<7x128xf32>
      %171 = tpu.matmul %168, %170, %cst_140 {dimension_numbers = #tpu.dot_dimension_numbers<[1], [0], [0], [1], [0, 0, 1, 1], [], []>} : vector<7x64xf32>, vector<64x128xf32>, vector<7x128xf32> -> vector<7x128xf32>
      %172 = arith.addf %164, %171 : vector<7x128xf32>
      %173 = vector.broadcast %0 : vector<1x128xf32> to vector<7x128xf32>
      %174 = arith.mulf %172, %173 : vector<7x128xf32>
      %175 = vector.broadcast %1 : vector<1x128xf32> to vector<7x128xf32>
      %176 = arith.addf %174, %175 : vector<7x128xf32>
      %177 = arith.maximumf %90, %176 : vector<7x128xf32>
      %cst_141 = arith.constant 0.000000e+00 : f32
      %178 = vector.broadcast %cst_141 : f32 to vector<7x128xf32>
      %c2_i32_142 = arith.constant 2 : i32
      %179 = arith.muli %c2_i32_142, %arg7 : i32
      %c1_i32_143 = arith.constant 1 : i32
      %180 = arith.addi %179, %c1_i32_143 : i32
      %c0_i32_144 = arith.constant 0 : i32
      %181 = arith.addi %180, %c0_i32_144 : i32
      %c0_145 = arith.constant 0 : index
      %182 = arith.index_cast %181 : i32 to index
      %c0_146 = arith.constant 0 : index
      %c0_147 = arith.constant 0 : index
      %183 = vector.load %arg1[%c0_145, %182, %c0_146, %c0_147] : memref<1x16x8x64xf32, #tpu.memory_space<vmem>>, vector<1x1x7x64xf32>
      %184 = vector.shape_cast %183 : vector<1x1x7x64xf32> to vector<1x7x64xf32>
      %185 = vector.shape_cast %184 : vector<1x7x64xf32> to vector<7x64xf32>
      %c0_148 = arith.constant 0 : index
      %c0_149 = arith.constant 0 : index
      %c0_150 = arith.constant 0 : index
      %186 = vector.load %arg3[%c0_148, %c0_149, %c0_150] : memref<9x64x128xf32, #tpu.memory_space<vmem>>, vector<1x64x128xf32>
      %187 = vector.shape_cast %186 : vector<1x64x128xf32> to vector<64x128xf32>
      %cst_151 = arith.constant dense<0.000000e+00> : vector<7x128xf32>
      %188 = tpu.matmul %185, %187, %cst_151 {dimension_numbers = #tpu.dot_dimension_numbers<[1], [0], [0], [1], [0, 0, 1, 1], [], []>} : vector<7x64xf32>, vector<64x128xf32>, vector<7x128xf32> -> vector<7x128xf32>
      %189 = arith.addf %178, %188 : vector<7x128xf32>
      %c0_152 = arith.constant 0 : index
      %190 = arith.index_cast %181 : i32 to index
      %c0_153 = arith.constant 0 : index
      %c0_154 = arith.constant 0 : index
      %191 = vector.load %arg2[%c0_152, %190, %c0_153, %c0_154] : memref<1x16x8x64xf32, #tpu.memory_space<vmem>>, vector<1x1x7x64xf32>
      %192 = vector.shape_cast %191 : vector<1x1x7x64xf32> to vector<1x7x64xf32>
      %193 = vector.shape_cast %192 : vector<1x7x64xf32> to vector<7x64xf32>
      %c1_155 = arith.constant 1 : index
      %c0_156 = arith.constant 0 : index
      %c0_157 = arith.constant 0 : index
      %194 = vector.load %arg3[%c1_155, %c0_156, %c0_157] : memref<9x64x128xf32, #tpu.memory_space<vmem>>, vector<1x64x128xf32>
      %195 = vector.shape_cast %194 : vector<1x64x128xf32> to vector<64x128xf32>
      %cst_158 = arith.constant dense<0.000000e+00> : vector<7x128xf32>
      %196 = tpu.matmul %193, %195, %cst_158 {dimension_numbers = #tpu.dot_dimension_numbers<[1], [0], [0], [1], [0, 0, 1, 1], [], []>} : vector<7x64xf32>, vector<64x128xf32>, vector<7x128xf32> -> vector<7x128xf32>
      %197 = arith.addf %189, %196 : vector<7x128xf32>
      %c0_159 = arith.constant 0 : index
      %198 = arith.index_cast %181 : i32 to index
      %c1_160 = arith.constant 1 : index
      %c0_161 = arith.constant 0 : index
      %199 = vector.load %arg1[%c0_159, %198, %c1_160, %c0_161] : memref<1x16x8x64xf32, #tpu.memory_space<vmem>>, vector<1x1x7x64xf32>
      %200 = vector.shape_cast %199 : vector<1x1x7x64xf32> to vector<1x7x64xf32>
      %201 = vector.shape_cast %200 : vector<1x7x64xf32> to vector<7x64xf32>
      %c2_162 = arith.constant 2 : index
      %c0_163 = arith.constant 0 : index
      %c0_164 = arith.constant 0 : index
      %202 = vector.load %arg3[%c2_162, %c0_163, %c0_164] : memref<9x64x128xf32, #tpu.memory_space<vmem>>, vector<1x64x128xf32>
      %203 = vector.shape_cast %202 : vector<1x64x128xf32> to vector<64x128xf32>
      %cst_165 = arith.constant dense<0.000000e+00> : vector<7x128xf32>
      %204 = tpu.matmul %201, %203, %cst_165 {dimension_numbers = #tpu.dot_dimension_numbers<[1], [0], [0], [1], [0, 0, 1, 1], [], []>} : vector<7x64xf32>, vector<64x128xf32>, vector<7x128xf32> -> vector<7x128xf32>
      %205 = arith.addf %197, %204 : vector<7x128xf32>
      %c2_i32_166 = arith.constant 2 : i32
      %206 = arith.muli %c2_i32_166, %arg7 : i32
      %c1_i32_167 = arith.constant 1 : i32
      %207 = arith.addi %206, %c1_i32_167 : i32
      %c1_i32_168 = arith.constant 1 : i32
      %208 = arith.addi %207, %c1_i32_168 : i32
      %c0_169 = arith.constant 0 : index
      %209 = arith.index_cast %208 : i32 to index
      %c0_170 = arith.constant 0 : index
      %c0_171 = arith.constant 0 : index
      %210 = vector.load %arg1[%c0_169, %209, %c0_170, %c0_171] : memref<1x16x8x64xf32, #tpu.memory_space<vmem>>, vector<1x1x7x64xf32>
      %211 = vector.shape_cast %210 : vector<1x1x7x64xf32> to vector<1x7x64xf32>
      %212 = vector.shape_cast %211 : vector<1x7x64xf32> to vector<7x64xf32>
      %c3_172 = arith.constant 3 : index
      %c0_173 = arith.constant 0 : index
      %c0_174 = arith.constant 0 : index
      %213 = vector.load %arg3[%c3_172, %c0_173, %c0_174] : memref<9x64x128xf32, #tpu.memory_space<vmem>>, vector<1x64x128xf32>
      %214 = vector.shape_cast %213 : vector<1x64x128xf32> to vector<64x128xf32>
      %cst_175 = arith.constant dense<0.000000e+00> : vector<7x128xf32>
      %215 = tpu.matmul %212, %214, %cst_175 {dimension_numbers = #tpu.dot_dimension_numbers<[1], [0], [0], [1], [0, 0, 1, 1], [], []>} : vector<7x64xf32>, vector<64x128xf32>, vector<7x128xf32> -> vector<7x128xf32>
      %216 = arith.addf %205, %215 : vector<7x128xf32>
      %c0_176 = arith.constant 0 : index
      %217 = arith.index_cast %208 : i32 to index
      %c0_177 = arith.constant 0 : index
      %c0_178 = arith.constant 0 : index
      %218 = vector.load %arg2[%c0_176, %217, %c0_177, %c0_178] : memref<1x16x8x64xf32, #tpu.memory_space<vmem>>, vector<1x1x7x64xf32>
      %219 = vector.shape_cast %218 : vector<1x1x7x64xf32> to vector<1x7x64xf32>
      %220 = vector.shape_cast %219 : vector<1x7x64xf32> to vector<7x64xf32>
      %c4_179 = arith.constant 4 : index
      %c0_180 = arith.constant 0 : index
      %c0_181 = arith.constant 0 : index
      %221 = vector.load %arg3[%c4_179, %c0_180, %c0_181] : memref<9x64x128xf32, #tpu.memory_space<vmem>>, vector<1x64x128xf32>
      %222 = vector.shape_cast %221 : vector<1x64x128xf32> to vector<64x128xf32>
      %cst_182 = arith.constant dense<0.000000e+00> : vector<7x128xf32>
      %223 = tpu.matmul %220, %222, %cst_182 {dimension_numbers = #tpu.dot_dimension_numbers<[1], [0], [0], [1], [0, 0, 1, 1], [], []>} : vector<7x64xf32>, vector<64x128xf32>, vector<7x128xf32> -> vector<7x128xf32>
      %224 = arith.addf %216, %223 : vector<7x128xf32>
      %c0_183 = arith.constant 0 : index
      %225 = arith.index_cast %208 : i32 to index
      %c1_184 = arith.constant 1 : index
      %c0_185 = arith.constant 0 : index
      %226 = vector.load %arg1[%c0_183, %225, %c1_184, %c0_185] : memref<1x16x8x64xf32, #tpu.memory_space<vmem>>, vector<1x1x7x64xf32>
      %227 = vector.shape_cast %226 : vector<1x1x7x64xf32> to vector<1x7x64xf32>
      %228 = vector.shape_cast %227 : vector<1x7x64xf32> to vector<7x64xf32>
      %c5_186 = arith.constant 5 : index
      %c0_187 = arith.constant 0 : index
      %c0_188 = arith.constant 0 : index
      %229 = vector.load %arg3[%c5_186, %c0_187, %c0_188] : memref<9x64x128xf32, #tpu.memory_space<vmem>>, vector<1x64x128xf32>
      %230 = vector.shape_cast %229 : vector<1x64x128xf32> to vector<64x128xf32>
      %cst_189 = arith.constant dense<0.000000e+00> : vector<7x128xf32>
      %231 = tpu.matmul %228, %230, %cst_189 {dimension_numbers = #tpu.dot_dimension_numbers<[1], [0], [0], [1], [0, 0, 1, 1], [], []>} : vector<7x64xf32>, vector<64x128xf32>, vector<7x128xf32> -> vector<7x128xf32>
      %232 = arith.addf %224, %231 : vector<7x128xf32>
      %c2_i32_190 = arith.constant 2 : i32
      %233 = arith.muli %c2_i32_190, %arg7 : i32
      %c1_i32_191 = arith.constant 1 : i32
      %234 = arith.addi %233, %c1_i32_191 : i32
      %c2_i32_192 = arith.constant 2 : i32
      %235 = arith.addi %234, %c2_i32_192 : i32
      %c0_193 = arith.constant 0 : index
      %236 = arith.index_cast %235 : i32 to index
      %c0_194 = arith.constant 0 : index
      %c0_195 = arith.constant 0 : index
      %237 = vector.load %arg1[%c0_193, %236, %c0_194, %c0_195] : memref<1x16x8x64xf32, #tpu.memory_space<vmem>>, vector<1x1x7x64xf32>
      %238 = vector.shape_cast %237 : vector<1x1x7x64xf32> to vector<1x7x64xf32>
      %239 = vector.shape_cast %238 : vector<1x7x64xf32> to vector<7x64xf32>
      %c6_196 = arith.constant 6 : index
      %c0_197 = arith.constant 0 : index
      %c0_198 = arith.constant 0 : index
      %240 = vector.load %arg3[%c6_196, %c0_197, %c0_198] : memref<9x64x128xf32, #tpu.memory_space<vmem>>, vector<1x64x128xf32>
      %241 = vector.shape_cast %240 : vector<1x64x128xf32> to vector<64x128xf32>
      %cst_199 = arith.constant dense<0.000000e+00> : vector<7x128xf32>
      %242 = tpu.matmul %239, %241, %cst_199 {dimension_numbers = #tpu.dot_dimension_numbers<[1], [0], [0], [1], [0, 0, 1, 1], [], []>} : vector<7x64xf32>, vector<64x128xf32>, vector<7x128xf32> -> vector<7x128xf32>
      %243 = arith.addf %232, %242 : vector<7x128xf32>
      %c0_200 = arith.constant 0 : index
      %244 = arith.index_cast %235 : i32 to index
      %c0_201 = arith.constant 0 : index
      %c0_202 = arith.constant 0 : index
      %245 = vector.load %arg2[%c0_200, %244, %c0_201, %c0_202] : memref<1x16x8x64xf32, #tpu.memory_space<vmem>>, vector<1x1x7x64xf32>
      %246 = vector.shape_cast %245 : vector<1x1x7x64xf32> to vector<1x7x64xf32>
      %247 = vector.shape_cast %246 : vector<1x7x64xf32> to vector<7x64xf32>
      %c7_203 = arith.constant 7 : index
      %c0_204 = arith.constant 0 : index
      %c0_205 = arith.constant 0 : index
      %248 = vector.load %arg3[%c7_203, %c0_204, %c0_205] : memref<9x64x128xf32, #tpu.memory_space<vmem>>, vector<1x64x128xf32>
      %249 = vector.shape_cast %248 : vector<1x64x128xf32> to vector<64x128xf32>
      %cst_206 = arith.constant dense<0.000000e+00> : vector<7x128xf32>
      %250 = tpu.matmul %247, %249, %cst_206 {dimension_numbers = #tpu.dot_dimension_numbers<[1], [0], [0], [1], [0, 0, 1, 1], [], []>} : vector<7x64xf32>, vector<64x128xf32>, vector<7x128xf32> -> vector<7x128xf32>
      %251 = arith.addf %243, %250 : vector<7x128xf32>
      %c0_207 = arith.constant 0 : index
      %252 = arith.index_cast %235 : i32 to index
      %c1_208 = arith.constant 1 : index
      %c0_209 = arith.constant 0 : index
      %253 = vector.load %arg1[%c0_207, %252, %c1_208, %c0_209] : memref<1x16x8x64xf32, #tpu.memory_space<vmem>>, vector<1x1x7x64xf32>
      %254 = vector.shape_cast %253 : vector<1x1x7x64xf32> to vector<1x7x64xf32>
      %255 = vector.shape_cast %254 : vector<1x7x64xf32> to vector<7x64xf32>
      %c8_210 = arith.constant 8 : index
      %c0_211 = arith.constant 0 : index
      %c0_212 = arith.constant 0 : index
      %256 = vector.load %arg3[%c8_210, %c0_211, %c0_212] : memref<9x64x128xf32, #tpu.memory_space<vmem>>, vector<1x64x128xf32>
      %257 = vector.shape_cast %256 : vector<1x64x128xf32> to vector<64x128xf32>
      %cst_213 = arith.constant dense<0.000000e+00> : vector<7x128xf32>
      %258 = tpu.matmul %255, %257, %cst_213 {dimension_numbers = #tpu.dot_dimension_numbers<[1], [0], [0], [1], [0, 0, 1, 1], [], []>} : vector<7x64xf32>, vector<64x128xf32>, vector<7x128xf32> -> vector<7x128xf32>
      %259 = arith.addf %251, %258 : vector<7x128xf32>
      %260 = vector.broadcast %0 : vector<1x128xf32> to vector<7x128xf32>
      %261 = arith.mulf %259, %260 : vector<7x128xf32>
      %262 = vector.broadcast %1 : vector<1x128xf32> to vector<7x128xf32>
      %263 = arith.addf %261, %262 : vector<7x128xf32>
      %264 = arith.maximumf %177, %263 : vector<7x128xf32>
      %cst_214 = arith.constant 0.000000e+00 : f32
      %265 = vector.broadcast %cst_214 : f32 to vector<7x128xf32>
      %c2_i32_215 = arith.constant 2 : i32
      %266 = arith.muli %c2_i32_215, %arg7 : i32
      %c1_i32_216 = arith.constant 1 : i32
      %267 = arith.addi %266, %c1_i32_216 : i32
      %c0_i32_217 = arith.constant 0 : i32
      %268 = arith.addi %267, %c0_i32_217 : i32
      %c0_218 = arith.constant 0 : index
      %269 = arith.index_cast %268 : i32 to index
      %c0_219 = arith.constant 0 : index
      %c0_220 = arith.constant 0 : index
      %270 = vector.load %arg2[%c0_218, %269, %c0_219, %c0_220] : memref<1x16x8x64xf32, #tpu.memory_space<vmem>>, vector<1x1x7x64xf32>
      %271 = vector.shape_cast %270 : vector<1x1x7x64xf32> to vector<1x7x64xf32>
      %272 = vector.shape_cast %271 : vector<1x7x64xf32> to vector<7x64xf32>
      %c0_221 = arith.constant 0 : index
      %c0_222 = arith.constant 0 : index
      %c0_223 = arith.constant 0 : index
      %273 = vector.load %arg3[%c0_221, %c0_222, %c0_223] : memref<9x64x128xf32, #tpu.memory_space<vmem>>, vector<1x64x128xf32>
      %274 = vector.shape_cast %273 : vector<1x64x128xf32> to vector<64x128xf32>
      %cst_224 = arith.constant dense<0.000000e+00> : vector<7x128xf32>
      %275 = tpu.matmul %272, %274, %cst_224 {dimension_numbers = #tpu.dot_dimension_numbers<[1], [0], [0], [1], [0, 0, 1, 1], [], []>} : vector<7x64xf32>, vector<64x128xf32>, vector<7x128xf32> -> vector<7x128xf32>
      %276 = arith.addf %265, %275 : vector<7x128xf32>
      %c0_225 = arith.constant 0 : index
      %277 = arith.index_cast %268 : i32 to index
      %c1_226 = arith.constant 1 : index
      %c0_227 = arith.constant 0 : index
      %278 = vector.load %arg1[%c0_225, %277, %c1_226, %c0_227] : memref<1x16x8x64xf32, #tpu.memory_space<vmem>>, vector<1x1x7x64xf32>
      %279 = vector.shape_cast %278 : vector<1x1x7x64xf32> to vector<1x7x64xf32>
      %280 = vector.shape_cast %279 : vector<1x7x64xf32> to vector<7x64xf32>
      %c1_228 = arith.constant 1 : index
      %c0_229 = arith.constant 0 : index
      %c0_230 = arith.constant 0 : index
      %281 = vector.load %arg3[%c1_228, %c0_229, %c0_230] : memref<9x64x128xf32, #tpu.memory_space<vmem>>, vector<1x64x128xf32>
      %282 = vector.shape_cast %281 : vector<1x64x128xf32> to vector<64x128xf32>
      %cst_231 = arith.constant dense<0.000000e+00> : vector<7x128xf32>
      %283 = tpu.matmul %280, %282, %cst_231 {dimension_numbers = #tpu.dot_dimension_numbers<[1], [0], [0], [1], [0, 0, 1, 1], [], []>} : vector<7x64xf32>, vector<64x128xf32>, vector<7x128xf32> -> vector<7x128xf32>
      %284 = arith.addf %276, %283 : vector<7x128xf32>
      %c0_232 = arith.constant 0 : index
      %285 = arith.index_cast %268 : i32 to index
      %c1_233 = arith.constant 1 : index
      %c0_234 = arith.constant 0 : index
      %286 = vector.load %arg2[%c0_232, %285, %c1_233, %c0_234] : memref<1x16x8x64xf32, #tpu.memory_space<vmem>>, vector<1x1x7x64xf32>
      %287 = vector.shape_cast %286 : vector<1x1x7x64xf32> to vector<1x7x64xf32>
      %288 = vector.shape_cast %287 : vector<1x7x64xf32> to vector<7x64xf32>
      %c2_235 = arith.constant 2 : index
      %c0_236 = arith.constant 0 : index
      %c0_237 = arith.constant 0 : index
      %289 = vector.load %arg3[%c2_235, %c0_236, %c0_237] : memref<9x64x128xf32, #tpu.memory_space<vmem>>, vector<1x64x128xf32>
      %290 = vector.shape_cast %289 : vector<1x64x128xf32> to vector<64x128xf32>
      %cst_238 = arith.constant dense<0.000000e+00> : vector<7x128xf32>
      %291 = tpu.matmul %288, %290, %cst_238 {dimension_numbers = #tpu.dot_dimension_numbers<[1], [0], [0], [1], [0, 0, 1, 1], [], []>} : vector<7x64xf32>, vector<64x128xf32>, vector<7x128xf32> -> vector<7x128xf32>
      %292 = arith.addf %284, %291 : vector<7x128xf32>
      %c2_i32_239 = arith.constant 2 : i32
      %293 = arith.muli %c2_i32_239, %arg7 : i32
      %c1_i32_240 = arith.constant 1 : i32
      %294 = arith.addi %293, %c1_i32_240 : i32
      %c1_i32_241 = arith.constant 1 : i32
      %295 = arith.addi %294, %c1_i32_241 : i32
      %c0_242 = arith.constant 0 : index
      %296 = arith.index_cast %295 : i32 to index
      %c0_243 = arith.constant 0 : index
      %c0_244 = arith.constant 0 : index
      %297 = vector.load %arg2[%c0_242, %296, %c0_243, %c0_244] : memref<1x16x8x64xf32, #tpu.memory_space<vmem>>, vector<1x1x7x64xf32>
      %298 = vector.shape_cast %297 : vector<1x1x7x64xf32> to vector<1x7x64xf32>
      %299 = vector.shape_cast %298 : vector<1x7x64xf32> to vector<7x64xf32>
      %c3_245 = arith.constant 3 : index
      %c0_246 = arith.constant 0 : index
      %c0_247 = arith.constant 0 : index
      %300 = vector.load %arg3[%c3_245, %c0_246, %c0_247] : memref<9x64x128xf32, #tpu.memory_space<vmem>>, vector<1x64x128xf32>
      %301 = vector.shape_cast %300 : vector<1x64x128xf32> to vector<64x128xf32>
      %cst_248 = arith.constant dense<0.000000e+00> : vector<7x128xf32>
      %302 = tpu.matmul %299, %301, %cst_248 {dimension_numbers = #tpu.dot_dimension_numbers<[1], [0], [0], [1], [0, 0, 1, 1], [], []>} : vector<7x64xf32>, vector<64x128xf32>, vector<7x128xf32> -> vector<7x128xf32>
      %303 = arith.addf %292, %302 : vector<7x128xf32>
      %c0_249 = arith.constant 0 : index
      %304 = arith.index_cast %295 : i32 to index
      %c1_250 = arith.constant 1 : index
      %c0_251 = arith.constant 0 : index
      %305 = vector.load %arg1[%c0_249, %304, %c1_250, %c0_251] : memref<1x16x8x64xf32, #tpu.memory_space<vmem>>, vector<1x1x7x64xf32>
      %306 = vector.shape_cast %305 : vector<1x1x7x64xf32> to vector<1x7x64xf32>
      %307 = vector.shape_cast %306 : vector<1x7x64xf32> to vector<7x64xf32>
      %c4_252 = arith.constant 4 : index
      %c0_253 = arith.constant 0 : index
      %c0_254 = arith.constant 0 : index
      %308 = vector.load %arg3[%c4_252, %c0_253, %c0_254] : memref<9x64x128xf32, #tpu.memory_space<vmem>>, vector<1x64x128xf32>
      %309 = vector.shape_cast %308 : vector<1x64x128xf32> to vector<64x128xf32>
      %cst_255 = arith.constant dense<0.000000e+00> : vector<7x128xf32>
      %310 = tpu.matmul %307, %309, %cst_255 {dimension_numbers = #tpu.dot_dimension_numbers<[1], [0], [0], [1], [0, 0, 1, 1], [], []>} : vector<7x64xf32>, vector<64x128xf32>, vector<7x128xf32> -> vector<7x128xf32>
      %311 = arith.addf %303, %310 : vector<7x128xf32>
      %c0_256 = arith.constant 0 : index
      %312 = arith.index_cast %295 : i32 to index
      %c1_257 = arith.constant 1 : index
      %c0_258 = arith.constant 0 : index
      %313 = vector.load %arg2[%c0_256, %312, %c1_257, %c0_258] : memref<1x16x8x64xf32, #tpu.memory_space<vmem>>, vector<1x1x7x64xf32>
      %314 = vector.shape_cast %313 : vector<1x1x7x64xf32> to vector<1x7x64xf32>
      %315 = vector.shape_cast %314 : vector<1x7x64xf32> to vector<7x64xf32>
      %c5_259 = arith.constant 5 : index
      %c0_260 = arith.constant 0 : index
      %c0_261 = arith.constant 0 : index
      %316 = vector.load %arg3[%c5_259, %c0_260, %c0_261] : memref<9x64x128xf32, #tpu.memory_space<vmem>>, vector<1x64x128xf32>
      %317 = vector.shape_cast %316 : vector<1x64x128xf32> to vector<64x128xf32>
      %cst_262 = arith.constant dense<0.000000e+00> : vector<7x128xf32>
      %318 = tpu.matmul %315, %317, %cst_262 {dimension_numbers = #tpu.dot_dimension_numbers<[1], [0], [0], [1], [0, 0, 1, 1], [], []>} : vector<7x64xf32>, vector<64x128xf32>, vector<7x128xf32> -> vector<7x128xf32>
      %319 = arith.addf %311, %318 : vector<7x128xf32>
      %c2_i32_263 = arith.constant 2 : i32
      %320 = arith.muli %c2_i32_263, %arg7 : i32
      %c1_i32_264 = arith.constant 1 : i32
      %321 = arith.addi %320, %c1_i32_264 : i32
      %c2_i32_265 = arith.constant 2 : i32
      %322 = arith.addi %321, %c2_i32_265 : i32
      %c0_266 = arith.constant 0 : index
      %323 = arith.index_cast %322 : i32 to index
      %c0_267 = arith.constant 0 : index
      %c0_268 = arith.constant 0 : index
      %324 = vector.load %arg2[%c0_266, %323, %c0_267, %c0_268] : memref<1x16x8x64xf32, #tpu.memory_space<vmem>>, vector<1x1x7x64xf32>
      %325 = vector.shape_cast %324 : vector<1x1x7x64xf32> to vector<1x7x64xf32>
      %326 = vector.shape_cast %325 : vector<1x7x64xf32> to vector<7x64xf32>
      %c6_269 = arith.constant 6 : index
      %c0_270 = arith.constant 0 : index
      %c0_271 = arith.constant 0 : index
      %327 = vector.load %arg3[%c6_269, %c0_270, %c0_271] : memref<9x64x128xf32, #tpu.memory_space<vmem>>, vector<1x64x128xf32>
      %328 = vector.shape_cast %327 : vector<1x64x128xf32> to vector<64x128xf32>
      %cst_272 = arith.constant dense<0.000000e+00> : vector<7x128xf32>
      %329 = tpu.matmul %326, %328, %cst_272 {dimension_numbers = #tpu.dot_dimension_numbers<[1], [0], [0], [1], [0, 0, 1, 1], [], []>} : vector<7x64xf32>, vector<64x128xf32>, vector<7x128xf32> -> vector<7x128xf32>
      %330 = arith.addf %319, %329 : vector<7x128xf32>
      %c0_273 = arith.constant 0 : index
      %331 = arith.index_cast %322 : i32 to index
      %c1_274 = arith.constant 1 : index
      %c0_275 = arith.constant 0 : index
      %332 = vector.load %arg1[%c0_273, %331, %c1_274, %c0_275] : memref<1x16x8x64xf32, #tpu.memory_space<vmem>>, vector<1x1x7x64xf32>
      %333 = vector.shape_cast %332 : vector<1x1x7x64xf32> to vector<1x7x64xf32>
      %334 = vector.shape_cast %333 : vector<1x7x64xf32> to vector<7x64xf32>
      %c7_276 = arith.constant 7 : index
      %c0_277 = arith.constant 0 : index
      %c0_278 = arith.constant 0 : index
      %335 = vector.load %arg3[%c7_276, %c0_277, %c0_278] : memref<9x64x128xf32, #tpu.memory_space<vmem>>, vector<1x64x128xf32>
      %336 = vector.shape_cast %335 : vector<1x64x128xf32> to vector<64x128xf32>
      %cst_279 = arith.constant dense<0.000000e+00> : vector<7x128xf32>
      %337 = tpu.matmul %334, %336, %cst_279 {dimension_numbers = #tpu.dot_dimension_numbers<[1], [0], [0], [1], [0, 0, 1, 1], [], []>} : vector<7x64xf32>, vector<64x128xf32>, vector<7x128xf32> -> vector<7x128xf32>
      %338 = arith.addf %330, %337 : vector<7x128xf32>
      %c0_280 = arith.constant 0 : index
      %339 = arith.index_cast %322 : i32 to index
      %c1_281 = arith.constant 1 : index
      %c0_282 = arith.constant 0 : index
      %340 = vector.load %arg2[%c0_280, %339, %c1_281, %c0_282] : memref<1x16x8x64xf32, #tpu.memory_space<vmem>>, vector<1x1x7x64xf32>
      %341 = vector.shape_cast %340 : vector<1x1x7x64xf32> to vector<1x7x64xf32>
      %342 = vector.shape_cast %341 : vector<1x7x64xf32> to vector<7x64xf32>
      %c8_283 = arith.constant 8 : index
      %c0_284 = arith.constant 0 : index
      %c0_285 = arith.constant 0 : index
      %343 = vector.load %arg3[%c8_283, %c0_284, %c0_285] : memref<9x64x128xf32, #tpu.memory_space<vmem>>, vector<1x64x128xf32>
      %344 = vector.shape_cast %343 : vector<1x64x128xf32> to vector<64x128xf32>
      %cst_286 = arith.constant dense<0.000000e+00> : vector<7x128xf32>
      %345 = tpu.matmul %342, %344, %cst_286 {dimension_numbers = #tpu.dot_dimension_numbers<[1], [0], [0], [1], [0, 0, 1, 1], [], []>} : vector<7x64xf32>, vector<64x128xf32>, vector<7x128xf32> -> vector<7x128xf32>
      %346 = arith.addf %338, %345 : vector<7x128xf32>
      %347 = vector.broadcast %0 : vector<1x128xf32> to vector<7x128xf32>
      %348 = arith.mulf %346, %347 : vector<7x128xf32>
      %349 = vector.broadcast %1 : vector<1x128xf32> to vector<7x128xf32>
      %350 = arith.addf %348, %349 : vector<7x128xf32>
      %351 = arith.maximumf %264, %350 : vector<7x128xf32>
      %cst_287 = arith.constant 0.000000e+00 : f32
      %352 = vector.broadcast %cst_287 : f32 to vector<7x128xf32>
      %353 = arith.maximumf %351, %352 : vector<7x128xf32>
      %354 = vector.shape_cast %353 : vector<7x128xf32> to vector<1x7x128xf32>
      %c0_288 = arith.constant 0 : index
      %355 = arith.index_cast %arg7 : i32 to index
      %c0_289 = arith.constant 0 : index
      %c0_290 = arith.constant 0 : index
      %356 = vector.load %arg6[%c0_288, %355, %c0_289, %c0_290] : memref<1x7x7x128xf32, #tpu.memory_space<vmem>>, vector<1x1x7x128xf32>
      %357 = vector.shape_cast %356 : vector<1x1x7x128xf32> to vector<1x7x128xf32>
      %358 = vector.shape_cast %354 : vector<1x7x128xf32> to vector<1x1x7x128xf32>
      tpu.vector_store %arg6[%c0_288, %355, %c0_289, %c0_290], %358 {strides = array<i32>} : memref<1x7x7x128xf32, #tpu.memory_space<vmem>>, vector<1x1x7x128xf32>,
    }
    %c7_i32_3 = arith.constant 7 : i32
    return
  }
  func.func @transform_0(%arg0: i32) -> (i32, i32, i32, i32) {
    %c0_i32 = arith.constant 0 : i32
    %c0_i32_0 = arith.constant 0 : i32
    %c0_i32_1 = arith.constant 0 : i32
    %c0_i32_2 = arith.constant 0 : i32
    return %arg0, %c0_i32, %c0_i32_0, %c0_i32_1 : i32, i32, i32, i32
  }
  func.func @transform_1(%arg0: i32) -> (i32, i32, i32, i32) {
    %c0_i32 = arith.constant 0 : i32
    %c0_i32_0 = arith.constant 0 : i32
    %c0_i32_1 = arith.constant 0 : i32
    %c0_i32_2 = arith.constant 0 : i32
    return %arg0, %c0_i32, %c0_i32_0, %c0_i32_1 : i32, i32, i32, i32
  }
  func.func @transform_2(%arg0: i32) -> (i32, i32, i32) {
    %c0_i32 = arith.constant 0 : i32
    %c0_i32_0 = arith.constant 0 : i32
    %c0_i32_1 = arith.constant 0 : i32
    %c0_i32_2 = arith.constant 0 : i32
    return %c0_i32, %c0_i32_0, %c0_i32_1 : i32, i32, i32
  }
  func.func @transform_3(%arg0: i32) -> (i32, i32) {
    %c0_i32 = arith.constant 0 : i32
    %c0_i32_0 = arith.constant 0 : i32
    %c0_i32_1 = arith.constant 0 : i32
    return %c0_i32, %c0_i32_0 : i32, i32
  }
  func.func @transform_4(%arg0: i32) -> (i32, i32) {
    %c0_i32 = arith.constant 0 : i32
    %c0_i32_0 = arith.constant 0 : i32
    %c0_i32_1 = arith.constant 0 : i32
    return %c0_i32, %c0_i32_0 : i32, i32
  }
  func.func @transform_5(%arg0: i32) -> (i32, i32, i32, i32) {
    %c0_i32 = arith.constant 0 : i32
    %c0_i32_0 = arith.constant 0 : i32
    %c0_i32_1 = arith.constant 0 : i32
    %c0_i32_2 = arith.constant 0 : i32
    return %arg0, %c0_i32, %c0_i32_0, %c0_i32_1 : i32, i32, i32, i32
  }
}

module attributes {stable_mosaic.version = 11 : i64} {
  func.func @fc_kernel(%arg0: i32, %arg1: memref<2x6272xf32, #tpu.memory_space<vmem>>, %arg2: memref<6272x256xf32, #tpu.memory_space<vmem>>, %arg3: memref<1x256xf32, #tpu.memory_space<vmem>>, %arg4: memref<2x256xf32, #tpu.memory_space<vmem>>) attributes {dimension_semantics = [#tpu.dimension_semantics<parallel>], iteration_bounds = array<i64: 4>, scalar_prefetch = 0 : i64, scratch_operands = 0 : i64, tpu.core_type = #tpu.core_type<tc>, window_params = [{pipeline_mode = #tpu.pipeline_mode<synchronous>, transform_indices = @transform_0, window_bounds = array<i64: 2, 6272>}, {transform_indices = @transform_1, window_bounds = array<i64: 6272, 256>}, {transform_indices = @transform_2, window_bounds = array<i64: 1, 256>}, {transform_indices = @transform_3, window_bounds = array<i64: 2, 256>}]} {
    %c0 = arith.constant 0 : index
    %c0_0 = arith.constant 0 : index
    %0 = vector.load %arg1[%c0, %c0_0] : memref<2x6272xf32, #tpu.memory_space<vmem>>, vector<2x6272xf32>
    %c0_1 = arith.constant 0 : index
    %c0_2 = arith.constant 0 : index
    %1 = vector.load %arg2[%c0_1, %c0_2] : memref<6272x256xf32, #tpu.memory_space<vmem>>, vector<6272x256xf32>
    %cst = arith.constant dense<0.000000e+00> : vector<2x256xf32>
    %2 = tpu.matmul %0, %1, %cst {dimension_numbers = #tpu.dot_dimension_numbers<[1], [0], [0], [1], [0, 0, 1, 1], [], []>} : vector<2x6272xf32>, vector<6272x256xf32>, vector<2x256xf32> -> vector<2x256xf32>
    %c0_3 = arith.constant 0 : index
    %c0_4 = arith.constant 0 : index
    %3 = vector.load %arg3[%c0_3, %c0_4] : memref<1x256xf32, #tpu.memory_space<vmem>>, vector<1x256xf32>
    %4 = vector.broadcast %3 : vector<1x256xf32> to vector<2x256xf32>
    %5 = arith.addf %2, %4 : vector<2x256xf32>
    %cst_5 = arith.constant 0.000000e+00 : f32
    %6 = vector.broadcast %cst_5 : f32 to vector<2x256xf32>
    %7 = arith.maximumf %5, %6 : vector<2x256xf32>
    %c0_6 = arith.constant 0 : index
    %c0_7 = arith.constant 0 : index
    %8 = vector.load %arg4[%c0_6, %c0_7] : memref<2x256xf32, #tpu.memory_space<vmem>>, vector<2x256xf32>
    tpu.vector_store %arg4[%c0_6, %c0_7], %7 {strides = array<i32>} : memref<2x256xf32, #tpu.memory_space<vmem>>, vector<2x256xf32>,
    return
  }
  func.func @transform_0(%arg0: i32) -> (i32, i32) {
    %c0_i32 = arith.constant 0 : i32
    %c0_i32_0 = arith.constant 0 : i32
    %c0_i32_1 = arith.constant 0 : i32
    return %c0_i32, %c0_i32_0 : i32, i32
  }
  func.func @transform_1(%arg0: i32) -> (i32, i32) {
    %c0_i32 = arith.constant 0 : i32
    %c0_i32_0 = arith.constant 0 : i32
    return %c0_i32, %arg0 : i32, i32
  }
  func.func @transform_2(%arg0: i32) -> (i32, i32) {
    %c0_i32 = arith.constant 0 : i32
    %c0_i32_0 = arith.constant 0 : i32
    return %c0_i32, %arg0 : i32, i32
  }
  func.func @transform_3(%arg0: i32) -> (i32, i32) {
    %c0_i32 = arith.constant 0 : i32
    %c0_i32_0 = arith.constant 0 : i32
    return %c0_i32, %arg0 : i32, i32
  }
}

module attributes {stable_mosaic.version = 11 : i64} {
  func.func @fc_kernel(%arg0: i32, %arg1: memref<2x1024xf32, #tpu.memory_space<vmem>>, %arg2: memref<1024x256xf32, #tpu.memory_space<vmem>>, %arg3: memref<1x256xf32, #tpu.memory_space<vmem>>, %arg4: memref<2x256xf32, #tpu.memory_space<vmem>>) attributes {dimension_semantics = [#tpu.dimension_semantics<parallel>], iteration_bounds = array<i64: 2>, scalar_prefetch = 0 : i64, scratch_operands = 0 : i64, tpu.core_type = #tpu.core_type<tc>, window_params = [{pipeline_mode = #tpu.pipeline_mode<synchronous>, transform_indices = @transform_0, window_bounds = array<i64: 2, 1024>}, {transform_indices = @transform_1, window_bounds = array<i64: 1024, 256>}, {transform_indices = @transform_2, window_bounds = array<i64: 1, 256>}, {transform_indices = @transform_3, window_bounds = array<i64: 2, 256>}]} {
    %c0 = arith.constant 0 : index
    %c0_0 = arith.constant 0 : index
    %0 = vector.load %arg1[%c0, %c0_0] : memref<2x1024xf32, #tpu.memory_space<vmem>>, vector<2x1024xf32>
    %c0_1 = arith.constant 0 : index
    %c0_2 = arith.constant 0 : index
    %1 = vector.load %arg2[%c0_1, %c0_2] : memref<1024x256xf32, #tpu.memory_space<vmem>>, vector<1024x256xf32>
    %cst = arith.constant dense<0.000000e+00> : vector<2x256xf32>
    %2 = tpu.matmul %0, %1, %cst {dimension_numbers = #tpu.dot_dimension_numbers<[1], [0], [0], [1], [0, 0, 1, 1], [], []>} : vector<2x1024xf32>, vector<1024x256xf32>, vector<2x256xf32> -> vector<2x256xf32>
    %c0_3 = arith.constant 0 : index
    %c0_4 = arith.constant 0 : index
    %3 = vector.load %arg3[%c0_3, %c0_4] : memref<1x256xf32, #tpu.memory_space<vmem>>, vector<1x256xf32>
    %4 = vector.broadcast %3 : vector<1x256xf32> to vector<2x256xf32>
    %5 = arith.addf %2, %4 : vector<2x256xf32>
    %cst_5 = arith.constant 0.000000e+00 : f32
    %6 = vector.broadcast %cst_5 : f32 to vector<2x256xf32>
    %7 = arith.maximumf %5, %6 : vector<2x256xf32>
    %c0_6 = arith.constant 0 : index
    %c0_7 = arith.constant 0 : index
    %8 = vector.load %arg4[%c0_6, %c0_7] : memref<2x256xf32, #tpu.memory_space<vmem>>, vector<2x256xf32>
    tpu.vector_store %arg4[%c0_6, %c0_7], %7 {strides = array<i32>} : memref<2x256xf32, #tpu.memory_space<vmem>>, vector<2x256xf32>,
    return
  }
  func.func @transform_0(%arg0: i32) -> (i32, i32) {
    %c0_i32 = arith.constant 0 : i32
    %c0_i32_0 = arith.constant 0 : i32
    %c0_i32_1 = arith.constant 0 : i32
    return %c0_i32, %c0_i32_0 : i32, i32
  }
  func.func @transform_1(%arg0: i32) -> (i32, i32) {
    %c0_i32 = arith.constant 0 : i32
    %c0_i32_0 = arith.constant 0 : i32
    return %c0_i32, %arg0 : i32, i32
  }
  func.func @transform_2(%arg0: i32) -> (i32, i32) {
    %c0_i32 = arith.constant 0 : i32
    %c0_i32_0 = arith.constant 0 : i32
    return %c0_i32, %arg0 : i32, i32
  }
  func.func @transform_3(%arg0: i32) -> (i32, i32) {
    %c0_i32 = arith.constant 0 : i32
    %c0_i32_0 = arith.constant 0 : i32
    return %c0_i32, %arg0 : i32, i32
  }
}

module attributes {stable_mosaic.version = 11 : i64} {
  func.func @fc_kernel(%arg0: i32, %arg1: memref<2x512xf32, #tpu.memory_space<vmem>>, %arg2: memref<512x128xf32, #tpu.memory_space<vmem>>, %arg3: memref<1x128xf32, #tpu.memory_space<vmem>>, %arg4: memref<2x128xf32, #tpu.memory_space<vmem>>) attributes {dimension_semantics = [#tpu.dimension_semantics<parallel>], iteration_bounds = array<i64: 1>, scalar_prefetch = 0 : i64, scratch_operands = 0 : i64, tpu.core_type = #tpu.core_type<tc>, window_params = [{pipeline_mode = #tpu.pipeline_mode<synchronous>, transform_indices = @transform_0, window_bounds = array<i64: 2, 512>}, {transform_indices = @transform_1, window_bounds = array<i64: 512, 128>}, {transform_indices = @transform_2, window_bounds = array<i64: 1, 128>}, {transform_indices = @transform_3, window_bounds = array<i64: 2, 128>}]} {
    %c0 = arith.constant 0 : index
    %c0_0 = arith.constant 0 : index
    %0 = vector.load %arg1[%c0, %c0_0] : memref<2x512xf32, #tpu.memory_space<vmem>>, vector<2x512xf32>
    %c0_1 = arith.constant 0 : index
    %c0_2 = arith.constant 0 : index
    %1 = vector.load %arg2[%c0_1, %c0_2] : memref<512x128xf32, #tpu.memory_space<vmem>>, vector<512x128xf32>
    %cst = arith.constant dense<0.000000e+00> : vector<2x128xf32>
    %2 = tpu.matmul %0, %1, %cst {dimension_numbers = #tpu.dot_dimension_numbers<[1], [0], [0], [1], [0, 0, 1, 1], [], []>} : vector<2x512xf32>, vector<512x128xf32>, vector<2x128xf32> -> vector<2x128xf32>
    %c0_3 = arith.constant 0 : index
    %c0_4 = arith.constant 0 : index
    %3 = vector.load %arg3[%c0_3, %c0_4] : memref<1x128xf32, #tpu.memory_space<vmem>>, vector<1x128xf32>
    %4 = vector.broadcast %3 : vector<1x128xf32> to vector<2x128xf32>
    %5 = arith.addf %2, %4 : vector<2x128xf32>
    %cst_5 = arith.constant 0.000000e+00 : f32
    %6 = vector.broadcast %cst_5 : f32 to vector<2x128xf32>
    %7 = arith.maximumf %5, %6 : vector<2x128xf32>
    %c0_6 = arith.constant 0 : index
    %c0_7 = arith.constant 0 : index
    %8 = vector.load %arg4[%c0_6, %c0_7] : memref<2x128xf32, #tpu.memory_space<vmem>>, vector<2x128xf32>
    tpu.vector_store %arg4[%c0_6, %c0_7], %7 {strides = array<i32>} : memref<2x128xf32, #tpu.memory_space<vmem>>, vector<2x128xf32>,
    return
  }
  func.func @transform_0(%arg0: i32) -> (i32, i32) {
    %c0_i32 = arith.constant 0 : i32
    %c0_i32_0 = arith.constant 0 : i32
    %c0_i32_1 = arith.constant 0 : i32
    return %c0_i32, %c0_i32_0 : i32, i32
  }
  func.func @transform_1(%arg0: i32) -> (i32, i32) {
    %c0_i32 = arith.constant 0 : i32
    %c0_i32_0 = arith.constant 0 : i32
    return %c0_i32, %arg0 : i32, i32
  }
  func.func @transform_2(%arg0: i32) -> (i32, i32) {
    %c0_i32 = arith.constant 0 : i32
    %c0_i32_0 = arith.constant 0 : i32
    return %c0_i32, %arg0 : i32, i32
  }
  func.func @transform_3(%arg0: i32) -> (i32, i32) {
    %c0_i32 = arith.constant 0 : i32
    %c0_i32_0 = arith.constant 0 : i32
    return %c0_i32, %arg0 : i32, i32
  }
}

module attributes {stable_mosaic.version = 11 : i64} {
  func.func @fc_kernel(%arg0: i32, %arg1: memref<2x128xf32, #tpu.memory_space<vmem>>, %arg2: memref<128x10xf32, #tpu.memory_space<vmem>>, %arg3: memref<1x10xf32, #tpu.memory_space<vmem>>, %arg4: memref<2x10xf32, #tpu.memory_space<vmem>>) attributes {dimension_semantics = [#tpu.dimension_semantics<parallel>], iteration_bounds = array<i64: 1>, scalar_prefetch = 0 : i64, scratch_operands = 0 : i64, tpu.core_type = #tpu.core_type<tc>, window_params = [{pipeline_mode = #tpu.pipeline_mode<synchronous>, transform_indices = @transform_0, window_bounds = array<i64: 2, 128>}, {transform_indices = @transform_1, window_bounds = array<i64: 128, 10>}, {transform_indices = @transform_2, window_bounds = array<i64: 1, 10>}, {transform_indices = @transform_3, window_bounds = array<i64: 2, 10>}]} {
    %c0 = arith.constant 0 : index
    %c0_0 = arith.constant 0 : index
    %0 = vector.load %arg1[%c0, %c0_0] : memref<2x128xf32, #tpu.memory_space<vmem>>, vector<2x128xf32>
    %c0_1 = arith.constant 0 : index
    %c0_2 = arith.constant 0 : index
    %1 = vector.load %arg2[%c0_1, %c0_2] : memref<128x10xf32, #tpu.memory_space<vmem>>, vector<128x10xf32>
    %cst = arith.constant dense<0.000000e+00> : vector<2x10xf32>
    %2 = tpu.matmul %0, %1, %cst {dimension_numbers = #tpu.dot_dimension_numbers<[1], [0], [0], [1], [0, 0, 1, 1], [], []>} : vector<2x128xf32>, vector<128x10xf32>, vector<2x10xf32> -> vector<2x10xf32>
    %c0_3 = arith.constant 0 : index
    %c0_4 = arith.constant 0 : index
    %3 = vector.load %arg3[%c0_3, %c0_4] : memref<1x10xf32, #tpu.memory_space<vmem>>, vector<1x10xf32>
    %4 = vector.broadcast %3 : vector<1x10xf32> to vector<2x10xf32>
    %5 = arith.addf %2, %4 : vector<2x10xf32>
    %cst_5 = arith.constant dense<0xFF800000> : vector<2xf32>
    %6 = vector.multi_reduction <maximumf>, %5, %cst_5 [1] : vector<2x10xf32> to vector<2xf32>
    %7 = vector.shape_cast %6 : vector<2xf32> to vector<2x1xf32>
    %8 = vector.broadcast %7 : vector<2x1xf32> to vector<2x10xf32>
    %9 = arith.subf %5, %8 : vector<2x10xf32>
    %10 = math.exp %9 : vector<2x10xf32>
    %cst_6 = arith.constant dense<0.000000e+00> : vector<2xf32>
    %11 = vector.multi_reduction <add>, %10, %cst_6 [1] : vector<2x10xf32> to vector<2xf32>
    %12 = vector.shape_cast %11 : vector<2xf32> to vector<2x1xf32>
    %13 = vector.broadcast %12 : vector<2x1xf32> to vector<2x10xf32>
    %14 = arith.divf %10, %13 : vector<2x10xf32>
    %c0_7 = arith.constant 0 : index
    %c0_8 = arith.constant 0 : index
    %15 = vector.load %arg4[%c0_7, %c0_8] : memref<2x10xf32, #tpu.memory_space<vmem>>, vector<2x10xf32>
    tpu.vector_store %arg4[%c0_7, %c0_8], %14 {strides = array<i32>} : memref<2x10xf32, #tpu.memory_space<vmem>>, vector<2x10xf32>,
    return
  }
  func.func @transform_0(%arg0: i32) -> (i32, i32) {
    %c0_i32 = arith.constant 0 : i32
    %c0_i32_0 = arith.constant 0 : i32
    %c0_i32_1 = arith.constant 0 : i32
    return %c0_i32, %c0_i32_0 : i32, i32
  }
  func.func @transform_1(%arg0: i32) -> (i32, i32) {
    %c0_i32 = arith.constant 0 : i32
    %c0_i32_0 = arith.constant 0 : i32
    return %c0_i32, %arg0 : i32, i32
  }
  func.func @transform_2(%arg0: i32) -> (i32, i32) {
    %c0_i32 = arith.constant 0 : i32
    %c0_i32_0 = arith.constant 0 : i32
    return %c0_i32, %arg0 : i32, i32
  }
  func.func @transform_3(%arg0: i32) -> (i32, i32) {
    %c0_i32 = arith.constant 0 : i32
    %c0_i32_0 = arith.constant 0 : i32
    return %c0_i32, %arg0 : i32, i32
  }
}

</mosaic_0001>

<bundles_post_ra>
// kernel: classifier_forward.6
= control target key start
LH: loop header
LB: loop body
LE: loop exit
PB: predicated region body
PF: predicated region fallthrough
CT: control target
= control target key end

     0   :  { %10 = vsyncpa [#allocation3], 0  ;;  %s1002_s18 = smov 0   ;;  %s1230_s0 = inlined_call_operand.vmem [shape: f32[2,30,15,1], index: 0, kind: input, shape index: {}]   ;;  %s1231_s1 = inlined_call_operand.vmem [shape: f32[2,30,15,1], index: 1, kind: input, shape index: {}]   ;;  %s1232_s2 = inlined_call_operand.hbm [shape: f32[9,1,64], index: 2, kind: input, shape index: {}]   ;;  %s1233_s3 = inlined_call_operand.vmem [shape: f32[1,64], index: 3, kind: input, shape index: {}]   ;;  %s1234_s4 = inlined_call_operand.vmem [shape: f32[1,64], index: 4, kind: input, shape index: {}]   ;;  %s1235_s5 = inlined_call_operand.vmem [shape: f32[2,14,14,64], index: 5, kind: output, shape index: {}]  }
   0x1 LB: > { %s173_s21 = sshll.u32 %s1232_s2, 4  ;;  %s816_s22 = sadd.s32 4294967295, %s962_s18   ;;  %s962_s18 = sphi %s1002_s18, %s16_s18   ;;  %s174_s21 = int_to_ptr.hbm [resolvable:$true] %s173_s21 }
   0x2   : > { %p818_p0 = scmp.ge.s32.totalorder %s962_s18, 1  ;;  %p162_p1 = scmp.lt.s32.totalorder %s962_s18, 3 }
   0x3   : > { %p884_p2 = scmp.eq.s32.totalorder %s816_s22, 0  ;;  %s968_s23 = smov [#allocation2]  }
   0x4   : > { %p163_p3 = pnand %p818_p0, %p162_p1  ;;  %s175_s24 = sshll.u32 %s968_s23, 4  ;;  %s176_s24 = int_to_ptr.vmem [resolvable:$true] %s175_s24 }
   0x5   : > { %s969_s25 = smov 16   ;;  %s970_s26 = smov 1  }
   0x6   : > { %p880_p4 = pneg %p163_p3  ;;  %213 = sbr.rel (%p163_p3) target bundleno = 232 (0xe8), region = 40 }
   0x8   : > { %p881_p5 = pnand %p884_p2, %p880_p4 }
   0xa   : > { %883 = dma.hbm_to_vmem [thread:$0]  (!%p881_p5), %s174_s21, 144, %s176_s24, [#allocation3], %s969_s25, %s969_s25, %s970_s26  }
   0xb   : > { %957 = dma.done.wait (%p884_p2), [#allocation3], 144  }
   0xc   : > { %959 = vsyncadd (%p884_p2), [#allocation3], 4294967152  ;;  %p247_p6 = scmp.lt.s32.totalorder %s816_s22, 1  ;;  %v1026_v0 = vld [vmem:[%s1233_s3] sm:$0x1]  ;;  %s1038_s17 = smov 0  }
   0xd   : > { %v1031_v1 = vld [vmem:[%s1234_s4] sm:$0x1] }
   0xe   : > { %s1237_s22 = smov (!%p247_p6, %s816_s22), 1 }
   0xf   : > { %s874_s27 = smul.u32 480, %s1237_s22 }
  0x10   : > { %s875_s28 = smul.u32 224, %s1237_s22 }
  0x11   : > { %s1016_s6 = scalar_lea.vmem %s1230_s0, %s874_s27  ;;  %s1021_s9 = scalar_lea.vmem %s1231_s1, %s874_s27 }
  0x12   : > { %s1036_s16 = scalar_lea.vmem %s1235_s5, %s875_s28 }
  0x13 LB: >> { %v971_v2 = vmov 0   ;;  %s867_s19 = sshll.u32 %s966_s17, 5  ;;  %v909_v51 = vld [vmem:[#allocation2 + $0x1] ss:$0 sm:$0xff]  ;;  %v911_v52 = vld [vmem:[#allocation2] ss:$0 sm:$0xff]  ;;  %s966_s17 = sphi %s1038_s17, %s269_s17  }
  0x14   : >> { %908 = vset.pattern.permute.xlu2 %v971_v2  ;;  %907 = vset.pattern.permute.xlu1 %v971_v2  ;;  %s1045_s20 = scalar_lea.vmem %s1021_s9, %s867_s19  ;;  %s1048_s21 = scalar_lea.vmem %s1016_s6, %s867_s19  ;;  %v1096_v55 = vld [vmem:[#allocation2 + $0x2] ss:$0 sm:$0xff]  ;;  %v1100_v57 = vld [vmem:[#allocation2 + $0x3] ss:$0 sm:$0xff]  ;;  %v1102_v58 = vld [vmem:[#allocation2 + $0x4] ss:$0 sm:$0xff] }
  0x15   : >> { %906 = vset.pattern.permute.xlu0 %v971_v2  ;;  %v294_v3 = vld [vmem:[%s1045_s20] sm:$0xff]  ;;  %v295_v6 = vld [vmem:[%s1045_s20 + $0x8] sm:$0x3f]  ;;  %v831_v9 = vld [vmem:[%s1048_s21 + $0x18] sm:$0x3f]  ;;  %s864_s22 = sshll.u32 %s966_s17, 4 }
  0x16   : >> { %v315_v4 = vld [vmem:[%s1048_s21 + $0x1] sm:$0xff]  ;;  %300 = vperm.xlu1 %907, %v294_v3   ;;  %v316_v7 = vld [vmem:[%s1048_s21 + $0x9] sm:$0x3f]  ;;  %v834_v10 = vld [vmem:[%s1045_s20 + $0x10] sm:$0xff]  ;;  %s697_s23 = scalar_lea.vmem %s1036_s16, %s864_s22  ;;  %vm700_vm0 = vcmask 521216   ;;  %vm698_vm1 = vcmask 523264  }
  0x17   : >> { %v273_v5 = vld [vmem:[%s1048_s21] sm:$0xff]  ;;  %321 = vperm.xlu2 %908, %v315_v4   ;;  %v274_v8 = vld [vmem:[%s1048_s21 + $0x8] sm:$0x3f]  ;;  %v830_v11 = vld [vmem:[%s1048_s21 + $0x10] sm:$0xff]  ;;  %s269_s17 = sadd.s32 1, %s966_s17  }
  0x18   : >> { %278 = vperm.xlu0 %906, %v273_v5   ;;  %v836_v12 = vld [vmem:[%s1048_s21 + $0x11] sm:$0xff]  ;;  %v837_v13 = vld [vmem:[%s1048_s21 + $0x19] sm:$0x3f]  ;;  %v841_v15 = vld [vmem:[%s1048_s21 + $0x28] sm:$0x3f]  ;;  %p266_p7 = scmp.ge.s32.totalorder %s269_s17, 14  }
  0x19   : >> { %v835_v14 = vld [vmem:[%s1045_s20 + $0x18] sm:$0x3f]  ;;  %v844_v16 = vld [vmem:[%s1045_s20 + $0x20] sm:$0xff]  ;;  %v847_v19 = vld [vmem:[%s1048_s21 + $0x29] sm:$0x3f] }
  0x1a   : >> { %v840_v17 = vld [vmem:[%s1048_s21 + $0x20] sm:$0xff]  ;;  %v845_v20 = vld [vmem:[%s1045_s20 + $0x28] sm:$0x3f]  ;;  %v848_v22 = vld [vmem:[%s1045_s20 + $0x11] sm:$0xff] }
  0x1b   : >> { %v846_v18 = vld [vmem:[%s1048_s21 + $0x21] sm:$0xff]  ;;  %v489_v21 = vld [vmem:[%s1045_s20 + $0x9] sm:$0x3f]  ;;  %v849_v26 = vld [vmem:[%s1045_s20 + $0x19] sm:$0x3f] }
  0x1c   : >> { %v488_v23 = vld [vmem:[%s1045_s20 + $0x1] sm:$0xff]  ;;  %v851_v25 = vld [vmem:[%s1045_s20 + $0x29] sm:$0x3f]  ;;  %v855_v27 = vld [vmem:[%s1048_s21 + $0x38] sm:$0x3f] }
  0x1d   : >> { %v850_v24 = vld [vmem:[%s1045_s20 + $0x21] sm:$0xff]  ;;  %v858_v28 = vld [vmem:[%s1045_s20 + $0x30] sm:$0xff]  ;;  %v861_v31 = vld [vmem:[%s1048_s21 + $0x39] sm:$0x3f] }
  0x1e   : >> { %305 = vperm.xlu1 %907, %v295_v6   ;;  %v854_v29 = vld [vmem:[%s1048_s21 + $0x30] sm:$0xff]  ;;  %v859_v32 = vld [vmem:[%s1045_s20 + $0x38] sm:$0x3f]  ;;  %v1104_v2 = vld [vmem:[#allocation2 + $0x5] ss:$0 sm:$0xff] }
  0x1f   : >> { %326 = vperm.xlu2 %908, %v316_v7   ;;  %v860_v30 = vld [vmem:[%s1048_s21 + $0x31] sm:$0xff]  ;;  %v863_v33 = vld [vmem:[%s1045_s20 + $0x39] sm:$0x3f] }
  0x20   : >> { %283 = vperm.xlu0 %906, %v274_v8   ;;  %v862_v34 = vld [vmem:[%s1045_s20 + $0x31] sm:$0xff] }
  0x26   : >> { %350 = vperm.xlu1 %907, %v831_v9  }
  0x27   : >> { %367 = vperm.xlu2 %908, %v834_v10  }
  0x28   : >> { %345 = vperm.xlu0 %906, %v830_v11   ;;  %v1112_v11 = vld [vmem:[#allocation2 + $0x6] ss:$0 sm:$0xff] }
  0x2e   : >> { %388 = vperm.xlu1 %907, %v836_v12   ;;  %v1114_v12 = vld [vmem:[#allocation2 + $0x7] ss:$0 sm:$0xff] }
  0x2f   : >> { %393 = vperm.xlu2 %908, %v837_v13  }
  0x30   : >> { %372 = vperm.xlu0 %906, %v835_v14  }
  0x36   : >> { %417 = vperm.xlu1 %907, %v841_v15  }
  0x37   : >> { %434 = vperm.xlu2 %908, %v844_v16  }
  0x38   : >> { %412 = vperm.xlu0 %906, %v840_v17  }
  0x3e   : >> { %455 = vperm.xlu1 %907, %v846_v18  }
  0x3f   : >> { %460 = vperm.xlu2 %908, %v847_v19  }
  0x40   : >> { %439 = vperm.xlu0 %906, %v845_v20  }
  0x46   : >> { %497 = vperm.xlu1 %907, %v489_v21  }
  0x47   : >> { %516 = vperm.xlu2 %908, %v848_v22  }
  0x48   : >> { %492 = vperm.xlu0 %906, %v488_v23  }
  0x4e   : >> { %540 = vperm.xlu1 %907, %v850_v24  }
  0x4f   : >> { %545 = vperm.xlu2 %908, %v851_v25  }
  0x50   : >> { %521 = vperm.xlu0 %906, %v849_v26  }
  0x56   : >> { %594 = vperm.xlu1 %907, %v855_v27  }
  0x57   : >> { %606 = vperm.xlu2 %908, %v858_v28  }
  0x58   : >> { %589 = vperm.xlu0 %906, %v854_v29  }
  0x5e   : >> { %622 = vperm.xlu1 %907, %v860_v30   ;;  %v1127_v30 = vld [vmem:[#allocation2 + $0x8] ss:$0 sm:$0xff] }
  0x5f   : >> { %627 = vperm.xlu2 %908, %v861_v31  }
  0x60   : >> { %611 = vperm.xlu0 %906, %v859_v32  }
  0x66   : >> { %681 = vperm.xlu1 %907, %v863_v33  }
  0x68   : >> { %676 = vperm.xlu0 %906, %v862_v34  }
  0x71   : >> { %v322_v35 = vpop.permute.xlu2 %321 }
  0x72   : >> { %v484_v62 = vmul.f32 %v909_v51, %v322_v35  ;;  %v332_v5 = vmul.f32 %v1096_v55, %v322_v35 }
  0x79   : >> { %v327_v36 = vpop.permute.xlu2 %326 }
  0x7a   : >> { %v485_v6 = vmul.f32 %v909_v51, %v327_v36  ;;  %v333_v7 = vmul.f32 %v1096_v55, %v327_v36 }
  0x81   : >> { %v368_v39 = vpop.permute.xlu2 %367 }
  0x82   : >> { %v1109_v8 = vmul.f32 %v1102_v58, %v368_v39  ;;  %v504_v9 = vmul.f32 %v1100_v57, %v368_v39  ;;  %v640_v14 = vmul.f32 %v911_v52, %v368_v39  ;;  %v562_v16 = vmul.f32 %v909_v51, %v368_v39 }
  0x88   : >> { %v301_v37 = vpop.permute.xlu1 %300 }
  0x89   : >> { %v394_v42 = vpop.permute.xlu2 %393  ;;  %v311_v59 = vmul.f32 %v909_v51, %v301_v37  ;;  %v480_v63 = vmul.f32 %v911_v52, %v301_v37 }
  0x8a   : >> { %v279_v38 = vpop.permute.xlu0 %278  ;;  %v1118_v20 = vmul.f32 %v1104_v2, %v394_v42  ;;  %v509_v23 = vmul.f32 %v1102_v58, %v394_v42  ;;  %v567_v24 = vmul.f32 %v1096_v55, %v394_v42  ;;  %v645_v25 = vmul.f32 %v909_v51, %v394_v42 }
  0x8b   : >> { %v289_v60 = vmul.f32 %v911_v52, %v279_v38  ;;  %v486_v19 = vadd.f32 %v484_v62, %v480_v63 }
  0x8d   : >> { %v313_v10 = vadd.f32 %v311_v59, %v289_v60 }
  0x8f   : >> { %v334_v27 = vadd.f32 %v332_v5, %v313_v10 }
  0x90   : >> { %v306_v40 = vpop.permute.xlu1 %305 }
  0x91   : >> { %v435_v45 = vpop.permute.xlu2 %434  ;;  %v481_v61 = vmul.f32 %v911_v52, %v306_v40  ;;  %v312_v3 = vmul.f32 %v909_v51, %v306_v40 }
  0x92   : >> { %v284_v41 = vpop.permute.xlu0 %283  ;;  %v1124_v28 = vmul.f32 %v1114_v12, %v435_v45  ;;  %v528_v29 = vmul.f32 %v1112_v11, %v435_v45  ;;  %v574_v32 = vmul.f32 %v1102_v58, %v435_v45  ;;  %v1131_v33 = vmul.f32 %v1100_v57, %v435_v45 }
  0x93   : >> { %v290_v4 = vmul.f32 %v911_v52, %v284_v41  ;;  %v487_v15 = vadd.f32 %v485_v6, %v481_v61 }
  0x95   : >> { %v314_v21 = vadd.f32 %v312_v3, %v290_v4 }
  0x97   : >> { %v335_v37 = vadd.f32 %v333_v7, %v314_v21 }
  0x98   : >> { %v351_v43 = vpop.permute.xlu1 %350 }
  0x99   : >> { %v1088_v49 = vpop.permute.xlu2 %460  ;;  %v357_v38 = vmul.f32 %v1100_v57, %v351_v43  ;;  %v559_v41 = vmul.f32 %v911_v52, %v351_v43 }
  0x9a   : >> { %v346_v44 = vpop.permute.xlu0 %345  ;;  %v1144_v60 = vmul.f32 %v1127_v30, %v1088_v49  ;;  %v533_v61 = vmul.f32 %v1114_v12, %v1088_v49  ;;  %v1155_v43 = vmul.f32 %v1104_v2, %v1088_v49 }
  0x9b   : >> { %v356_v34 = vmul.f32 %v1100_v57, %v346_v44  ;;  %v558_v39 = vmul.f32 %v911_v52, %v346_v44 }
  0x9d   : >> { %v358_v3 = vadd.f32 %v356_v34, %v334_v27  ;;  %v564_v7 = vadd.f32 %v562_v16, %v558_v39 }
  0xa0   : >> { %v1082_v46 = vpop.permute.xlu1 %388 }
  0xa1   : >> { %v1098_v56 = vpop.permute.xlu2 %516  ;;  %v508_v42 = vmul.f32 %v1102_v58, %v1082_v46  ;;  %v644_v59 = vmul.f32 %v909_v51, %v1082_v46  ;;  %v566_v62 = vmul.f32 %v1096_v55, %v1082_v46 }
  0xa2   : >> { %v1084_v47 = vpop.permute.xlu0 %372 }
  0xa3   : >> { %v505_v35 = vmul.f32 %v1100_v57, %v1084_v47  ;;  %v563_v44 = vmul.f32 %v909_v51, %v1084_v47  ;;  %v641_v4 = vmul.f32 %v911_v52, %v1084_v47  ;;  %v657_v52 = vmul.f32 %v1102_v58, %v1088_v49 }
  0xa4   : >> { %v568_v21 = vadd.f32 %v566_v62, %v564_v7 }
  0xa5   : >> { %v565_v16 = vadd.f32 %v563_v44, %v559_v41  ;;  %v647_v27 = vadd.f32 %v645_v25, %v641_v4 }
  0xa8   : >> { %v1086_v48 = vpop.permute.xlu1 %417 }
  0xa9   : >> { %v1136_v36 = vpop.permute.xlu2 %545 }
  0xaa   : >> { %v1090_v50 = vpop.permute.xlu0 %412 }
  0xab   : >> { %v570_v10 = vmul.f32 %v1100_v57, %v1090_v50 }
  0xad   : >> { %v572_v34 = vadd.f32 %v570_v10, %v568_v21 }
  0xaf   : >> { %v576_v44 = vadd.f32 %v574_v32, %v572_v34  ;;  %v471_v34 = vperm.slane %v1026_v0, 0 }
  0xb0   : >> { %v1092_v53 = vpop.permute.xlu1 %455 }
  0xb1   : >> { %v607_v49 = vpop.permute.xlu2 %606  ;;  %v532_v4 = vmul.f32 %v1114_v12, %v1092_v53  ;;  %v656_v32 = vmul.f32 %v1102_v58, %v1092_v53 }
  0xb2   : >> { %v1094_v54 = vpop.permute.xlu0 %439 }
  0xb3   : >> { %v653_v41 = vmul.f32 %v1100_v57, %v1094_v54 }
  0xb8   : >> { %v498_v13 = vpop.permute.xlu1 %497 }
  0xb9   : >> { %v501_v17 = vmul.f32 %v1096_v55, %v498_v13  ;;  %v646_v13 = vadd.f32 %v644_v59, %v640_v14  ;;  %v380_v14 = vadd.f32 %v1109_v8, %v358_v3  ;;  %v578_v8 = vmul.f32 %v1104_v2, %v1092_v53 }
  0xba   : >> { %v493_v18 = vpop.permute.xlu0 %492 }
  0xbb   : >> { %v500_v22 = vmul.f32 %v1096_v55, %v493_v18  ;;  %v503_v26 = vadd.f32 %v501_v17, %v487_v15  ;;  %v379_v15 = vmul.f32 %v1102_v58, %v1084_v47  ;;  %v399_v47 = vmul.f32 %v1104_v2, %v1082_v46 }
  0xbc   : >> { %v575_v46 = vmul.f32 %v1102_v58, %v1094_v54  ;;  %v580_v7 = vadd.f32 %v578_v8, %v576_v44  ;;  %v664_v8 = vmul.f32 %v1112_v11, %v607_v49 }
  0xbd   : >> { %v502_v31 = vadd.f32 %v500_v22, %v486_v19  ;;  %v507_v45 = vadd.f32 %v505_v35, %v503_v26  ;;  %v359_v19 = vadd.f32 %v357_v38, %v335_v37  ;;  %v648_v22 = vmul.f32 %v1096_v55, %v1098_v56 }
  0xbe   : >> { %v529_v38 = vmul.f32 %v1112_v11, %v1094_v54  ;;  %v401_v62 = vadd.f32 %v399_v47, %v380_v14 }
  0xbf   : >> { %v506_v40 = vadd.f32 %v504_v9, %v502_v31  ;;  %v524_v9 = vmul.f32 %v1104_v2, %v1098_v56  ;;  %v511_v17 = vadd.f32 %v509_v23, %v507_v45  ;;  %v571_v23 = vmul.f32 %v1100_v57, %v1086_v48 }
  0xc0   : >> { %v1151_v63 = vpop.permute.xlu1 %540  ;;  %v650_v35 = vadd.f32 %v648_v22, %v646_v13  ;;  %v381_v37 = vadd.f32 %v379_v15, %v359_v19  ;;  %v423_v56 = vmul.f32 %v1112_v11, %v1090_v50  ;;  %v661_v13 = vmul.f32 %v1104_v2, %v1136_v36  ;;  %v628_v22 = vpop.permute.xlu2 %627 }
  0xc1   : >> { %v510_v5 = vadd.f32 %v508_v42, %v506_v40  ;;  %v424_v40 = vmul.f32 %v1112_v11, %v1086_v48 }
  0xc2   : >> { %v522_v6 = vpop.permute.xlu0 %521  ;;  %v402_v3 = vadd.f32 %v1118_v20, %v381_v37  ;;  %v425_v57 = vadd.f32 %v423_v56, %v401_v62  ;;  %v549_v20 = vmul.f32 %v1127_v30, %v1136_v36 }
  0xc3   : >> { %v525_v51 = vmul.f32 %v1104_v2, %v522_v6  ;;  %v649_v18 = vmul.f32 %v1096_v55, %v522_v6  ;;  %v526_v26 = vadd.f32 %v524_v9, %v510_v5  ;;  %v569_v55 = vadd.f32 %v567_v24, %v565_v16 }
  0xc4   : >> { %v446_v5 = vmul.f32 %v1114_v12, %v1094_v54  ;;  %v654_v6 = vadd.f32 %v1131_v33, %v650_v35  ;;  %v426_v9 = vadd.f32 %v424_v40, %v402_v3  ;;  %v466_v33 = vmul.f32 %v1127_v30, %v1092_v53 }
  0xc5   : >> { %v527_v31 = vadd.f32 %v525_v51, %v511_v17  ;;  %v651_v39 = vadd.f32 %v649_v18, %v647_v27  ;;  %v530_v42 = vadd.f32 %v528_v29, %v526_v26  ;;  %v573_v24 = vadd.f32 %v571_v23, %v569_v55 }
  0xc6   : >> { %v448_v17 = vadd.f32 %v446_v5, %v426_v9  ;;  %v548_v18 = vmul.f32 %v1127_v30, %v1151_v63  ;;  %v447_v58 = vadd.f32 %v1124_v28, %v425_v57  ;;  %v660_v16 = vmul.f32 %v1104_v2, %v1151_v63 }
  0xc7   : >> { %v531_v59 = vadd.f32 %v529_v38, %v527_v31  ;;  %v655_v48 = vadd.f32 %v653_v41, %v651_v39  ;;  %v577_v29 = vadd.f32 %v575_v46, %v573_v24  ;;  %v534_v10 = vadd.f32 %v532_v4, %v530_v42 }
  0xc8   : >> { %v595_v25 = vpop.permute.xlu1 %594  ;;  %v658_v27 = vadd.f32 %v656_v32, %v654_v6  ;;  %v468_v35 = vadd.f32 %v466_v33, %v447_v58  ;;  %v469_v2 = vadd.f32 %v1144_v60, %v448_v17  ;;  %v476_v41 = vperm.slane %v1031_v1, 0 }
  0xc9   : >> { %v535_v51 = vadd.f32 %v533_v61, %v531_v59  ;;  %v598_v54 = vmul.f32 %v1112_v11, %v595_v25  ;;  %v659_v19 = vadd.f32 %v657_v52, %v655_v48  ;;  %v614_v61 = vmul.f32 %v1114_v12, %v607_v49 }
  0xca   : >> { %v590_v45 = vpop.permute.xlu0 %589  ;;  %v581_v36 = vadd.f32 %v1155_v43, %v577_v29  ;;  %v550_v26 = vadd.f32 %v548_v18, %v534_v10  ;;  %v631_v43 = vmul.f32 %v1127_v30, %v628_v22  ;;  %v662_v37 = vadd.f32 %v660_v16, %v658_v27 }
  0xcb   : >> { %v597_v50 = vmul.f32 %v1112_v11, %v590_v45  ;;  %v551_v31 = vadd.f32 %v549_v20, %v535_v51  ;;  %v663_v63 = vadd.f32 %v661_v13, %v659_v19  ;;  %v474_v42 = vmul.f32 %v471_v34, %v469_v2 }
  0xcc   : >> { %v600_v47 = vadd.f32 %v598_v54, %v581_v36  ;;  %v552_v46 = vmul.f32 %v550_v26, %v471_v34  ;;  %v669_v59 = vmul.f32 %v1114_v12, %v628_v22  ;;  %v473_v60 = vmul.f32 %v471_v34, %v468_v35 }
  0xcd   : >> { %v599_v15 = vadd.f32 %v597_v50, %v580_v7  ;;  %v553_v55 = vmul.f32 %v551_v31, %v471_v34  ;;  %v666_v24 = vadd.f32 %v664_v8, %v662_v37  ;;  %v479_v6 = vadd.f32 %v476_v41, %v474_v42 }
  0xce   : >> { %v554_v49 = vadd.f32 %v552_v46, %v476_v41 }
  0xcf   : >> { %v616_v23 = vadd.f32 %v614_v61, %v599_v15  ;;  %v555_v50 = vadd.f32 %v553_v55, %v476_v41 }
  0xd0   : >> { %v623_v21 = vpop.permute.xlu1 %622 }
  0xd1   : >> { %v630_v53 = vmul.f32 %v1127_v30, %v623_v21  ;;  %v668_v25 = vmul.f32 %v1114_v12, %v623_v21  ;;  %v557_v32 = vmax.f32 %v479_v6, %v555_v50 }
  0xd2   : >> { %v612_v14 = vpop.permute.xlu0 %611 }
  0xd3   : >> { %v615_v52 = vmul.f32 %v1114_v12, %v612_v14  ;;  %v665_v28 = vmul.f32 %v1112_v11, %v612_v14  ;;  %v632_v38 = vadd.f32 %v630_v53, %v616_v23  ;;  %v670_v5 = vadd.f32 %v668_v25, %v666_v24 }
  0xd4   : >> { %v478_v12 = vadd.f32 %v476_v41, %v473_v60 }
  0xd5   : >> { %v617_v39 = vadd.f32 %v615_v52, %v600_v47  ;;  %v667_v56 = vadd.f32 %v665_v28, %v663_v63  ;;  %v634_v45 = vmul.f32 %v632_v38, %v471_v34 }
  0xd6   : >> { %v556_v51 = vmax.f32 %v478_v12, %v554_v49 }
  0xd7   : >> { %v633_v40 = vadd.f32 %v631_v43, %v617_v39  ;;  %v671_v3 = vadd.f32 %v669_v59, %v667_v56  ;;  %v636_v7 = vadd.f32 %v634_v45, %v476_v41 }
  0xd8   : >> { %v682_v44 = vpop.permute.xlu1 %681 }
  0xd9   : >> { %v635_v62 = vmul.f32 %v633_v40, %v471_v34  ;;  %v685_v4 = vmul.f32 %v1127_v30, %v682_v44  ;;  %v638_v15 = vmax.f32 %v556_v51, %v636_v7 }
  0xda   : >> { %v677_v11 = vpop.permute.xlu0 %676 }
  0xdb   : >> { %v684_v48 = vmul.f32 %v1127_v30, %v677_v11  ;;  %v637_v57 = vadd.f32 %v635_v62, %v476_v41  ;;  %v687_v29 = vadd.f32 %v685_v4, %v671_v3 }
  0xdd   : >> { %v686_v9 = vadd.f32 %v684_v48, %v670_v5  ;;  %v689_v10 = vmul.f32 %v687_v29, %v471_v34  ;;  %v639_v13 = vmax.f32 %v557_v32, %v637_v57 }
  0xdf   : >> { %v688_v20 = vmul.f32 %v686_v9, %v471_v34  ;;  %v691_v54 = vadd.f32 %v689_v10, %v476_v41 }
  0xe1   : >> { %v690_v33 = vadd.f32 %v688_v20, %v476_v41  ;;  %v693_v17 = vmax.f32 %v639_v13, %v691_v54 }
  0xe3   : >> { %v692_v30 = vmax.f32 %v638_v15, %v690_v33  ;;  %v695_v18 = vmax.f32 %v693_v17, 0.0  ;;  %268 = sbr.rel (!%p266_p7) target bundleno = 19 (0x13), region = 102 }
  0xe5   : >> { %v694_v19 = vmax.f32 %v692_v30, 0.0  ;;  %701 = vst.msk [vmem:[%s697_s23 + $0x8] sm:$0x3f] %vm700_vm0, %v695_v18 }
  0xe7   : >> { %699 = vst.msk [vmem:[%s697_s23] sm:$0xff] %vm698_vm1, %v694_v19 }
  0xe8 PF: > { %s16_s18 = sadd.s32 1, %s962_s18  }
  0xe9   : > { %p13_p8 = scmp.ge.s32.totalorder %s16_s18, 4  }
  0xeb   :  { %15 = sbr.rel (!%p13_p8) target bundleno = 1 (0x1), region = 113 }
  0xf0   :  { %723 = vsyncpa [#allocation3], 1 }
  0xf1   :  { %725 = vsyncpa [#allocation3 + $0x1], 1 }

// kernel: classifier_forward.9
= control target key start
LH: loop header
LB: loop body
LE: loop exit
PB: predicated region body
PF: predicated region fallthrough
CT: control target
= control target key end

     0   :  { %8 = vsyncpa [#allocation3], 0  ;;  %s1548_s0 = inlined_call_operand.vmem [shape: f32[2,1024], index: 0, kind: input, shape index: {}]   ;;  %s1549_s1 = inlined_call_operand.hbm [shape: f32[1024,512], index: 1, kind: input, shape index: {}]   ;;  %s1550_s2 = inlined_call_operand.hbm [shape: f32[1,512], index: 2, kind: input, shape index: {}]   ;;  %s1551_s3 = inlined_call_operand.vmem [shape: f32[2,512], index: 3, kind: output, shape index: {}]  }
   0x1   :  { %10 = vsyncpa [#allocation3 + $0x1], 0 }
   0x2   :  { %11 = vsyncpa [#allocation5], 0 }
   0x3   :  { %13 = vsyncpa [#allocation5 + $0x1], 0  ;;  %s1126_s12 = smov 0   ;;  %s1128_s13 = smov 0  }
   0x4   :  { %s1130_s14 = smov 0   ;;  %s1132_s15 = smov 0  }
   0x5 LB: > { %s939_s16 = sadd.s32 4294967295, %s1101_s15   ;;  %s1146_s17 = sadd.s32 1, %s1101_s15   ;;  %s1101_s15 = sphi %s1132_s15, %s1559_s15   ;;  %s1097_s14 = sphi %s1130_s14, %s1558_s14   ;;  %s1093_s13 = sphi %s1128_s13, %s1557_s13   ;;  %s1089_s12 = sphi %s1126_s12, %s1556_s12  }
   0x6   : > { %s44_s18 = ssub.s32 %s1101_s15, %s1146_s17  ;;  %s47_s19 = sadd.s32 1, %s1097_s14 }
   0x7   : > { %p45_p0 = scmp.eq.s32.totalorder %s44_s18, 0  ;;  %p54_p1 = scmp.ne.s32.totalorder %s1097_s14, %s1093_s13 }
   0x8   : > { %p55_p2 = scmp.eq.s32.totalorder %s1101_s15, 0  ;;  %p60_p3 = scmp.ne.s32.totalorder %s1093_s13, %s1089_s12 }
   0x9   : > { %s1156_s20 = scalar_select %p45_p0, %s1097_s14, %s47_s19  }
   0xa   : > { %p1158_p4 = por %p55_p2, %p54_p1  ;;  %p61_p5 = scmp.eq.s32.totalorder %s939_s16, 0 }
   0xb   : > { %p967_p6 = scmp.lt.s32.totalorder %s1101_s15, 2  ;;  %s1170_s23 = sand.u32 1, %s1097_s14  }
   0xc   : > { %p1165_p7 = por %p61_p5, %p60_p3  ;;  %s943_s24 = sshll.u32 %s1170_s23, 11 }
   0xd   : > { %s955_s25 = sshll.u32 %s1101_s15, 4  ;;  %s143_s29 = scalar_lea.vmem [#allocation2], %s943_s24 }
   0xe   : > { %s148_s28 = scalar_lea.hbm %s1549_s1, %s955_s25  ;;  %s151_s30 = sshll.u32 %s143_s29, 4  ;;  %s152_s30 = int_to_ptr.vmem [resolvable:$true] %s151_s30 }
   0xf   : > { %s149_s4 = sshll.u32 %s148_s28, 4  ;;  %p1179_p8 = pnand %p967_p6, %p1158_p4  ;;  %s150_s4 = int_to_ptr.hbm [resolvable:$true] %s149_s4 }
  0x10   : > { %s140_s6 = scalar_lea.sflag [#allocation3], %s1170_s23  ;;  %s1003_s7 = sshra.s32 %s150_s4, 4  ;;  %s1004_s7 = int_to_ptr.hbm [resolvable:$true] %s1003_s7 }
  0x11   : > { %s1005_s8 = scalar_lea.hbm %s1004_s7, 2048  ;;  %p1007_p10 = pneg %p1179_p8 }
  0x12   : > { %p1006_p9 = scmp.ne.s32.totalorder %s1004_s7, %s1005_s8  ;;  %s1010_s11 = scalar_lea.hbm %s1549_s1, 4096 }
  0x13   : > { %p1011_p13 = scmp.lt.s32.totalorder %s1004_s7, %s1549_s1  ;;  %p1012_p0 = scmp.lt.s32.totalorder %s1010_s11, %s1005_s8 }
  0x14   : > { %p1008_p11 = pnand %p1007_p10, %p1006_p9 }
  0x15   : > { %p1013_p1 = por %p1012_p0, %p1011_p13 }
  0x16   : > { %p1009_p12 = pneg %p1008_p11 }
  0x18   : > { %p1014_p2 = pnand %p1013_p1, %p1009_p12 }
  0x1a   : > { %1017 = shalt.err (!%p1014_p2)
}
  0x1b   : > { %s1103_s19 = smov 512   ;;  %s1104_s21 = smov 256  }
  0x1c   : > { %s1105_s24 = smov 16   ;;  %p948_p3 = scmp.ge.s32.totalorder %s1101_s15, 1 }
  0x1d   : > { %963 = dma.hbm_to_vmem [thread:$0]  (!%p1179_p8), %s150_s4, 32768, %s152_s30, %s140_s6, %s1103_s19, %s1104_s21, %s1105_s24  }
  0x1e   : > { %p178_p4 = scmp.lt.s32.totalorder %s1101_s15, 3  ;;  %s946_s25 = sshll.u32 %s1170_s23, 1 }
  0x1f   : > { %s947_s27 = sshll.u32 %s1101_s15, 1  ;;  %s165_s28 = scalar_lea.vmem [#allocation4], %s946_s25 }
  0x20   : > { %p1200_p5 = pnand %p948_p3, %p178_p4  ;;  %s173_s29 = sshll.u32 %s165_s28, 4  ;;  %s174_s29 = int_to_ptr.vmem [resolvable:$true] %s173_s29 }
  0x21   : > { %s169_s9 = scalar_lea.hbm %s1550_s2, %s947_s27  ;;  %s162_s11 = scalar_lea.sflag [#allocation5], %s1170_s23 }
  0x22   : > { %s171_s10 = sshll.u32 %s169_s9, 4  ;;  %s1040_s18 = scalar_lea.hbm %s1550_s2, 4  ;;  %s172_s10 = int_to_ptr.hbm [resolvable:$true] %s171_s10 }
  0x23   : > { %s1033_s30 = sshra.s32 %s172_s10, 4  ;;  %s1034_s30 = int_to_ptr.hbm [resolvable:$true] %s1033_s30 }
  0x24   : > { %s1035_s4 = scalar_lea.hbm %s1034_s30, 2  ;;  %p1041_p12 = scmp.lt.s32.totalorder %s1034_s30, %s1550_s2 }
  0x25   : > { %p1036_p6 = scmp.ne.s32.totalorder %s1034_s30, %s1035_s4  ;;  %p1042_p13 = scmp.lt.s32.totalorder %s1040_s18, %s1035_s4 }
  0x27   : > { %p1038_p9 = pnand %p1036_p6, %p1007_p10  ;;  %p1043_p0 = por %p1042_p13, %p1041_p12 }
  0x29   : > { %p1039_p11 = pneg %p1038_p9 }
  0x2b   : > { %p1044_p1 = pnand %p1043_p0, %p1039_p11 }
  0x2d   : > { %1047 = shalt.err (!%p1044_p1)
}
  0x2e   : > { %966 = dma.hbm_to_vmem [thread:$0]  (!%p1179_p8), %s172_s10, 32, %s174_s29, %s162_s11  }
  0x2f   : > { %182 = sbr.rel (%p1200_p5) target bundleno = 332 (0x14c), region = 32  ;;  %s184_s23 = sand.u32 (!%p1200_p5), 1, %s1093_s13  }
  0x30   : > { %s949_s24 = sshll.u32 (!%p1200_p5), %s184_s23, 11  ;;  %s185_s25 = scalar_lea.sflag (!%p1200_p5), [#allocation3], %s184_s23 }
  0x31   : > { %s1223_s27 = scalar_lea.vmem (!%p1200_p5), [#allocation2], %s949_s24 }
  0x34   : > { %1080 = dma.done.wait (%p1165_p7), %s185_s25, 32768  }
  0x35   : > { %1082 = vsyncadd (%p1165_p7), %s185_s25, 4294934528  ;;  %s950_s28 = sshll.u32 %s184_s23, 1  ;;  %s195_s7 = scalar_lea.sflag [#allocation5], %s184_s23 }
  0x36   : > { %s1229_s5 = scalar_lea.vmem [#allocation4], %s950_s28 }
  0x37   : > { %1084 = dma.done.wait (%p1165_p7), %s195_s7, 32  }
  0x38   : > { %1086 = vsyncadd (%p1165_p7), %s195_s7, 4294967264  ;;  %v331_v0 = vld [vmem:[%s1223_s27 + $0x2f0] sm:$0xff]  ;;  %v329_v2 = vld [vmem:[%s1223_s27 + $0x2e0] sm:$0xff]  ;;  %s951_s9 = sshll.u32 %s939_s16, 1  ;;  %vm845_vm0 = vcmask 1041408  }
  0x39   : > { %v267_v1 = vld [vmem:[%s1223_s27 + $0xf0] sm:$0xff]  ;;  %560 = vmatpush.msra.mxu2 %v331_v0  ;;  %v265_v4 = vld [vmem:[%s1223_s27 + $0xe0] sm:$0xff]  ;;  %p230_p7 = scmp.lt.s32.totalorder %s951_s9, 3 }
  0x3a   : > { %520 = vmatpush.msra.mxu0 %v267_v1  ;;  %v363_v3 = vld [vmem:[%s1223_s27 + $0x3f0] sm:$0xff]  ;;  %v361_v7 = vld [vmem:[%s1223_s27 + $0x3e0] sm:$0xff] }
  0x3b   : > { %v299_v5 = vld [vmem:[%s1223_s27 + $0x1f0] sm:$0xff]  ;;  %580 = vmatpush.msra.mxu3 %v363_v3  ;;  %561 = vmatpush.msra.mxu2 %v329_v2  ;;  %v297_v9 = vld [vmem:[%s1223_s27 + $0x1e0] sm:$0xff]  ;;  %s1561_s9 = smov (!%p230_p7, %s951_s9), 3 }
  0x3c   : > { %540 = vmatpush.msra.mxu1 %v299_v5  ;;  %v327_v6 = vld [vmem:[%s1223_s27 + $0x2d0] sm:$0xff]  ;;  %521 = vmatpush.msra.mxu0 %v265_v4  ;;  %v325_v11 = vld [vmem:[%s1223_s27 + $0x2c0] sm:$0xff]  ;;  %s952_s10 = sshll.u32 %s1561_s9, 1 }
  0x3d   : > { %v263_v8 = vld [vmem:[%s1223_s27 + $0xd0] sm:$0xff]  ;;  %581 = vmatpush.msra.mxu3 %v361_v7  ;;  %v261_v12 = vld [vmem:[%s1223_s27 + $0xc0] sm:$0xff]  ;;  %562 = vmatpush.msra.mxu2 %v327_v6  ;;  %s233_s11 = scalar_lea.vmem %s1551_s3, %s952_s10 }
  0x3e   : > { %v359_v10 = vld [vmem:[%s1223_s27 + $0x3d0] sm:$0xff]  ;;  %541 = vmatpush.msra.mxu1 %v297_v9  ;;  %522 = vmatpush.msra.mxu0 %v263_v8  ;;  %v357_v14 = vld [vmem:[%s1223_s27 + $0x3c0] sm:$0xff] }
  0x3f   : > { %v295_v13 = vld [vmem:[%s1223_s27 + $0x1d0] sm:$0xff]  ;;  %v293_v15 = vld [vmem:[%s1223_s27 + $0x1c0] sm:$0xff]  ;;  %582 = vmatpush.msra.mxu3 %v359_v10  ;;  %563 = vmatpush.msra.mxu2 %v325_v11 }
  0x40   : > { %542 = vmatpush.msra.mxu1 %v295_v13  ;;  %v323_v16 = vld [vmem:[%s1223_s27 + $0x2b0] sm:$0xff]  ;;  %523 = vmatpush.msra.mxu0 %v261_v12  ;;  %v321_v20 = vld [vmem:[%s1223_s27 + $0x2a0] sm:$0xff] }
  0x41   : > { %v259_v17 = vld [vmem:[%s1223_s27 + $0xb0] sm:$0xff]  ;;  %583 = vmatpush.msra.mxu3 %v357_v14  ;;  %v257_v21 = vld [vmem:[%s1223_s27 + $0xa0] sm:$0xff]  ;;  %564 = vmatpush.msra.mxu2 %v323_v16 }
  0x42   : > { %v355_v18 = vld [vmem:[%s1223_s27 + $0x3b0] sm:$0xff]  ;;  %543 = vmatpush.msra.mxu1 %v293_v15  ;;  %524 = vmatpush.msra.mxu0 %v259_v17  ;;  %v353_v22 = vld [vmem:[%s1223_s27 + $0x3a0] sm:$0xff] }
  0x43   : > { %v291_v19 = vld [vmem:[%s1223_s27 + $0x1b0] sm:$0xff]  ;;  %v289_v23 = vld [vmem:[%s1223_s27 + $0x1a0] sm:$0xff]  ;;  %584 = vmatpush.msra.mxu3 %v355_v18  ;;  %565 = vmatpush.msra.mxu2 %v321_v20 }
  0x44   : > { %544 = vmatpush.msra.mxu1 %v291_v19  ;;  %v319_v24 = vld [vmem:[%s1223_s27 + $0x290] sm:$0xff]  ;;  %525 = vmatpush.msra.mxu0 %v257_v21  ;;  %v317_v28 = vld [vmem:[%s1223_s27 + $0x280] sm:$0xff] }
  0x45   : > { %v255_v25 = vld [vmem:[%s1223_s27 + $0x90] sm:$0xff]  ;;  %585 = vmatpush.msra.mxu3 %v353_v22  ;;  %v253_v29 = vld [vmem:[%s1223_s27 + $0x80] sm:$0xff]  ;;  %566 = vmatpush.msra.mxu2 %v319_v24  ;;  %v235_v24 = vld [vmem:[%s1548_s0] sm:$0xff] }
  0x46   : > { %v351_v26 = vld [vmem:[%s1223_s27 + $0x390] sm:$0xff]  ;;  %545 = vmatpush.msra.mxu1 %v289_v23  ;;  %526 = vmatpush.msra.mxu0 %v255_v25  ;;  %v349_v30 = vld [vmem:[%s1223_s27 + $0x380] sm:$0xff]  ;;  %501 = vst [vmem:[#allocation1] ss:$4 sm:$0xff] %v235_v24 }
  0x47   : > { %v287_v27 = vld [vmem:[%s1223_s27 + $0x190] sm:$0xff]  ;;  %v285_v31 = vld [vmem:[%s1223_s27 + $0x180] sm:$0xff]  ;;  %586 = vmatpush.msra.mxu3 %v351_v26  ;;  %567 = vmatpush.msra.mxu2 %v317_v28 }
  0x48   : > { %546 = vmatpush.msra.mxu1 %v287_v27  ;;  %v315_v32 = vld [vmem:[%s1223_s27 + $0x270] sm:$0xff]  ;;  %527 = vmatpush.msra.mxu0 %v253_v29  ;;  %v313_v36 = vld [vmem:[%s1223_s27 + $0x260] sm:$0xff] }
  0x49   : > { %v251_v33 = vld [vmem:[%s1223_s27 + $0x70] sm:$0xff]  ;;  %587 = vmatpush.msra.mxu3 %v349_v30  ;;  %v249_v37 = vld [vmem:[%s1223_s27 + $0x60] sm:$0xff]  ;;  %568 = vmatpush.msra.mxu2 %v315_v32 }
  0x4a   : > { %v347_v34 = vld [vmem:[%s1223_s27 + $0x370] sm:$0xff]  ;;  %547 = vmatpush.msra.mxu1 %v285_v31  ;;  %528 = vmatpush.msra.mxu0 %v251_v33  ;;  %v345_v38 = vld [vmem:[%s1223_s27 + $0x360] sm:$0xff] }
  0x4b   : > { %v283_v35 = vld [vmem:[%s1223_s27 + $0x170] sm:$0xff]  ;;  %v281_v39 = vld [vmem:[%s1223_s27 + $0x160] sm:$0xff]  ;;  %588 = vmatpush.msra.mxu3 %v347_v34  ;;  %569 = vmatpush.msra.mxu2 %v313_v36 }
  0x4c   : > { %548 = vmatpush.msra.mxu1 %v283_v35  ;;  %v311_v40 = vld [vmem:[%s1223_s27 + $0x250] sm:$0xff]  ;;  %529 = vmatpush.msra.mxu0 %v249_v37  ;;  %v309_v44 = vld [vmem:[%s1223_s27 + $0x240] sm:$0xff] }
  0x4d   : > { %v247_v41 = vld [vmem:[%s1223_s27 + $0x50] sm:$0xff]  ;;  %589 = vmatpush.msra.mxu3 %v345_v38  ;;  %v245_v45 = vld [vmem:[%s1223_s27 + $0x40] sm:$0xff]  ;;  %570 = vmatpush.msra.mxu2 %v311_v40 }
  0x4e   : > { %v343_v42 = vld [vmem:[%s1223_s27 + $0x350] sm:$0xff]  ;;  %549 = vmatpush.msra.mxu1 %v281_v39  ;;  %530 = vmatpush.msra.mxu0 %v247_v41  ;;  %v341_v46 = vld [vmem:[%s1223_s27 + $0x340] sm:$0xff] }
  0x4f   : > { %v279_v43 = vld [vmem:[%s1223_s27 + $0x150] sm:$0xff]  ;;  %v277_v47 = vld [vmem:[%s1223_s27 + $0x140] sm:$0xff]  ;;  %590 = vmatpush.msra.mxu3 %v343_v42  ;;  %571 = vmatpush.msra.mxu2 %v309_v44 }
  0x50   : > { %550 = vmatpush.msra.mxu1 %v279_v43  ;;  %v307_v48 = vld [vmem:[%s1223_s27 + $0x230] sm:$0xff]  ;;  %531 = vmatpush.msra.mxu0 %v245_v45  ;;  %v305_v52 = vld [vmem:[%s1223_s27 + $0x220] sm:$0xff] }
  0x51   : > { %v243_v49 = vld [vmem:[%s1223_s27 + $0x30] sm:$0xff]  ;;  %591 = vmatpush.msra.mxu3 %v341_v46  ;;  %v241_v53 = vld [vmem:[%s1223_s27 + $0x20] sm:$0xff]  ;;  %572 = vmatpush.msra.mxu2 %v307_v48 }
  0x52   : > { %v339_v50 = vld [vmem:[%s1223_s27 + $0x330] sm:$0xff]  ;;  %551 = vmatpush.msra.mxu1 %v277_v47  ;;  %532 = vmatpush.msra.mxu0 %v243_v49  ;;  %v337_v54 = vld [vmem:[%s1223_s27 + $0x320] sm:$0xff] }
  0x53   : > { %v275_v51 = vld [vmem:[%s1223_s27 + $0x130] sm:$0xff]  ;;  %v273_v55 = vld [vmem:[%s1223_s27 + $0x120] sm:$0xff]  ;;  %592 = vmatpush.msra.mxu3 %v339_v50  ;;  %573 = vmatpush.msra.mxu2 %v305_v52 }
  0x54   : > { %552 = vmatpush.msra.mxu1 %v275_v51  ;;  %v303_v56 = vld [vmem:[%s1223_s27 + $0x210] sm:$0xff]  ;;  %533 = vmatpush.msra.mxu0 %v241_v53  ;;  %v301_v60 = vld [vmem:[%s1223_s27 + $0x200] sm:$0xff] }
  0x55   : > { %v239_v57 = vld [vmem:[%s1223_s27 + $0x10] sm:$0xff]  ;;  %593 = vmatpush.msra.mxu3 %v337_v54  ;;  %v237_v61 = vld [vmem:[%s1223_s27] sm:$0xff]  ;;  %574 = vmatpush.msra.mxu2 %v303_v56 }
  0x56   : > { %v335_v58 = vld [vmem:[%s1223_s27 + $0x310] sm:$0xff]  ;;  %553 = vmatpush.msra.mxu1 %v273_v55  ;;  %534 = vmatpush.msra.mxu0 %v239_v57  ;;  %v333_v63 = vld [vmem:[%s1223_s27 + $0x300] sm:$0xff] }
  0x57   : > { %v271_v59 = vld [vmem:[%s1223_s27 + $0x110] sm:$0xff]  ;;  %594 = vmatpush.msra.mxu3 %v335_v58  ;;  %575 = vmatpush.msra.mxu2 %v301_v60  ;;  %v457_v2 = vld [vmem:[%s1223_s27 + $0x6e0] sm:$0xff] }
  0x58   : > { %v459_v62 = vld [vmem:[%s1223_s27 + $0x6f0] sm:$0xff]  ;;  %554 = vmatpush.msra.mxu1 %v271_v59  ;;  %535 = vmatpush.msra.mxu0 %v237_v61  ;;  %v269_v3 = vld [vmem:[%s1223_s27 + $0x100] sm:$0xff] }
  0x59   : > { %v395_v0 = vld [vmem:[%s1223_s27 + $0x4f0] sm:$0xff]  ;;  %640 = vmatpush.msrb.mxu2 %v459_v62  ;;  %595 = vmatpush.msra.mxu3 %v333_v63  ;;  %v393_v4 = vld [vmem:[%s1223_s27 + $0x4e0] sm:$0xff]  ;;  %v1365_v62 = vld.sshfl [vmem:[#allocation1 + $0x10] sm:$0xff pattern:$0x73625140] }
  0x5a   : > { %v491_v1 = vld [vmem:[%s1223_s27 + $0x7f0] sm:$0xff]  ;;  %600 = vmatpush.msrb.mxu0 %v395_v0  ;;  %v489_v7 = vld [vmem:[%s1223_s27 + $0x7e0] sm:$0xff]  ;;  %555 = vmatpush.msra.mxu1 %v269_v3  ;;  %v332_v0 = vld [vmem:[%s1223_s27 + $0x2f8] sm:$0xff] }
  0x5b   : > { %v427_v5 = vld [vmem:[%s1223_s27 + $0x5f0] sm:$0xff]  ;;  %660 = vmatpush.msrb.mxu3 %v491_v1  ;;  %641 = vmatpush.msrb.mxu2 %v457_v2  ;;  %v425_v9 = vld [vmem:[%s1223_s27 + $0x5e0] sm:$0xff]  ;;  %v1371_v3 = vld.sshfl [vmem:[#allocation1] sm:$0xff pattern:$0x73625140] }
  0x5c   : > { %v455_v6 = vld [vmem:[%s1223_s27 + $0x6d0] sm:$0xff]  ;;  %601 = vmatpush.msrb.mxu0 %v393_v4  ;;  %620 = vmatpush.msrb.mxu1 %v427_v5  ;;  %v453_v10 = vld [vmem:[%s1223_s27 + $0x6c0] sm:$0xff]  ;;  %v268_v5 = vld [vmem:[%s1223_s27 + $0xf8] sm:$0xff] }
  0x5d   : > { %v391_v8 = vld [vmem:[%s1223_s27 + $0x4d0] sm:$0xff]  ;;  %642 = vmatpush.msrb.mxu2 %v455_v6  ;;  %661 = vmatpush.msrb.mxu3 %v489_v7  ;;  %v389_v12 = vld [vmem:[%s1223_s27 + $0x4c0] sm:$0xff]  ;;  %v330_v6 = vld [vmem:[%s1223_s27 + $0x2e8] sm:$0xff] }
  0x5e   : > { %v487_v11 = vld [vmem:[%s1223_s27 + $0x7d0] sm:$0xff]  ;;  %602 = vmatpush.msrb.mxu0 %v391_v8  ;;  %621 = vmatpush.msrb.mxu1 %v425_v9  ;;  %v485_v15 = vld [vmem:[%s1223_s27 + $0x7c0] sm:$0xff]  ;;  %v364_v7 = vld [vmem:[%s1223_s27 + $0x3f8] sm:$0xff] }
  0x5f   : > { %v423_v13 = vld [vmem:[%s1223_s27 + $0x5d0] sm:$0xff]  ;;  %643 = vmatpush.msrb.mxu2 %v453_v10  ;;  %662 = vmatpush.msrb.mxu3 %v487_v11  ;;  %v421_v17 = vld [vmem:[%s1223_s27 + $0x5c0] sm:$0xff]  ;;  %v266_v9 = vld [vmem:[%s1223_s27 + $0xe8] sm:$0xff] }
  0x60   : > { %v451_v14 = vld [vmem:[%s1223_s27 + $0x6b0] sm:$0xff]  ;;  %603 = vmatpush.msrb.mxu0 %v389_v12  ;;  %622 = vmatpush.msrb.mxu1 %v423_v13  ;;  %v449_v18 = vld [vmem:[%s1223_s27 + $0x6a0] sm:$0xff]  ;;  %v328_v11 = vld [vmem:[%s1223_s27 + $0x2d8] sm:$0xff] }
  0x61   : > { %v387_v16 = vld [vmem:[%s1223_s27 + $0x4b0] sm:$0xff]  ;;  %644 = vmatpush.msrb.mxu2 %v451_v14  ;;  %663 = vmatpush.msrb.mxu3 %v485_v15  ;;  %v385_v20 = vld [vmem:[%s1223_s27 + $0x4a0] sm:$0xff]  ;;  %v300_v12 = vld [vmem:[%s1223_s27 + $0x1f8] sm:$0xff] }
  0x62   : > { %v483_v19 = vld [vmem:[%s1223_s27 + $0x7b0] sm:$0xff]  ;;  %604 = vmatpush.msrb.mxu0 %v387_v16  ;;  %623 = vmatpush.msrb.mxu1 %v421_v17  ;;  %v481_v23 = vld [vmem:[%s1223_s27 + $0x7a0] sm:$0xff]  ;;  %v362_v13 = vld [vmem:[%s1223_s27 + $0x3e8] sm:$0xff] }
  0x63   : > { %v419_v21 = vld [vmem:[%s1223_s27 + $0x5b0] sm:$0xff]  ;;  %645 = vmatpush.msrb.mxu2 %v449_v18  ;;  %664 = vmatpush.msrb.mxu3 %v483_v19  ;;  %v417_v26 = vld [vmem:[%s1223_s27 + $0x5a0] sm:$0xff]  ;;  %v264_v14 = vld [vmem:[%s1223_s27 + $0xd8] sm:$0xff] }
  0x64   : > { %v447_v22 = vld [vmem:[%s1223_s27 + $0x690] sm:$0xff]  ;;  %605 = vmatpush.msrb.mxu0 %v385_v20  ;;  %624 = vmatpush.msrb.mxu1 %v419_v21  ;;  %v445_v27 = vld [vmem:[%s1223_s27 + $0x680] sm:$0xff]  ;;  %v326_v15 = vld [vmem:[%s1223_s27 + $0x2c8] sm:$0xff] }
  0x65   : > { %v383_v25 = vld [vmem:[%s1223_s27 + $0x490] sm:$0xff]  ;;  %646 = vmatpush.msrb.mxu2 %v447_v22  ;;  %665 = vmatpush.msrb.mxu3 %v481_v23  ;;  %v381_v29 = vld [vmem:[%s1223_s27 + $0x480] sm:$0xff]  ;;  %v298_v16 = vld [vmem:[%s1223_s27 + $0x1e8] sm:$0xff] }
  0x66   : > { %v479_v28 = vld [vmem:[%s1223_s27 + $0x790] sm:$0xff]  ;;  %606 = vmatpush.msrb.mxu0 %v383_v25  ;;  %625 = vmatpush.msrb.mxu1 %v417_v26  ;;  %v477_v32 = vld [vmem:[%s1223_s27 + $0x780] sm:$0xff]  ;;  %v360_v17 = vld [vmem:[%s1223_s27 + $0x3d8] sm:$0xff] }
  0x67   : > { %v415_v30 = vld [vmem:[%s1223_s27 + $0x590] sm:$0xff]  ;;  %647 = vmatpush.msrb.mxu2 %v445_v27  ;;  %666 = vmatpush.msrb.mxu3 %v479_v28  ;;  %v413_v34 = vld [vmem:[%s1223_s27 + $0x580] sm:$0xff]  ;;  %v262_v19 = vld [vmem:[%s1223_s27 + $0xc8] sm:$0xff] }
  0x68   : > { %v443_v31 = vld [vmem:[%s1223_s27 + $0x670] sm:$0xff]  ;;  %607 = vmatpush.msrb.mxu0 %v381_v29  ;;  %626 = vmatpush.msrb.mxu1 %v415_v30  ;;  %v441_v35 = vld [vmem:[%s1223_s27 + $0x660] sm:$0xff]  ;;  %v296_v20 = vld [vmem:[%s1223_s27 + $0x1d8] sm:$0xff] }
  0x69   : > { %v379_v33 = vld [vmem:[%s1223_s27 + $0x470] sm:$0xff]  ;;  %v236_v37 = vld [vmem:[%s1548_s0 + $0x8] sm:$0xff]  ;;  %648 = vmatpush.msrb.mxu2 %v443_v31  ;;  %667 = vmatpush.msrb.mxu3 %v477_v32  ;;  %v324_v21 = vld [vmem:[%s1223_s27 + $0x2b8] sm:$0xff] }
  0x6a   : > { %v475_v36 = vld [vmem:[%s1223_s27 + $0x770] sm:$0xff]  ;;  %v377_v38 = vld [vmem:[%s1223_s27 + $0x460] sm:$0xff]  ;;  %503 = vst [vmem:[#allocation1 + $0x20] ss:$4 sm:$0xff] %v236_v37  ;;  %608 = vmatpush.msrb.mxu0 %v379_v33  ;;  %627 = vmatpush.msrb.mxu1 %v413_v34  ;;  %v358_v22 = vld [vmem:[%s1223_s27 + $0x3c8] sm:$0xff] }
  0x6b   : > { %v411_v39 = vld [vmem:[%s1223_s27 + $0x570] sm:$0xff]  ;;  %v473_v41 = vld [vmem:[%s1223_s27 + $0x760] sm:$0xff]  ;;  %649 = vmatpush.msrb.mxu2 %v441_v35  ;;  %668 = vmatpush.msrb.mxu3 %v475_v36  ;;  %v260_v25 = vld [vmem:[%s1223_s27 + $0xb8] sm:$0xff] }
  0x6c   : > { %v439_v40 = vld [vmem:[%s1223_s27 + $0x650] sm:$0xff]  ;;  %v409_v43 = vld [vmem:[%s1223_s27 + $0x560] sm:$0xff]  ;;  %609 = vmatpush.msrb.mxu0 %v377_v38  ;;  %628 = vmatpush.msrb.mxu1 %v411_v39  ;;  %v294_v26 = vld [vmem:[%s1223_s27 + $0x1c8] sm:$0xff] }
  0x6d   : > { %v375_v42 = vld [vmem:[%s1223_s27 + $0x450] sm:$0xff]  ;;  %v437_v44 = vld [vmem:[%s1223_s27 + $0x640] sm:$0xff]  ;;  %650 = vmatpush.msrb.mxu2 %v439_v40  ;;  %669 = vmatpush.msrb.mxu3 %v473_v41  ;;  %v322_v27 = vld [vmem:[%s1223_s27 + $0x2a8] sm:$0xff] }
  0x6e   : > { %v471_v45 = vld [vmem:[%s1223_s27 + $0x750] sm:$0xff]  ;;  %v373_v46 = vld [vmem:[%s1223_s27 + $0x440] sm:$0xff]  ;;  %610 = vmatpush.msrb.mxu0 %v375_v42  ;;  %629 = vmatpush.msrb.mxu1 %v409_v43  ;;  %v356_v28 = vld [vmem:[%s1223_s27 + $0x3b8] sm:$0xff] }
  0x6f   : > { %v407_v47 = vld [vmem:[%s1223_s27 + $0x550] sm:$0xff]  ;;  %v469_v49 = vld [vmem:[%s1223_s27 + $0x740] sm:$0xff]  ;;  %651 = vmatpush.msrb.mxu2 %v437_v44  ;;  %670 = vmatpush.msrb.mxu3 %v471_v45  ;;  %v258_v30 = vld [vmem:[%s1223_s27 + $0xa8] sm:$0xff] }
  0x70   : > { %v435_v48 = vld [vmem:[%s1223_s27 + $0x630] sm:$0xff]  ;;  %v405_v51 = vld [vmem:[%s1223_s27 + $0x540] sm:$0xff]  ;;  %611 = vmatpush.msrb.mxu0 %v373_v46  ;;  %630 = vmatpush.msrb.mxu1 %v407_v47  ;;  %v292_v31 = vld [vmem:[%s1223_s27 + $0x1b8] sm:$0xff] }
  0x71   : > { %v371_v50 = vld [vmem:[%s1223_s27 + $0x430] sm:$0xff]  ;;  %v433_v52 = vld [vmem:[%s1223_s27 + $0x620] sm:$0xff]  ;;  %652 = vmatpush.msrb.mxu2 %v435_v48  ;;  %671 = vmatpush.msrb.mxu3 %v469_v49  ;;  %v1393_v18 = vld.sshfl [vmem:[#allocation1 + $0x30] sm:$0xff pattern:$0x73625140] }
  0x72   : > { %v467_v53 = vld [vmem:[%s1223_s27 + $0x730] sm:$0xff]  ;;  %v369_v54 = vld [vmem:[%s1223_s27 + $0x420] sm:$0xff]  ;;  %612 = vmatpush.msrb.mxu0 %v371_v50  ;;  %631 = vmatpush.msrb.mxu1 %v405_v51  ;;  %v1399_v23 = vld.sshfl [vmem:[#allocation1 + $0x20] sm:$0xff pattern:$0x73625140] }
  0x73   : > { %v403_v55 = vld [vmem:[%s1223_s27 + $0x530] sm:$0xff]  ;;  %v465_v57 = vld [vmem:[%s1223_s27 + $0x720] sm:$0xff]  ;;  %653 = vmatpush.msrb.mxu2 %v433_v52  ;;  %672 = vmatpush.msrb.mxu3 %v467_v53  ;;  %v320_v32 = vld [vmem:[%s1223_s27 + $0x298] sm:$0xff] }
  0x74   : > { %v431_v56 = vld [vmem:[%s1223_s27 + $0x610] sm:$0xff]  ;;  %v401_v59 = vld [vmem:[%s1223_s27 + $0x520] sm:$0xff]  ;;  %613 = vmatpush.msrb.mxu0 %v369_v54  ;;  %632 = vmatpush.msrb.mxu1 %v403_v55  ;;  %v354_v33 = vld [vmem:[%s1223_s27 + $0x3a8] sm:$0xff] }
  0x75   : > { %v367_v58 = vld [vmem:[%s1223_s27 + $0x410] sm:$0xff]  ;;  %v429_v60 = vld [vmem:[%s1223_s27 + $0x600] sm:$0xff]  ;;  %654 = vmatpush.msrb.mxu2 %v431_v56  ;;  %673 = vmatpush.msrb.mxu3 %v465_v57  ;;  %v256_v34 = vld [vmem:[%s1223_s27 + $0x98] sm:$0xff] }
  0x76   : > { %v463_v61 = vld [vmem:[%s1223_s27 + $0x710] sm:$0xff]  ;;  %v365_v63 = vld [vmem:[%s1223_s27 + $0x400] sm:$0xff]  ;;  %614 = vmatpush.msrb.mxu0 %v367_v58  ;;  %633 = vmatpush.msrb.mxu1 %v401_v59  ;;  %v290_v35 = vld [vmem:[%s1223_s27 + $0x1a8] sm:$0xff] }
  0x77   : > { %v399_v1 = vld [vmem:[%s1223_s27 + $0x510] sm:$0xff]  ;;  %655 = vmatpush.msrb.mxu2 %v429_v60  ;;  %674 = vmatpush.msrb.mxu3 %v463_v61  ;;  %v461_v2 = vld [vmem:[%s1223_s27 + $0x700] sm:$0xff]  ;;  %v318_v36 = vld [vmem:[%s1223_s27 + $0x288] sm:$0xff] }
  0x78   : > { %576 = vmatmul.f32.vlgmr.msra.gmra.mxu2 %v1365_v62  ;;  %615 = vmatpush.msrb.mxu0 %v365_v63  ;;  %v1374_v4 = vld.sshfl [vmem:[#allocation1 + $0x18] sm:$0xff pattern:$0x73625140]  ;;  %v397_v8 = vld [vmem:[%s1223_s27 + $0x500] sm:$0xff]  ;;  %v352_v37 = vld [vmem:[%s1223_s27 + $0x398] sm:$0xff] }
  0x79   : > { %720 = vmatpush.msra.mxu2 %v332_v0  ;;  %634 = vmatpush.msrb.mxu1 %v399_v1  ;;  %v1383_v10 = vld.sshfl [vmem:[#allocation1 + $0x8] sm:$0xff pattern:$0x73625140]  ;;  %v1402_v24 = vld.sshfl [vmem:[#allocation1 + $0x38] sm:$0xff pattern:$0x73625140] }
  0x7a   : > { %675 = vmatpush.msrb.mxu3 %v461_v2  ;;  %536 = vmatmul.f32.vlgmr.msra.gmra.mxu0 %v1371_v3  ;;  %v1409_v29 = vld.sshfl [vmem:[#allocation1 + $0x28] sm:$0xff pattern:$0x73625140]  ;;  %v254_v38 = vld [vmem:[%s1223_s27 + $0x88] sm:$0xff]  ;;  %v288_v39 = vld [vmem:[%s1223_s27 + $0x198] sm:$0xff] }
  0x7b   : > { %596 = vmatmul.f32.vlgmr.msra.gmra.mxu3 %v1374_v4  ;;  %680 = vmatpush.msra.mxu0 %v268_v5  ;;  %v316_v40 = vld [vmem:[%s1223_s27 + $0x278] sm:$0xff]  ;;  %v350_v41 = vld [vmem:[%s1223_s27 + $0x388] sm:$0xff] }
  0x7c   : > { %721 = vmatpush.msra.mxu2 %v330_v6  ;;  %740 = vmatpush.msra.mxu3 %v364_v7  ;;  %v252_v42 = vld [vmem:[%s1223_s27 + $0x78] sm:$0xff]  ;;  %v286_v43 = vld [vmem:[%s1223_s27 + $0x188] sm:$0xff] }
  0x7d   : > { %635 = vmatpush.msrb.mxu1 %v397_v8  ;;  %681 = vmatpush.msra.mxu0 %v266_v9  ;;  %v314_v44 = vld [vmem:[%s1223_s27 + $0x268] sm:$0xff]  ;;  %v348_v45 = vld [vmem:[%s1223_s27 + $0x378] sm:$0xff] }
  0x7e   : > { %556 = vmatmul.f32.vlgmr.msra.gmra.mxu1 %v1383_v10  ;;  %722 = vmatpush.msra.mxu2 %v328_v11  ;;  %v250_v46 = vld [vmem:[%s1223_s27 + $0x68] sm:$0xff]  ;;  %v284_v47 = vld [vmem:[%s1223_s27 + $0x178] sm:$0xff] }
  0x7f   : > { %700 = vmatpush.msra.mxu1 %v300_v12  ;;  %741 = vmatpush.msra.mxu3 %v362_v13  ;;  %v312_v48 = vld [vmem:[%s1223_s27 + $0x258] sm:$0xff]  ;;  %v346_v49 = vld [vmem:[%s1223_s27 + $0x368] sm:$0xff] }
  0x80   : > { %682 = vmatpush.msra.mxu0 %v264_v14  ;;  %723 = vmatpush.msra.mxu2 %v326_v15  ;;  %v248_v50 = vld [vmem:[%s1223_s27 + $0x58] sm:$0xff]  ;;  %v282_v51 = vld [vmem:[%s1223_s27 + $0x168] sm:$0xff] }
  0x81   : > { %701 = vmatpush.msra.mxu1 %v298_v16  ;;  %742 = vmatpush.msra.mxu3 %v360_v17  ;;  %v310_v52 = vld [vmem:[%s1223_s27 + $0x248] sm:$0xff]  ;;  %v344_v53 = vld [vmem:[%s1223_s27 + $0x358] sm:$0xff] }
  0x82   : > { %656 = vmatmul.f32.vlgmr.msrb.gmra.mxu2 %v1393_v18  ;;  %683 = vmatpush.msra.mxu0 %v262_v19  ;;  %v246_v54 = vld [vmem:[%s1223_s27 + $0x48] sm:$0xff]  ;;  %v280_v55 = vld [vmem:[%s1223_s27 + $0x158] sm:$0xff] }
  0x83   : > { %702 = vmatpush.msra.mxu1 %v296_v20  ;;  %724 = vmatpush.msra.mxu2 %v324_v21  ;;  %v308_v56 = vld [vmem:[%s1223_s27 + $0x238] sm:$0xff]  ;;  %v342_v57 = vld [vmem:[%s1223_s27 + $0x348] sm:$0xff] }
  0x84   : > { %743 = vmatpush.msra.mxu3 %v358_v22  ;;  %616 = vmatmul.f32.vlgmr.msrb.gmra.mxu0 %v1399_v23  ;;  %v244_v58 = vld [vmem:[%s1223_s27 + $0x38] sm:$0xff]  ;;  %v278_v59 = vld [vmem:[%s1223_s27 + $0x148] sm:$0xff] }
  0x85   : > { %676 = vmatmul.f32.vlgmr.msrb.gmra.mxu3 %v1402_v24  ;;  %684 = vmatpush.msra.mxu0 %v260_v25  ;;  %v306_v60 = vld [vmem:[%s1223_s27 + $0x228] sm:$0xff]  ;;  %v340_v61 = vld [vmem:[%s1223_s27 + $0x338] sm:$0xff] }
  0x86   : > { %703 = vmatpush.msra.mxu1 %v294_v26  ;;  %725 = vmatpush.msra.mxu2 %v322_v27  ;;  %v242_v63 = vld [vmem:[%s1223_s27 + $0x28] sm:$0xff]  ;;  %v276_v0 = vld [vmem:[%s1223_s27 + $0x138] sm:$0xff] }
  0x87   : > { %744 = vmatpush.msra.mxu3 %v356_v28  ;;  %636 = vmatmul.f32.vlgmr.msrb.gmra.mxu1 %v1409_v29  ;;  %v304_v1 = vld [vmem:[%s1223_s27 + $0x218] sm:$0xff]  ;;  %v338_v2 = vld [vmem:[%s1223_s27 + $0x328] sm:$0xff] }
  0x88   : > { %685 = vmatpush.msra.mxu0 %v258_v30  ;;  %704 = vmatpush.msra.mxu1 %v292_v31  ;;  %v240_v5 = vld [vmem:[%s1223_s27 + $0x18] sm:$0xff]  ;;  %v274_v6 = vld [vmem:[%s1223_s27 + $0x128] sm:$0xff] }
  0x89   : > { %726 = vmatpush.msra.mxu2 %v320_v32  ;;  %745 = vmatpush.msra.mxu3 %v354_v33  ;;  %v302_v7 = vld [vmem:[%s1223_s27 + $0x208] sm:$0xff]  ;;  %v336_v8 = vld [vmem:[%s1223_s27 + $0x318] sm:$0xff] }
  0x8a   : > { %686 = vmatpush.msra.mxu0 %v256_v34  ;;  %705 = vmatpush.msra.mxu1 %v290_v35  ;;  %v460_v9 = vld [vmem:[%s1223_s27 + $0x6f8] sm:$0xff]  ;;  %v238_v11 = vld [vmem:[%s1223_s27 + $0x8] sm:$0xff] }
  0x8b   : > { %727 = vmatpush.msra.mxu2 %v318_v36  ;;  %746 = vmatpush.msra.mxu3 %v352_v37  ;;  %v272_v12 = vld [vmem:[%s1223_s27 + $0x118] sm:$0xff]  ;;  %v334_v13 = vld [vmem:[%s1223_s27 + $0x308] sm:$0xff] }
  0x8c   : > { %687 = vmatpush.msra.mxu0 %v254_v38  ;;  %706 = vmatpush.msra.mxu1 %v288_v39  ;;  %v396_v14 = vld [vmem:[%s1223_s27 + $0x4f8] sm:$0xff]  ;;  %v458_v15 = vld [vmem:[%s1223_s27 + $0x6e8] sm:$0xff] }
  0x8d   : > { %728 = vmatpush.msra.mxu2 %v316_v40  ;;  %747 = vmatpush.msra.mxu3 %v350_v41  ;;  %v492_v16 = vld [vmem:[%s1223_s27 + $0x7f8] sm:$0xff]  ;;  %v270_v17 = vld [vmem:[%s1223_s27 + $0x108] sm:$0xff] }
  0x8e   : > { %688 = vmatpush.msra.mxu0 %v252_v42  ;;  %707 = vmatpush.msra.mxu1 %v286_v43  ;;  %v394_v19 = vld [vmem:[%s1223_s27 + $0x4e8] sm:$0xff]  ;;  %v428_v20 = vld [vmem:[%s1223_s27 + $0x5f8] sm:$0xff] }
  0x8f   : > { %729 = vmatpush.msra.mxu2 %v314_v44  ;;  %748 = vmatpush.msra.mxu3 %v348_v45  ;;  %v456_v21 = vld [vmem:[%s1223_s27 + $0x6d8] sm:$0xff]  ;;  %v490_v22 = vld [vmem:[%s1223_s27 + $0x7e8] sm:$0xff] }
  0x90   : > { %689 = vmatpush.msra.mxu0 %v250_v46  ;;  %708 = vmatpush.msra.mxu1 %v284_v47  ;;  %v392_v25 = vld [vmem:[%s1223_s27 + $0x4d8] sm:$0xff]  ;;  %v426_v26 = vld [vmem:[%s1223_s27 + $0x5e8] sm:$0xff] }
  0x91   : > { %730 = vmatpush.msra.mxu2 %v312_v48  ;;  %749 = vmatpush.msra.mxu3 %v346_v49  ;;  %v454_v27 = vld [vmem:[%s1223_s27 + $0x6c8] sm:$0xff]  ;;  %v488_v28 = vld [vmem:[%s1223_s27 + $0x7d8] sm:$0xff] }
  0x92   : > { %690 = vmatpush.msra.mxu0 %v248_v50  ;;  %709 = vmatpush.msra.mxu1 %v282_v51  ;;  %v390_v30 = vld [vmem:[%s1223_s27 + $0x4c8] sm:$0xff]  ;;  %v424_v31 = vld [vmem:[%s1223_s27 + $0x5d8] sm:$0xff] }
  0x93   : > { %731 = vmatpush.msra.mxu2 %v310_v52  ;;  %750 = vmatpush.msra.mxu3 %v344_v53  ;;  %v452_v32 = vld [vmem:[%s1223_s27 + $0x6b8] sm:$0xff]  ;;  %v486_v33 = vld [vmem:[%s1223_s27 + $0x7c8] sm:$0xff] }
  0x94   : > { %691 = vmatpush.msra.mxu0 %v246_v54  ;;  %710 = vmatpush.msra.mxu1 %v280_v55  ;;  %v388_v34 = vld [vmem:[%s1223_s27 + $0x4b8] sm:$0xff]  ;;  %v422_v35 = vld [vmem:[%s1223_s27 + $0x5c8] sm:$0xff] }
  0x95   : > { %732 = vmatpush.msra.mxu2 %v308_v56  ;;  %751 = vmatpush.msra.mxu3 %v342_v57  ;;  %v450_v36 = vld [vmem:[%s1223_s27 + $0x6a8] sm:$0xff]  ;;  %v484_v37 = vld [vmem:[%s1223_s27 + $0x7b8] sm:$0xff] }
  0x96   : > { %692 = vmatpush.msra.mxu0 %v244_v58  ;;  %711 = vmatpush.msra.mxu1 %v278_v59  ;;  %v386_v38 = vld [vmem:[%s1223_s27 + $0x4a8] sm:$0xff]  ;;  %v420_v39 = vld [vmem:[%s1223_s27 + $0x5b8] sm:$0xff] }
  0x97   : > { %733 = vmatpush.msra.mxu2 %v306_v60  ;;  %752 = vmatpush.msra.mxu3 %v340_v61  ;;  %v448_v40 = vld [vmem:[%s1223_s27 + $0x698] sm:$0xff]  ;;  %v482_v41 = vld [vmem:[%s1223_s27 + $0x7a8] sm:$0xff] }
  0x98   : > { %693 = vmatpush.msra.mxu0 %v242_v63  ;;  %712 = vmatpush.msra.mxu1 %v276_v0  ;;  %v384_v42 = vld [vmem:[%s1223_s27 + $0x498] sm:$0xff]  ;;  %v418_v43 = vld [vmem:[%s1223_s27 + $0x5a8] sm:$0xff] }
  0x99   : > { %734 = vmatpush.msra.mxu2 %v304_v1  ;;  %753 = vmatpush.msra.mxu3 %v338_v2  ;;  %v446_v44 = vld [vmem:[%s1223_s27 + $0x688] sm:$0xff]  ;;  %v480_v45 = vld [vmem:[%s1223_s27 + $0x798] sm:$0xff] }
  0x9a   : > { %694 = vmatpush.msra.mxu0 %v240_v5  ;;  %713 = vmatpush.msra.mxu1 %v274_v6  ;;  %v382_v46 = vld [vmem:[%s1223_s27 + $0x488] sm:$0xff]  ;;  %v416_v47 = vld [vmem:[%s1223_s27 + $0x598] sm:$0xff] }
  0x9b   : > { %735 = vmatpush.msra.mxu2 %v302_v7  ;;  %754 = vmatpush.msra.mxu3 %v336_v8  ;;  %v444_v48 = vld [vmem:[%s1223_s27 + $0x678] sm:$0xff]  ;;  %v478_v49 = vld [vmem:[%s1223_s27 + $0x788] sm:$0xff] }
  0x9c   : > { %695 = vmatpush.msra.mxu0 %v238_v11  ;;  %714 = vmatpush.msra.mxu1 %v272_v12  ;;  %v380_v50 = vld [vmem:[%s1223_s27 + $0x478] sm:$0xff]  ;;  %v414_v51 = vld [vmem:[%s1223_s27 + $0x588] sm:$0xff] }
  0x9d   : > { %800 = vmatpush.msrb.mxu2 %v460_v9  ;;  %755 = vmatpush.msra.mxu3 %v334_v13  ;;  %v442_v52 = vld [vmem:[%s1223_s27 + $0x668] sm:$0xff]  ;;  %v476_v53 = vld [vmem:[%s1223_s27 + $0x778] sm:$0xff] }
  0x9e   : > { %760 = vmatpush.msrb.mxu0 %v396_v14  ;;  %715 = vmatpush.msra.mxu1 %v270_v17  ;;  %v378_v54 = vld [vmem:[%s1223_s27 + $0x468] sm:$0xff]  ;;  %v412_v55 = vld [vmem:[%s1223_s27 + $0x578] sm:$0xff] }
  0x9f   : > { %801 = vmatpush.msrb.mxu2 %v458_v15  ;;  %820 = vmatpush.msrb.mxu3 %v492_v16  ;;  %v440_v56 = vld [vmem:[%s1223_s27 + $0x658] sm:$0xff]  ;;  %v474_v57 = vld [vmem:[%s1223_s27 + $0x768] sm:$0xff] }
  0xa0   : > { %761 = vmatpush.msrb.mxu0 %v394_v19  ;;  %780 = vmatpush.msrb.mxu1 %v428_v20  ;;  %v376_v58 = vld [vmem:[%s1223_s27 + $0x458] sm:$0xff]  ;;  %v410_v59 = vld [vmem:[%s1223_s27 + $0x568] sm:$0xff]  ;;  %v493_v19 = vld [vmem:[%s1229_s5] sm:$0x3] }
  0xa1   : > { %802 = vmatpush.msrb.mxu2 %v456_v21  ;;  %821 = vmatpush.msrb.mxu3 %v490_v22  ;;  %v438_v60 = vld [vmem:[%s1223_s27 + $0x648] sm:$0xff]  ;;  %v472_v61 = vld [vmem:[%s1223_s27 + $0x758] sm:$0xff]  ;;  %v495_v21 = vperm.slane %v493_v19, 0 }
  0xa2   : > { %762 = vmatpush.msrb.mxu0 %v392_v25  ;;  %781 = vmatpush.msrb.mxu1 %v426_v26  ;;  %v374_v63 = vld [vmem:[%s1223_s27 + $0x448] sm:$0xff]  ;;  %v408_v0 = vld [vmem:[%s1223_s27 + $0x558] sm:$0xff] }
  0xa3   : > { %803 = vmatpush.msrb.mxu2 %v454_v27  ;;  %822 = vmatpush.msrb.mxu3 %v488_v28  ;;  %v436_v1 = vld [vmem:[%s1223_s27 + $0x638] sm:$0xff]  ;;  %v470_v2 = vld [vmem:[%s1223_s27 + $0x748] sm:$0xff] }
  0xa4   : > { %763 = vmatpush.msrb.mxu0 %v390_v30  ;;  %782 = vmatpush.msrb.mxu1 %v424_v31  ;;  %v372_v5 = vld [vmem:[%s1223_s27 + $0x438] sm:$0xff]  ;;  %v406_v6 = vld [vmem:[%s1223_s27 + $0x548] sm:$0xff] }
  0xa5   : > { %804 = vmatpush.msrb.mxu2 %v452_v32  ;;  %823 = vmatpush.msrb.mxu3 %v486_v33  ;;  %v434_v7 = vld [vmem:[%s1223_s27 + $0x628] sm:$0xff]  ;;  %v468_v8 = vld [vmem:[%s1223_s27 + $0x738] sm:$0xff]  ;;  %v496_v33 = vperm.slane %v493_v19, 1 }
  0xa6   : > { %764 = vmatpush.msrb.mxu0 %v388_v34  ;;  %783 = vmatpush.msrb.mxu1 %v422_v35  ;;  %v404_v9 = vld [vmem:[%s1223_s27 + $0x538] sm:$0xff]  ;;  %v466_v12 = vld [vmem:[%s1223_s27 + $0x728] sm:$0xff] }
  0xa7   : > { %805 = vmatpush.msrb.mxu2 %v450_v36  ;;  %824 = vmatpush.msrb.mxu3 %v484_v37  ;;  %v432_v11 = vld [vmem:[%s1223_s27 + $0x618] sm:$0xff]  ;;  %v430_v14 = vld [vmem:[%s1223_s27 + $0x608] sm:$0xff] }
  0xa8   : > { %765 = vmatpush.msrb.mxu0 %v386_v38  ;;  %784 = vmatpush.msrb.mxu1 %v420_v39  ;;  %v368_v13 = vld [vmem:[%s1223_s27 + $0x418] sm:$0xff]  ;;  %v366_v15 = vld [vmem:[%s1223_s27 + $0x408] sm:$0xff] }
  0xa9   : > { %806 = vmatpush.msrb.mxu2 %v448_v40  ;;  %825 = vmatpush.msrb.mxu3 %v482_v41  ;;  %v400_v16 = vld [vmem:[%s1223_s27 + $0x518] sm:$0xff]  ;;  %v462_v17 = vld [vmem:[%s1223_s27 + $0x708] sm:$0xff] }
  0xaa   : > { %766 = vmatpush.msrb.mxu0 %v384_v42  ;;  %785 = vmatpush.msrb.mxu1 %v418_v43 }
  0xab   : > { %807 = vmatpush.msrb.mxu2 %v446_v44  ;;  %826 = vmatpush.msrb.mxu3 %v480_v45 }
  0xac   : > { %767 = vmatpush.msrb.mxu0 %v382_v46  ;;  %786 = vmatpush.msrb.mxu1 %v416_v47 }
  0xad   : > { %808 = vmatpush.msrb.mxu2 %v444_v48  ;;  %827 = vmatpush.msrb.mxu3 %v478_v49 }
  0xae   : > { %768 = vmatpush.msrb.mxu0 %v380_v50  ;;  %787 = vmatpush.msrb.mxu1 %v414_v51 }
  0xaf   : > { %809 = vmatpush.msrb.mxu2 %v442_v52  ;;  %828 = vmatpush.msrb.mxu3 %v476_v53 }
  0xb0   : > { %769 = vmatpush.msrb.mxu0 %v378_v54  ;;  %788 = vmatpush.msrb.mxu1 %v412_v55 }
  0xb1   : > { %810 = vmatpush.msrb.mxu2 %v440_v56  ;;  %829 = vmatpush.msrb.mxu3 %v474_v57 }
  0xb2   : > { %770 = vmatpush.msrb.mxu0 %v376_v58  ;;  %789 = vmatpush.msrb.mxu1 %v410_v59 }
  0xb3   : > { %811 = vmatpush.msrb.mxu2 %v438_v60  ;;  %830 = vmatpush.msrb.mxu3 %v472_v61 }
  0xb4   : > { %736 = vmatmul.f32.vlgmr.msra.gmra.mxu2 %v1365_v62  ;;  %771 = vmatpush.msrb.mxu0 %v374_v63  ;;  %v370_v62 = vld [vmem:[%s1223_s27 + $0x428] sm:$0xff] }
  0xb5   : > { %790 = vmatpush.msrb.mxu1 %v408_v0  ;;  %812 = vmatpush.msrb.mxu2 %v436_v1 }
  0xb6   : > { %831 = vmatpush.msrb.mxu3 %v470_v2  ;;  %696 = vmatmul.f32.vlgmr.msra.gmra.mxu0 %v1371_v3  ;;  %v402_v3 = vld [vmem:[%s1223_s27 + $0x528] sm:$0xff] }
  0xb7   : > { %756 = vmatmul.f32.vlgmr.msra.gmra.mxu3 %v1374_v4  ;;  %772 = vmatpush.msrb.mxu0 %v372_v5  ;;  %v464_v4 = vld [vmem:[%s1223_s27 + $0x718] sm:$0xff] }
  0xb8   : > { %791 = vmatpush.msrb.mxu1 %v406_v6  ;;  %813 = vmatpush.msrb.mxu2 %v434_v7 }
  0xb9   : > { %832 = vmatpush.msrb.mxu3 %v468_v8  ;;  %716 = vmatmul.f32.vlgmr.msra.gmra.mxu1 %v1383_v10  ;;  %v398_v10 = vld [vmem:[%s1223_s27 + $0x508] sm:$0xff] }
  0xba   : > { %773 = vmatpush.msrb.mxu0 %v370_v62  ;;  %792 = vmatpush.msrb.mxu1 %v404_v9 }
  0xbb   : > { %814 = vmatpush.msrb.mxu2 %v432_v11  ;;  %833 = vmatpush.msrb.mxu3 %v466_v12 }
  0xbc   : > { %774 = vmatpush.msrb.mxu0 %v368_v13  ;;  %793 = vmatpush.msrb.mxu1 %v402_v3 }
  0xbd   : > { %815 = vmatpush.msrb.mxu2 %v430_v14  ;;  %834 = vmatpush.msrb.mxu3 %v464_v4 }
  0xbe   : > { %816 = vmatmul.f32.vlgmr.msrb.gmra.mxu2 %v1393_v18  ;;  %775 = vmatpush.msrb.mxu0 %v366_v15 }
  0xbf   : > { %794 = vmatpush.msrb.mxu1 %v400_v16  ;;  %835 = vmatpush.msrb.mxu3 %v462_v17 }
  0xc0   : > { %776 = vmatmul.f32.vlgmr.msrb.gmra.mxu0 %v1399_v23  ;;  %836 = vmatmul.f32.vlgmr.msrb.gmra.mxu3 %v1402_v24 }
  0xc1   : > { %795 = vmatpush.msrb.mxu1 %v398_v10 }
  0xc2   : > { %796 = vmatmul.f32.vlgmr.msrb.gmra.mxu1 %v1409_v29 }
  0xf7   : > { %v537_v20 = vpop.f32.mrf.mxu0 }
  0xf8   : > { %v538_v26 = vadd.f32 %v537_v20, %v495_v21 }
  0xfb   : > { %v557_v22 = vpop.f32.mrf.mxu1  ;;  %v577_v25 = vpop.f32.mrf.mxu2 }
  0xfc   : > { %v558_v18 = vadd.f32 %v557_v22, %v538_v26 }
  0xfe   : > { %v597_v27 = vpop.f32.mrf.mxu3  ;;  %v578_v32 = vadd.f32 %v577_v25, %v558_v18 }
 0x100   : > { %v598_v24 = vadd.f32 %v597_v27, %v578_v32 }
 0x101   : > { %v617_v28 = vpop.f32.mrf.mxu0 }
 0x102   : > { %v618_v38 = vadd.f32 %v617_v28, %v598_v24 }
 0x104   : > { %v637_v30 = vpop.f32.mrf.mxu1 }
 0x105   : > { %v657_v31 = vpop.f32.mrf.mxu2  ;;  %v638_v42 = vadd.f32 %v637_v30, %v618_v38 }
 0x107   : > { %v658_v46 = vadd.f32 %v657_v31, %v638_v42 }
 0x108   : > { %v677_v23 = vpop.f32.mrf.mxu3 }
 0x109   : > { %v678_v51 = vadd.f32 %v677_v23, %v658_v46 }
 0x10b   : > { %v840_v54 = vmax.f32 %v678_v51, 0.0 }
 0x133   : > { %v697_v34 = vpop.f32.mrf.mxu0 }
 0x134   : > { %v698_v35 = vadd.f32 %v697_v34, %v496_v33 }
 0x136   : > { %v717_v36 = vpop.f32.mrf.mxu1 }
 0x137   : > { %v718_v29 = vadd.f32 %v717_v36, %v698_v35  ;;  %v737_v37 = vpop.f32.mrf.mxu2 }
 0x139   : > { %v738_v39 = vadd.f32 %v737_v37, %v718_v29 }
 0x13a   : > { %v757_v40 = vpop.f32.mrf.mxu3 }
 0x13b   : > { %v758_v41 = vadd.f32 %v757_v40, %v738_v39 }
 0x13d   : > { %v777_v43 = vpop.f32.mrf.mxu0 }
 0x13e   : > { %v778_v44 = vadd.f32 %v777_v43, %v758_v41 }
 0x13f   : > { %v797_v45 = vpop.f32.mrf.mxu1 }
 0x140   : > { %v798_v47 = vadd.f32 %v797_v45, %v778_v44 }
 0x141   : > { %v817_v48 = vpop.f32.mrf.mxu2 }
 0x142   : > { %v818_v49 = vadd.f32 %v817_v48, %v798_v47 }
 0x143   : > { %v837_v50 = vpop.f32.mrf.mxu3 }
 0x144   : > { %v838_v52 = vadd.f32 %v837_v50, %v818_v49 }
 0x146   : > { %v841_v53 = vmax.f32 %v838_v52, 0.0 }
 0x148   : > { %v844_v55 = vrot.slane %v841_v53, 6 }
 0x14a   : > { %v846_v56 = vsel %vm845_vm0, %v840_v54, %v844_v55 }
 0x14b   : > { %848 = vst [vmem:[%s233_s11] sm:$0xf] %v846_v56 }
 0x14c PF: > { %p16_p8 = scmp.ge.s32.totalorder %s1146_s17, 4   ;;  %s1556_s12 = smov %s1093_s13 }
 0x14d   : > { %s1557_s13 = smov %s1097_s14  ;;  %s1558_s14 = smov %s1156_s20 }
 0x14e   : > { %s1559_s15 = smov %s1146_s17  ;;  %18 = sbr.rel (!%p16_p8) target bundleno = 5 (0x5), region = 86 }
 0x153   :  { %871 = vsyncpa [#allocation3], 1 }
 0x154   :  { %873 = vsyncpa [#allocation3 + $0x1], 1 }
 0x155   :  { %874 = vsyncpa [#allocation5], 1 }
 0x156   :  { %876 = vsyncpa [#allocation5 + $0x1], 1 }

// kernel: classifier_forward.7
= control target key start
LH: loop header
LB: loop body
LE: loop exit
PB: predicated region body
PF: predicated region fallthrough
CT: control target
= control target key end

     0   :  { %10 = vsyncpa [#allocation3], 0  ;;  %s1513_s18 = smov 0   ;;  %s2111_s0 = inlined_call_operand.vmem [shape: f32[2,16,8,64], index: 0, kind: input, shape index: {}]   ;;  %s2112_s1 = inlined_call_operand.vmem [shape: f32[2,16,8,64], index: 1, kind: input, shape index: {}]   ;;  %s2113_s2 = inlined_call_operand.hbm [shape: f32[9,64,128], index: 2, kind: input, shape index: {}]   ;;  %s2114_s3 = inlined_call_operand.vmem [shape: f32[1,128], index: 3, kind: input, shape index: {}]   ;;  %s2115_s4 = inlined_call_operand.vmem [shape: f32[1,128], index: 4, kind: input, shape index: {}]   ;;  %s2116_s5 = inlined_call_operand.vmem [shape: f32[2,7,7,128], index: 5, kind: output, shape index: {}]  }
   0x1 LB: > { %s173_s21 = sshll.u32 %s2113_s2, 4  ;;  %s1314_s22 = sadd.s32 4294967295, %s1474_s18   ;;  %s1474_s18 = sphi %s1513_s18, %s16_s18   ;;  %s174_s21 = int_to_ptr.hbm [resolvable:$true] %s173_s21 }
   0x2   : > { %p1316_p0 = scmp.ge.s32.totalorder %s1474_s18, 1  ;;  %p162_p1 = scmp.lt.s32.totalorder %s1474_s18, 3 }
   0x3   : > { %p1409_p2 = scmp.eq.s32.totalorder %s1314_s22, 0  ;;  %s1480_s23 = smov [#allocation2]  }
   0x4   : > { %p163_p3 = pnand %p1316_p0, %p162_p1  ;;  %s175_s24 = sshll.u32 %s1480_s23, 4  ;;  %s176_s24 = int_to_ptr.vmem [resolvable:$true] %s175_s24 }
   0x5   : > { %s1481_s25 = smov 128   ;;  %s1482_s26 = smov 8  }
   0x6   : > { %p1405_p4 = pneg %p163_p3  ;;  %213 = sbr.rel (%p163_p3) target bundleno = 324 (0x144), region = 40 }
   0x8   : > { %p1406_p5 = pnand %p1409_p2, %p1405_p4 }
   0xa   : > { %1408 = dma.hbm_to_vmem [thread:$0]  (!%p1406_p5), %s174_s21, 9216, %s176_s24, [#allocation3], %s1481_s25, %s1481_s25, %s1482_s26  }
   0xb   : > { %1469 = dma.done.wait (%p1409_p2), [#allocation3], 9216  }
   0xc   : > { %1471 = vsyncadd (%p1409_p2), [#allocation3], 4294958080  ;;  %p247_p6 = scmp.lt.s32.totalorder %s1314_s22, 1  ;;  %v1542_v0 = vld [vmem:[%s2114_s3] sm:$0x1]  ;;  %s1549_s17 = smov 0  }
   0xd   : > { %2168 = vst [vmem:[#allocation5_spill] sm:$0xff] %v1542_v0  ;;  %v1547_v1 = vld [vmem:[%s2115_s4] sm:$0x1] }
   0xe   : > { %s2239_s22 = smov (!%p247_p6, %s1314_s22), 1  ;;  %2169 = vst [vmem:[#allocation6_spill] sm:$0xff] %v1547_v1 }
   0xf   : > { %s1391_s27 = sshll.u32 %s2239_s22, 7  ;;  %s1400_s28 = smul.u32 56, %s2239_s22 }
  0x10   : > { %s1527_s6 = scalar_lea.vmem %s2111_s0, %s1391_s27  ;;  %s1532_s9 = scalar_lea.vmem %s2112_s1, %s1391_s27 }
  0x11   : > { %s1537_s12 = scalar_lea.vmem %s2116_s5, %s1400_s28 }
  0x12 LB: >> { %v1554_v2 = vld [vmem:[#allocation2 + $0x78] sm:$0xff]  ;;  %v1558_v4 = vld [vmem:[#allocation2 + $0x70] sm:$0xff]  ;;  %v1570_v8 = vld [vmem:[#allocation2 + $0x68] sm:$0xff]  ;;  %s1393_s19 = sshll.u32 %s1478_s17, 4  ;;  %vm293_vm0 = vcmask 523264   ;;  %s1388_s22 = sshll.u32 %s1478_s17, 3  ;;  %s1478_s17 = sphi %s1549_s17, %s269_s17  }
  0x13   : >> { %v1556_v3 = vld [vmem:[#allocation2 + $0xb8] sm:$0xff]  ;;  %305 = vmatpush.msra.mxu0 %v1554_v2  ;;  %v1564_v6 = vld [vmem:[#allocation2 + $0xb0] sm:$0xff]  ;;  %v1574_v10 = vld [vmem:[#allocation2 + $0xa8] sm:$0xff]  ;;  %s1712_s20 = scalar_lea.vmem %s1527_s6, %s1393_s19  ;;  %s1727_s21 = scalar_lea.vmem %s1532_s9, %s1393_s19 }
  0x14   : >> { %2170 = vst [vmem:[#allocation7_spill] sm:$0xff] %v1556_v3  ;;  %361 = vmatpush.msra.mxu2 %v1556_v3  ;;  %v1562_v5 = vld [vmem:[#allocation2 + $0x38] sm:$0xff]  ;;  %v1572_v9 = vld [vmem:[#allocation2 + $0x30] sm:$0xff]  ;;  %v1580_v12 = vld [vmem:[#allocation2 + $0x28] sm:$0xff]  ;;  %s1198_s23 = scalar_lea.vmem %s1537_s12, %s1388_s22  ;;  %s269_s17 = sadd.s32 1, %s1478_s17  }
  0x15   : >> { %2171 = vst [vmem:[#allocation8_spill] sm:$0xff] %v1562_v5  ;;  %v1566_v7 = vld [vmem:[#allocation2 + $0xf8] sm:$0xff]  ;;  %328 = vmatpush.msra.mxu1 %v1562_v5  ;;  %306 = vmatpush.msra.mxu0 %v1558_v4  ;;  %v1578_v11 = vld [vmem:[#allocation2 + $0xf0] sm:$0xff]  ;;  %v1584_v13 = vld [vmem:[#allocation2 + $0x60] sm:$0xff]  ;;  %p266_p7 = scmp.ge.s32.totalorder %s269_s17, 7  }
  0x16   : >> { %2172 = vst [vmem:[#allocation9_spill] sm:$0xff] %v1564_v6  ;;  %398 = vmatpush.msra.mxu3 %v1566_v7  ;;  %362 = vmatpush.msra.mxu2 %v1564_v6  ;;  %v1586_v14 = vld [vmem:[#allocation2 + $0xa0] sm:$0xff]  ;;  %v1588_v15 = vld [vmem:[#allocation2 + $0xe8] sm:$0xff]  ;;  %v1598_v18 = vld [vmem:[#allocation2 + $0x58] sm:$0xff] }
  0x17   : >> { %2173 = vst [vmem:[#allocation10_spill] sm:$0xff] %v1572_v9  ;;  %329 = vmatpush.msra.mxu1 %v1572_v9  ;;  %307 = vmatpush.msra.mxu0 %v1570_v8  ;;  %v1592_v16 = vld [vmem:[#allocation2 + $0x20] sm:$0xff]  ;;  %v1600_v19 = vld [vmem:[#allocation2 + $0x98] sm:$0xff]  ;;  %v1610_v22 = vld [vmem:[#allocation2 + $0x50] sm:$0xff] }
  0x18   : >> { %2174 = vst [vmem:[#allocation11_spill] sm:$0xff] %v1574_v10  ;;  %399 = vmatpush.msra.mxu3 %v1578_v11  ;;  %363 = vmatpush.msra.mxu2 %v1574_v10  ;;  %v1594_v17 = vld [vmem:[#allocation2 + $0xe0] sm:$0xff]  ;;  %v1604_v20 = vld [vmem:[#allocation2 + $0x18] sm:$0xff]  ;;  %v1612_v23 = vld [vmem:[#allocation2 + $0x90] sm:$0xff] }
  0x19   : >> { %2175 = vst [vmem:[#allocation12_spill] sm:$0xff] %v1580_v12  ;;  %330 = vmatpush.msra.mxu1 %v1580_v12  ;;  %308 = vmatpush.msra.mxu0 %v1584_v13  ;;  %v1606_v21 = vld [vmem:[#allocation2 + $0xd8] sm:$0xff]  ;;  %v1616_v24 = vld [vmem:[#allocation2 + $0x10] sm:$0xff]  ;;  %v1622_v26 = vld [vmem:[#allocation2 + $0x48] sm:$0xff] }
  0x1a   : >> { %2176 = vst [vmem:[#allocation13_spill] sm:$0xff] %v1586_v14  ;;  %400 = vmatpush.msra.mxu3 %v1588_v15  ;;  %364 = vmatpush.msra.mxu2 %v1586_v14  ;;  %v1618_v25 = vld [vmem:[#allocation2 + $0xd0] sm:$0xff]  ;;  %v1624_v27 = vld [vmem:[#allocation2 + $0x88] sm:$0xff]  ;;  %v1634_v30 = vld [vmem:[#allocation2 + $0x40] sm:$0xff] }
  0x1b   : >> { %2177 = vst [vmem:[#allocation14_spill] sm:$0xff] %v1592_v16  ;;  %331 = vmatpush.msra.mxu1 %v1592_v16  ;;  %309 = vmatpush.msra.mxu0 %v1598_v18  ;;  %v1628_v28 = vld [vmem:[#allocation2 + $0x8] sm:$0xff]  ;;  %v1636_v31 = vld [vmem:[#allocation2 + $0x80] sm:$0xff]  ;;  %v1640_v32 = vld [vmem:[#allocation2 + $0x138] sm:$0xff] }
  0x1c   : >> { %2178 = vst [vmem:[#allocation15_spill] sm:$0xff] %v1604_v20  ;;  %401 = vmatpush.msra.mxu3 %v1594_v17  ;;  %365 = vmatpush.msra.mxu2 %v1600_v19  ;;  %v1630_v29 = vld [vmem:[#allocation2 + $0xc8] sm:$0xff]  ;;  %v1642_v33 = vld [vmem:[#allocation2 + $0x1b8] sm:$0xff]  ;;  %v1646_v34 = vld [vmem:[#allocation2] sm:$0xff] }
  0x1d   : >> { %2179 = vst [vmem:[#allocation16_spill] sm:$0xff] %v1616_v24  ;;  %332 = vmatpush.msra.mxu1 %v1604_v20  ;;  %310 = vmatpush.msra.mxu0 %v1610_v22  ;;  %v1648_v35 = vld [vmem:[#allocation2 + $0xc0] sm:$0xff]  ;;  %v1652_v36 = vld [vmem:[#allocation2 + $0x130] sm:$0xff]  ;;  %v1654_v37 = vld [vmem:[#allocation2 + $0x178] sm:$0xff] }
  0x1e   : >> { %402 = vmatpush.msra.mxu3 %v1606_v21  ;;  %366 = vmatpush.msra.mxu2 %v1612_v23  ;;  %2180 = vst [vmem:[#allocation17_spill] sm:$0xff] %v1628_v28  ;;  %v1658_v38 = vld [vmem:[#allocation2 + $0x1b0] sm:$0xff]  ;;  %v1660_v39 = vld [vmem:[#allocation2 + $0x1f8] sm:$0xff]  ;;  %v1664_v40 = vld [vmem:[#allocation2 + $0x128] sm:$0xff] }
  0x1f   : >> { %333 = vmatpush.msra.mxu1 %v1616_v24  ;;  %311 = vmatpush.msra.mxu0 %v1622_v26  ;;  %2181 = vst [vmem:[#allocation18_spill] sm:$0xff] %v1646_v34  ;;  %v1666_v41 = vld [vmem:[#allocation2 + $0x170] sm:$0xff]  ;;  %v1670_v42 = vld [vmem:[#allocation2 + $0x1a8] sm:$0xff]  ;;  %v1676_v44 = vld [vmem:[#allocation2 + $0x120] sm:$0xff] }
  0x20   : >> { %403 = vmatpush.msra.mxu3 %v1618_v25  ;;  %367 = vmatpush.msra.mxu2 %v1624_v27  ;;  %2182 = vst [vmem:[#allocation19_spill] sm:$0xff] %v1670_v42  ;;  %v1672_v43 = vld [vmem:[#allocation2 + $0x1f0] sm:$0xff]  ;;  %v1678_v45 = vld [vmem:[#allocation2 + $0x168] sm:$0xff]  ;;  %v1682_v46 = vld [vmem:[#allocation2 + $0x1a0] sm:$0xff] }
  0x21   : >> { %334 = vmatpush.msra.mxu1 %v1628_v28  ;;  %312 = vmatpush.msra.mxu0 %v1634_v30  ;;  %2183 = vst [vmem:[#allocation20_spill] sm:$0xff] %v1672_v43  ;;  %v1684_v47 = vld [vmem:[#allocation2 + $0x1e8] sm:$0xff]  ;;  %v1688_v48 = vld [vmem:[#allocation2 + $0x118] sm:$0xff]  ;;  %v1690_v49 = vld [vmem:[#allocation2 + $0x160] sm:$0xff] }
  0x22   : >> { %404 = vmatpush.msra.mxu3 %v1630_v29  ;;  %368 = vmatpush.msra.mxu2 %v1636_v31  ;;  %2184 = vst [vmem:[#allocation21_spill] sm:$0xff] %v1684_v47  ;;  %v1695_v50 = vld [vmem:[#allocation2 + $0x198] sm:$0xff]  ;;  %v1697_v51 = vld [vmem:[#allocation2 + $0x1e0] sm:$0xff]  ;;  %v1701_v52 = vld [vmem:[#allocation2 + $0x110] sm:$0xff] }
  0x23   : >> { %433 = vmatpush.msrb.mxu0 %v1640_v32  ;;  %335 = vmatpush.msra.mxu1 %v1646_v34  ;;  %2185 = vst [vmem:[#allocation22_spill] sm:$0xff] %v1695_v50  ;;  %v1703_v53 = vld [vmem:[#allocation2 + $0x158] sm:$0xff]  ;;  %v1707_v54 = vld [vmem:[#allocation2 + $0x190] sm:$0xff]  ;;  %v1716_v56 = vld [vmem:[#allocation2 + $0x108] sm:$0xff] }
  0x24   : >> { %504 = vmatpush.msrb.mxu2 %v1642_v33  ;;  %405 = vmatpush.msra.mxu3 %v1648_v35  ;;  %2186 = vst [vmem:[#allocation23_spill] sm:$0xff] %v1697_v51  ;;  %v1709_v55 = vld [vmem:[#allocation2 + $0x1d8] sm:$0xff]  ;;  %v1718_v57 = vld [vmem:[#allocation2 + $0x150] sm:$0xff]  ;;  %v1722_v58 = vld [vmem:[#allocation2 + $0x188] sm:$0xff] }
  0x25   : >> { %434 = vmatpush.msrb.mxu0 %v1652_v36  ;;  %467 = vmatpush.msrb.mxu1 %v1654_v37  ;;  %2187 = vst [vmem:[#allocation24_spill] sm:$0xff] %v1707_v54  ;;  %v1724_v59 = vld [vmem:[#allocation2 + $0x1d0] sm:$0xff]  ;;  %v1732_v60 = vld [vmem:[%s1712_s20 + $0x1] sm:$0x7f]  ;;  %v1738_v62 = vld [vmem:[#allocation2 + $0x148] sm:$0xff] }
  0x26   : >> { %505 = vmatpush.msrb.mxu2 %v1658_v38  ;;  %539 = vmatpush.msrb.mxu3 %v1660_v39  ;;  %2188 = vst [vmem:[#allocation25_spill] sm:$0xff] %v1709_v55  ;;  %v1734_v61 = vld [vmem:[#allocation2 + $0x100] sm:$0xff]  ;;  %v1744_v1 = vld [vmem:[#allocation2 + $0x1c8] sm:$0xff] }
  0x27   : >> { %435 = vmatpush.msrb.mxu0 %v1664_v40  ;;  %468 = vmatpush.msrb.mxu1 %v1666_v41  ;;  %2189 = vst [vmem:[#allocation26_spill] sm:$0xff] %v1722_v58  ;;  %v1740_v63 = vld [vmem:[#allocation2 + $0x180] sm:$0xff] }
  0x28   : >> { %506 = vmatpush.msrb.mxu2 %v1670_v42  ;;  %540 = vmatpush.msrb.mxu3 %v1672_v43  ;;  %2190 = vst [vmem:[#allocation27_spill] sm:$0xff] %v1724_v59  ;;  %v1747_v0 = vld [vmem:[%s1727_s21] sm:$0x7f] }
  0x29   : >> { %436 = vmatpush.msrb.mxu0 %v1676_v44  ;;  %469 = vmatpush.msrb.mxu1 %v1678_v45  ;;  %2191 = vst [vmem:[#allocation28_spill] sm:$0xff] %v1734_v61  ;;  %v273_v43 = vld [vmem:[%s1712_s20] sm:$0x7f] }
  0x2a   : >> { %507 = vmatpush.msrb.mxu2 %v1682_v46  ;;  %541 = vmatpush.msrb.mxu3 %v1684_v47  ;;  %2192 = vst [vmem:[#allocation29_spill] sm:$0xff] %v1738_v62  ;;  %v1759_v47 = vld [vmem:[#allocation2 + $0x140] sm:$0xff] }
  0x2b   : >> { %437 = vmatpush.msrb.mxu0 %v1688_v48  ;;  %470 = vmatpush.msrb.mxu1 %v1690_v49  ;;  %2193 = vst [vmem:[#allocation30_spill] sm:$0xff] %v1740_v63 }
  0x2c   : >> { %508 = vmatpush.msrb.mxu2 %v1695_v50  ;;  %542 = vmatpush.msrb.mxu3 %v1697_v51  ;;  %2194 = vst [vmem:[#allocation31_spill] sm:$0xff] %v1744_v1  ;;  %v1755_v51 = vld [vmem:[#allocation2 + $0x238] sm:$0xff] }
  0x2d   : >> { %438 = vmatpush.msrb.mxu0 %v1701_v52  ;;  %471 = vmatpush.msrb.mxu1 %v1703_v53  ;;  %2196 = vst [vmem:[#allocation33_spill] sm:$0xff] %v1759_v47 }
  0x2e   : >> { %509 = vmatpush.msrb.mxu2 %v1707_v54  ;;  %543 = vmatpush.msrb.mxu3 %v1709_v55  ;;  %v1753_v55 = vld [vmem:[%s1712_s20 + $0x8] sm:$0x7f] }
  0x2f   : >> { %439 = vmatpush.msrb.mxu0 %v1716_v56  ;;  %472 = vmatpush.msrb.mxu1 %v1718_v57  ;;  %2195 = vst [vmem:[#allocation32_spill] sm:$0xff] %v1753_v55 }
  0x30   : >> { %510 = vmatpush.msrb.mxu2 %v1722_v58  ;;  %544 = vmatpush.msrb.mxu3 %v1724_v59  ;;  %v1764_v59 = vld [vmem:[#allocation2 + $0x1c0] sm:$0xff] }
  0x31   : >> { %1330 = vmatmul.msk.f32.vlgmr.msra.gmra.mxu2 %vm293_vm0, %v1732_v60  ;;  %440 = vmatpush.msrb.mxu0 %v1734_v61  ;;  %2197 = vst [vmem:[#allocation34_spill] sm:$0xff] %v1764_v59  ;;  %v1770_v61 = vld [vmem:[#allocation2 + $0x230] sm:$0xff] }
  0x32   : >> { %473 = vmatpush.msrb.mxu1 %v1738_v62  ;;  %511 = vmatpush.msrb.mxu2 %v1740_v63 }
  0x33   : >> { %545 = vmatpush.msrb.mxu3 %v1744_v1  ;;  %1328 = vmatmul.msk.f32.vlgmr.msra.gmra.mxu0 %vm293_vm0, %v1747_v0  ;;  %v1776_v1 = vld [vmem:[#allocation2 + $0x228] sm:$0xff] }
  0x34   : >> { %1334 = vmatmul.msk.f32.vlgmr.msra.gmra.mxu3 %vm293_vm0, %v1753_v55  ;;  %573 = vmatpush.msra.mxu0 %v1755_v51  ;;  %v1783_v55 = vld [vmem:[%s1712_s20 + $0x10] sm:$0x7f] }
  0x35   : >> { %622 = vmatpush.msra.mxu2 %v1562_v5  ;;  %474 = vmatpush.msrb.mxu1 %v1759_v47  ;;  %2198 = vst [vmem:[#allocation35_spill] sm:$0xff] %v1783_v55  ;;  %v1785_v5 = vld [vmem:[#allocation2 + $0x220] sm:$0xff] }
  0x36   : >> { %546 = vmatpush.msrb.mxu3 %v1764_v59  ;;  %1329 = vmatmul.msk.f32.vlgmr.msra.gmra.mxu1 %vm293_vm0, %v273_v43  ;;  %v1792_v43 = vld [vmem:[%s1727_s21 + $0x8] sm:$0x7f]  ;;  %v1800_v59 = vld [vmem:[#allocation2 + $0x218] sm:$0xff] }
  0x37   : >> { %574 = vmatpush.msra.mxu0 %v1770_v61  ;;  %602 = vmatpush.msra.mxu1 %v1554_v2  ;;  %2199 = vst [vmem:[#allocation36_spill] sm:$0xff] %v1800_v59 }
  0x38   : >> { %623 = vmatpush.msra.mxu2 %v1572_v9  ;;  %646 = vmatpush.msra.mxu3 %v1556_v3  ;;  %v1798_v3 = vld [vmem:[%s1727_s21 + $0x10] sm:$0x7f] }
  0x39   : >> { %575 = vmatpush.msra.mxu0 %v1776_v1  ;;  %603 = vmatpush.msra.mxu1 %v1558_v4 }
  0x3a   : >> { %624 = vmatpush.msra.mxu2 %v1580_v12  ;;  %647 = vmatpush.msra.mxu3 %v1564_v6  ;;  %v1808_v6 = vld [vmem:[%s1712_s20 + $0x9] sm:$0x7f] }
  0x3b   : >> { %1344 = vmatmul.msk.f32.vlgmr.msrb.gmra.mxu2 %vm293_vm0, %v1783_v55  ;;  %576 = vmatpush.msra.mxu0 %v1785_v5  ;;  %v1813_v55 = vld [vmem:[#allocation2 + $0x210] sm:$0xff] }
  0x3c   : >> { %604 = vmatpush.msra.mxu1 %v1570_v8  ;;  %625 = vmatpush.msra.mxu2 %v1592_v16 }
  0x3d   : >> { %648 = vmatpush.msra.mxu3 %v1574_v10  ;;  %1338 = vmatmul.msk.f32.vlgmr.msrb.gmra.mxu0 %vm293_vm0, %v1792_v43  ;;  %v1820_v10 = vld [vmem:[#allocation2 + $0x208] sm:$0xff] }
  0x3e   : >> { %1348 = vmatmul.msk.f32.vlgmr.msrb.gmra.mxu3 %vm293_vm0, %v1798_v3  ;;  %577 = vmatpush.msra.mxu0 %v1800_v59  ;;  %v1826_v59 = vld [vmem:[#allocation2 + $0x200] sm:$0xff] }
  0x3f   : >> { %605 = vmatpush.msra.mxu1 %v1584_v13  ;;  %626 = vmatpush.msra.mxu2 %v1604_v20 }
  0x40   : >> { %649 = vmatpush.msra.mxu3 %v1586_v14  ;;  %1340 = vmatmul.msk.f32.vlgmr.msrb.gmra.mxu1 %vm293_vm0, %v1808_v6  ;;  %v1835_v14 = vld [vmem:[%s1712_s20 + $0x11] sm:$0x7f] }
  0x41   : >> { %578 = vmatpush.msra.mxu0 %v1813_v55  ;;  %606 = vmatpush.msra.mxu1 %v1598_v18 }
  0x42   : >> { %627 = vmatpush.msra.mxu2 %v1616_v24  ;;  %650 = vmatpush.msra.mxu3 %v1600_v19 }
  0x43   : >> { %579 = vmatpush.msra.mxu0 %v1820_v10  ;;  %607 = vmatpush.msra.mxu1 %v1610_v22 }
  0x44   : >> { %628 = vmatpush.msra.mxu2 %v1628_v28  ;;  %651 = vmatpush.msra.mxu3 %v1612_v23 }
  0x45   : >> { %580 = vmatpush.msra.mxu0 %v1826_v59  ;;  %608 = vmatpush.msra.mxu1 %v1622_v26 }
  0x46   : >> { %629 = vmatpush.msra.mxu2 %v1646_v34  ;;  %652 = vmatpush.msra.mxu3 %v1624_v27 }
  0x47   : >> { %667 = vmatpush.msrb.mxu0 %v1566_v7  ;;  %609 = vmatpush.msra.mxu1 %v1634_v30 }
  0x48   : >> { %713 = vmatpush.msrb.mxu2 %v1654_v37  ;;  %1350 = vmatmul.msk.f32.vlgmr.msra.gmra.mxu0 %vm293_vm0, %v1835_v14 }
  0x49   : >> { %653 = vmatpush.msra.mxu3 %v1636_v31  ;;  %668 = vmatpush.msrb.mxu0 %v1578_v11 }
  0x4a   : >> { %688 = vmatpush.msrb.mxu1 %v1640_v32  ;;  %714 = vmatpush.msrb.mxu2 %v1666_v41 }
  0x4b   : >> { %734 = vmatpush.msrb.mxu3 %v1642_v33  ;;  %669 = vmatpush.msrb.mxu0 %v1588_v15 }
  0x4c   : >> { %689 = vmatpush.msrb.mxu1 %v1652_v36  ;;  %715 = vmatpush.msrb.mxu2 %v1678_v45 }
  0x4d   : >> { %735 = vmatpush.msrb.mxu3 %v1658_v38  ;;  %670 = vmatpush.msrb.mxu0 %v1594_v17 }
  0x4e   : >> { %690 = vmatpush.msrb.mxu1 %v1664_v40  ;;  %716 = vmatpush.msrb.mxu2 %v1690_v49 }
  0x4f   : >> { %736 = vmatpush.msrb.mxu3 %v1670_v42  ;;  %671 = vmatpush.msrb.mxu0 %v1606_v21  ;;  %v634_v42 = vld [vmem:[%s1727_s21 + $0x1] sm:$0x7f] }
  0x50   : >> { %691 = vmatpush.msrb.mxu1 %v1676_v44  ;;  %717 = vmatpush.msrb.mxu2 %v1703_v53 }
  0x51   : >> { %737 = vmatpush.msrb.mxu3 %v1682_v46  ;;  %672 = vmatpush.msrb.mxu0 %v1618_v25 }
  0x52   : >> { %692 = vmatpush.msrb.mxu1 %v1688_v48  ;;  %718 = vmatpush.msrb.mxu2 %v1718_v57 }
  0x53   : >> { %738 = vmatpush.msrb.mxu3 %v1695_v50  ;;  %1352 = vmatmul.msk.f32.vlgmr.msra.gmra.mxu2 %vm293_vm0, %v1747_v0  ;;  %v2200_v0 = vld [vmem:[#allocation28_spill] sm:$0xff]  ;;  %v2204_v50 = vld [vmem:[#allocation21_spill] sm:$0xff] }
  0x54   : >> { %673 = vmatpush.msrb.mxu0 %v1630_v29  ;;  %693 = vmatpush.msrb.mxu1 %v1701_v52 }
  0x55   : >> { %719 = vmatpush.msrb.mxu2 %v1738_v62  ;;  %739 = vmatpush.msrb.mxu3 %v1707_v54  ;;  %v2202_v54 = vld [vmem:[#allocation8_spill] sm:$0xff] }
  0x56   : >> { %1353 = vmatmul.msk.f32.vlgmr.msra.gmra.mxu3 %vm293_vm0, %v634_v42  ;;  %674 = vmatpush.msrb.mxu0 %v1648_v35  ;;  %v2201_v42 = vld [vmem:[#allocation20_spill] sm:$0xff] }
  0x57   : >> { %694 = vmatpush.msrb.mxu1 %v1716_v56  ;;  %720 = vmatpush.msrb.mxu2 %v1759_v47 }
  0x58   : >> { %740 = vmatpush.msrb.mxu3 %v1722_v58  ;;  %755 = vmatpush.msra.mxu0 %v1660_v39  ;;  %v1888_v58 = vld [vmem:[%s1727_s21 + $0x9] sm:$0x7f] }
  0x59   : >> { %804 = vmatpush.msra.mxu2 %v1554_v2  ;;  %1351 = vmatmul.msk.f32.vlgmr.msra.gmra.mxu1 %vm293_vm0, %v1732_v60  ;;  %2203 = vst [vmem:[#allocation28_spill] sm:$0xff] %v1888_v58  ;;  %v2205_v60 = vld [vmem:[#allocation23_spill] sm:$0xff] }
  0x5a   : >> { %695 = vmatpush.msrb.mxu1 %v2200_v0  ;;  %741 = vmatpush.msrb.mxu3 %v1740_v63  ;;  %v1923_v63 = vld [vmem:[%s1727_s21 + $0x11] sm:$0x7f] }
  0x5b   : >> { %756 = vmatpush.msra.mxu0 %v2201_v42  ;;  %805 = vmatpush.msra.mxu2 %v1558_v4  ;;  %2211 = vst [vmem:[#allocation20_spill] sm:$0xff] %v1923_v63 }
  0x5c   : >> { %780 = vmatpush.msra.mxu1 %v1755_v51  ;;  %824 = vmatpush.msra.mxu3 %v2202_v54  ;;  %v2206_v54 = vld [vmem:[#allocation25_spill] sm:$0xff] }
  0x5d   : >> { %757 = vmatpush.msra.mxu0 %v2204_v50  ;;  %806 = vmatpush.msra.mxu2 %v1570_v8 }
  0x5e   : >> { %781 = vmatpush.msra.mxu1 %v1770_v61  ;;  %825 = vmatpush.msra.mxu3 %v1572_v9  ;;  %v2209_v9 = vld [vmem:[#allocation31_spill] sm:$0xff] }
  0x5f   : >> { %1357 = vmatmul.msk.f32.vlgmr.msrb.gmra.mxu2 %vm293_vm0, %v1888_v58  ;;  %758 = vmatpush.msra.mxu0 %v2205_v60  ;;  %v2207_v58 = vld [vmem:[#allocation27_spill] sm:$0xff] }
  0x60   : >> { %782 = vmatpush.msra.mxu1 %v1776_v1  ;;  %807 = vmatpush.msra.mxu2 %v1584_v13 }
  0x61   : >> { %826 = vmatpush.msra.mxu3 %v1580_v12  ;;  %1354 = vmatmul.msk.f32.vlgmr.msrb.gmra.mxu0 %vm293_vm0, %v1792_v43  ;;  %v2208_v12 = vld [vmem:[#allocation36_spill] sm:$0xff] }
  0x62   : >> { %1358 = vmatmul.msk.f32.vlgmr.msrb.gmra.mxu3 %vm293_vm0, %v1798_v3  ;;  %759 = vmatpush.msra.mxu0 %v2206_v54 }
  0x63   : >> { %783 = vmatpush.msra.mxu1 %v1785_v5  ;;  %808 = vmatpush.msra.mxu2 %v1598_v18 }
  0x64   : >> { %827 = vmatpush.msra.mxu3 %v1592_v16  ;;  %1355 = vmatmul.msk.f32.vlgmr.msrb.gmra.mxu1 %vm293_vm0, %v1808_v6  ;;  %v2210_v16 = vld [vmem:[#allocation34_spill] sm:$0xff] }
  0x65   : >> { %760 = vmatpush.msra.mxu0 %v2207_v58  ;;  %784 = vmatpush.msra.mxu1 %v2208_v12 }
  0x66   : >> { %809 = vmatpush.msra.mxu2 %v1610_v22  ;;  %828 = vmatpush.msra.mxu3 %v1604_v20  ;;  %v2212_v20 = vld [vmem:[#allocation7_spill] sm:$0xff] }
  0x67   : >> { %761 = vmatpush.msra.mxu0 %v2209_v9  ;;  %785 = vmatpush.msra.mxu1 %v1813_v55 }
  0x68   : >> { %810 = vmatpush.msra.mxu2 %v1622_v26  ;;  %829 = vmatpush.msra.mxu3 %v1616_v24  ;;  %v2213_v24 = vld [vmem:[#allocation9_spill] sm:$0xff] }
  0x69   : >> { %762 = vmatpush.msra.mxu0 %v2210_v16  ;;  %786 = vmatpush.msra.mxu1 %v1820_v10 }
  0x6a   : >> { %811 = vmatpush.msra.mxu2 %v1634_v30  ;;  %830 = vmatpush.msra.mxu3 %v1628_v28  ;;  %v2214_v28 = vld [vmem:[#allocation11_spill] sm:$0xff] }
  0x6b   : >> { %1359 = vmatmul.msk.f32.vlgmr.msra.gmra.mxu0 %vm293_vm0, %v1835_v14  ;;  %787 = vmatpush.msra.mxu1 %v1826_v59 }
  0x6c   : >> { %886 = vmatpush.msrb.mxu2 %v1640_v32  ;;  %844 = vmatpush.msrb.mxu0 %v2212_v20 }
  0x6d   : >> { %831 = vmatpush.msra.mxu3 %v1646_v34  ;;  %1361 = vmatmul.msk.f32.vlgmr.msra.gmra.mxu1 %vm293_vm0, %v1923_v63  ;;  %v2215_v34 = vld [vmem:[#allocation13_spill] sm:$0xff]  ;;  %v2216_v63 = vld [vmem:[#allocation32_spill] sm:$0xff] }
  0x6e   : >> { %845 = vmatpush.msrb.mxu0 %v2213_v24  ;;  %865 = vmatpush.msrb.mxu1 %v1566_v7 }
  0x6f   : >> { %887 = vmatpush.msrb.mxu2 %v1652_v36  ;;  %907 = vmatpush.msrb.mxu3 %v1654_v37 }
  0x70   : >> { %846 = vmatpush.msrb.mxu0 %v2214_v28  ;;  %866 = vmatpush.msrb.mxu1 %v1578_v11 }
  0x71   : >> { %888 = vmatpush.msrb.mxu2 %v1664_v40  ;;  %908 = vmatpush.msrb.mxu3 %v1666_v41 }
  0x72   : >> { %847 = vmatpush.msrb.mxu0 %v2215_v34  ;;  %867 = vmatpush.msrb.mxu1 %v1588_v15 }
  0x73   : >> { %889 = vmatpush.msrb.mxu2 %v1676_v44  ;;  %909 = vmatpush.msrb.mxu3 %v1678_v45 }
  0x74   : >> { %848 = vmatpush.msrb.mxu0 %v1600_v19  ;;  %868 = vmatpush.msrb.mxu1 %v1594_v17 }
  0x75   : >> { %890 = vmatpush.msrb.mxu2 %v1688_v48  ;;  %910 = vmatpush.msrb.mxu3 %v1690_v49 }
  0x76   : >> { %849 = vmatpush.msrb.mxu0 %v1612_v23  ;;  %869 = vmatpush.msrb.mxu1 %v1606_v21 }
  0x77   : >> { %891 = vmatpush.msrb.mxu2 %v1701_v52  ;;  %911 = vmatpush.msrb.mxu3 %v1703_v53 }
  0x78   : >> { %850 = vmatpush.msrb.mxu0 %v1624_v27  ;;  %870 = vmatpush.msrb.mxu1 %v1618_v25 }
  0x79   : >> { %892 = vmatpush.msrb.mxu2 %v1716_v56  ;;  %912 = vmatpush.msrb.mxu3 %v1718_v57 }
  0x7a   : >> { %1362 = vmatmul.msk.f32.vlgmr.msra.gmra.mxu2 %vm293_vm0, %v1792_v43  ;;  %851 = vmatpush.msrb.mxu0 %v1636_v31 }
  0x7b   : >> { %871 = vmatpush.msrb.mxu1 %v1630_v29  ;;  %893 = vmatpush.msrb.mxu2 %v2200_v0 }
  0x7c   : >> { %913 = vmatpush.msrb.mxu3 %v1738_v62  ;;  %935 = vmatpush.msra.mxu0 %v1642_v33  ;;  %v2217_v62 = vld [vmem:[#allocation19_spill] sm:$0xff] }
  0x7d   : >> { %1363 = vmatmul.msk.f32.vlgmr.msra.gmra.mxu3 %vm293_vm0, %v2216_v63  ;;  %986 = vmatpush.msra.mxu2 %v1755_v51  ;;  %v2221_v63 = vld [vmem:[#allocation26_spill] sm:$0xff] }
  0x7e   : >> { %872 = vmatpush.msrb.mxu1 %v1648_v35  ;;  %914 = vmatpush.msrb.mxu3 %v1759_v47  ;;  %v1370_v47 = vld [vmem:[%s1712_s20 + $0x18] sm:$0x7f] }
  0x7f   : >> { %936 = vmatpush.msra.mxu0 %v1658_v38  ;;  %987 = vmatpush.msra.mxu2 %v1770_v61 }
  0x80   : >> { %961 = vmatpush.msra.mxu1 %v1660_v39  ;;  %1010 = vmatpush.msra.mxu3 %v1554_v2  ;;  %v2218_v2 = vld [vmem:[#allocation22_spill] sm:$0xff] }
  0x81   : >> { %937 = vmatpush.msra.mxu0 %v2217_v62  ;;  %988 = vmatpush.msra.mxu2 %v1776_v1 }
  0x82   : >> { %962 = vmatpush.msra.mxu1 %v2201_v42  ;;  %1011 = vmatpush.msra.mxu3 %v1558_v4  ;;  %v2219_v4 = vld [vmem:[#allocation35_spill] sm:$0xff] }
  0x83   : >> { %1366 = vmatmul.msk.f32.vlgmr.msrb.gmra.mxu2 %vm293_vm0, %v1798_v3  ;;  %938 = vmatpush.msra.mxu0 %v1682_v46 }
  0x84   : >> { %963 = vmatpush.msra.mxu1 %v2204_v50  ;;  %989 = vmatpush.msra.mxu2 %v1785_v5 }
  0x85   : >> { %1012 = vmatpush.msra.mxu3 %v1570_v8  ;;  %1364 = vmatmul.msk.f32.vlgmr.msrb.gmra.mxu0 %vm293_vm0, %v1808_v6  ;;  %v2220_v8 = vld [vmem:[#allocation24_spill] sm:$0xff] }
  0x86   : >> { %1367 = vmatmul.msk.f32.vlgmr.msrb.gmra.mxu3 %vm293_vm0, %v1835_v14  ;;  %939 = vmatpush.msra.mxu0 %v2218_v2 }
  0x87   : >> { %964 = vmatpush.msra.mxu1 %v2205_v60  ;;  %990 = vmatpush.msra.mxu2 %v2208_v12 }
  0x88   : >> { %1013 = vmatpush.msra.mxu3 %v1584_v13  ;;  %1365 = vmatmul.msk.f32.vlgmr.msrb.gmra.mxu1 %vm293_vm0, %v2219_v4  ;;  %v2002_v13 = vld [vmem:[%s1712_s20 + $0x19] sm:$0x7f]  ;;  %v2222_v4 = vld [vmem:[#allocation30_spill] sm:$0xff] }
  0x89   : >> { %940 = vmatpush.msra.mxu0 %v2220_v8  ;;  %965 = vmatpush.msra.mxu1 %v2206_v54 }
  0x8a   : >> { %991 = vmatpush.msra.mxu2 %v1813_v55  ;;  %1014 = vmatpush.msra.mxu3 %v1598_v18  ;;  %v2223_v18 = vld [vmem:[#allocation8_spill] sm:$0xff] }
  0x8b   : >> { %941 = vmatpush.msra.mxu0 %v2221_v63  ;;  %966 = vmatpush.msra.mxu1 %v2207_v58 }
  0x8c   : >> { %992 = vmatpush.msra.mxu2 %v1820_v10  ;;  %1015 = vmatpush.msra.mxu3 %v1610_v22  ;;  %v2017_v22 = vld [vmem:[%s1727_s21 + $0x18] sm:$0x7f] }
  0x8d   : >> { %942 = vmatpush.msra.mxu0 %v2222_v4  ;;  %967 = vmatpush.msra.mxu1 %v2209_v9  ;;  %v2224_v4 = vld [vmem:[#allocation10_spill] sm:$0xff] }
  0x8e   : >> { %993 = vmatpush.msra.mxu2 %v1826_v59  ;;  %1016 = vmatpush.msra.mxu3 %v1622_v26  ;;  %v2226_v26 = vld [vmem:[#allocation14_spill] sm:$0xff] }
  0x8f   : >> { %1377 = vmatmul.msk.f32.vlgmr.msra.gmra.mxu2 %vm293_vm0, %v2002_v13  ;;  %1030 = vmatpush.msrb.mxu0 %v2223_v18 }
  0x90   : >> { %1071 = vmatpush.msrb.mxu2 %v1566_v7  ;;  %1371 = vmatmul.msk.f32.vlgmr.msra.gmra.mxu0 %vm293_vm0, %v1370_v47  ;;  %v2225_v7 = vld [vmem:[#allocation12_spill] sm:$0xff] }
  0x91   : >> { %968 = vmatpush.msra.mxu1 %v2210_v16  ;;  %1017 = vmatpush.msra.mxu3 %v1634_v30 }
  0x92   : >> { %1031 = vmatpush.msrb.mxu0 %v2224_v4  ;;  %1072 = vmatpush.msrb.mxu2 %v1578_v11  ;;  %v2227_v11 = vld [vmem:[#allocation15_spill] sm:$0xff] }
  0x93   : >> { %1050 = vmatpush.msrb.mxu1 %v2212_v20  ;;  %1092 = vmatpush.msrb.mxu3 %v1640_v32  ;;  %v2228_v20 = vld [vmem:[#allocation16_spill] sm:$0xff] }
  0x94   : >> { %1375 = vmatmul.msk.f32.vlgmr.msra.gmra.mxu1 %vm293_vm0, %v2017_v22  ;;  %1032 = vmatpush.msrb.mxu0 %v2225_v7 }
  0x95   : >> { %1051 = vmatpush.msrb.mxu1 %v2213_v24  ;;  %1073 = vmatpush.msrb.mxu2 %v1588_v15  ;;  %v2229_v15 = vld [vmem:[#allocation17_spill] sm:$0xff] }
  0x96   : >> { %1093 = vmatpush.msrb.mxu3 %v1652_v36  ;;  %1033 = vmatpush.msrb.mxu0 %v2226_v26 }
  0x97   : >> { %1052 = vmatpush.msrb.mxu1 %v2214_v28  ;;  %1074 = vmatpush.msrb.mxu2 %v1594_v17  ;;  %v2230_v17 = vld [vmem:[#allocation18_spill] sm:$0xff] }
  0x98   : >> { %1094 = vmatpush.msrb.mxu3 %v1664_v40  ;;  %1034 = vmatpush.msrb.mxu0 %v2227_v11 }
  0x99   : >> { %1053 = vmatpush.msrb.mxu1 %v2215_v34  ;;  %1075 = vmatpush.msrb.mxu2 %v1606_v21 }
  0x9a   : >> { %1095 = vmatpush.msrb.mxu3 %v1676_v44  ;;  %1035 = vmatpush.msrb.mxu0 %v2228_v20 }
  0x9b   : >> { %1054 = vmatpush.msrb.mxu1 %v1600_v19  ;;  %1076 = vmatpush.msrb.mxu2 %v1618_v25 }
  0x9c   : >> { %1096 = vmatpush.msrb.mxu3 %v1688_v48  ;;  %1036 = vmatpush.msrb.mxu0 %v2229_v15 }
  0x9d   : >> { %1055 = vmatpush.msrb.mxu1 %v1612_v23  ;;  %1077 = vmatpush.msrb.mxu2 %v1630_v29 }
  0x9e   : >> { %1097 = vmatpush.msrb.mxu3 %v1701_v52  ;;  %1037 = vmatpush.msrb.mxu0 %v2230_v17 }
  0x9f   : >> { %1378 = vmatmul.msk.f32.vlgmr.msra.gmra.mxu3 %vm293_vm0, %v1808_v6  ;;  %1056 = vmatpush.msrb.mxu1 %v1624_v27  ;;  %v1386_v6 = vld [vmem:[%s1727_s21 + $0x19] sm:$0x7f] }
  0xa0   : >> { %1078 = vmatpush.msrb.mxu2 %v1648_v35  ;;  %1098 = vmatpush.msrb.mxu3 %v1716_v56 }
  0xa1   : >> { %1113 = vmatpush.msra.mxu0 %v1654_v37  ;;  %1057 = vmatpush.msrb.mxu1 %v1636_v31 }
  0xa2   : >> { %1155 = vmatpush.msra.mxu2 %v1660_v39  ;;  %1099 = vmatpush.msrb.mxu3 %v2200_v0 }
  0xa3   : >> { %1114 = vmatpush.msra.mxu0 %v1666_v41  ;;  %1134 = vmatpush.msra.mxu1 %v1642_v33 }
  0xa4   : >> { %1156 = vmatpush.msra.mxu2 %v2201_v42  ;;  %1180 = vmatpush.msra.mxu3 %v1755_v51 }
  0xa5   : >> { %1115 = vmatpush.msra.mxu0 %v1678_v45  ;;  %1135 = vmatpush.msra.mxu1 %v1658_v38 }
  0xa6   : >> { %1157 = vmatpush.msra.mxu2 %v2204_v50  ;;  %1181 = vmatpush.msra.mxu3 %v1770_v61 }
  0xa7   : >> { %1381 = vmatmul.msk.f32.vlgmr.msrb.gmra.mxu2 %vm293_vm0, %v1798_v3  ;;  %1116 = vmatpush.msra.mxu0 %v1690_v49  ;;  %v2231_v3 = vld [vmem:[#allocation28_spill] sm:$0xff] }
  0xa8   : >> { %1136 = vmatpush.msra.mxu1 %v2217_v62  ;;  %1158 = vmatpush.msra.mxu2 %v2205_v60 }
  0xa9   : >> { %1182 = vmatpush.msra.mxu3 %v1776_v1  ;;  %1379 = vmatmul.msk.f32.vlgmr.msrb.gmra.mxu0 %vm293_vm0, %v1792_v43  ;;  %v2232_v1 = vld [vmem:[#allocation29_spill] sm:$0xff] }
  0xaa   : >> { %1382 = vmatmul.msk.f32.vlgmr.msrb.gmra.mxu3 %vm293_vm0, %v1835_v14  ;;  %1117 = vmatpush.msra.mxu0 %v1703_v53  ;;  %v2234_v14 = vld [vmem:[#allocation20_spill] sm:$0xff] }
  0xab   : >> { %1137 = vmatpush.msra.mxu1 %v1682_v46  ;;  %1159 = vmatpush.msra.mxu2 %v2206_v54 }
  0xac   : >> { %1183 = vmatpush.msra.mxu3 %v1785_v5  ;;  %1380 = vmatmul.msk.f32.vlgmr.msrb.gmra.mxu1 %vm293_vm0, %v2231_v3  ;;  %v2233_v5 = vld [vmem:[#allocation33_spill] sm:$0xff] }
  0xad   : >> { %1118 = vmatpush.msra.mxu0 %v1718_v57  ;;  %1138 = vmatpush.msra.mxu1 %v2218_v2 }
  0xae   : >> { %1160 = vmatpush.msra.mxu2 %v2207_v58  ;;  %1184 = vmatpush.msra.mxu3 %v2208_v12  ;;  %v2235_v12 = vld [vmem:[#allocation30_spill] sm:$0xff] }
  0xaf   : >> { %1119 = vmatpush.msra.mxu0 %v2232_v1  ;;  %1139 = vmatpush.msra.mxu1 %v2220_v8 }
  0xb0   : >> { %1161 = vmatpush.msra.mxu2 %v2209_v9  ;;  %1185 = vmatpush.msra.mxu3 %v1813_v55  ;;  %v314_v9 = vpop.f32.mrf.mxu0 }
  0xb1   : >> { %1120 = vmatpush.msra.mxu0 %v2233_v5  ;;  %1140 = vmatpush.msra.mxu1 %v2221_v63  ;;  %v2236_v5 = vld [vmem:[#allocation5_spill] sm:$0xff] }
  0xb2   : >> { %1162 = vmatpush.msra.mxu2 %v2210_v16  ;;  %1186 = vmatpush.msra.mxu3 %v1820_v10 }
  0xb3   : >> { %1383 = vmatmul.msk.f32.vlgmr.msra.gmra.mxu0 %vm293_vm0, %v2234_v14  ;;  %1385 = vmatmul.msk.f32.vlgmr.msra.gmra.mxu2 %vm293_vm0, %v2002_v13  ;;  %v337_v16 = vpop.f32.mrf.mxu1 }
  0xb4   : >> { %1141 = vmatpush.msra.mxu1 %v2235_v12  ;;  %1187 = vmatpush.msra.mxu3 %v1826_v59  ;;  %v370_v19 = vpop.f32.mrf.mxu2  ;;  %v338_v41 = vadd.f32 %v337_v16, %v314_v9 }
  0xb5   : >> { %1384 = vmatmul.msk.f32.vlgmr.msra.gmra.mxu1 %vm293_vm0, %v2017_v22  ;;  %1387 = vmatmul.msk.f32.vlgmr.msra.gmra.mxu3 %vm293_vm0, %v1386_v6  ;;  %v587_v6 = vperm.slane %v2236_v5, 0 }
  0xb6   : >> { %v373_v48 = vadd.f32 %v370_v19, %v338_v41 }
  0xb7   : >> { %v407_v10 = vpop.f32.mrf.mxu3 }
  0xb8   : >> { %v410_v52 = vadd.f32 %v407_v10, %v373_v48  ;;  %v2237_v10 = vld [vmem:[#allocation6_spill] sm:$0xff] }
  0xba   : >> { %v442_v21 = vpop.f32.mrf.mxu0 }
  0xbb   : >> { %v445_v56 = vadd.f32 %v442_v21, %v410_v52  ;;  %v591_v21 = vperm.slane %v2237_v10, 0 }
  0xbd   : >> { %v476_v23 = vpop.f32.mrf.mxu1 }
  0xbe   : >> { %v513_v24 = vpop.f32.mrf.mxu2  ;;  %v479_v43 = vadd.f32 %v476_v23, %v445_v56 }
  0xc0   : >> { %v516_v8 = vadd.f32 %v513_v24, %v479_v43 }
  0xc1   : >> { %v548_v25 = vpop.f32.mrf.mxu3 }
  0xc2   : >> { %v551_v26 = vadd.f32 %v548_v25, %v516_v8 }
  0xc5   : >> { %v582_v27 = vpop.f32.mrf.mxu0 }
  0xc6   : >> { %v585_v1 = vadd.f32 %v582_v27, %v551_v26 }
  0xc8   : >> { %v589_v19 = vmul.f32 %v587_v6, %v585_v1 }
  0xd6   : >> { %v611_v28 = vpop.f32.mrf.mxu1  ;;  %v631_v29 = vpop.f32.mrf.mxu2 }
  0xd7   : >> { %v632_v39 = vadd.f32 %v631_v29, %v611_v28 }
  0xd9   : >> { %v655_v30 = vpop.f32.mrf.mxu3 }
  0xda   : >> { %v658_v45 = vadd.f32 %v655_v30, %v632_v39 }
  0xde   : >> { %v676_v31 = vpop.f32.mrf.mxu0 }
  0xdf   : >> { %v679_v50 = vadd.f32 %v676_v31, %v658_v45  ;;  %v593_v31 = vadd.f32 %v591_v21, %v589_v19 }
  0xe1   : >> { %v697_v32 = vpop.f32.mrf.mxu1 }
  0xe2   : >> { %v722_v33 = vpop.f32.mrf.mxu2  ;;  %v700_v55 = vadd.f32 %v697_v32, %v679_v50 }
  0xe4   : >> { %v725_v61 = vadd.f32 %v722_v33, %v700_v55 }
  0xe5   : >> { %v743_v34 = vpop.f32.mrf.mxu3 }
  0xe6   : >> { %v746_v60 = vadd.f32 %v743_v34, %v725_v61 }
  0xe8   : >> { %v764_v35 = vpop.f32.mrf.mxu0 }
  0xe9   : >> { %v767_v22 = vadd.f32 %v764_v35, %v746_v60 }
  0xea   : >> { %v789_v37 = vpop.f32.mrf.mxu1 }
  0xeb   : >> { %v792_v17 = vadd.f32 %v789_v37, %v767_v22 }
  0xed   : >> { %v793_v16 = vmul.f32 %v792_v17, %v587_v6 }
  0xef   : >> { %v794_v28 = vadd.f32 %v793_v16, %v591_v21 }
  0xf1   : >> { %v795_v33 = vmax.f32 %v593_v31, %v794_v28 }
  0xfd   : >> { %v813_v36 = vpop.f32.mrf.mxu2 }
 0x100   : >> { %v833_v38 = vpop.f32.mrf.mxu3 }
 0x101   : >> { %v834_v44 = vadd.f32 %v833_v38, %v813_v36 }
 0x102   : >> { %v853_v40 = vpop.f32.mrf.mxu0 }
 0x103   : >> { %v856_v49 = vadd.f32 %v853_v40, %v834_v44 }
 0x105   : >> { %v874_v46 = vpop.f32.mrf.mxu1 }
 0x106   : >> { %v895_v47 = vpop.f32.mrf.mxu2  ;;  %v877_v53 = vadd.f32 %v874_v46, %v856_v49 }
 0x108   : >> { %v898_v57 = vadd.f32 %v895_v47, %v877_v53 }
 0x109   : >> { %v916_v51 = vpop.f32.mrf.mxu3 }
 0x10a   : >> { %v919_v0 = vadd.f32 %v916_v51, %v898_v57 }
 0x10d   : >> { %v944_v54 = vpop.f32.mrf.mxu0 }
 0x10e   : >> { %v947_v63 = vadd.f32 %v944_v54, %v919_v0 }
 0x111   : >> { %v970_v58 = vpop.f32.mrf.mxu1 }
 0x112   : >> { %v995_v59 = vpop.f32.mrf.mxu2  ;;  %v973_v11 = vadd.f32 %v970_v58, %v947_v63 }
 0x114   : >> { %v998_v14 = vadd.f32 %v995_v59, %v973_v11 }
 0x116   : >> { %v999_v23 = vmul.f32 %v998_v14, %v587_v6 }
 0x118   : >> { %v1000_v32 = vadd.f32 %v999_v23, %v591_v21 }
 0x11a   : >> { %v1001_v35 = vmax.f32 %v795_v33, %v1000_v32 }
 0x122   : >> { %v1019_v62 = vpop.f32.mrf.mxu3 }
 0x126   : >> { %v1039_v42 = vpop.f32.mrf.mxu0 }
 0x127   : >> { %v1040_v2 = vadd.f32 %v1039_v42, %v1019_v62 }
 0x129   : >> { %v1059_v13 = vpop.f32.mrf.mxu1 }
 0x12a   : >> { %v1062_v4 = vadd.f32 %v1059_v13, %v1040_v2  ;;  %v1080_v18 = vpop.f32.mrf.mxu2 }
 0x12c   : >> { %v1083_v7 = vadd.f32 %v1080_v18, %v1062_v4 }
 0x12d   : >> { %v1101_v20 = vpop.f32.mrf.mxu3 }
 0x12e   : >> { %v1104_v15 = vadd.f32 %v1101_v20, %v1083_v7 }
 0x130   : >> { %v1122_v3 = vpop.f32.mrf.mxu0 }
 0x131   : >> { %v1125_v12 = vadd.f32 %v1122_v3, %v1104_v15 }
 0x132   : >> { %v1143_v9 = vpop.f32.mrf.mxu1 }
 0x133   : >> { %v1146_v24 = vadd.f32 %v1143_v9, %v1125_v12 }
 0x136   : >> { %v1164_v25 = vpop.f32.mrf.mxu2 }
 0x137   : >> { %v1167_v29 = vadd.f32 %v1164_v25, %v1146_v24 }
 0x138   : >> { %v1189_v30 = vpop.f32.mrf.mxu3 }
 0x139   : >> { %v1192_v27 = vadd.f32 %v1189_v30, %v1167_v29 }
 0x13b   : >> { %v1193_v34 = vmul.f32 %v1192_v27, %v587_v6 }
 0x13d   : >> { %v1194_v36 = vadd.f32 %v1193_v34, %v591_v21 }
 0x13f   : >> { %v1195_v37 = vmax.f32 %v1001_v35, %v1194_v36  ;;  %268 = sbr.rel (!%p266_p7) target bundleno = 18 (0x12), region = 102 }
 0x141   : >> { %v1196_v38 = vmax.f32 %v1195_v37, 0.0 }
 0x143   : >> { %1199 = vst [vmem:[%s1198_s23] sm:$0x7f] %v1196_v38 }
 0x144 PF: > { %s16_s18 = sadd.s32 1, %s1474_s18  }
 0x145   : > { %p13_p8 = scmp.ge.s32.totalorder %s16_s18, 4  }
 0x147   :  { %15 = sbr.rel (!%p13_p8) target bundleno = 1 (0x1), region = 113 }
 0x14c   :  { %1221 = vsyncpa [#allocation3], 1 }
 0x14d   :  { %1223 = vsyncpa [#allocation3 + $0x1], 1 }

// kernel: classifier_forward.10
= control target key start
LH: loop header
LB: loop body
LE: loop exit
PB: predicated region body
PF: predicated region fallthrough
CT: control target
= control target key end

     0   :  { %8 = vsyncpa [#allocation3], 0  ;;  %s304_s0 = inlined_call_operand.vmem [shape: f32[2,512], index: 0, kind: input, shape index: {}]   ;;  %s305_s1 = inlined_call_operand.hbm [shape: f32[512,128], index: 1, kind: input, shape index: {}]   ;;  %s306_s2 = inlined_call_operand.hbm [shape: f32[1,128], index: 2, kind: input, shape index: {}]   ;;  %s307_s3 = inlined_call_operand.vmem [shape: f32[2,128], index: 3, kind: output, shape index: {}]  }
   0x1   :  { %s16_s14 = sshll.u32 %s305_s1, 4  ;;  %s17_s14 = int_to_ptr.hbm [resolvable:$true] %s16_s14 }
   0x2   :  { %9 = vsyncpa [#allocation5], 0  ;;  %s268_s15 = smov [#allocation2]   ;;  %s30_s19 = sshll.u32 %s306_s2, 4  ;;  %s31_s19 = int_to_ptr.hbm [resolvable:$true] %s30_s19 }
   0x3   :  { %s18_s16 = sshll.u32 %s268_s15, 4  ;;  %s269_s20 = smov 128   ;;  %s19_s16 = int_to_ptr.vmem [resolvable:$true] %s18_s16 }
   0x4   :  { %s270_s21 = smov 8   ;;  %s271_s22 = smov [#allocation4]  }
   0x5   :  { %24 = dma.hbm_to_vmem [thread:$0]  %s17_s14, 8192, %s19_s16, [#allocation3], %s269_s20, %s269_s20, %s270_s21  }
   0x6   :  { %s32_s23 = sshll.u32 %s271_s22, 4  ;;  %s33_s23 = int_to_ptr.vmem [resolvable:$true] %s32_s23 }
   0x7   :  { %35 = dma.hbm_to_vmem [thread:$0]  %s31_s19, 16, %s33_s23, [#allocation5]  }
   0x8   :  { %264 = dma.done.wait [#allocation3], 8192  }
   0x9   :  { %265 = vsyncadd [#allocation3], 4294959104 }
   0xa   :  { %266 = dma.done.wait [#allocation5], 16  }
   0xb   :  { %267 = vsyncadd [#allocation5], 4294967280  ;;  %v92_v0 = vld [vmem:[#allocation2 + $0x178] sm:$0xff]  ;;  %v91_v2 = vld [vmem:[#allocation2 + $0x170] sm:$0xff] }
   0xc   :  { %v60_v1 = vld [vmem:[#allocation2 + $0x78] sm:$0xff]  ;;  %163 = vmatpush.msra.mxu2 %v92_v0  ;;  %v59_v4 = vld [vmem:[#allocation2 + $0x70] sm:$0xff]  ;;  %v90_v6 = vld [vmem:[#allocation2 + $0x168] sm:$0xff] }
   0xd   :  { %123 = vmatpush.msra.mxu0 %v60_v1  ;;  %v108_v3 = vld [vmem:[#allocation2 + $0x1f8] sm:$0xff]  ;;  %v107_v7 = vld [vmem:[#allocation2 + $0x1f0] sm:$0xff]  ;;  %v58_v8 = vld [vmem:[#allocation2 + $0x68] sm:$0xff] }
   0xe   :  { %v76_v5 = vld [vmem:[#allocation2 + $0xf8] sm:$0xff]  ;;  %183 = vmatpush.msra.mxu3 %v108_v3  ;;  %164 = vmatpush.msra.mxu2 %v91_v2  ;;  %v75_v9 = vld [vmem:[#allocation2 + $0xf0] sm:$0xff]  ;;  %v106_v10 = vld [vmem:[#allocation2 + $0x1e8] sm:$0xff] }
   0xf   :  { %143 = vmatpush.msra.mxu1 %v76_v5  ;;  %124 = vmatpush.msra.mxu0 %v59_v4  ;;  %v89_v11 = vld [vmem:[#allocation2 + $0x160] sm:$0xff]  ;;  %v74_v13 = vld [vmem:[#allocation2 + $0xe8] sm:$0xff]  ;;  %v88_v16 = vld [vmem:[#allocation2 + $0x158] sm:$0xff] }
  0x10   :  { %184 = vmatpush.msra.mxu3 %v107_v7  ;;  %v57_v12 = vld [vmem:[#allocation2 + $0x60] sm:$0xff]  ;;  %165 = vmatpush.msra.mxu2 %v90_v6  ;;  %v56_v17 = vld [vmem:[#allocation2 + $0x58] sm:$0xff]  ;;  %v87_v20 = vld [vmem:[#allocation2 + $0x150] sm:$0xff] }
  0x11   :  { %144 = vmatpush.msra.mxu1 %v75_v9  ;;  %125 = vmatpush.msra.mxu0 %v58_v8  ;;  %v105_v14 = vld [vmem:[#allocation2 + $0x1e0] sm:$0xff]  ;;  %v104_v18 = vld [vmem:[#allocation2 + $0x1d8] sm:$0xff]  ;;  %v55_v21 = vld [vmem:[#allocation2 + $0x50] sm:$0xff] }
  0x12   :  { %v73_v15 = vld [vmem:[#allocation2 + $0xe0] sm:$0xff]  ;;  %185 = vmatpush.msra.mxu3 %v106_v10  ;;  %166 = vmatpush.msra.mxu2 %v89_v11  ;;  %v72_v19 = vld [vmem:[#allocation2 + $0xd8] sm:$0xff]  ;;  %v103_v22 = vld [vmem:[#allocation2 + $0x1d0] sm:$0xff] }
  0x13   :  { %145 = vmatpush.msra.mxu1 %v74_v13  ;;  %126 = vmatpush.msra.mxu0 %v57_v12  ;;  %v71_v23 = vld [vmem:[#allocation2 + $0xd0] sm:$0xff]  ;;  %v86_v24 = vld [vmem:[#allocation2 + $0x148] sm:$0xff]  ;;  %v85_v28 = vld [vmem:[#allocation2 + $0x140] sm:$0xff] }
  0x14   :  { %186 = vmatpush.msra.mxu3 %v105_v14  ;;  %167 = vmatpush.msra.mxu2 %v88_v16  ;;  %v54_v25 = vld [vmem:[#allocation2 + $0x48] sm:$0xff]  ;;  %v53_v29 = vld [vmem:[#allocation2 + $0x40] sm:$0xff]  ;;  %v84_v32 = vld [vmem:[#allocation2 + $0x138] sm:$0xff] }
  0x15   :  { %146 = vmatpush.msra.mxu1 %v73_v15  ;;  %127 = vmatpush.msra.mxu0 %v56_v17  ;;  %v102_v26 = vld [vmem:[#allocation2 + $0x1c8] sm:$0xff]  ;;  %v101_v30 = vld [vmem:[#allocation2 + $0x1c0] sm:$0xff]  ;;  %v52_v33 = vld [vmem:[#allocation2 + $0x38] sm:$0xff] }
  0x16   :  { %187 = vmatpush.msra.mxu3 %v104_v18  ;;  %168 = vmatpush.msra.mxu2 %v87_v20  ;;  %v70_v27 = vld [vmem:[#allocation2 + $0xc8] sm:$0xff]  ;;  %v69_v31 = vld [vmem:[#allocation2 + $0xc0] sm:$0xff]  ;;  %v100_v34 = vld [vmem:[#allocation2 + $0x1b8] sm:$0xff] }
  0x17   :  { %147 = vmatpush.msra.mxu1 %v72_v19  ;;  %128 = vmatpush.msra.mxu0 %v55_v21  ;;  %v68_v35 = vld [vmem:[#allocation2 + $0xb8] sm:$0xff]  ;;  %v83_v36 = vld [vmem:[#allocation2 + $0x130] sm:$0xff]  ;;  %v82_v40 = vld [vmem:[#allocation2 + $0x128] sm:$0xff] }
  0x18   :  { %188 = vmatpush.msra.mxu3 %v103_v22  ;;  %169 = vmatpush.msra.mxu2 %v86_v24  ;;  %v51_v37 = vld [vmem:[#allocation2 + $0x30] sm:$0xff]  ;;  %v50_v41 = vld [vmem:[#allocation2 + $0x28] sm:$0xff]  ;;  %v81_v44 = vld [vmem:[#allocation2 + $0x120] sm:$0xff] }
  0x19   :  { %148 = vmatpush.msra.mxu1 %v71_v23  ;;  %129 = vmatpush.msra.mxu0 %v54_v25  ;;  %v99_v38 = vld [vmem:[#allocation2 + $0x1b0] sm:$0xff]  ;;  %v98_v42 = vld [vmem:[#allocation2 + $0x1a8] sm:$0xff]  ;;  %v49_v45 = vld [vmem:[#allocation2 + $0x20] sm:$0xff] }
  0x1a   :  { %189 = vmatpush.msra.mxu3 %v102_v26  ;;  %170 = vmatpush.msra.mxu2 %v85_v28  ;;  %v67_v39 = vld [vmem:[#allocation2 + $0xb0] sm:$0xff]  ;;  %v66_v43 = vld [vmem:[#allocation2 + $0xa8] sm:$0xff]  ;;  %v44_v46 = vld [vmem:[%s304_s0] sm:$0xff] }
  0x1b   :  { %149 = vmatpush.msra.mxu1 %v70_v27  ;;  %130 = vmatpush.msra.mxu0 %v53_v29  ;;  %v97_v47 = vld [vmem:[#allocation2 + $0x1a0] sm:$0xff]  ;;  %114 = vst [vmem:[#allocation1] ss:$4 sm:$0xff] %v44_v46  ;;  %v80_v49 = vld [vmem:[#allocation2 + $0x118] sm:$0xff]  ;;  %v79_v53 = vld [vmem:[#allocation2 + $0x110] sm:$0xff] }
  0x1c   :  { %190 = vmatpush.msra.mxu3 %v101_v30  ;;  %171 = vmatpush.msra.mxu2 %v84_v32  ;;  %v65_v48 = vld [vmem:[#allocation2 + $0xa0] sm:$0xff]  ;;  %v48_v50 = vld [vmem:[#allocation2 + $0x18] sm:$0xff]  ;;  %v47_v54 = vld [vmem:[#allocation2 + $0x10] sm:$0xff] }
  0x1d   :  { %150 = vmatpush.msra.mxu1 %v69_v31  ;;  %131 = vmatpush.msra.mxu0 %v52_v33  ;;  %v96_v51 = vld [vmem:[#allocation2 + $0x198] sm:$0xff]  ;;  %v95_v55 = vld [vmem:[#allocation2 + $0x190] sm:$0xff]  ;;  %v78_v57 = vld [vmem:[#allocation2 + $0x108] sm:$0xff] }
  0x1e   :  { %191 = vmatpush.msra.mxu3 %v100_v34  ;;  %172 = vmatpush.msra.mxu2 %v83_v36  ;;  %v64_v52 = vld [vmem:[#allocation2 + $0x98] sm:$0xff]  ;;  %v63_v56 = vld [vmem:[#allocation2 + $0x90] sm:$0xff]  ;;  %v46_v58 = vld [vmem:[#allocation2 + $0x8] sm:$0xff] }
  0x1f   :  { %151 = vmatpush.msra.mxu1 %v68_v35  ;;  %132 = vmatpush.msra.mxu0 %v51_v37  ;;  %v94_v59 = vld [vmem:[#allocation2 + $0x188] sm:$0xff]  ;;  %v77_v61 = vld [vmem:[#allocation2 + $0x100] sm:$0xff] }
  0x20   :  { %192 = vmatpush.msra.mxu3 %v99_v38  ;;  %173 = vmatpush.msra.mxu2 %v82_v40  ;;  %v62_v60 = vld [vmem:[#allocation2 + $0x88] sm:$0xff]  ;;  %v45_v62 = vld [vmem:[#allocation2] sm:$0xff] }
  0x21   :  { %152 = vmatpush.msra.mxu1 %v67_v39  ;;  %133 = vmatpush.msra.mxu0 %v50_v41  ;;  %v93_v0 = vld [vmem:[#allocation2 + $0x180] sm:$0xff] }
  0x22   :  { %193 = vmatpush.msra.mxu3 %v98_v42  ;;  %174 = vmatpush.msra.mxu2 %v81_v44  ;;  %v117_v63 = vld.sshfl [vmem:[#allocation1 + $0x10] sm:$0xff pattern:$0x73625140]  ;;  %v115_v1 = vld.sshfl [vmem:[#allocation1] sm:$0xff pattern:$0x73625140] }
  0x23   :  { %153 = vmatpush.msra.mxu1 %v66_v43  ;;  %134 = vmatpush.msra.mxu0 %v49_v45  ;;  %v118_v2 = vld.sshfl [vmem:[#allocation1 + $0x18] sm:$0xff pattern:$0x73625140]  ;;  %v61_v3 = vld [vmem:[#allocation2 + $0x80] sm:$0xff] }
  0x24   :  { %194 = vmatpush.msra.mxu3 %v97_v47  ;;  %175 = vmatpush.msra.mxu2 %v80_v49  ;;  %v116_v4 = vld.sshfl [vmem:[#allocation1 + $0x8] sm:$0xff pattern:$0x73625140] }
  0x25   :  { %154 = vmatpush.msra.mxu1 %v65_v48  ;;  %135 = vmatpush.msra.mxu0 %v48_v50  ;;  %v215_v5 = vld [vmem:[#allocation4] ss:$0 sm:$0xff] }
  0x26   :  { %195 = vmatpush.msra.mxu3 %v96_v51  ;;  %176 = vmatpush.msra.mxu2 %v79_v53 }
  0x27   :  { %155 = vmatpush.msra.mxu1 %v64_v52  ;;  %136 = vmatpush.msra.mxu0 %v47_v54 }
  0x28   :  { %196 = vmatpush.msra.mxu3 %v95_v55  ;;  %177 = vmatpush.msra.mxu2 %v78_v57 }
  0x29   :  { %156 = vmatpush.msra.mxu1 %v63_v56  ;;  %137 = vmatpush.msra.mxu0 %v46_v58 }
  0x2a   :  { %197 = vmatpush.msra.mxu3 %v94_v59  ;;  %178 = vmatpush.msra.mxu2 %v77_v61 }
  0x2b   :  { %157 = vmatpush.msra.mxu1 %v62_v60  ;;  %138 = vmatpush.msra.mxu0 %v45_v62 }
  0x2c   :  { %179 = vmatmul.f32.vlgmr.msra.gmra.mxu2 %v117_v63  ;;  %198 = vmatpush.msra.mxu3 %v93_v0 }
  0x2d   :  { %139 = vmatmul.f32.vlgmr.msra.gmra.mxu0 %v115_v1  ;;  %199 = vmatmul.f32.vlgmr.msra.gmra.mxu3 %v118_v2 }
  0x2e   :  { %158 = vmatpush.msra.mxu1 %v61_v3 }
  0x2f   :  { %159 = vmatmul.f32.vlgmr.msra.gmra.mxu1 %v116_v4 }
  0xaa   :  { %v140_v6 = vpop.f32.mrf.mxu0 }
  0xab   :  { %v141_v7 = vadd.f32 %v215_v5, %v140_v6 }
  0xac   :  { %v160_v8 = vpop.f32.mrf.mxu1 }
  0xad   :  { %v161_v9 = vadd.f32 %v160_v8, %v141_v7 }
  0xaf   :  { %v180_v10 = vpop.f32.mrf.mxu2 }
  0xb0   :  { %v181_v11 = vadd.f32 %v180_v10, %v161_v9  ;;  %v200_v12 = vpop.f32.mrf.mxu3 }
  0xb2   :  { %v201_v13 = vadd.f32 %v200_v12, %v181_v11 }
  0xb4   :  { %v203_v14 = vmax.f32 %v201_v13, 0.0 }
  0xb6   :  { %204 = vst [vmem:[%s307_s3] sm:$0x3] %v203_v14 }
  0xb7   :  { %209 = vsyncpa [#allocation3], 1 }
  0xb8   :  { %210 = vsyncpa [#allocation5], 1 }

// kernel: classifier_forward.11
= control target key start
LH: loop header
LB: loop body
LE: loop exit
PB: predicated region body
PF: predicated region fallthrough
CT: control target
= control target key end

     0   :  { %8 = vsyncpa [#allocation3], 0  ;;  %s254_s0 = inlined_call_operand.vmem [shape: f32[2,128], index: 0, kind: input, shape index: {}]   ;;  %s255_s1 = inlined_call_operand.vmem [shape: f32[128,10], index: 1, kind: input, shape index: {}]   ;;  %s256_s2 = inlined_call_operand.hbm [shape: f32[1,10], index: 2, kind: input, shape index: {}]   ;;  %s257_s3 = inlined_call_operand.hbm [shape: f32[2,10], index: 3, kind: output, shape index: {}]  }
   0x1   :  { %9 = vsyncpa [#allocation4], 0  ;;  %s19_s14 = sshll.u32 %s256_s2, 4  ;;  %s172_s15 = smov [#allocation2]   ;;  %s20_s14 = int_to_ptr.hbm [resolvable:$true] %s19_s14 }
   0x2   :  { %s21_s16 = sshll.u32 %s172_s15, 4  ;;  %s22_s16 = int_to_ptr.vmem [resolvable:$true] %s21_s16 }
   0x3   :  { %24 = dma.hbm_to_vmem [thread:$0]  %s20_s14, 16, %s22_s16, [#allocation3]  }
   0x4   :  { %168 = dma.done.wait [#allocation3], 16  }
   0x5   :  { %169 = vsyncadd [#allocation3], 4294967280  ;;  %v45_v0 = vld [vmem:[%s255_s1 + $0x78] sm:$0xff]  ;;  %v44_v1 = vld [vmem:[%s255_s1 + $0x70] sm:$0xff]  ;;  %vm70_vm0 = vcmask 74752   ;;  %s103_s24 = sshll.u32 %s257_s3, 4  ;;  %s104_s24 = int_to_ptr.hbm [resolvable:$true] %s103_s24 }
   0x6   :  { %50 = vmatpush.msra.mxu0 %v45_v0  ;;  %v43_v2 = vld [vmem:[%s255_s1 + $0x68] sm:$0xff]  ;;  %v42_v3 = vld [vmem:[%s255_s1 + $0x60] sm:$0xff]  ;;  %v41_v4 = vld [vmem:[%s255_s1 + $0x58] sm:$0xff] }
   0x7   :  { %v40_v5 = vld [vmem:[%s255_s1 + $0x50] sm:$0xff]  ;;  %v39_v6 = vld [vmem:[%s255_s1 + $0x48] sm:$0xff]  ;;  %v38_v7 = vld [vmem:[%s255_s1 + $0x40] sm:$0xff] }
   0x8   :  { %51 = vmatpush.msra.mxu0 %v44_v1  ;;  %v37_v8 = vld [vmem:[%s255_s1 + $0x38] sm:$0xff]  ;;  %v36_v9 = vld [vmem:[%s255_s1 + $0x30] sm:$0xff]  ;;  %v35_v10 = vld [vmem:[%s255_s1 + $0x28] sm:$0xff] }
   0x9   :  { %v34_v11 = vld [vmem:[%s255_s1 + $0x20] sm:$0xff]  ;;  %v33_v12 = vld [vmem:[%s255_s1 + $0x18] sm:$0xff]  ;;  %v32_v13 = vld [vmem:[%s255_s1 + $0x10] sm:$0xff] }
   0xa   :  { %52 = vmatpush.msra.mxu0 %v43_v2  ;;  %v31_v14 = vld [vmem:[%s255_s1 + $0x8] sm:$0xff]  ;;  %v30_v15 = vld [vmem:[%s255_s1] sm:$0xff] }
   0xb   :  { %v29_v16 = vld [vmem:[%s254_s0] sm:$0x3]  ;;  %s173_s0 = smov [#allocation5]  }
   0xc   :  { %53 = vmatpush.msra.mxu0 %v42_v3  ;;  %v115_v17 = vld [vmem:[#allocation2] ss:$0 sm:$0xff]  ;;  %s101_s1 = sshll.u32 %s173_s0, 4  ;;  %s102_s1 = int_to_ptr.vmem [resolvable:$true] %s101_s1 }
   0xe   :  { %54 = vmatpush.msra.mxu0 %v41_v4 }
  0x10   :  { %55 = vmatpush.msra.mxu0 %v40_v5 }
  0x12   :  { %56 = vmatpush.msra.mxu0 %v39_v6 }
  0x14   :  { %57 = vmatpush.msra.mxu0 %v38_v7 }
  0x16   :  { %58 = vmatpush.msra.mxu0 %v37_v8 }
  0x18   :  { %59 = vmatpush.msra.mxu0 %v36_v9 }
  0x1a   :  { %60 = vmatpush.msra.mxu0 %v35_v10 }
  0x1c   :  { %61 = vmatpush.msra.mxu0 %v34_v11 }
  0x1e   :  { %62 = vmatpush.msra.mxu0 %v33_v12 }
  0x20   :  { %63 = vmatpush.msra.mxu0 %v32_v13 }
  0x22   :  { %64 = vmatpush.msra.mxu0 %v31_v14 }
  0x24   :  { %65 = vmatpush.msra.mxu0 %v30_v15 }
  0x25   :  { %66 = vmatmul.f32.vlgmr.msra.gmra.mxu0 %v29_v16 }
  0xa2   :  { %v67_v18 = vpop.f32.mrf.mxu0 }
  0xa3   :  { %v68_v19 = vadd.f32 %v115_v17, %v67_v18 }
  0xa5   :  { %v71_v20 = vsel %vm70_vm0, %v68_v19, -inf }
  0xa6   :  { %72 = vmax.xlane.f32.xlu0 %v71_v20 }
 0x119   :  { %v73_v21 = vpop.xlane.xlu0 %72 }
 0x11a   :  { %v74_v22 = vsub.f32 %v68_v19, %v73_v21 }
 0x11c   :  { %v75_v23 = vmul.f32 1.442695, %v74_v22 }
 0x11e   :  { %116 = vpow2.f32 %v75_v23 }
 0x124   :  { %v117_v24 = vpop.eup %116 }
 0x125   :  { %v77_v25 = vsel %vm70_vm0, %v117_v24, 0.0 }
 0x126   :  { %78 = vadd.xlane.f32.xlu0 %v77_v25 }
 0x199   :  { %v79_v26 = vpop.xlane.xlu0 %78 }
 0x19a   :  { %118 = vrcp.f32 %v79_v26  ;;  %v91_v30 = vand.u32 2147483648, %v79_v26  ;;  %v89_v32 = vand.u32 2147483647, %v79_v26  ;;  %vm85_vm2 = vweird.f32 %v79_v26 }
 0x19c   :  { %v92_v34 = vor.u32 1.1754944e-38, %v91_v30  ;;  %vm90_vm4 = vcmp.eq.f32.partialorder %v89_v32, 8.507059e+37 }
 0x1a0   :  { %v119_v27 = vpop.eup %118 }
 0x1a1   :  { %v81_v28 = vmul.f32 %v119_v27, %v79_v26  ;;  %vm86_vm1 = vweird.f32 %v119_v27 }
 0x1a2   :  { %vm87_vm3 = vmor %vm85_vm2, %vm86_vm1 }
 0x1a3   :  { %v82_v29 = vsub.f32 1.0, %v81_v28 }
 0x1a5   :  { %v83_v31 = vmul.f32 %v119_v27, %v82_v29 }
 0x1a7   :  { %v84_v33 = vadd.f32 %v119_v27, %v83_v31 }
 0x1a9   :  { %v88_v35 = vsel %vm87_vm3, %v119_v27, %v84_v33 }
 0x1aa   :  { %v93_v36 = vsel %vm90_vm4, %v92_v34, %v88_v35 }
 0x1ab   :  { %v94_v37 = vmul.f32 %v117_v24, %v93_v36 }
 0x1ad   :  { %95 = vst.msk [vmem:[#allocation5] sm:$0x3] %vm70_vm0, %v94_v37 }
 0x1ae   :  { %106 = dma.vmem_to_hbm [thread:$0]  %s102_s1, 32, %s104_s24, [#allocation4]  }
 0x1af   :  { %170 = dma.done.wait [#allocation4], 32  }
 0x1b0   :  { %171 = vsyncadd [#allocation4], 4294967264 }
 0x1b1   :  { %111 = vsyncpa [#allocation3], 1 }
 0x1b2   :  { %112 = vsyncpa [#allocation4], 1 }

// kernel: classifier_forward.8
= control target key start
LH: loop header
LB: loop body
LE: loop exit
PB: predicated region body
PF: predicated region fallthrough
CT: control target
= control target key end

     0   :  { %8 = vsyncpa [#allocation3], 0  ;;  %s6141_s0 = inlined_call_operand.vmem [shape: f32[2,6272], index: 0, kind: input, shape index: {}]   ;;  %s6142_s1 = inlined_call_operand.hbm [shape: f32[6272,1024], index: 1, kind: input, shape index: {}]   ;;  %s6143_s2 = inlined_call_operand.hbm [shape: f32[1,1024], index: 2, kind: input, shape index: {}]   ;;  %s6144_s3 = inlined_call_operand.vmem [shape: f32[2,1024], index: 3, kind: output, shape index: {}]  }
   0x1   :  { %10 = vsyncpa [#allocation3 + $0x1], 0 }
   0x2   :  { %11 = vsyncpa [#allocation5], 0 }
   0x3   :  { %13 = vsyncpa [#allocation5 + $0x1], 0  ;;  %s4199_s12 = smov 0   ;;  %s4201_s13 = smov 0  }
   0x4   :  { %s4203_s14 = smov 0   ;;  %s4205_s15 = smov 0  }
   0x5 LB: > { %s4006_s16 = sadd.s32 4294967295, %s4174_s15   ;;  %s4219_s17 = sadd.s32 1, %s4174_s15   ;;  %s4174_s15 = sphi %s4205_s15, %s6151_s15   ;;  %s4170_s14 = sphi %s4203_s14, %s6150_s14   ;;  %s4166_s13 = sphi %s4201_s13, %s6149_s13   ;;  %s4162_s12 = sphi %s4199_s12, %s6148_s12  }
   0x6   : > { %s44_s18 = ssub.s32 %s4174_s15, %s4219_s17  ;;  %s47_s19 = sadd.s32 1, %s4170_s14 }
   0x7   : > { %p45_p0 = scmp.eq.s32.totalorder %s44_s18, 0  ;;  %p54_p1 = scmp.ne.s32.totalorder %s4170_s14, %s4166_s13 }
   0x8   : > { %p55_p2 = scmp.eq.s32.totalorder %s4174_s15, 0  ;;  %p60_p3 = scmp.ne.s32.totalorder %s4166_s13, %s4162_s12 }
   0x9   : > { %s4229_s20 = scalar_select %p45_p0, %s4170_s14, %s47_s19  }
   0xa   : > { %p56_p4 = por %p55_p2, %p54_p1  ;;  %p61_p5 = scmp.eq.s32.totalorder %s4006_s16, 0 }
   0xb   : > { %p4034_p6 = scmp.lt.s32.totalorder %s4174_s15, 4  ;;  %s4239_s22 = sand.u32 1, %s4170_s14  }
   0xc   : > { %p4234_p7 = por %p61_p5, %p60_p3  ;;  %s4021_s23 = smul.u32 12544, %s4239_s22 }
   0xd   : > { %s4020_s24 = sshll.u32 %s4174_s15, 4  ;;  %p4243_p8 = pnand %p4034_p6, %p56_p4 }
   0xe   : > { %s148_s28 = scalar_lea.hbm %s6142_s1, %s4020_s24  ;;  %s143_s30 = scalar_lea.vmem [#allocation2], %s4021_s23 }
   0xf   : > { %s149_s29 = sshll.u32 %s148_s28, 4  ;;  %s151_s4 = sshll.u32 %s143_s30, 4  ;;  %s150_s29 = int_to_ptr.hbm [resolvable:$true] %s149_s29  ;;  %s152_s4 = int_to_ptr.vmem [resolvable:$true] %s151_s4 }
  0x10   : > { %s140_s5 = scalar_lea.sflag [#allocation3], %s4239_s22  ;;  %s4076_s6 = sshra.s32 %s150_s29, 4  ;;  %s4077_s6 = int_to_ptr.hbm [resolvable:$true] %s4076_s6 }
  0x11   : > { %s4078_s7 = scalar_lea.hbm %s4077_s6, 12544  ;;  %p4080_p10 = pneg %p4243_p8 }
  0x12   : > { %p4079_p9 = scmp.ne.s32.totalorder %s4077_s6, %s4078_s7  ;;  %s4083_s10 = scalar_lea.hbm %s6142_s1, 50176 }
  0x13   : > { %p4084_p13 = scmp.lt.s32.totalorder %s4077_s6, %s6142_s1  ;;  %p4085_p0 = scmp.lt.s32.totalorder %s4083_s10, %s4078_s7 }
  0x14   : > { %p4081_p11 = pnand %p4080_p10, %p4079_p9 }
  0x15   : > { %p4086_p1 = por %p4085_p0, %p4084_p13 }
  0x16   : > { %p4082_p12 = pneg %p4081_p11 }
  0x18   : > { %p4087_p2 = pnand %p4086_p1, %p4082_p12 }
  0x1a   : > { %4090 = shalt.err (!%p4087_p2)
}
  0x1b   : > { %s4176_s18 = smov 1024   ;;  %s4177_s19 = smov 256  }
  0x1c   : > { %s4178_s23 = smov 16   ;;  %p4014_p3 = scmp.ge.s32.totalorder %s4174_s15, 1 }
  0x1d   : > { %4030 = dma.hbm_to_vmem [thread:$0]  (!%p4243_p8), %s150_s29, 200704, %s152_s4, %s140_s5, %s4176_s18, %s4177_s19, %s4178_s23  }
  0x1e   : > { %p178_p4 = scmp.lt.s32.totalorder %s4174_s15, 5  ;;  %s4012_s24 = sshll.u32 %s4239_s22, 1 }
  0x1f   : > { %s4013_s27 = sshll.u32 %s4174_s15, 1  ;;  %s165_s28 = scalar_lea.vmem [#allocation4], %s4012_s24 }
  0x20   : > { %p4267_p5 = pnand %p4014_p3, %p178_p4  ;;  %s173_s30 = sshll.u32 %s165_s28, 4  ;;  %s174_s30 = int_to_ptr.vmem [resolvable:$true] %s173_s30 }
  0x21   : > { %s169_s8 = scalar_lea.hbm %s6143_s2, %s4013_s27  ;;  %s162_s10 = scalar_lea.sflag [#allocation5], %s4239_s22 }
  0x22   : > { %s171_s9 = sshll.u32 %s169_s8, 4  ;;  %s4113_s12 = scalar_lea.hbm %s6143_s2, 8  ;;  %s172_s9 = int_to_ptr.hbm [resolvable:$true] %s171_s9 }
  0x23   : > { %s4106_s29 = sshra.s32 %s172_s9, 4  ;;  %s4107_s29 = int_to_ptr.hbm [resolvable:$true] %s4106_s29 }
  0x24   : > { %s4108_s4 = scalar_lea.hbm %s4107_s29, 2  ;;  %p4114_p12 = scmp.lt.s32.totalorder %s4107_s29, %s6143_s2 }
  0x25   : > { %p4109_p6 = scmp.ne.s32.totalorder %s4107_s29, %s4108_s4  ;;  %p4115_p13 = scmp.lt.s32.totalorder %s4113_s12, %s4108_s4 }
  0x27   : > { %p4111_p9 = pnand %p4109_p6, %p4080_p10  ;;  %p4116_p0 = por %p4115_p13, %p4114_p12 }
  0x29   : > { %p4112_p11 = pneg %p4111_p9 }
  0x2b   : > { %p4117_p1 = pnand %p4116_p0, %p4112_p11 }
  0x2d   : > { %4120 = shalt.err (!%p4117_p1)
}
  0x2e   : > { %4033 = dma.hbm_to_vmem [thread:$0]  (!%p4243_p8), %s172_s9, 32, %s174_s30, %s162_s10  }
  0x2f   : > { %182 = sbr.rel (%p4267_p5) target bundleno = 1041 (0x411), region = 32  ;;  %s184_s22 = sand.u32 (!%p4267_p5), 1, %s4166_s13  }
  0x30   : > { %s4022_s23 = smul.u32 (!%p4267_p5), 12544, %s184_s22  ;;  %s185_s24 = scalar_lea.sflag (!%p4267_p5), [#allocation3], %s184_s22 }
  0x32   : > { %s4290_s27 = scalar_lea.vmem (!%p4267_p5), [#allocation2], %s4022_s23 }
  0x34   : > { %4153 = dma.done.wait (%p4234_p7), %s185_s24, 200704  }
  0x35   : > { %4155 = vsyncadd (%p4234_p7), %s185_s24, 4294766592  ;;  %s4015_s28 = sshll.u32 %s184_s22, 1  ;;  %s195_s6 = scalar_lea.sflag [#allocation5], %s184_s22 }
  0x36   : > { %s4296_s25 = scalar_lea.vmem [#allocation4], %s4015_s28 }
  0x37   : > { %4157 = dma.done.wait (%p4234_p7), %s195_s6, 32  }
  0x38   : > { %4159 = vsyncadd (%p4234_p7), %s195_s6, 4294967264  ;;  %v278_v0 = vld [vmem:[%s4290_s27 + $0xf0] sm:$0xff]  ;;  %v276_v2 = vld [vmem:[%s4290_s27 + $0xe0] sm:$0xff]  ;;  %vm3912_vm0 = vcmask 1041408  }
  0x39   : > { %v342_v1 = vld [vmem:[%s4290_s27 + $0x2f0] sm:$0xff]  ;;  %1947 = vmatpush.msra.mxu0 %v278_v0  ;;  %v340_v4 = vld [vmem:[%s4290_s27 + $0x2e0] sm:$0xff] }
  0x3a   : > { %1987 = vmatpush.msra.mxu2 %v342_v1  ;;  %v310_v3 = vld [vmem:[%s4290_s27 + $0x1f0] sm:$0xff]  ;;  %v308_v7 = vld [vmem:[%s4290_s27 + $0x1e0] sm:$0xff] }
  0x3b   : > { %v374_v5 = vld [vmem:[%s4290_s27 + $0x3f0] sm:$0xff]  ;;  %1967 = vmatpush.msra.mxu1 %v310_v3  ;;  %1948 = vmatpush.msra.mxu0 %v276_v2  ;;  %v372_v9 = vld [vmem:[%s4290_s27 + $0x3e0] sm:$0xff] }
  0x3c   : > { %2007 = vmatpush.msra.mxu3 %v374_v5  ;;  %v274_v6 = vld [vmem:[%s4290_s27 + $0xd0] sm:$0xff]  ;;  %1988 = vmatpush.msra.mxu2 %v340_v4  ;;  %v272_v11 = vld [vmem:[%s4290_s27 + $0xc0] sm:$0xff] }
  0x3d   : > { %v338_v8 = vld [vmem:[%s4290_s27 + $0x2d0] sm:$0xff]  ;;  %1968 = vmatpush.msra.mxu1 %v308_v7  ;;  %v336_v12 = vld [vmem:[%s4290_s27 + $0x2c0] sm:$0xff]  ;;  %1949 = vmatpush.msra.mxu0 %v274_v6 }
  0x3e   : > { %v306_v10 = vld [vmem:[%s4290_s27 + $0x1d0] sm:$0xff]  ;;  %2008 = vmatpush.msra.mxu3 %v372_v9  ;;  %1989 = vmatpush.msra.mxu2 %v338_v8  ;;  %v304_v14 = vld [vmem:[%s4290_s27 + $0x1c0] sm:$0xff] }
  0x3f   : > { %v370_v13 = vld [vmem:[%s4290_s27 + $0x3d0] sm:$0xff]  ;;  %v368_v15 = vld [vmem:[%s4290_s27 + $0x3c0] sm:$0xff]  ;;  %1969 = vmatpush.msra.mxu1 %v306_v10  ;;  %1950 = vmatpush.msra.mxu0 %v272_v11 }
  0x40   : > { %2009 = vmatpush.msra.mxu3 %v370_v13  ;;  %v270_v16 = vld [vmem:[%s4290_s27 + $0xb0] sm:$0xff]  ;;  %1990 = vmatpush.msra.mxu2 %v336_v12  ;;  %v268_v20 = vld [vmem:[%s4290_s27 + $0xa0] sm:$0xff] }
  0x41   : > { %v334_v17 = vld [vmem:[%s4290_s27 + $0x2b0] sm:$0xff]  ;;  %1970 = vmatpush.msra.mxu1 %v304_v14  ;;  %v332_v21 = vld [vmem:[%s4290_s27 + $0x2a0] sm:$0xff]  ;;  %1951 = vmatpush.msra.mxu0 %v270_v16 }
  0x42   : > { %v302_v18 = vld [vmem:[%s4290_s27 + $0x1b0] sm:$0xff]  ;;  %2010 = vmatpush.msra.mxu3 %v368_v15  ;;  %1991 = vmatpush.msra.mxu2 %v334_v17  ;;  %v300_v22 = vld [vmem:[%s4290_s27 + $0x1a0] sm:$0xff] }
  0x43   : > { %v366_v19 = vld [vmem:[%s4290_s27 + $0x3b0] sm:$0xff]  ;;  %v364_v23 = vld [vmem:[%s4290_s27 + $0x3a0] sm:$0xff]  ;;  %1971 = vmatpush.msra.mxu1 %v302_v18  ;;  %1952 = vmatpush.msra.mxu0 %v268_v20 }
  0x44   : > { %2011 = vmatpush.msra.mxu3 %v366_v19  ;;  %v266_v24 = vld [vmem:[%s4290_s27 + $0x90] sm:$0xff]  ;;  %1992 = vmatpush.msra.mxu2 %v332_v21  ;;  %v264_v28 = vld [vmem:[%s4290_s27 + $0x80] sm:$0xff] }
  0x45   : > { %v330_v25 = vld [vmem:[%s4290_s27 + $0x290] sm:$0xff]  ;;  %1972 = vmatpush.msra.mxu1 %v300_v22  ;;  %v328_v29 = vld [vmem:[%s4290_s27 + $0x280] sm:$0xff]  ;;  %1953 = vmatpush.msra.mxu0 %v266_v24  ;;  %v235_v22 = vld [vmem:[%s6141_s0] sm:$0xff] }
  0x46   : > { %v298_v26 = vld [vmem:[%s4290_s27 + $0x190] sm:$0xff]  ;;  %2012 = vmatpush.msra.mxu3 %v364_v23  ;;  %1993 = vmatpush.msra.mxu2 %v330_v25  ;;  %v296_v30 = vld [vmem:[%s4290_s27 + $0x180] sm:$0xff]  ;;  %1835 = vst [vmem:[#allocation1] ss:$4 sm:$0xff] %v235_v22 }
  0x47   : > { %v362_v27 = vld [vmem:[%s4290_s27 + $0x390] sm:$0xff]  ;;  %v360_v31 = vld [vmem:[%s4290_s27 + $0x380] sm:$0xff]  ;;  %1973 = vmatpush.msra.mxu1 %v298_v26  ;;  %1954 = vmatpush.msra.mxu0 %v264_v28 }
  0x48   : > { %2013 = vmatpush.msra.mxu3 %v362_v27  ;;  %v262_v32 = vld [vmem:[%s4290_s27 + $0x70] sm:$0xff]  ;;  %1994 = vmatpush.msra.mxu2 %v328_v29  ;;  %v260_v36 = vld [vmem:[%s4290_s27 + $0x60] sm:$0xff] }
  0x49   : > { %v326_v33 = vld [vmem:[%s4290_s27 + $0x270] sm:$0xff]  ;;  %1974 = vmatpush.msra.mxu1 %v296_v30  ;;  %v324_v37 = vld [vmem:[%s4290_s27 + $0x260] sm:$0xff]  ;;  %1955 = vmatpush.msra.mxu0 %v262_v32 }
  0x4a   : > { %v294_v34 = vld [vmem:[%s4290_s27 + $0x170] sm:$0xff]  ;;  %2014 = vmatpush.msra.mxu3 %v360_v31  ;;  %1995 = vmatpush.msra.mxu2 %v326_v33  ;;  %v292_v38 = vld [vmem:[%s4290_s27 + $0x160] sm:$0xff] }
  0x4b   : > { %v358_v35 = vld [vmem:[%s4290_s27 + $0x370] sm:$0xff]  ;;  %v356_v39 = vld [vmem:[%s4290_s27 + $0x360] sm:$0xff]  ;;  %1975 = vmatpush.msra.mxu1 %v294_v34  ;;  %1956 = vmatpush.msra.mxu0 %v260_v36 }
  0x4c   : > { %2015 = vmatpush.msra.mxu3 %v358_v35  ;;  %v258_v40 = vld [vmem:[%s4290_s27 + $0x50] sm:$0xff]  ;;  %1996 = vmatpush.msra.mxu2 %v324_v37  ;;  %v256_v44 = vld [vmem:[%s4290_s27 + $0x40] sm:$0xff] }
  0x4d   : > { %v322_v41 = vld [vmem:[%s4290_s27 + $0x250] sm:$0xff]  ;;  %1976 = vmatpush.msra.mxu1 %v292_v38  ;;  %v320_v45 = vld [vmem:[%s4290_s27 + $0x240] sm:$0xff]  ;;  %1957 = vmatpush.msra.mxu0 %v258_v40 }
  0x4e   : > { %v290_v42 = vld [vmem:[%s4290_s27 + $0x150] sm:$0xff]  ;;  %2016 = vmatpush.msra.mxu3 %v356_v39  ;;  %1997 = vmatpush.msra.mxu2 %v322_v41  ;;  %v288_v46 = vld [vmem:[%s4290_s27 + $0x140] sm:$0xff] }
  0x4f   : > { %v354_v43 = vld [vmem:[%s4290_s27 + $0x350] sm:$0xff]  ;;  %v352_v47 = vld [vmem:[%s4290_s27 + $0x340] sm:$0xff]  ;;  %1977 = vmatpush.msra.mxu1 %v290_v42  ;;  %1958 = vmatpush.msra.mxu0 %v256_v44  ;;  %v237_v42 = vld [vmem:[%s6141_s0 + $0x10] sm:$0xff] }
  0x50   : > { %2017 = vmatpush.msra.mxu3 %v354_v43  ;;  %v254_v48 = vld [vmem:[%s4290_s27 + $0x30] sm:$0xff]  ;;  %1998 = vmatpush.msra.mxu2 %v320_v45  ;;  %v252_v52 = vld [vmem:[%s4290_s27 + $0x20] sm:$0xff]  ;;  %v4416_v44 = vld.sshfl [vmem:[#allocation1 + $0x10] sm:$0xff pattern:$0x73625140] }
  0x51   : > { %v318_v49 = vld [vmem:[%s4290_s27 + $0x230] sm:$0xff]  ;;  %1978 = vmatpush.msra.mxu1 %v288_v46  ;;  %v316_v53 = vld [vmem:[%s4290_s27 + $0x220] sm:$0xff]  ;;  %1959 = vmatpush.msra.mxu0 %v254_v48  ;;  %v4418_v45 = vld.sshfl [vmem:[#allocation1] sm:$0xff pattern:$0x73625140] }
  0x52   : > { %v286_v50 = vld [vmem:[%s4290_s27 + $0x130] sm:$0xff]  ;;  %2018 = vmatpush.msra.mxu3 %v352_v47  ;;  %1999 = vmatpush.msra.mxu2 %v318_v49  ;;  %v284_v54 = vld [vmem:[%s4290_s27 + $0x120] sm:$0xff] }
  0x53   : > { %v350_v51 = vld [vmem:[%s4290_s27 + $0x330] sm:$0xff]  ;;  %v348_v55 = vld [vmem:[%s4290_s27 + $0x320] sm:$0xff]  ;;  %1979 = vmatpush.msra.mxu1 %v286_v50  ;;  %1960 = vmatpush.msra.mxu0 %v252_v52 }
  0x54   : > { %2019 = vmatpush.msra.mxu3 %v350_v51  ;;  %v250_v56 = vld [vmem:[%s4290_s27 + $0x10] sm:$0xff]  ;;  %2000 = vmatpush.msra.mxu2 %v316_v53  ;;  %v248_v60 = vld [vmem:[%s4290_s27] sm:$0xff] }
  0x55   : > { %v314_v57 = vld [vmem:[%s4290_s27 + $0x210] sm:$0xff]  ;;  %1980 = vmatpush.msra.mxu1 %v284_v54  ;;  %v312_v61 = vld [vmem:[%s4290_s27 + $0x200] sm:$0xff]  ;;  %1961 = vmatpush.msra.mxu0 %v250_v56 }
  0x56   : > { %v282_v58 = vld [vmem:[%s4290_s27 + $0x110] sm:$0xff]  ;;  %2020 = vmatpush.msra.mxu3 %v348_v55  ;;  %2001 = vmatpush.msra.mxu2 %v314_v57  ;;  %v280_v0 = vld [vmem:[%s4290_s27 + $0x100] sm:$0xff] }
  0x57   : > { %v346_v59 = vld [vmem:[%s4290_s27 + $0x310] sm:$0xff]  ;;  %1981 = vmatpush.msra.mxu1 %v282_v58  ;;  %v344_v1 = vld [vmem:[%s4290_s27 + $0x300] sm:$0xff]  ;;  %1962 = vmatpush.msra.mxu0 %v248_v60 }
  0x58   : > { %v406_v62 = vld [vmem:[%s4290_s27 + $0x4f0] sm:$0xff]  ;;  %2021 = vmatpush.msra.mxu3 %v346_v59  ;;  %2002 = vmatpush.msra.mxu2 %v312_v61  ;;  %v404_v2 = vld [vmem:[%s4290_s27 + $0x4e0] sm:$0xff] }
  0x59   : > { %v470_v63 = vld [vmem:[%s4290_s27 + $0x6f0] sm:$0xff]  ;;  %2027 = vmatpush.msrb.mxu0 %v406_v62  ;;  %v468_v4 = vld [vmem:[%s4290_s27 + $0x6e0] sm:$0xff]  ;;  %1982 = vmatpush.msra.mxu1 %v280_v0 }
  0x5a   : > { %v438_v3 = vld [vmem:[%s4290_s27 + $0x5f0] sm:$0xff]  ;;  %2067 = vmatpush.msrb.mxu2 %v470_v63  ;;  %2022 = vmatpush.msra.mxu3 %v344_v1  ;;  %v436_v7 = vld [vmem:[%s4290_s27 + $0x5e0] sm:$0xff] }
  0x5b   : > { %v502_v5 = vld [vmem:[%s4290_s27 + $0x7f0] sm:$0xff]  ;;  %2028 = vmatpush.msrb.mxu0 %v404_v2  ;;  %2047 = vmatpush.msrb.mxu1 %v438_v3  ;;  %v500_v9 = vld [vmem:[%s4290_s27 + $0x7e0] sm:$0xff] }
  0x5c   : > { %v402_v6 = vld [vmem:[%s4290_s27 + $0x4d0] sm:$0xff]  ;;  %2068 = vmatpush.msrb.mxu2 %v468_v4  ;;  %2087 = vmatpush.msrb.mxu3 %v502_v5  ;;  %v400_v10 = vld [vmem:[%s4290_s27 + $0x4c0] sm:$0xff] }
  0x5d   : > { %v466_v8 = vld [vmem:[%s4290_s27 + $0x6d0] sm:$0xff]  ;;  %2029 = vmatpush.msrb.mxu0 %v402_v6  ;;  %2048 = vmatpush.msrb.mxu1 %v436_v7  ;;  %v464_v12 = vld [vmem:[%s4290_s27 + $0x6c0] sm:$0xff] }
  0x5e   : > { %v434_v11 = vld [vmem:[%s4290_s27 + $0x5d0] sm:$0xff]  ;;  %2069 = vmatpush.msrb.mxu2 %v466_v8  ;;  %2088 = vmatpush.msrb.mxu3 %v500_v9  ;;  %v432_v15 = vld [vmem:[%s4290_s27 + $0x5c0] sm:$0xff] }
  0x5f   : > { %v498_v13 = vld [vmem:[%s4290_s27 + $0x7d0] sm:$0xff]  ;;  %2030 = vmatpush.msrb.mxu0 %v400_v10  ;;  %2049 = vmatpush.msrb.mxu1 %v434_v11  ;;  %v496_v17 = vld [vmem:[%s4290_s27 + $0x7c0] sm:$0xff] }
  0x60   : > { %v398_v14 = vld [vmem:[%s4290_s27 + $0x4b0] sm:$0xff]  ;;  %2070 = vmatpush.msrb.mxu2 %v464_v12  ;;  %2089 = vmatpush.msrb.mxu3 %v498_v13  ;;  %v396_v18 = vld [vmem:[%s4290_s27 + $0x4a0] sm:$0xff] }
  0x61   : > { %v462_v16 = vld [vmem:[%s4290_s27 + $0x6b0] sm:$0xff]  ;;  %2031 = vmatpush.msrb.mxu0 %v398_v14  ;;  %2050 = vmatpush.msrb.mxu1 %v432_v15  ;;  %v460_v20 = vld [vmem:[%s4290_s27 + $0x6a0] sm:$0xff] }
  0x62   : > { %v430_v19 = vld [vmem:[%s4290_s27 + $0x5b0] sm:$0xff]  ;;  %2071 = vmatpush.msrb.mxu2 %v462_v16  ;;  %2090 = vmatpush.msrb.mxu3 %v496_v17  ;;  %v428_v24 = vld [vmem:[%s4290_s27 + $0x5a0] sm:$0xff] }
  0x63   : > { %v494_v21 = vld [vmem:[%s4290_s27 + $0x7b0] sm:$0xff]  ;;  %2032 = vmatpush.msrb.mxu0 %v396_v18  ;;  %2051 = vmatpush.msrb.mxu1 %v430_v19  ;;  %v492_v26 = vld [vmem:[%s4290_s27 + $0x7a0] sm:$0xff] }
  0x64   : > { %v394_v23 = vld [vmem:[%s4290_s27 + $0x490] sm:$0xff]  ;;  %v392_v27 = vld [vmem:[%s4290_s27 + $0x480] sm:$0xff]  ;;  %2072 = vmatpush.msrb.mxu2 %v460_v20  ;;  %2091 = vmatpush.msrb.mxu3 %v494_v21 }
  0x65   : > { %v458_v25 = vld [vmem:[%s4290_s27 + $0x690] sm:$0xff]  ;;  %v456_v29 = vld [vmem:[%s4290_s27 + $0x680] sm:$0xff]  ;;  %2033 = vmatpush.msrb.mxu0 %v394_v23  ;;  %2052 = vmatpush.msrb.mxu1 %v428_v24 }
  0x66   : > { %v426_v28 = vld [vmem:[%s4290_s27 + $0x590] sm:$0xff]  ;;  %v424_v32 = vld [vmem:[%s4290_s27 + $0x580] sm:$0xff]  ;;  %2073 = vmatpush.msrb.mxu2 %v458_v25  ;;  %2092 = vmatpush.msrb.mxu3 %v492_v26 }
  0x67   : > { %v490_v30 = vld [vmem:[%s4290_s27 + $0x790] sm:$0xff]  ;;  %v488_v34 = vld [vmem:[%s4290_s27 + $0x780] sm:$0xff]  ;;  %2034 = vmatpush.msrb.mxu0 %v392_v27  ;;  %2053 = vmatpush.msrb.mxu1 %v426_v28 }
  0x68   : > { %v390_v31 = vld [vmem:[%s4290_s27 + $0x470] sm:$0xff]  ;;  %v388_v35 = vld [vmem:[%s4290_s27 + $0x460] sm:$0xff]  ;;  %2074 = vmatpush.msrb.mxu2 %v456_v29  ;;  %2093 = vmatpush.msrb.mxu3 %v490_v30 }
  0x69   : > { %v454_v33 = vld [vmem:[%s4290_s27 + $0x670] sm:$0xff]  ;;  %v452_v37 = vld [vmem:[%s4290_s27 + $0x660] sm:$0xff]  ;;  %2035 = vmatpush.msrb.mxu0 %v390_v31  ;;  %2054 = vmatpush.msrb.mxu1 %v424_v32 }
  0x6a   : > { %v422_v36 = vld [vmem:[%s4290_s27 + $0x570] sm:$0xff]  ;;  %v236_v39 = vld [vmem:[%s6141_s0 + $0x8] sm:$0xff]  ;;  %2075 = vmatpush.msrb.mxu2 %v454_v33  ;;  %2094 = vmatpush.msrb.mxu3 %v488_v34 }
  0x6b   : > { %v486_v38 = vld [vmem:[%s4290_s27 + $0x770] sm:$0xff]  ;;  %v420_v41 = vld [vmem:[%s4290_s27 + $0x560] sm:$0xff]  ;;  %1837 = vst [vmem:[#allocation1 + $0x20] ss:$4 sm:$0xff] %v236_v39  ;;  %2036 = vmatpush.msrb.mxu0 %v388_v35  ;;  %2055 = vmatpush.msrb.mxu1 %v422_v36 }
  0x6c   : > { %v386_v40 = vld [vmem:[%s4290_s27 + $0x450] sm:$0xff]  ;;  %v4422_v47 = vld.sshfl [vmem:[#allocation1 + $0x8] sm:$0xff pattern:$0x73625140]  ;;  %2076 = vmatpush.msrb.mxu2 %v452_v37  ;;  %2095 = vmatpush.msrb.mxu3 %v486_v38 }
  0x6d   : > { %v450_v43 = vld [vmem:[%s4290_s27 + $0x650] sm:$0xff]  ;;  %v484_v48 = vld [vmem:[%s4290_s27 + $0x760] sm:$0xff]  ;;  %2037 = vmatpush.msrb.mxu0 %v386_v40  ;;  %2056 = vmatpush.msrb.mxu1 %v420_v41 }
  0x6e   : > { %v4420_v46 = vld.sshfl [vmem:[#allocation1 + $0x18] sm:$0xff pattern:$0x73625140]  ;;  %v384_v49 = vld [vmem:[%s4290_s27 + $0x440] sm:$0xff]  ;;  %2077 = vmatpush.msrb.mxu2 %v450_v43  ;;  %2096 = vmatpush.msrb.mxu3 %v484_v48 }
  0x6f   : > { %v418_v50 = vld [vmem:[%s4290_s27 + $0x550] sm:$0xff]  ;;  %1846 = vst [vmem:[#allocation1] ss:$4 sm:$0xff] %v237_v42  ;;  %v448_v51 = vld [vmem:[%s4290_s27 + $0x640] sm:$0xff]  ;;  %2038 = vmatpush.msrb.mxu0 %v384_v49  ;;  %2003 = vmatmul.f32.vlgmr.msra.gmra.mxu2 %v4416_v44 }
  0x70   : > { %v482_v52 = vld [vmem:[%s4290_s27 + $0x750] sm:$0xff]  ;;  %v416_v54 = vld [vmem:[%s4290_s27 + $0x540] sm:$0xff]  ;;  %2057 = vmatpush.msrb.mxu1 %v418_v50  ;;  %2078 = vmatpush.msrb.mxu2 %v448_v51 }
  0x71   : > { %v382_v53 = vld [vmem:[%s4290_s27 + $0x430] sm:$0xff]  ;;  %v480_v56 = vld [vmem:[%s4290_s27 + $0x740] sm:$0xff]  ;;  %2097 = vmatpush.msrb.mxu3 %v482_v52  ;;  %1963 = vmatmul.f32.vlgmr.msra.gmra.mxu0 %v4418_v45 }
  0x72   : > { %v446_v55 = vld [vmem:[%s4290_s27 + $0x630] sm:$0xff]  ;;  %v380_v57 = vld [vmem:[%s4290_s27 + $0x420] sm:$0xff]  ;;  %v4438_v60 = vld.sshfl [vmem:[#allocation1 + $0x30] sm:$0xff pattern:$0x73625140]  ;;  %2039 = vmatpush.msrb.mxu0 %v382_v53  ;;  %2058 = vmatpush.msrb.mxu1 %v416_v54 }
  0x73   : > { %v414_v58 = vld [vmem:[%s4290_s27 + $0x530] sm:$0xff]  ;;  %v4440_v61 = vld.sshfl [vmem:[#allocation1 + $0x20] sm:$0xff pattern:$0x73625140]  ;;  %v444_v0 = vld [vmem:[%s4290_s27 + $0x620] sm:$0xff]  ;;  %2079 = vmatpush.msrb.mxu2 %v446_v55  ;;  %2098 = vmatpush.msrb.mxu3 %v480_v56 }
  0x74   : > { %v238_v59 = vld [vmem:[%s6141_s0 + $0x18] sm:$0xff]  ;;  %v4444_v63 = vld.sshfl [vmem:[#allocation1 + $0x28] sm:$0xff pattern:$0x73625140]  ;;  %2040 = vmatpush.msrb.mxu0 %v380_v57  ;;  %2059 = vmatpush.msrb.mxu1 %v414_v58 }
  0x75   : > { %v4442_v62 = vld.sshfl [vmem:[#allocation1 + $0x38] sm:$0xff pattern:$0x73625140]  ;;  %v412_v3 = vld [vmem:[%s4290_s27 + $0x520] sm:$0xff]  ;;  %2080 = vmatpush.msrb.mxu2 %v444_v0  ;;  %2023 = vmatmul.f32.vlgmr.msra.gmra.mxu3 %v4420_v46 }
  0x76   : > { %v478_v1 = vld [vmem:[%s4290_s27 + $0x730] sm:$0xff]  ;;  %1847 = vst [vmem:[#allocation1 + $0x20] ss:$4 sm:$0xff] %v238_v59  ;;  %v476_v5 = vld [vmem:[%s4290_s27 + $0x720] sm:$0xff]  ;;  %2060 = vmatpush.msrb.mxu1 %v412_v3 }
  0x77   : > { %v378_v2 = vld [vmem:[%s4290_s27 + $0x410] sm:$0xff]  ;;  %2099 = vmatpush.msrb.mxu3 %v478_v1  ;;  %v376_v6 = vld [vmem:[%s4290_s27 + $0x400] sm:$0xff]  ;;  %1983 = vmatmul.f32.vlgmr.msra.gmra.mxu1 %v4422_v47 }
  0x78   : > { %v442_v4 = vld [vmem:[%s4290_s27 + $0x610] sm:$0xff]  ;;  %2041 = vmatpush.msrb.mxu0 %v378_v2  ;;  %v440_v8 = vld [vmem:[%s4290_s27 + $0x600] sm:$0xff] }
  0x79   : > { %v410_v7 = vld [vmem:[%s4290_s27 + $0x510] sm:$0xff]  ;;  %2081 = vmatpush.msrb.mxu2 %v442_v4  ;;  %2100 = vmatpush.msrb.mxu3 %v476_v5  ;;  %v408_v12 = vld [vmem:[%s4290_s27 + $0x500] sm:$0xff] }
  0x7a   : > { %v474_v9 = vld [vmem:[%s4290_s27 + $0x710] sm:$0xff]  ;;  %2042 = vmatpush.msrb.mxu0 %v376_v6  ;;  %2061 = vmatpush.msrb.mxu1 %v410_v7  ;;  %v472_v13 = vld [vmem:[%s4290_s27 + $0x700] sm:$0xff] }
  0x7b   : > { %v534_v10 = vld [vmem:[%s4290_s27 + $0x8f0] sm:$0xff]  ;;  %2082 = vmatpush.msrb.mxu2 %v440_v8  ;;  %2101 = vmatpush.msrb.mxu3 %v474_v9  ;;  %v532_v14 = vld [vmem:[%s4290_s27 + $0x8e0] sm:$0xff] }
  0x7c   : > { %v598_v11 = vld [vmem:[%s4290_s27 + $0xaf0] sm:$0xff]  ;;  %2107 = vmatpush.msra.mxu0 %v534_v10  ;;  %2062 = vmatpush.msrb.mxu1 %v408_v12  ;;  %v596_v16 = vld [vmem:[%s4290_s27 + $0xae0] sm:$0xff] }
  0x7d   : > { %v566_v15 = vld [vmem:[%s4290_s27 + $0x9f0] sm:$0xff]  ;;  %2147 = vmatpush.msra.mxu2 %v598_v11  ;;  %2102 = vmatpush.msrb.mxu3 %v472_v13  ;;  %v564_v19 = vld [vmem:[%s4290_s27 + $0x9e0] sm:$0xff] }
  0x7e   : > { %v630_v17 = vld [vmem:[%s4290_s27 + $0xbf0] sm:$0xff]  ;;  %2108 = vmatpush.msra.mxu0 %v532_v14  ;;  %2127 = vmatpush.msra.mxu1 %v566_v15  ;;  %v628_v21 = vld [vmem:[%s4290_s27 + $0xbe0] sm:$0xff] }
  0x7f   : > { %v530_v18 = vld [vmem:[%s4290_s27 + $0x8d0] sm:$0xff]  ;;  %2148 = vmatpush.msra.mxu2 %v596_v16  ;;  %2167 = vmatpush.msra.mxu3 %v630_v17  ;;  %v528_v22 = vld [vmem:[%s4290_s27 + $0x8c0] sm:$0xff] }
  0x80   : > { %v594_v20 = vld [vmem:[%s4290_s27 + $0xad0] sm:$0xff]  ;;  %2109 = vmatpush.msra.mxu0 %v530_v18  ;;  %2128 = vmatpush.msra.mxu1 %v564_v19  ;;  %v592_v24 = vld [vmem:[%s4290_s27 + $0xac0] sm:$0xff]  ;;  %v4528_v18 = vld.sshfl [vmem:[#allocation1] sm:$0xff pattern:$0x73625140] }
  0x81   : > { %v562_v23 = vld [vmem:[%s4290_s27 + $0x9d0] sm:$0xff]  ;;  %2149 = vmatpush.msra.mxu2 %v594_v20  ;;  %2168 = vmatpush.msra.mxu3 %v628_v21  ;;  %v560_v27 = vld [vmem:[%s4290_s27 + $0x9c0] sm:$0xff]  ;;  %v4530_v19 = vld.sshfl [vmem:[#allocation1 + $0x10] sm:$0xff pattern:$0x73625140] }
  0x82   : > { %v626_v25 = vld [vmem:[%s4290_s27 + $0xbd0] sm:$0xff]  ;;  %2083 = vmatmul.f32.vlgmr.msrb.gmra.mxu2 %v4438_v60  ;;  %2110 = vmatpush.msra.mxu0 %v528_v22  ;;  %v624_v29 = vld [vmem:[%s4290_s27 + $0xbc0] sm:$0xff] }
  0x83   : > { %v526_v26 = vld [vmem:[%s4290_s27 + $0x8b0] sm:$0xff]  ;;  %2129 = vmatpush.msra.mxu1 %v562_v23  ;;  %2150 = vmatpush.msra.mxu2 %v592_v24  ;;  %v524_v30 = vld [vmem:[%s4290_s27 + $0x8a0] sm:$0xff] }
  0x84   : > { %v590_v28 = vld [vmem:[%s4290_s27 + $0xab0] sm:$0xff]  ;;  %2169 = vmatpush.msra.mxu3 %v626_v25  ;;  %2043 = vmatmul.f32.vlgmr.msrb.gmra.mxu0 %v4440_v61  ;;  %v588_v32 = vld [vmem:[%s4290_s27 + $0xaa0] sm:$0xff] }
  0x85   : > { %2103 = vmatmul.f32.vlgmr.msrb.gmra.mxu3 %v4442_v62  ;;  %2111 = vmatpush.msra.mxu0 %v526_v26  ;;  %v558_v31 = vld [vmem:[%s4290_s27 + $0x9b0] sm:$0xff]  ;;  %v556_v35 = vld [vmem:[%s4290_s27 + $0x9a0] sm:$0xff] }
  0x86   : > { %2130 = vmatpush.msra.mxu1 %v560_v27  ;;  %2151 = vmatpush.msra.mxu2 %v590_v28  ;;  %v622_v33 = vld [vmem:[%s4290_s27 + $0xbb0] sm:$0xff]  ;;  %v620_v37 = vld [vmem:[%s4290_s27 + $0xba0] sm:$0xff] }
  0x87   : > { %2170 = vmatpush.msra.mxu3 %v624_v29  ;;  %2063 = vmatmul.f32.vlgmr.msrb.gmra.mxu1 %v4444_v63  ;;  %v522_v34 = vld [vmem:[%s4290_s27 + $0x890] sm:$0xff]  ;;  %v520_v38 = vld [vmem:[%s4290_s27 + $0x880] sm:$0xff] }
  0x88   : > { %2112 = vmatpush.msra.mxu0 %v524_v30  ;;  %2131 = vmatpush.msra.mxu1 %v558_v31  ;;  %v586_v36 = vld [vmem:[%s4290_s27 + $0xa90] sm:$0xff]  ;;  %v584_v40 = vld [vmem:[%s4290_s27 + $0xa80] sm:$0xff] }
  0x89   : > { %2152 = vmatpush.msra.mxu2 %v588_v32  ;;  %2171 = vmatpush.msra.mxu3 %v622_v33  ;;  %v554_v39 = vld [vmem:[%s4290_s27 + $0x990] sm:$0xff]  ;;  %v552_v43 = vld [vmem:[%s4290_s27 + $0x980] sm:$0xff] }
  0x8a   : > { %2113 = vmatpush.msra.mxu0 %v522_v34  ;;  %2132 = vmatpush.msra.mxu1 %v556_v35  ;;  %v618_v41 = vld [vmem:[%s4290_s27 + $0xb90] sm:$0xff]  ;;  %v616_v49 = vld [vmem:[%s4290_s27 + $0xb80] sm:$0xff] }
  0x8b   : > { %2153 = vmatpush.msra.mxu2 %v586_v36  ;;  %2172 = vmatpush.msra.mxu3 %v620_v37  ;;  %v518_v42 = vld [vmem:[%s4290_s27 + $0x870] sm:$0xff]  ;;  %v516_v50 = vld [vmem:[%s4290_s27 + $0x860] sm:$0xff] }
  0x8c   : > { %2114 = vmatpush.msra.mxu0 %v520_v38  ;;  %2133 = vmatpush.msra.mxu1 %v554_v39  ;;  %v582_v48 = vld [vmem:[%s4290_s27 + $0xa70] sm:$0xff]  ;;  %v580_v52 = vld [vmem:[%s4290_s27 + $0xa60] sm:$0xff] }
  0x8d   : > { %2154 = vmatpush.msra.mxu2 %v584_v40  ;;  %2173 = vmatpush.msra.mxu3 %v618_v41  ;;  %v550_v51 = vld [vmem:[%s4290_s27 + $0x970] sm:$0xff]  ;;  %v548_v55 = vld [vmem:[%s4290_s27 + $0x960] sm:$0xff] }
  0x8e   : > { %2115 = vmatpush.msra.mxu0 %v518_v42  ;;  %2134 = vmatpush.msra.mxu1 %v552_v43  ;;  %v614_v53 = vld [vmem:[%s4290_s27 + $0xb70] sm:$0xff]  ;;  %v612_v57 = vld [vmem:[%s4290_s27 + $0xb60] sm:$0xff] }
  0x8f   : > { %2155 = vmatpush.msra.mxu2 %v582_v48  ;;  %2174 = vmatpush.msra.mxu3 %v616_v49  ;;  %v514_v54 = vld [vmem:[%s4290_s27 + $0x850] sm:$0xff]  ;;  %v512_v58 = vld [vmem:[%s4290_s27 + $0x840] sm:$0xff] }
  0x90   : > { %2116 = vmatpush.msra.mxu0 %v516_v50  ;;  %2135 = vmatpush.msra.mxu1 %v550_v51  ;;  %v578_v56 = vld [vmem:[%s4290_s27 + $0xa50] sm:$0xff]  ;;  %v576_v0 = vld [vmem:[%s4290_s27 + $0xa40] sm:$0xff] }
  0x91   : > { %2156 = vmatpush.msra.mxu2 %v580_v52  ;;  %2175 = vmatpush.msra.mxu3 %v614_v53  ;;  %v546_v59 = vld [vmem:[%s4290_s27 + $0x950] sm:$0xff]  ;;  %v544_v3 = vld [vmem:[%s4290_s27 + $0x940] sm:$0xff] }
  0x92   : > { %2117 = vmatpush.msra.mxu0 %v514_v54  ;;  %2136 = vmatpush.msra.mxu1 %v548_v55  ;;  %v610_v1 = vld [vmem:[%s4290_s27 + $0xb50] sm:$0xff]  ;;  %v608_v5 = vld [vmem:[%s4290_s27 + $0xb40] sm:$0xff] }
  0x93   : > { %2157 = vmatpush.msra.mxu2 %v578_v56  ;;  %2176 = vmatpush.msra.mxu3 %v612_v57  ;;  %v510_v2 = vld [vmem:[%s4290_s27 + $0x830] sm:$0xff]  ;;  %v508_v6 = vld [vmem:[%s4290_s27 + $0x820] sm:$0xff] }
  0x94   : > { %2118 = vmatpush.msra.mxu0 %v512_v58  ;;  %2137 = vmatpush.msra.mxu1 %v546_v59  ;;  %v574_v4 = vld [vmem:[%s4290_s27 + $0xa30] sm:$0xff]  ;;  %v572_v8 = vld [vmem:[%s4290_s27 + $0xa20] sm:$0xff] }
  0x95   : > { %2158 = vmatpush.msra.mxu2 %v576_v0  ;;  %2177 = vmatpush.msra.mxu3 %v610_v1  ;;  %v542_v7 = vld [vmem:[%s4290_s27 + $0x930] sm:$0xff]  ;;  %v540_v11 = vld [vmem:[%s4290_s27 + $0x920] sm:$0xff] }
  0x96   : > { %2119 = vmatpush.msra.mxu0 %v510_v2  ;;  %2138 = vmatpush.msra.mxu1 %v544_v3  ;;  %v606_v9 = vld [vmem:[%s4290_s27 + $0xb30] sm:$0xff]  ;;  %v604_v13 = vld [vmem:[%s4290_s27 + $0xb20] sm:$0xff] }
  0x97   : > { %2159 = vmatpush.msra.mxu2 %v574_v4  ;;  %2178 = vmatpush.msra.mxu3 %v608_v5  ;;  %v506_v10 = vld [vmem:[%s4290_s27 + $0x810] sm:$0xff]  ;;  %v504_v14 = vld [vmem:[%s4290_s27 + $0x800] sm:$0xff] }
  0x98   : > { %2120 = vmatpush.msra.mxu0 %v508_v6  ;;  %2139 = vmatpush.msra.mxu1 %v542_v7  ;;  %v570_v12 = vld [vmem:[%s4290_s27 + $0xa10] sm:$0xff]  ;;  %v568_v16 = vld [vmem:[%s4290_s27 + $0xa00] sm:$0xff] }
  0x99   : > { %2160 = vmatpush.msra.mxu2 %v572_v8  ;;  %2179 = vmatpush.msra.mxu3 %v606_v9  ;;  %v538_v15 = vld [vmem:[%s4290_s27 + $0x910] sm:$0xff]  ;;  %v536_v22 = vld [vmem:[%s4290_s27 + $0x900] sm:$0xff] }
  0x9a   : > { %2121 = vmatpush.msra.mxu0 %v506_v10  ;;  %2140 = vmatpush.msra.mxu1 %v540_v11  ;;  %v602_v17 = vld [vmem:[%s4290_s27 + $0xb10] sm:$0xff]  ;;  %v600_v23 = vld [vmem:[%s4290_s27 + $0xb00] sm:$0xff] }
  0x9b   : > { %2161 = vmatpush.msra.mxu2 %v570_v12  ;;  %2180 = vmatpush.msra.mxu3 %v604_v13  ;;  %v662_v20 = vld [vmem:[%s4290_s27 + $0xcf0] sm:$0xff]  ;;  %v4538_v24 = vld.sshfl [vmem:[#allocation1 + $0x8] sm:$0xff pattern:$0x73625140] }
  0x9c   : > { %2122 = vmatpush.msra.mxu0 %v504_v14  ;;  %2141 = vmatpush.msra.mxu1 %v538_v15  ;;  %v726_v21 = vld [vmem:[%s4290_s27 + $0xef0] sm:$0xff]  ;;  %v660_v26 = vld [vmem:[%s4290_s27 + $0xce0] sm:$0xff] }
  0x9d   : > { %2162 = vmatpush.msra.mxu2 %v568_v16  ;;  %2181 = vmatpush.msra.mxu3 %v602_v17  ;;  %v4540_v25 = vld.sshfl [vmem:[#allocation1 + $0x18] sm:$0xff pattern:$0x73625140]  ;;  %v724_v28 = vld [vmem:[%s4290_s27 + $0xee0] sm:$0xff] }
  0x9e   : > { %2123 = vmatmul.f32.vlgmr.msra.gmra.mxu0 %v4528_v18  ;;  %2163 = vmatmul.f32.vlgmr.msra.gmra.mxu2 %v4530_v19  ;;  %v694_v27 = vld [vmem:[%s4290_s27 + $0xdf0] sm:$0xff]  ;;  %v692_v31 = vld [vmem:[%s4290_s27 + $0xde0] sm:$0xff] }
  0x9f   : > { %2187 = vmatpush.msrb.mxu0 %v662_v20  ;;  %2227 = vmatpush.msrb.mxu2 %v726_v21  ;;  %v758_v29 = vld [vmem:[%s4290_s27 + $0xff0] sm:$0xff]  ;;  %v756_v33 = vld [vmem:[%s4290_s27 + $0xfe0] sm:$0xff] }
  0xa0   : > { %2142 = vmatpush.msra.mxu1 %v536_v22  ;;  %2182 = vmatpush.msra.mxu3 %v600_v23  ;;  %v658_v30 = vld [vmem:[%s4290_s27 + $0xcd0] sm:$0xff]  ;;  %v656_v34 = vld [vmem:[%s4290_s27 + $0xcc0] sm:$0xff] }
  0xa1   : > { %2143 = vmatmul.f32.vlgmr.msra.gmra.mxu1 %v4538_v24  ;;  %2183 = vmatmul.f32.vlgmr.msra.gmra.mxu3 %v4540_v25  ;;  %v722_v32 = vld [vmem:[%s4290_s27 + $0xed0] sm:$0xff]  ;;  %v720_v36 = vld [vmem:[%s4290_s27 + $0xec0] sm:$0xff] }
  0xa2   : > { %2188 = vmatpush.msrb.mxu0 %v660_v26  ;;  %2207 = vmatpush.msrb.mxu1 %v694_v27  ;;  %v690_v35 = vld [vmem:[%s4290_s27 + $0xdd0] sm:$0xff]  ;;  %v688_v39 = vld [vmem:[%s4290_s27 + $0xdc0] sm:$0xff] }
  0xa3   : > { %2228 = vmatpush.msrb.mxu2 %v724_v28  ;;  %2247 = vmatpush.msrb.mxu3 %v758_v29  ;;  %v754_v37 = vld [vmem:[%s4290_s27 + $0xfd0] sm:$0xff]  ;;  %v752_v41 = vld [vmem:[%s4290_s27 + $0xfc0] sm:$0xff]  ;;  %v239_v28 = vld [vmem:[%s6141_s0 + $0x20] sm:$0xff] }
  0xa4   : > { %2189 = vmatpush.msrb.mxu0 %v658_v30  ;;  %2208 = vmatpush.msrb.mxu1 %v692_v31  ;;  %v654_v38 = vld [vmem:[%s4290_s27 + $0xcb0] sm:$0xff]  ;;  %v652_v42 = vld [vmem:[%s4290_s27 + $0xca0] sm:$0xff]  ;;  %1856 = vst [vmem:[#allocation1] ss:$4 sm:$0xff] %v239_v28 }
  0xa5   : > { %2229 = vmatpush.msrb.mxu2 %v722_v32  ;;  %2248 = vmatpush.msrb.mxu3 %v756_v33  ;;  %v718_v40 = vld [vmem:[%s4290_s27 + $0xeb0] sm:$0xff]  ;;  %v716_v48 = vld [vmem:[%s4290_s27 + $0xea0] sm:$0xff] }
  0xa6   : > { %2190 = vmatpush.msrb.mxu0 %v656_v34  ;;  %2209 = vmatpush.msrb.mxu1 %v690_v35  ;;  %v686_v43 = vld [vmem:[%s4290_s27 + $0xdb0] sm:$0xff]  ;;  %v684_v51 = vld [vmem:[%s4290_s27 + $0xda0] sm:$0xff]  ;;  %v4607_v35 = vld.sshfl [vmem:[#allocation1 + $0x20] sm:$0xff pattern:$0x73625140] }
  0xa7   : > { %2230 = vmatpush.msrb.mxu2 %v720_v36  ;;  %2249 = vmatpush.msrb.mxu3 %v754_v37  ;;  %v750_v49 = vld [vmem:[%s4290_s27 + $0xfb0] sm:$0xff]  ;;  %v748_v53 = vld [vmem:[%s4290_s27 + $0xfa0] sm:$0xff]  ;;  %v4609_v36 = vld.sshfl [vmem:[#allocation1 + $0x30] sm:$0xff pattern:$0x73625140] }
  0xa8   : > { %2191 = vmatpush.msrb.mxu0 %v654_v38  ;;  %2210 = vmatpush.msrb.mxu1 %v688_v39  ;;  %v650_v50 = vld [vmem:[%s4290_s27 + $0xc90] sm:$0xff]  ;;  %v648_v54 = vld [vmem:[%s4290_s27 + $0xc80] sm:$0xff] }
  0xa9   : > { %2231 = vmatpush.msrb.mxu2 %v718_v40  ;;  %2250 = vmatpush.msrb.mxu3 %v752_v41  ;;  %v714_v52 = vld [vmem:[%s4290_s27 + $0xe90] sm:$0xff]  ;;  %v712_v56 = vld [vmem:[%s4290_s27 + $0xe80] sm:$0xff] }
  0xaa   : > { %2192 = vmatpush.msrb.mxu0 %v652_v42  ;;  %2211 = vmatpush.msrb.mxu1 %v686_v43  ;;  %v682_v55 = vld [vmem:[%s4290_s27 + $0xd90] sm:$0xff]  ;;  %v680_v59 = vld [vmem:[%s4290_s27 + $0xd80] sm:$0xff] }
  0xab   : > { %2232 = vmatpush.msrb.mxu2 %v716_v48  ;;  %2251 = vmatpush.msrb.mxu3 %v750_v49  ;;  %v746_v57 = vld [vmem:[%s4290_s27 + $0xf90] sm:$0xff]  ;;  %v744_v1 = vld [vmem:[%s4290_s27 + $0xf80] sm:$0xff] }
  0xac   : > { %2193 = vmatpush.msrb.mxu0 %v650_v50  ;;  %2212 = vmatpush.msrb.mxu1 %v684_v51  ;;  %v646_v58 = vld [vmem:[%s4290_s27 + $0xc70] sm:$0xff]  ;;  %v644_v2 = vld [vmem:[%s4290_s27 + $0xc60] sm:$0xff] }
  0xad   : > { %2233 = vmatpush.msrb.mxu2 %v714_v52  ;;  %2252 = vmatpush.msrb.mxu3 %v748_v53  ;;  %v710_v0 = vld [vmem:[%s4290_s27 + $0xe70] sm:$0xff]  ;;  %v708_v4 = vld [vmem:[%s4290_s27 + $0xe60] sm:$0xff] }
  0xae   : > { %2194 = vmatpush.msrb.mxu0 %v648_v54  ;;  %2213 = vmatpush.msrb.mxu1 %v682_v55  ;;  %v678_v3 = vld [vmem:[%s4290_s27 + $0xd70] sm:$0xff]  ;;  %v676_v7 = vld [vmem:[%s4290_s27 + $0xd60] sm:$0xff] }
  0xaf   : > { %2234 = vmatpush.msrb.mxu2 %v712_v56  ;;  %2253 = vmatpush.msrb.mxu3 %v746_v57  ;;  %v742_v5 = vld [vmem:[%s4290_s27 + $0xf70] sm:$0xff]  ;;  %v740_v9 = vld [vmem:[%s4290_s27 + $0xf60] sm:$0xff] }
  0xb0   : > { %2195 = vmatpush.msrb.mxu0 %v646_v58  ;;  %2214 = vmatpush.msrb.mxu1 %v680_v59  ;;  %v642_v6 = vld [vmem:[%s4290_s27 + $0xc50] sm:$0xff]  ;;  %v640_v10 = vld [vmem:[%s4290_s27 + $0xc40] sm:$0xff] }
  0xb1   : > { %2235 = vmatpush.msrb.mxu2 %v710_v0  ;;  %2254 = vmatpush.msrb.mxu3 %v744_v1  ;;  %v706_v8 = vld [vmem:[%s4290_s27 + $0xe50] sm:$0xff]  ;;  %v704_v12 = vld [vmem:[%s4290_s27 + $0xe40] sm:$0xff] }
  0xb2   : > { %2196 = vmatpush.msrb.mxu0 %v644_v2  ;;  %2215 = vmatpush.msrb.mxu1 %v678_v3  ;;  %v674_v11 = vld [vmem:[%s4290_s27 + $0xd50] sm:$0xff]  ;;  %v672_v15 = vld [vmem:[%s4290_s27 + $0xd40] sm:$0xff] }
  0xb3   : > { %2236 = vmatpush.msrb.mxu2 %v708_v4  ;;  %2255 = vmatpush.msrb.mxu3 %v742_v5  ;;  %v738_v13 = vld [vmem:[%s4290_s27 + $0xf50] sm:$0xff]  ;;  %v736_v17 = vld [vmem:[%s4290_s27 + $0xf40] sm:$0xff] }
  0xb4   : > { %2197 = vmatpush.msrb.mxu0 %v642_v6  ;;  %2216 = vmatpush.msrb.mxu1 %v676_v7  ;;  %v638_v14 = vld [vmem:[%s4290_s27 + $0xc30] sm:$0xff]  ;;  %v636_v20 = vld [vmem:[%s4290_s27 + $0xc20] sm:$0xff] }
  0xb5   : > { %2237 = vmatpush.msrb.mxu2 %v706_v8  ;;  %2256 = vmatpush.msrb.mxu3 %v740_v9  ;;  %v702_v16 = vld [vmem:[%s4290_s27 + $0xe30] sm:$0xff]  ;;  %v700_v22 = vld [vmem:[%s4290_s27 + $0xe20] sm:$0xff] }
  0xb6   : > { %2198 = vmatpush.msrb.mxu0 %v640_v10  ;;  %2217 = vmatpush.msrb.mxu1 %v674_v11  ;;  %v670_v21 = vld [vmem:[%s4290_s27 + $0xd30] sm:$0xff]  ;;  %v668_v27 = vld [vmem:[%s4290_s27 + $0xd20] sm:$0xff] }
  0xb7   : > { %2238 = vmatpush.msrb.mxu2 %v704_v12  ;;  %2257 = vmatpush.msrb.mxu3 %v738_v13  ;;  %v734_v23 = vld [vmem:[%s4290_s27 + $0xf30] sm:$0xff]  ;;  %v732_v30 = vld [vmem:[%s4290_s27 + $0xf20] sm:$0xff] }
  0xb8   : > { %2199 = vmatpush.msrb.mxu0 %v638_v14  ;;  %2218 = vmatpush.msrb.mxu1 %v672_v15  ;;  %v634_v26 = vld [vmem:[%s4290_s27 + $0xc10] sm:$0xff]  ;;  %v632_v31 = vld [vmem:[%s4290_s27 + $0xc00] sm:$0xff] }
  0xb9   : > { %2239 = vmatpush.msrb.mxu2 %v702_v16  ;;  %2258 = vmatpush.msrb.mxu3 %v736_v17  ;;  %v698_v29 = vld [vmem:[%s4290_s27 + $0xe10] sm:$0xff]  ;;  %v696_v33 = vld [vmem:[%s4290_s27 + $0xe00] sm:$0xff] }
  0xba   : > { %2200 = vmatpush.msrb.mxu0 %v636_v20  ;;  %2219 = vmatpush.msrb.mxu1 %v670_v21  ;;  %v666_v32 = vld [vmem:[%s4290_s27 + $0xd10] sm:$0xff]  ;;  %v664_v39 = vld [vmem:[%s4290_s27 + $0xd00] sm:$0xff] }
  0xbb   : > { %2240 = vmatpush.msrb.mxu2 %v700_v22  ;;  %2259 = vmatpush.msrb.mxu3 %v734_v23  ;;  %v730_v34 = vld [vmem:[%s4290_s27 + $0xf10] sm:$0xff]  ;;  %v728_v40 = vld [vmem:[%s4290_s27 + $0xf00] sm:$0xff] }
  0xbc   : > { %2201 = vmatpush.msrb.mxu0 %v634_v26  ;;  %2220 = vmatpush.msrb.mxu1 %v668_v27  ;;  %v790_v37 = vld [vmem:[%s4290_s27 + $0x10f0] sm:$0xff]  ;;  %v4617_v41 = vld.sshfl [vmem:[#allocation1 + $0x28] sm:$0xff pattern:$0x73625140] }
  0xbd   : > { %2241 = vmatpush.msrb.mxu2 %v698_v29  ;;  %2260 = vmatpush.msrb.mxu3 %v732_v30  ;;  %v854_v38 = vld [vmem:[%s4290_s27 + $0x12f0] sm:$0xff]  ;;  %v788_v43 = vld [vmem:[%s4290_s27 + $0x10e0] sm:$0xff] }
  0xbe   : > { %2202 = vmatpush.msrb.mxu0 %v632_v31  ;;  %2221 = vmatpush.msrb.mxu1 %v666_v32  ;;  %v4619_v42 = vld.sshfl [vmem:[#allocation1 + $0x38] sm:$0xff pattern:$0x73625140]  ;;  %v852_v49 = vld [vmem:[%s4290_s27 + $0x12e0] sm:$0xff] }
  0xbf   : > { %2242 = vmatpush.msrb.mxu2 %v696_v33  ;;  %2261 = vmatpush.msrb.mxu3 %v730_v34  ;;  %v822_v48 = vld [vmem:[%s4290_s27 + $0x11f0] sm:$0xff]  ;;  %v820_v52 = vld [vmem:[%s4290_s27 + $0x11e0] sm:$0xff] }
  0xc0   : > { %2203 = vmatmul.f32.vlgmr.msrb.gmra.mxu0 %v4607_v35  ;;  %2243 = vmatmul.f32.vlgmr.msrb.gmra.mxu2 %v4609_v36  ;;  %v886_v50 = vld [vmem:[%s4290_s27 + $0x13f0] sm:$0xff]  ;;  %v884_v54 = vld [vmem:[%s4290_s27 + $0x13e0] sm:$0xff] }
  0xc1   : > { %2267 = vmatpush.msra.mxu0 %v790_v37  ;;  %2307 = vmatpush.msra.mxu2 %v854_v38  ;;  %v786_v51 = vld [vmem:[%s4290_s27 + $0x10d0] sm:$0xff]  ;;  %v784_v55 = vld [vmem:[%s4290_s27 + $0x10c0] sm:$0xff] }
  0xc2   : > { %2222 = vmatpush.msrb.mxu1 %v664_v39  ;;  %2262 = vmatpush.msrb.mxu3 %v728_v40  ;;  %v850_v53 = vld [vmem:[%s4290_s27 + $0x12d0] sm:$0xff]  ;;  %v848_v57 = vld [vmem:[%s4290_s27 + $0x12c0] sm:$0xff] }
  0xc3   : > { %2223 = vmatmul.f32.vlgmr.msrb.gmra.mxu1 %v4617_v41  ;;  %2263 = vmatmul.f32.vlgmr.msrb.gmra.mxu3 %v4619_v42  ;;  %v818_v56 = vld [vmem:[%s4290_s27 + $0x11d0] sm:$0xff]  ;;  %v816_v0 = vld [vmem:[%s4290_s27 + $0x11c0] sm:$0xff] }
  0xc4   : > { %2268 = vmatpush.msra.mxu0 %v788_v43  ;;  %2287 = vmatpush.msra.mxu1 %v822_v48  ;;  %v882_v58 = vld [vmem:[%s4290_s27 + $0x13d0] sm:$0xff]  ;;  %v880_v2 = vld [vmem:[%s4290_s27 + $0x13c0] sm:$0xff] }
  0xc5   : > { %2308 = vmatpush.msra.mxu2 %v852_v49  ;;  %2327 = vmatpush.msra.mxu3 %v886_v50  ;;  %v782_v59 = vld [vmem:[%s4290_s27 + $0x10b0] sm:$0xff]  ;;  %v780_v3 = vld [vmem:[%s4290_s27 + $0x10a0] sm:$0xff] }
  0xc6   : > { %2269 = vmatpush.msra.mxu0 %v786_v51  ;;  %2288 = vmatpush.msra.mxu1 %v820_v52  ;;  %v846_v1 = vld [vmem:[%s4290_s27 + $0x12b0] sm:$0xff]  ;;  %v844_v5 = vld [vmem:[%s4290_s27 + $0x12a0] sm:$0xff] }
  0xc7   : > { %2309 = vmatpush.msra.mxu2 %v850_v53  ;;  %2328 = vmatpush.msra.mxu3 %v884_v54  ;;  %v814_v4 = vld [vmem:[%s4290_s27 + $0x11b0] sm:$0xff]  ;;  %v812_v8 = vld [vmem:[%s4290_s27 + $0x11a0] sm:$0xff] }
  0xc8   : > { %2270 = vmatpush.msra.mxu0 %v784_v55  ;;  %2289 = vmatpush.msra.mxu1 %v818_v56  ;;  %v878_v6 = vld [vmem:[%s4290_s27 + $0x13b0] sm:$0xff]  ;;  %v876_v10 = vld [vmem:[%s4290_s27 + $0x13a0] sm:$0xff] }
  0xc9   : > { %2310 = vmatpush.msra.mxu2 %v848_v57  ;;  %2329 = vmatpush.msra.mxu3 %v882_v58  ;;  %v778_v7 = vld [vmem:[%s4290_s27 + $0x1090] sm:$0xff]  ;;  %v776_v11 = vld [vmem:[%s4290_s27 + $0x1080] sm:$0xff] }
  0xca   : > { %2271 = vmatpush.msra.mxu0 %v782_v59  ;;  %2290 = vmatpush.msra.mxu1 %v816_v0  ;;  %v842_v9 = vld [vmem:[%s4290_s27 + $0x1290] sm:$0xff]  ;;  %v840_v13 = vld [vmem:[%s4290_s27 + $0x1280] sm:$0xff]  ;;  %v4686_v0 = vld.sshfl [vmem:[#allocation1] sm:$0xff pattern:$0x73625140] }
  0xcb   : > { %2311 = vmatpush.msra.mxu2 %v846_v1  ;;  %2330 = vmatpush.msra.mxu3 %v880_v2  ;;  %v810_v12 = vld [vmem:[%s4290_s27 + $0x1190] sm:$0xff]  ;;  %v808_v16 = vld [vmem:[%s4290_s27 + $0x1180] sm:$0xff]  ;;  %v4688_v1 = vld.sshfl [vmem:[#allocation1 + $0x10] sm:$0xff pattern:$0x73625140] }
  0xcc   : > { %2272 = vmatpush.msra.mxu0 %v780_v3  ;;  %2291 = vmatpush.msra.mxu1 %v814_v4  ;;  %v874_v14 = vld [vmem:[%s4290_s27 + $0x1390] sm:$0xff]  ;;  %v872_v20 = vld [vmem:[%s4290_s27 + $0x1380] sm:$0xff] }
  0xcd   : > { %2312 = vmatpush.msra.mxu2 %v844_v5  ;;  %2331 = vmatpush.msra.mxu3 %v878_v6  ;;  %v774_v15 = vld [vmem:[%s4290_s27 + $0x1070] sm:$0xff]  ;;  %v772_v21 = vld [vmem:[%s4290_s27 + $0x1060] sm:$0xff] }
  0xce   : > { %2273 = vmatpush.msra.mxu0 %v778_v7  ;;  %2292 = vmatpush.msra.mxu1 %v812_v8  ;;  %v838_v17 = vld [vmem:[%s4290_s27 + $0x1270] sm:$0xff]  ;;  %v836_v23 = vld [vmem:[%s4290_s27 + $0x1260] sm:$0xff] }
  0xcf   : > { %2313 = vmatpush.msra.mxu2 %v842_v9  ;;  %2332 = vmatpush.msra.mxu3 %v876_v10  ;;  %v806_v22 = vld [vmem:[%s4290_s27 + $0x1170] sm:$0xff]  ;;  %v804_v28 = vld [vmem:[%s4290_s27 + $0x1160] sm:$0xff] }
  0xd0   : > { %2274 = vmatpush.msra.mxu0 %v776_v11  ;;  %2293 = vmatpush.msra.mxu1 %v810_v12  ;;  %v870_v26 = vld [vmem:[%s4290_s27 + $0x1370] sm:$0xff]  ;;  %v868_v30 = vld [vmem:[%s4290_s27 + $0x1360] sm:$0xff] }
  0xd1   : > { %2314 = vmatpush.msra.mxu2 %v840_v13  ;;  %2333 = vmatpush.msra.mxu3 %v874_v14  ;;  %v770_v27 = vld [vmem:[%s4290_s27 + $0x1050] sm:$0xff]  ;;  %v768_v31 = vld [vmem:[%s4290_s27 + $0x1040] sm:$0xff] }
  0xd2   : > { %2275 = vmatpush.msra.mxu0 %v774_v15  ;;  %2294 = vmatpush.msra.mxu1 %v808_v16  ;;  %v834_v29 = vld [vmem:[%s4290_s27 + $0x1250] sm:$0xff]  ;;  %v832_v33 = vld [vmem:[%s4290_s27 + $0x1240] sm:$0xff] }
  0xd3   : > { %2315 = vmatpush.msra.mxu2 %v838_v17  ;;  %2334 = vmatpush.msra.mxu3 %v872_v20  ;;  %v802_v32 = vld [vmem:[%s4290_s27 + $0x1150] sm:$0xff]  ;;  %v800_v38 = vld [vmem:[%s4290_s27 + $0x1140] sm:$0xff] }
  0xd4   : > { %2276 = vmatpush.msra.mxu0 %v772_v21  ;;  %2295 = vmatpush.msra.mxu1 %v806_v22  ;;  %v866_v34 = vld [vmem:[%s4290_s27 + $0x1350] sm:$0xff]  ;;  %v864_v40 = vld [vmem:[%s4290_s27 + $0x1340] sm:$0xff] }
  0xd5   : > { %2316 = vmatpush.msra.mxu2 %v836_v23  ;;  %2335 = vmatpush.msra.mxu3 %v870_v26  ;;  %v766_v37 = vld [vmem:[%s4290_s27 + $0x1030] sm:$0xff]  ;;  %v764_v43 = vld [vmem:[%s4290_s27 + $0x1020] sm:$0xff] }
  0xd6   : > { %2277 = vmatpush.msra.mxu0 %v770_v27  ;;  %2296 = vmatpush.msra.mxu1 %v804_v28  ;;  %v830_v39 = vld [vmem:[%s4290_s27 + $0x1230] sm:$0xff]  ;;  %v828_v49 = vld [vmem:[%s4290_s27 + $0x1220] sm:$0xff] }
  0xd7   : > { %2317 = vmatpush.msra.mxu2 %v834_v29  ;;  %2336 = vmatpush.msra.mxu3 %v868_v30  ;;  %v798_v48 = vld [vmem:[%s4290_s27 + $0x1130] sm:$0xff]  ;;  %v796_v52 = vld [vmem:[%s4290_s27 + $0x1120] sm:$0xff] }
  0xd8   : > { %2278 = vmatpush.msra.mxu0 %v768_v31  ;;  %2297 = vmatpush.msra.mxu1 %v802_v32  ;;  %v862_v50 = vld [vmem:[%s4290_s27 + $0x1330] sm:$0xff]  ;;  %v240_v53 = vld [vmem:[%s6141_s0 + $0x28] sm:$0xff] }
  0xd9   : > { %2318 = vmatpush.msra.mxu2 %v832_v33  ;;  %2337 = vmatpush.msra.mxu3 %v866_v34  ;;  %v762_v51 = vld [vmem:[%s4290_s27 + $0x1010] sm:$0xff]  ;;  %v860_v55 = vld [vmem:[%s4290_s27 + $0x1320] sm:$0xff]  ;;  %1857 = vst [vmem:[#allocation1 + $0x20] ss:$4 sm:$0xff] %v240_v53 }
  0xda   : > { %2279 = vmatpush.msra.mxu0 %v766_v37  ;;  %2298 = vmatpush.msra.mxu1 %v800_v38  ;;  %v826_v54 = vld [vmem:[%s4290_s27 + $0x1210] sm:$0xff]  ;;  %v760_v56 = vld [vmem:[%s4290_s27 + $0x1000] sm:$0xff] }
  0xdb   : > { %2319 = vmatpush.msra.mxu2 %v830_v39  ;;  %2338 = vmatpush.msra.mxu3 %v864_v40  ;;  %v794_v57 = vld [vmem:[%s4290_s27 + $0x1110] sm:$0xff]  ;;  %v824_v58 = vld [vmem:[%s4290_s27 + $0x1200] sm:$0xff] }
  0xdc   : > { %2280 = vmatpush.msra.mxu0 %v764_v43  ;;  %2299 = vmatpush.msra.mxu1 %v798_v48  ;;  %v858_v59 = vld [vmem:[%s4290_s27 + $0x1310] sm:$0xff]  ;;  %v792_v4 = vld [vmem:[%s4290_s27 + $0x1100] sm:$0xff] }
  0xdd   : > { %2320 = vmatpush.msra.mxu2 %v828_v49  ;;  %2339 = vmatpush.msra.mxu3 %v862_v50  ;;  %v918_v2 = vld [vmem:[%s4290_s27 + $0x14f0] sm:$0xff]  ;;  %v856_v5 = vld [vmem:[%s4290_s27 + $0x1300] sm:$0xff] }
  0xde   : > { %2281 = vmatpush.msra.mxu0 %v762_v51  ;;  %2300 = vmatpush.msra.mxu1 %v796_v52  ;;  %v982_v3 = vld [vmem:[%s4290_s27 + $0x16f0] sm:$0xff]  ;;  %v4696_v6 = vld.sshfl [vmem:[#allocation1 + $0x8] sm:$0xff pattern:$0x73625140] }
  0xdf   : > { %2321 = vmatpush.msra.mxu2 %v826_v54  ;;  %2340 = vmatpush.msra.mxu3 %v860_v55  ;;  %v4698_v7 = vld.sshfl [vmem:[#allocation1 + $0x18] sm:$0xff pattern:$0x73625140]  ;;  %v916_v8 = vld [vmem:[%s4290_s27 + $0x14e0] sm:$0xff] }
  0xe0   : > { %2282 = vmatpush.msra.mxu0 %v760_v56  ;;  %2301 = vmatpush.msra.mxu1 %v794_v57  ;;  %v950_v9 = vld [vmem:[%s4290_s27 + $0x15f0] sm:$0xff]  ;;  %v980_v10 = vld [vmem:[%s4290_s27 + $0x16e0] sm:$0xff] }
  0xe1   : > { %2322 = vmatpush.msra.mxu2 %v824_v58  ;;  %2341 = vmatpush.msra.mxu3 %v858_v59  ;;  %v1014_v11 = vld [vmem:[%s4290_s27 + $0x17f0] sm:$0xff]  ;;  %v948_v13 = vld [vmem:[%s4290_s27 + $0x15e0] sm:$0xff] }
  0xe2   : > { %2283 = vmatmul.f32.vlgmr.msra.gmra.mxu0 %v4686_v0  ;;  %2323 = vmatmul.f32.vlgmr.msra.gmra.mxu2 %v4688_v1  ;;  %v914_v12 = vld [vmem:[%s4290_s27 + $0x14d0] sm:$0xff]  ;;  %v1012_v15 = vld [vmem:[%s4290_s27 + $0x17e0] sm:$0xff] }
  0xe3   : > { %2347 = vmatpush.msrb.mxu0 %v918_v2  ;;  %2387 = vmatpush.msrb.mxu2 %v982_v3  ;;  %v978_v14 = vld [vmem:[%s4290_s27 + $0x16d0] sm:$0xff]  ;;  %v912_v16 = vld [vmem:[%s4290_s27 + $0x14c0] sm:$0xff] }
  0xe4   : > { %2302 = vmatpush.msra.mxu1 %v792_v4  ;;  %2342 = vmatpush.msra.mxu3 %v856_v5  ;;  %v946_v17 = vld [vmem:[%s4290_s27 + $0x15d0] sm:$0xff]  ;;  %v976_v20 = vld [vmem:[%s4290_s27 + $0x16c0] sm:$0xff] }
  0xe5   : > { %2303 = vmatmul.f32.vlgmr.msra.gmra.mxu1 %v4696_v6  ;;  %2343 = vmatmul.f32.vlgmr.msra.gmra.mxu3 %v4698_v7  ;;  %v1010_v21 = vld [vmem:[%s4290_s27 + $0x17d0] sm:$0xff]  ;;  %v944_v23 = vld [vmem:[%s4290_s27 + $0x15c0] sm:$0xff] }
  0xe6   : > { %2348 = vmatpush.msrb.mxu0 %v916_v8  ;;  %2367 = vmatpush.msrb.mxu1 %v950_v9  ;;  %v910_v22 = vld [vmem:[%s4290_s27 + $0x14b0] sm:$0xff]  ;;  %v1008_v27 = vld [vmem:[%s4290_s27 + $0x17c0] sm:$0xff] }
  0xe7   : > { %2388 = vmatpush.msrb.mxu2 %v980_v10  ;;  %2407 = vmatpush.msrb.mxu3 %v1014_v11  ;;  %v974_v26 = vld [vmem:[%s4290_s27 + $0x16b0] sm:$0xff]  ;;  %v908_v28 = vld [vmem:[%s4290_s27 + $0x14a0] sm:$0xff] }
  0xe8   : > { %2349 = vmatpush.msrb.mxu0 %v914_v12  ;;  %2368 = vmatpush.msrb.mxu1 %v948_v13  ;;  %v942_v29 = vld [vmem:[%s4290_s27 + $0x15b0] sm:$0xff]  ;;  %v972_v30 = vld [vmem:[%s4290_s27 + $0x16a0] sm:$0xff] }
  0xe9   : > { %2389 = vmatpush.msrb.mxu2 %v978_v14  ;;  %2408 = vmatpush.msrb.mxu3 %v1012_v15  ;;  %v1006_v31 = vld [vmem:[%s4290_s27 + $0x17b0] sm:$0xff]  ;;  %v940_v33 = vld [vmem:[%s4290_s27 + $0x15a0] sm:$0xff] }
  0xea   : > { %2350 = vmatpush.msrb.mxu0 %v912_v16  ;;  %2369 = vmatpush.msrb.mxu1 %v946_v17  ;;  %v906_v32 = vld [vmem:[%s4290_s27 + $0x1490] sm:$0xff]  ;;  %v1004_v37 = vld [vmem:[%s4290_s27 + $0x17a0] sm:$0xff] }
  0xeb   : > { %2390 = vmatpush.msrb.mxu2 %v976_v20  ;;  %2409 = vmatpush.msrb.mxu3 %v1010_v21  ;;  %v970_v34 = vld [vmem:[%s4290_s27 + $0x1690] sm:$0xff]  ;;  %v904_v38 = vld [vmem:[%s4290_s27 + $0x1480] sm:$0xff] }
  0xec   : > { %2351 = vmatpush.msrb.mxu0 %v910_v22  ;;  %2370 = vmatpush.msrb.mxu1 %v944_v23  ;;  %v938_v39 = vld [vmem:[%s4290_s27 + $0x1590] sm:$0xff]  ;;  %v968_v40 = vld [vmem:[%s4290_s27 + $0x1680] sm:$0xff] }
  0xed   : > { %2391 = vmatpush.msrb.mxu2 %v974_v26  ;;  %2410 = vmatpush.msrb.mxu3 %v1008_v27  ;;  %v1002_v43 = vld [vmem:[%s4290_s27 + $0x1790] sm:$0xff]  ;;  %v936_v49 = vld [vmem:[%s4290_s27 + $0x1580] sm:$0xff] }
  0xee   : > { %2352 = vmatpush.msrb.mxu0 %v908_v28  ;;  %2371 = vmatpush.msrb.mxu1 %v942_v29  ;;  %v902_v48 = vld [vmem:[%s4290_s27 + $0x1470] sm:$0xff]  ;;  %v1816_v50 = vld [vmem:[%s4296_s25] sm:$0x3]  ;;  %v1964_v8 = vpop.f32.mrf.mxu0 }
  0xef   : > { %2392 = vmatpush.msrb.mxu2 %v972_v30  ;;  %2411 = vmatpush.msrb.mxu3 %v1006_v31  ;;  %v966_v51 = vld [vmem:[%s4290_s27 + $0x1670] sm:$0xff]  ;;  %v1000_v52 = vld [vmem:[%s4290_s27 + $0x1780] sm:$0xff]  ;;  %v1818_v57 = vperm.slane %v1816_v50, 0  ;;  %v241_v30 = vld [vmem:[%s6141_s0 + $0x30] sm:$0xff] }
  0xf0   : > { %2353 = vmatpush.msrb.mxu0 %v906_v32  ;;  %2372 = vmatpush.msrb.mxu1 %v940_v33  ;;  %v900_v53 = vld [vmem:[%s4290_s27 + $0x1460] sm:$0xff]  ;;  %v934_v54 = vld [vmem:[%s4290_s27 + $0x1570] sm:$0xff]  ;;  %1866 = vst [vmem:[#allocation1] ss:$4 sm:$0xff] %v241_v30 }
  0xf1   : > { %2393 = vmatpush.msrb.mxu2 %v970_v34  ;;  %2412 = vmatpush.msrb.mxu3 %v1004_v37  ;;  %v964_v55 = vld [vmem:[%s4290_s27 + $0x1660] sm:$0xff]  ;;  %v998_v56 = vld [vmem:[%s4290_s27 + $0x1770] sm:$0xff]  ;;  %v1965_v11 = vadd.f32 %v1964_v8, %v1818_v57 }
  0xf2   : > { %2354 = vmatpush.msrb.mxu0 %v904_v38  ;;  %2373 = vmatpush.msrb.mxu1 %v938_v39  ;;  %v898_v58 = vld [vmem:[%s4290_s27 + $0x1450] sm:$0xff]  ;;  %v932_v59 = vld [vmem:[%s4290_s27 + $0x1560] sm:$0xff]  ;;  %v2004_v22 = vpop.f32.mrf.mxu2 }
  0xf3   : > { %2394 = vmatpush.msrb.mxu2 %v968_v40  ;;  %2413 = vmatpush.msrb.mxu3 %v1002_v43  ;;  %v962_v2 = vld [vmem:[%s4290_s27 + $0x1650] sm:$0xff]  ;;  %v996_v3 = vld [vmem:[%s4290_s27 + $0x1760] sm:$0xff]  ;;  %v4766_v43 = vld.sshfl [vmem:[#allocation1 + $0x20] sm:$0xff pattern:$0x73625140] }
  0xf4   : > { %2355 = vmatpush.msrb.mxu0 %v902_v48  ;;  %2374 = vmatpush.msrb.mxu1 %v936_v49  ;;  %v896_v4 = vld [vmem:[%s4290_s27 + $0x1440] sm:$0xff]  ;;  %v930_v5 = vld [vmem:[%s4290_s27 + $0x1550] sm:$0xff]  ;;  %v1984_v16 = vpop.f32.mrf.mxu1  ;;  %v4768_v48 = vld.sshfl [vmem:[#allocation1 + $0x30] sm:$0xff pattern:$0x73625140] }
  0xf5   : > { %2395 = vmatpush.msrb.mxu2 %v966_v51  ;;  %2414 = vmatpush.msrb.mxu3 %v1000_v52  ;;  %v960_v9 = vld [vmem:[%s4290_s27 + $0x1640] sm:$0xff]  ;;  %v994_v10 = vld [vmem:[%s4290_s27 + $0x1750] sm:$0xff]  ;;  %v1985_v21 = vadd.f32 %v1984_v16, %v1965_v11 }
  0xf6   : > { %2356 = vmatpush.msrb.mxu0 %v900_v53  ;;  %2375 = vmatpush.msrb.mxu1 %v934_v54  ;;  %v894_v12 = vld [vmem:[%s4290_s27 + $0x1430] sm:$0xff]  ;;  %v928_v13 = vld [vmem:[%s4290_s27 + $0x1540] sm:$0xff] }
  0xf7   : > { %2396 = vmatpush.msrb.mxu2 %v964_v55  ;;  %2415 = vmatpush.msrb.mxu3 %v998_v56  ;;  %v958_v14 = vld [vmem:[%s4290_s27 + $0x1630] sm:$0xff]  ;;  %v992_v15 = vld [vmem:[%s4290_s27 + $0x1740] sm:$0xff]  ;;  %v2005_v29 = vadd.f32 %v2004_v22, %v1985_v21 }
  0xf8   : > { %2357 = vmatpush.msrb.mxu0 %v898_v58  ;;  %2376 = vmatpush.msrb.mxu1 %v932_v59  ;;  %v892_v17 = vld [vmem:[%s4290_s27 + $0x1420] sm:$0xff]  ;;  %v926_v20 = vld [vmem:[%s4290_s27 + $0x1530] sm:$0xff]  ;;  %v2024_v33 = vpop.f32.mrf.mxu3 }
  0xf9   : > { %2397 = vmatpush.msrb.mxu2 %v962_v2  ;;  %2416 = vmatpush.msrb.mxu3 %v996_v3  ;;  %v956_v23 = vld [vmem:[%s4290_s27 + $0x1620] sm:$0xff]  ;;  %v990_v26 = vld [vmem:[%s4290_s27 + $0x1730] sm:$0xff]  ;;  %v2025_v38 = vadd.f32 %v2024_v33, %v2005_v29 }
  0xfa   : > { %2358 = vmatpush.msrb.mxu0 %v896_v4  ;;  %2377 = vmatpush.msrb.mxu1 %v930_v5  ;;  %v890_v27 = vld [vmem:[%s4290_s27 + $0x1410] sm:$0xff]  ;;  %v924_v28 = vld [vmem:[%s4290_s27 + $0x1520] sm:$0xff] }
  0xfb   : > { %2398 = vmatpush.msrb.mxu2 %v960_v9  ;;  %2417 = vmatpush.msrb.mxu3 %v994_v10  ;;  %v954_v31 = vld [vmem:[%s4290_s27 + $0x1610] sm:$0xff]  ;;  %v988_v32 = vld [vmem:[%s4290_s27 + $0x1720] sm:$0xff] }
  0xfc   : > { %2359 = vmatpush.msrb.mxu0 %v894_v12  ;;  %2378 = vmatpush.msrb.mxu1 %v928_v13  ;;  %v888_v34 = vld [vmem:[%s4290_s27 + $0x1400] sm:$0xff]  ;;  %v922_v37 = vld [vmem:[%s4290_s27 + $0x1510] sm:$0xff] }
  0xfd   : > { %2399 = vmatpush.msrb.mxu2 %v958_v14  ;;  %2418 = vmatpush.msrb.mxu3 %v992_v15  ;;  %v952_v39 = vld [vmem:[%s4290_s27 + $0x1600] sm:$0xff]  ;;  %v986_v40 = vld [vmem:[%s4290_s27 + $0x1710] sm:$0xff] }
  0xfe   : > { %2360 = vmatpush.msrb.mxu0 %v892_v17  ;;  %2379 = vmatpush.msrb.mxu1 %v926_v20  ;;  %v1046_v50 = vld [vmem:[%s4290_s27 + $0x18f0] sm:$0xff]  ;;  %v920_v53 = vld [vmem:[%s4290_s27 + $0x1500] sm:$0xff] }
  0xff   : > { %2400 = vmatpush.msrb.mxu2 %v956_v23  ;;  %2419 = vmatpush.msrb.mxu3 %v990_v26  ;;  %v1110_v51 = vld [vmem:[%s4290_s27 + $0x1af0] sm:$0xff]  ;;  %v984_v54 = vld [vmem:[%s4290_s27 + $0x1700] sm:$0xff] }
 0x100   : > { %2361 = vmatpush.msrb.mxu0 %v890_v27  ;;  %2380 = vmatpush.msrb.mxu1 %v924_v28  ;;  %v4776_v55 = vld.sshfl [vmem:[#allocation1 + $0x28] sm:$0xff pattern:$0x73625140]  ;;  %v4778_v56 = vld.sshfl [vmem:[#allocation1 + $0x38] sm:$0xff pattern:$0x73625140] }
 0x101   : > { %2401 = vmatpush.msrb.mxu2 %v954_v31  ;;  %2420 = vmatpush.msrb.mxu3 %v988_v32  ;;  %v2044_v49 = vpop.f32.mrf.mxu0  ;;  %v1044_v58 = vld [vmem:[%s4290_s27 + $0x18e0] sm:$0xff]  ;;  %v1078_v59 = vld [vmem:[%s4290_s27 + $0x19f0] sm:$0xff] }
 0x102   : > { %2362 = vmatpush.msrb.mxu0 %v888_v34  ;;  %2381 = vmatpush.msrb.mxu1 %v922_v37  ;;  %v2045_v52 = vadd.f32 %v2044_v49, %v2025_v38  ;;  %v1108_v4 = vld [vmem:[%s4290_s27 + $0x1ae0] sm:$0xff]  ;;  %v1142_v5 = vld [vmem:[%s4290_s27 + $0x1bf0] sm:$0xff] }
 0x103   : > { %2402 = vmatpush.msrb.mxu2 %v952_v39  ;;  %2421 = vmatpush.msrb.mxu3 %v986_v40  ;;  %v1042_v8 = vld [vmem:[%s4290_s27 + $0x18d0] sm:$0xff]  ;;  %v1076_v9 = vld [vmem:[%s4290_s27 + $0x19e0] sm:$0xff] }
 0x104   : > { %2363 = vmatmul.f32.vlgmr.msrb.gmra.mxu0 %v4766_v43  ;;  %2403 = vmatmul.f32.vlgmr.msrb.gmra.mxu2 %v4768_v48  ;;  %v2064_v57 = vpop.f32.mrf.mxu1  ;;  %v1106_v11 = vld [vmem:[%s4290_s27 + $0x1ad0] sm:$0xff]  ;;  %v1140_v12 = vld [vmem:[%s4290_s27 + $0x1be0] sm:$0xff] }
 0x105   : > { %2427 = vmatpush.msra.mxu0 %v1046_v50  ;;  %2467 = vmatpush.msra.mxu2 %v1110_v51  ;;  %v2065_v2 = vadd.f32 %v2064_v57, %v2045_v52  ;;  %v2084_v3 = vpop.f32.mrf.mxu2  ;;  %v1040_v14 = vld [vmem:[%s4290_s27 + $0x18c0] sm:$0xff]  ;;  %v1074_v15 = vld [vmem:[%s4290_s27 + $0x19d0] sm:$0xff] }
 0x106   : > { %2382 = vmatpush.msrb.mxu1 %v920_v53  ;;  %2422 = vmatpush.msrb.mxu3 %v984_v54  ;;  %v1104_v17 = vld [vmem:[%s4290_s27 + $0x1ac0] sm:$0xff]  ;;  %v1138_v20 = vld [vmem:[%s4290_s27 + $0x1bd0] sm:$0xff] }
 0x107   : > { %2383 = vmatmul.f32.vlgmr.msrb.gmra.mxu1 %v4776_v55  ;;  %2423 = vmatmul.f32.vlgmr.msrb.gmra.mxu3 %v4778_v56  ;;  %v2085_v10 = vadd.f32 %v2084_v3, %v2065_v2  ;;  %v1038_v21 = vld [vmem:[%s4290_s27 + $0x18b0] sm:$0xff]  ;;  %v1072_v22 = vld [vmem:[%s4290_s27 + $0x19c0] sm:$0xff] }
 0x108   : > { %2428 = vmatpush.msra.mxu0 %v1044_v58  ;;  %2447 = vmatpush.msra.mxu1 %v1078_v59  ;;  %v2104_v13 = vpop.f32.mrf.mxu3  ;;  %v1102_v23 = vld [vmem:[%s4290_s27 + $0x1ab0] sm:$0xff]  ;;  %v1136_v26 = vld [vmem:[%s4290_s27 + $0x1bc0] sm:$0xff] }
 0x109   : > { %2468 = vmatpush.msra.mxu2 %v1108_v4  ;;  %2487 = vmatpush.msra.mxu3 %v1142_v5  ;;  %v4792_v16 = vadd.f32 %v2104_v13, %v2085_v10  ;;  %v1036_v27 = vld [vmem:[%s4290_s27 + $0x18a0] sm:$0xff]  ;;  %v1070_v28 = vld [vmem:[%s4290_s27 + $0x19b0] sm:$0xff] }
 0x10a   : > { %2429 = vmatpush.msra.mxu0 %v1042_v8  ;;  %2448 = vmatpush.msra.mxu1 %v1076_v9  ;;  %v1100_v29 = vld [vmem:[%s4290_s27 + $0x1aa0] sm:$0xff]  ;;  %v1134_v30 = vld [vmem:[%s4290_s27 + $0x1bb0] sm:$0xff] }
 0x10b   : > { %2469 = vmatpush.msra.mxu2 %v1106_v11  ;;  %2488 = vmatpush.msra.mxu3 %v1140_v12  ;;  %v1034_v31 = vld [vmem:[%s4290_s27 + $0x1890] sm:$0xff]  ;;  %v1068_v32 = vld [vmem:[%s4290_s27 + $0x19a0] sm:$0xff] }
 0x10c   : > { %2430 = vmatpush.msra.mxu0 %v1040_v14  ;;  %2449 = vmatpush.msra.mxu1 %v1074_v15  ;;  %v1098_v33 = vld [vmem:[%s4290_s27 + $0x1a90] sm:$0xff]  ;;  %v1132_v34 = vld [vmem:[%s4290_s27 + $0x1ba0] sm:$0xff] }
 0x10d   : > { %2470 = vmatpush.msra.mxu2 %v1104_v17  ;;  %2489 = vmatpush.msra.mxu3 %v1138_v20  ;;  %v1032_v37 = vld [vmem:[%s4290_s27 + $0x1880] sm:$0xff]  ;;  %v1066_v38 = vld [vmem:[%s4290_s27 + $0x1990] sm:$0xff] }
 0x10e   : > { %2431 = vmatpush.msra.mxu0 %v1038_v21  ;;  %2450 = vmatpush.msra.mxu1 %v1072_v22  ;;  %v1096_v39 = vld [vmem:[%s4290_s27 + $0x1a80] sm:$0xff]  ;;  %v1130_v40 = vld [vmem:[%s4290_s27 + $0x1b90] sm:$0xff] }
 0x10f   : > { %2471 = vmatpush.msra.mxu2 %v1102_v23  ;;  %2490 = vmatpush.msra.mxu3 %v1136_v26  ;;  %v1030_v49 = vld [vmem:[%s4290_s27 + $0x1870] sm:$0xff]  ;;  %v1064_v50 = vld [vmem:[%s4290_s27 + $0x1980] sm:$0xff] }
 0x110   : > { %2432 = vmatpush.msra.mxu0 %v1036_v27  ;;  %2451 = vmatpush.msra.mxu1 %v1070_v28  ;;  %v1094_v51 = vld [vmem:[%s4290_s27 + $0x1a70] sm:$0xff]  ;;  %v1128_v52 = vld [vmem:[%s4290_s27 + $0x1b80] sm:$0xff] }
 0x111   : > { %2472 = vmatpush.msra.mxu2 %v1100_v29  ;;  %2491 = vmatpush.msra.mxu3 %v1134_v30  ;;  %v1028_v53 = vld [vmem:[%s4290_s27 + $0x1860] sm:$0xff]  ;;  %v1062_v54 = vld [vmem:[%s4290_s27 + $0x1970] sm:$0xff] }
 0x112   : > { %2433 = vmatpush.msra.mxu0 %v1034_v31  ;;  %2452 = vmatpush.msra.mxu1 %v1068_v32  ;;  %v1092_v57 = vld [vmem:[%s4290_s27 + $0x1a60] sm:$0xff]  ;;  %v1126_v58 = vld [vmem:[%s4290_s27 + $0x1b70] sm:$0xff] }
 0x113   : > { %2473 = vmatpush.msra.mxu2 %v1098_v33  ;;  %2492 = vmatpush.msra.mxu3 %v1132_v34  ;;  %v1026_v59 = vld [vmem:[%s4290_s27 + $0x1850] sm:$0xff]  ;;  %v1060_v2 = vld [vmem:[%s4290_s27 + $0x1960] sm:$0xff] }
 0x114   : > { %2434 = vmatpush.msra.mxu0 %v1032_v37  ;;  %2453 = vmatpush.msra.mxu1 %v1066_v38  ;;  %v1090_v3 = vld [vmem:[%s4290_s27 + $0x1a50] sm:$0xff]  ;;  %v1124_v4 = vld [vmem:[%s4290_s27 + $0x1b60] sm:$0xff] }
 0x115   : > { %2474 = vmatpush.msra.mxu2 %v1096_v39  ;;  %2493 = vmatpush.msra.mxu3 %v1130_v40  ;;  %v1024_v5 = vld [vmem:[%s4290_s27 + $0x1840] sm:$0xff]  ;;  %v1058_v8 = vld [vmem:[%s4290_s27 + $0x1950] sm:$0xff]  ;;  %v4848_v40 = vld.sshfl [vmem:[#allocation1] sm:$0xff pattern:$0x73625140] }
 0x116   : > { %2435 = vmatpush.msra.mxu0 %v1030_v49  ;;  %2454 = vmatpush.msra.mxu1 %v1064_v50  ;;  %v1088_v9 = vld [vmem:[%s4290_s27 + $0x1a40] sm:$0xff]  ;;  %v1122_v10 = vld [vmem:[%s4290_s27 + $0x1b50] sm:$0xff]  ;;  %v4850_v49 = vld.sshfl [vmem:[#allocation1 + $0x10] sm:$0xff pattern:$0x73625140] }
 0x117   : > { %2475 = vmatpush.msra.mxu2 %v1094_v51  ;;  %2494 = vmatpush.msra.mxu3 %v1128_v52  ;;  %v1022_v11 = vld [vmem:[%s4290_s27 + $0x1830] sm:$0xff]  ;;  %v1056_v12 = vld [vmem:[%s4290_s27 + $0x1940] sm:$0xff] }
 0x118   : > { %2436 = vmatpush.msra.mxu0 %v1028_v53  ;;  %2455 = vmatpush.msra.mxu1 %v1062_v54  ;;  %v1086_v14 = vld [vmem:[%s4290_s27 + $0x1a30] sm:$0xff]  ;;  %v1120_v15 = vld [vmem:[%s4290_s27 + $0x1b40] sm:$0xff] }
 0x119   : > { %2476 = vmatpush.msra.mxu2 %v1092_v57  ;;  %2495 = vmatpush.msra.mxu3 %v1126_v58  ;;  %v1020_v20 = vld [vmem:[%s4290_s27 + $0x1820] sm:$0xff]  ;;  %v1054_v21 = vld [vmem:[%s4290_s27 + $0x1930] sm:$0xff] }
 0x11a   : > { %2437 = vmatpush.msra.mxu0 %v1026_v59  ;;  %2456 = vmatpush.msra.mxu1 %v1060_v2  ;;  %v1084_v22 = vld [vmem:[%s4290_s27 + $0x1a20] sm:$0xff]  ;;  %v1118_v23 = vld [vmem:[%s4290_s27 + $0x1b30] sm:$0xff] }
 0x11b   : > { %2477 = vmatpush.msra.mxu2 %v1090_v3  ;;  %2496 = vmatpush.msra.mxu3 %v1124_v4  ;;  %v2124_v13 = vpop.f32.mrf.mxu0  ;;  %v1018_v27 = vld [vmem:[%s4290_s27 + $0x1810] sm:$0xff]  ;;  %v1052_v28 = vld [vmem:[%s4290_s27 + $0x1920] sm:$0xff] }
 0x11c   : > { %2438 = vmatpush.msra.mxu0 %v1024_v5  ;;  %2457 = vmatpush.msra.mxu1 %v1058_v8  ;;  %v2125_v17 = vadd.f32 %v2124_v13, %v4792_v16  ;;  %v242_v29 = vld [vmem:[%s6141_s0 + $0x38] sm:$0xff]  ;;  %v1116_v31 = vld [vmem:[%s4290_s27 + $0x1b20] sm:$0xff] }
 0x11d   : > { %2478 = vmatpush.msra.mxu2 %v1088_v9  ;;  %2497 = vmatpush.msra.mxu3 %v1122_v10  ;;  %v1082_v30 = vld [vmem:[%s4290_s27 + $0x1a10] sm:$0xff]  ;;  %1867 = vst [vmem:[#allocation1 + $0x20] ss:$4 sm:$0xff] %v242_v29  ;;  %v1016_v32 = vld [vmem:[%s4290_s27 + $0x1800] sm:$0xff] }
 0x11e   : > { %2439 = vmatpush.msra.mxu0 %v1022_v11  ;;  %2458 = vmatpush.msra.mxu1 %v1056_v12  ;;  %v2144_v26 = vpop.f32.mrf.mxu1  ;;  %v1050_v33 = vld [vmem:[%s4290_s27 + $0x1910] sm:$0xff]  ;;  %v1080_v37 = vld [vmem:[%s4290_s27 + $0x1a00] sm:$0xff] }
 0x11f   : > { %2479 = vmatpush.msra.mxu2 %v1086_v14  ;;  %2498 = vmatpush.msra.mxu3 %v1120_v15  ;;  %v2145_v16 = vadd.f32 %v2144_v26, %v2125_v17  ;;  %v1114_v38 = vld [vmem:[%s4290_s27 + $0x1b10] sm:$0xff]  ;;  %v1048_v53 = vld [vmem:[%s4290_s27 + $0x1900] sm:$0xff] }
 0x120   : > { %2440 = vmatpush.msra.mxu0 %v1020_v20  ;;  %2459 = vmatpush.msra.mxu1 %v1054_v21  ;;  %v1174_v50 = vld [vmem:[%s4290_s27 + $0x1cf0] sm:$0xff]  ;;  %v1112_v54 = vld [vmem:[%s4290_s27 + $0x1b00] sm:$0xff] }
 0x121   : > { %2480 = vmatpush.msra.mxu2 %v1084_v22  ;;  %2499 = vmatpush.msra.mxu3 %v1118_v23  ;;  %v2164_v34 = vpop.f32.mrf.mxu2  ;;  %v1238_v51 = vld [vmem:[%s4290_s27 + $0x1ef0] sm:$0xff]  ;;  %v4860_v58 = vld.sshfl [vmem:[#allocation1 + $0x8] sm:$0xff pattern:$0x73625140] }
 0x122   : > { %2441 = vmatpush.msra.mxu0 %v1018_v27  ;;  %2460 = vmatpush.msra.mxu1 %v1052_v28  ;;  %v2165_v39 = vadd.f32 %v2164_v34, %v2145_v16  ;;  %v4862_v59 = vld.sshfl [vmem:[#allocation1 + $0x18] sm:$0xff pattern:$0x73625140]  ;;  %v1172_v2 = vld [vmem:[%s4290_s27 + $0x1ce0] sm:$0xff] }
 0x123   : > { %2481 = vmatpush.msra.mxu2 %v1082_v30  ;;  %2500 = vmatpush.msra.mxu3 %v1116_v31  ;;  %v1206_v3 = vld [vmem:[%s4290_s27 + $0x1df0] sm:$0xff]  ;;  %v1236_v4 = vld [vmem:[%s4290_s27 + $0x1ee0] sm:$0xff] }
 0x124   : > { %2442 = vmatpush.msra.mxu0 %v1016_v32  ;;  %2461 = vmatpush.msra.mxu1 %v1050_v33  ;;  %v2184_v52 = vpop.f32.mrf.mxu3  ;;  %v1270_v5 = vld [vmem:[%s4290_s27 + $0x1ff0] sm:$0xff]  ;;  %v1204_v9 = vld [vmem:[%s4290_s27 + $0x1de0] sm:$0xff] }
 0x125   : > { %2482 = vmatpush.msra.mxu2 %v1080_v37  ;;  %2501 = vmatpush.msra.mxu3 %v1114_v38  ;;  %v4856_v57 = vadd.f32 %v2184_v52, %v2165_v39  ;;  %v1170_v8 = vld [vmem:[%s4290_s27 + $0x1cd0] sm:$0xff]  ;;  %v1268_v11 = vld [vmem:[%s4290_s27 + $0x1fe0] sm:$0xff] }
 0x126   : > { %2443 = vmatmul.f32.vlgmr.msra.gmra.mxu0 %v4848_v40  ;;  %2483 = vmatmul.f32.vlgmr.msra.gmra.mxu2 %v4850_v49  ;;  %v1234_v10 = vld [vmem:[%s4290_s27 + $0x1ed0] sm:$0xff]  ;;  %v1168_v12 = vld [vmem:[%s4290_s27 + $0x1cc0] sm:$0xff] }
 0x127   : > { %2507 = vmatpush.msrb.mxu0 %v1174_v50  ;;  %2547 = vmatpush.msrb.mxu2 %v1238_v51  ;;  %v1202_v13 = vld [vmem:[%s4290_s27 + $0x1dd0] sm:$0xff]  ;;  %v1232_v14 = vld [vmem:[%s4290_s27 + $0x1ec0] sm:$0xff] }
 0x128   : > { %2462 = vmatpush.msra.mxu1 %v1048_v53  ;;  %2502 = vmatpush.msra.mxu3 %v1112_v54  ;;  %v1266_v15 = vld [vmem:[%s4290_s27 + $0x1fd0] sm:$0xff]  ;;  %v1200_v20 = vld [vmem:[%s4290_s27 + $0x1dc0] sm:$0xff] }
 0x129   : > { %2463 = vmatmul.f32.vlgmr.msra.gmra.mxu1 %v4860_v58  ;;  %2503 = vmatmul.f32.vlgmr.msra.gmra.mxu3 %v4862_v59  ;;  %v1166_v17 = vld [vmem:[%s4290_s27 + $0x1cb0] sm:$0xff]  ;;  %v1264_v22 = vld [vmem:[%s4290_s27 + $0x1fc0] sm:$0xff] }
 0x12a   : > { %2508 = vmatpush.msrb.mxu0 %v1172_v2  ;;  %2527 = vmatpush.msrb.mxu1 %v1206_v3  ;;  %v1230_v21 = vld [vmem:[%s4290_s27 + $0x1eb0] sm:$0xff]  ;;  %v1164_v23 = vld [vmem:[%s4290_s27 + $0x1ca0] sm:$0xff] }
 0x12b   : > { %2548 = vmatpush.msrb.mxu2 %v1236_v4  ;;  %2567 = vmatpush.msrb.mxu3 %v1270_v5  ;;  %v1198_v26 = vld [vmem:[%s4290_s27 + $0x1db0] sm:$0xff]  ;;  %v1228_v27 = vld [vmem:[%s4290_s27 + $0x1ea0] sm:$0xff] }
 0x12c   : > { %2509 = vmatpush.msrb.mxu0 %v1170_v8  ;;  %2528 = vmatpush.msrb.mxu1 %v1204_v9  ;;  %v1262_v28 = vld [vmem:[%s4290_s27 + $0x1fb0] sm:$0xff]  ;;  %v1196_v29 = vld [vmem:[%s4290_s27 + $0x1da0] sm:$0xff] }
 0x12d   : > { %2549 = vmatpush.msrb.mxu2 %v1234_v10  ;;  %2568 = vmatpush.msrb.mxu3 %v1268_v11  ;;  %v1162_v16 = vld [vmem:[%s4290_s27 + $0x1c90] sm:$0xff]  ;;  %v1260_v31 = vld [vmem:[%s4290_s27 + $0x1fa0] sm:$0xff] }
 0x12e   : > { %2510 = vmatpush.msrb.mxu0 %v1168_v12  ;;  %2529 = vmatpush.msrb.mxu1 %v1202_v13  ;;  %v1226_v30 = vld [vmem:[%s4290_s27 + $0x1e90] sm:$0xff]  ;;  %v1160_v32 = vld [vmem:[%s4290_s27 + $0x1c80] sm:$0xff] }
 0x12f   : > { %2550 = vmatpush.msrb.mxu2 %v1232_v14  ;;  %2569 = vmatpush.msrb.mxu3 %v1266_v15  ;;  %v1194_v33 = vld [vmem:[%s4290_s27 + $0x1d90] sm:$0xff]  ;;  %v1224_v34 = vld [vmem:[%s4290_s27 + $0x1e80] sm:$0xff] }
 0x130   : > { %2511 = vmatpush.msrb.mxu0 %v1166_v17  ;;  %2530 = vmatpush.msrb.mxu1 %v1200_v20  ;;  %v1258_v37 = vld [vmem:[%s4290_s27 + $0x1f90] sm:$0xff]  ;;  %v1192_v39 = vld [vmem:[%s4290_s27 + $0x1d80] sm:$0xff] }
 0x131   : > { %2551 = vmatpush.msrb.mxu2 %v1230_v21  ;;  %2570 = vmatpush.msrb.mxu3 %v1264_v22  ;;  %v1158_v38 = vld [vmem:[%s4290_s27 + $0x1c70] sm:$0xff]  ;;  %v1256_v51 = vld [vmem:[%s4290_s27 + $0x1f80] sm:$0xff] }
 0x132   : > { %2512 = vmatpush.msrb.mxu0 %v1164_v23  ;;  %2531 = vmatpush.msrb.mxu1 %v1198_v26  ;;  %v1222_v50 = vld [vmem:[%s4290_s27 + $0x1e70] sm:$0xff]  ;;  %v1156_v52 = vld [vmem:[%s4290_s27 + $0x1c60] sm:$0xff] }
 0x133   : > { %2552 = vmatpush.msrb.mxu2 %v1228_v27  ;;  %2571 = vmatpush.msrb.mxu3 %v1262_v28  ;;  %v1190_v53 = vld [vmem:[%s4290_s27 + $0x1d70] sm:$0xff]  ;;  %v1220_v54 = vld [vmem:[%s4290_s27 + $0x1e60] sm:$0xff] }
 0x134   : > { %2513 = vmatpush.msrb.mxu0 %v1162_v16  ;;  %2532 = vmatpush.msrb.mxu1 %v1196_v29  ;;  %v1254_v2 = vld [vmem:[%s4290_s27 + $0x1f70] sm:$0xff]  ;;  %v1188_v4 = vld [vmem:[%s4290_s27 + $0x1d60] sm:$0xff] }
 0x135   : > { %2553 = vmatpush.msrb.mxu2 %v1226_v30  ;;  %2572 = vmatpush.msrb.mxu3 %v1260_v31  ;;  %v1154_v3 = vld [vmem:[%s4290_s27 + $0x1c50] sm:$0xff]  ;;  %v1252_v8 = vld [vmem:[%s4290_s27 + $0x1f60] sm:$0xff]  ;;  %v243_v30 = vld [vmem:[%s6141_s0 + $0x40] sm:$0xff] }
 0x136   : > { %2514 = vmatpush.msrb.mxu0 %v1160_v32  ;;  %2533 = vmatpush.msrb.mxu1 %v1194_v33  ;;  %v1218_v5 = vld [vmem:[%s4290_s27 + $0x1e50] sm:$0xff]  ;;  %v1152_v9 = vld [vmem:[%s4290_s27 + $0x1c40] sm:$0xff]  ;;  %1876 = vst [vmem:[#allocation1] ss:$4 sm:$0xff] %v243_v30 }
 0x137   : > { %2554 = vmatpush.msrb.mxu2 %v1224_v34  ;;  %2573 = vmatpush.msrb.mxu3 %v1258_v37  ;;  %v1186_v10 = vld [vmem:[%s4290_s27 + $0x1d50] sm:$0xff]  ;;  %v1216_v11 = vld [vmem:[%s4290_s27 + $0x1e40] sm:$0xff] }
 0x138   : > { %2515 = vmatpush.msrb.mxu0 %v1158_v38  ;;  %2534 = vmatpush.msrb.mxu1 %v1192_v39  ;;  %v1250_v12 = vld [vmem:[%s4290_s27 + $0x1f50] sm:$0xff]  ;;  %v1184_v14 = vld [vmem:[%s4290_s27 + $0x1d40] sm:$0xff] }
 0x139   : > { %2555 = vmatpush.msrb.mxu2 %v1222_v50  ;;  %2574 = vmatpush.msrb.mxu3 %v1256_v51  ;;  %v1150_v13 = vld [vmem:[%s4290_s27 + $0x1c30] sm:$0xff]  ;;  %v1248_v20 = vld [vmem:[%s4290_s27 + $0x1f40] sm:$0xff]  ;;  %v4930_v51 = vld.sshfl [vmem:[#allocation1 + $0x20] sm:$0xff pattern:$0x73625140] }
 0x13a   : > { %2516 = vmatpush.msrb.mxu0 %v1156_v52  ;;  %2535 = vmatpush.msrb.mxu1 %v1190_v53  ;;  %v1214_v17 = vld [vmem:[%s4290_s27 + $0x1e30] sm:$0xff]  ;;  %v1148_v22 = vld [vmem:[%s4290_s27 + $0x1c20] sm:$0xff]  ;;  %v4932_v52 = vld.sshfl [vmem:[#allocation1 + $0x30] sm:$0xff pattern:$0x73625140] }
 0x13b   : > { %2556 = vmatpush.msrb.mxu2 %v1220_v54  ;;  %2575 = vmatpush.msrb.mxu3 %v1254_v2  ;;  %v1182_v23 = vld [vmem:[%s4290_s27 + $0x1d30] sm:$0xff]  ;;  %v1212_v26 = vld [vmem:[%s4290_s27 + $0x1e20] sm:$0xff] }
 0x13c   : > { %2517 = vmatpush.msrb.mxu0 %v1154_v3  ;;  %2536 = vmatpush.msrb.mxu1 %v1188_v4  ;;  %v1246_v27 = vld [vmem:[%s4290_s27 + $0x1f30] sm:$0xff]  ;;  %v1180_v29 = vld [vmem:[%s4290_s27 + $0x1d20] sm:$0xff] }
 0x13d   : > { %2557 = vmatpush.msrb.mxu2 %v1218_v5  ;;  %2576 = vmatpush.msrb.mxu3 %v1252_v8  ;;  %v2204_v15 = vpop.f32.mrf.mxu0  ;;  %v1146_v16 = vld [vmem:[%s4290_s27 + $0x1c10] sm:$0xff]  ;;  %v1244_v32 = vld [vmem:[%s4290_s27 + $0x1f20] sm:$0xff] }
 0x13e   : > { %2518 = vmatpush.msrb.mxu0 %v1152_v9  ;;  %2537 = vmatpush.msrb.mxu1 %v1186_v10  ;;  %v2205_v21 = vadd.f32 %v2204_v15, %v4856_v57  ;;  %v1210_v31 = vld [vmem:[%s4290_s27 + $0x1e10] sm:$0xff]  ;;  %v1144_v33 = vld [vmem:[%s4290_s27 + $0x1c00] sm:$0xff] }
 0x13f   : > { %2558 = vmatpush.msrb.mxu2 %v1216_v11  ;;  %2577 = vmatpush.msrb.mxu3 %v1250_v12  ;;  %v1178_v34 = vld [vmem:[%s4290_s27 + $0x1d10] sm:$0xff]  ;;  %v1208_v38 = vld [vmem:[%s4290_s27 + $0x1e00] sm:$0xff] }
 0x140   : > { %2519 = vmatpush.msrb.mxu0 %v1150_v13  ;;  %2538 = vmatpush.msrb.mxu1 %v1184_v14  ;;  %v2224_v28 = vpop.f32.mrf.mxu1  ;;  %v1242_v39 = vld [vmem:[%s4290_s27 + $0x1f10] sm:$0xff]  ;;  %v1176_v3 = vld [vmem:[%s4290_s27 + $0x1d00] sm:$0xff] }
 0x141   : > { %2559 = vmatpush.msrb.mxu2 %v1214_v17  ;;  %2578 = vmatpush.msrb.mxu3 %v1248_v20  ;;  %v2225_v57 = vadd.f32 %v2224_v28, %v2205_v21  ;;  %v1302_v53 = vld [vmem:[%s4290_s27 + $0x20f0] sm:$0xff]  ;;  %v1240_v4 = vld [vmem:[%s4290_s27 + $0x1f00] sm:$0xff] }
 0x142   : > { %2520 = vmatpush.msrb.mxu0 %v1148_v22  ;;  %2539 = vmatpush.msrb.mxu1 %v1182_v23  ;;  %v1366_v54 = vld [vmem:[%s4290_s27 + $0x22f0] sm:$0xff]  ;;  %v4942_v8 = vld.sshfl [vmem:[#allocation1 + $0x28] sm:$0xff pattern:$0x73625140] }
 0x143   : > { %2560 = vmatpush.msrb.mxu2 %v1212_v26  ;;  %2579 = vmatpush.msrb.mxu3 %v1246_v27  ;;  %v2244_v37 = vpop.f32.mrf.mxu2  ;;  %v4944_v9 = vld.sshfl [vmem:[#allocation1 + $0x38] sm:$0xff pattern:$0x73625140]  ;;  %v1300_v10 = vld [vmem:[%s4290_s27 + $0x20e0] sm:$0xff] }
 0x144   : > { %2521 = vmatpush.msrb.mxu0 %v1146_v16  ;;  %2540 = vmatpush.msrb.mxu1 %v1180_v29  ;;  %v2245_v50 = vadd.f32 %v2244_v37, %v2225_v57  ;;  %v1334_v11 = vld [vmem:[%s4290_s27 + $0x21f0] sm:$0xff]  ;;  %v1364_v12 = vld [vmem:[%s4290_s27 + $0x22e0] sm:$0xff] }
 0x145   : > { %2561 = vmatpush.msrb.mxu2 %v1210_v31  ;;  %2580 = vmatpush.msrb.mxu3 %v1244_v32  ;;  %v1398_v13 = vld [vmem:[%s4290_s27 + $0x23f0] sm:$0xff]  ;;  %v1332_v15 = vld [vmem:[%s4290_s27 + $0x21e0] sm:$0xff] }
 0x146   : > { %2522 = vmatpush.msrb.mxu0 %v1144_v33  ;;  %2541 = vmatpush.msrb.mxu1 %v1178_v34  ;;  %v2264_v2 = vpop.f32.mrf.mxu3  ;;  %v1298_v14 = vld [vmem:[%s4290_s27 + $0x20d0] sm:$0xff]  ;;  %v1396_v20 = vld [vmem:[%s4290_s27 + $0x23e0] sm:$0xff] }
 0x147   : > { %2562 = vmatpush.msrb.mxu2 %v1208_v38  ;;  %2581 = vmatpush.msrb.mxu3 %v1242_v39  ;;  %v4938_v5 = vadd.f32 %v2264_v2, %v2245_v50  ;;  %v1362_v17 = vld [vmem:[%s4290_s27 + $0x22d0] sm:$0xff]  ;;  %v1296_v21 = vld [vmem:[%s4290_s27 + $0x20c0] sm:$0xff] }
 0x148   : > { %2523 = vmatmul.f32.vlgmr.msrb.gmra.mxu0 %v4930_v51  ;;  %2563 = vmatmul.f32.vlgmr.msrb.gmra.mxu2 %v4932_v52  ;;  %v1330_v22 = vld [vmem:[%s4290_s27 + $0x21d0] sm:$0xff]  ;;  %v1360_v23 = vld [vmem:[%s4290_s27 + $0x22c0] sm:$0xff] }
 0x149   : > { %2587 = vmatpush.msra.mxu0 %v1302_v53  ;;  %2627 = vmatpush.msra.mxu2 %v1366_v54  ;;  %v1394_v26 = vld [vmem:[%s4290_s27 + $0x23d0] sm:$0xff]  ;;  %v1328_v28 = vld [vmem:[%s4290_s27 + $0x21c0] sm:$0xff] }
 0x14a   : > { %2542 = vmatpush.msrb.mxu1 %v1176_v3  ;;  %2582 = vmatpush.msrb.mxu3 %v1240_v4  ;;  %v1294_v27 = vld [vmem:[%s4290_s27 + $0x20b0] sm:$0xff]  ;;  %v1392_v29 = vld [vmem:[%s4290_s27 + $0x23c0] sm:$0xff] }
 0x14b   : > { %2543 = vmatmul.f32.vlgmr.msrb.gmra.mxu1 %v4942_v8  ;;  %2583 = vmatmul.f32.vlgmr.msrb.gmra.mxu3 %v4944_v9  ;;  %v1358_v16 = vld [vmem:[%s4290_s27 + $0x22b0] sm:$0xff]  ;;  %v1292_v57 = vld [vmem:[%s4290_s27 + $0x20a0] sm:$0xff] }
 0x14c   : > { %2588 = vmatpush.msra.mxu0 %v1300_v10  ;;  %2607 = vmatpush.msra.mxu1 %v1334_v11  ;;  %v1326_v30 = vld [vmem:[%s4290_s27 + $0x21b0] sm:$0xff]  ;;  %v1356_v31 = vld [vmem:[%s4290_s27 + $0x22a0] sm:$0xff] }
 0x14d   : > { %2628 = vmatpush.msra.mxu2 %v1364_v12  ;;  %2647 = vmatpush.msra.mxu3 %v1398_v13  ;;  %v1390_v32 = vld [vmem:[%s4290_s27 + $0x23b0] sm:$0xff]  ;;  %v1324_v34 = vld [vmem:[%s4290_s27 + $0x21a0] sm:$0xff] }
 0x14e   : > { %2589 = vmatpush.msra.mxu0 %v1298_v14  ;;  %2608 = vmatpush.msra.mxu1 %v1332_v15  ;;  %v1290_v33 = vld [vmem:[%s4290_s27 + $0x2090] sm:$0xff]  ;;  %v1388_v38 = vld [vmem:[%s4290_s27 + $0x23a0] sm:$0xff] }
 0x14f   : > { %2629 = vmatpush.msra.mxu2 %v1362_v17  ;;  %2648 = vmatpush.msra.mxu3 %v1396_v20  ;;  %v1354_v37 = vld [vmem:[%s4290_s27 + $0x2290] sm:$0xff]  ;;  %v1288_v39 = vld [vmem:[%s4290_s27 + $0x2080] sm:$0xff] }
 0x150   : > { %2590 = vmatpush.msra.mxu0 %v1296_v21  ;;  %2609 = vmatpush.msra.mxu1 %v1330_v22  ;;  %v1322_v50 = vld [vmem:[%s4290_s27 + $0x2190] sm:$0xff]  ;;  %v1352_v53 = vld [vmem:[%s4290_s27 + $0x2280] sm:$0xff] }
 0x151   : > { %2630 = vmatpush.msra.mxu2 %v1360_v23  ;;  %2649 = vmatpush.msra.mxu3 %v1394_v26  ;;  %v1386_v54 = vld [vmem:[%s4290_s27 + $0x2390] sm:$0xff]  ;;  %v1320_v3 = vld [vmem:[%s4290_s27 + $0x2180] sm:$0xff] }
 0x152   : > { %2591 = vmatpush.msra.mxu0 %v1294_v27  ;;  %2610 = vmatpush.msra.mxu1 %v1328_v28  ;;  %v1286_v2 = vld [vmem:[%s4290_s27 + $0x2070] sm:$0xff]  ;;  %v1384_v10 = vld [vmem:[%s4290_s27 + $0x2380] sm:$0xff] }
 0x153   : > { %2631 = vmatpush.msra.mxu2 %v1358_v16  ;;  %2650 = vmatpush.msra.mxu3 %v1392_v29  ;;  %v1350_v4 = vld [vmem:[%s4290_s27 + $0x2270] sm:$0xff]  ;;  %v1284_v11 = vld [vmem:[%s4290_s27 + $0x2060] sm:$0xff] }
 0x154   : > { %2592 = vmatpush.msra.mxu0 %v1292_v57  ;;  %2611 = vmatpush.msra.mxu1 %v1326_v30  ;;  %v1318_v12 = vld [vmem:[%s4290_s27 + $0x2170] sm:$0xff]  ;;  %v1348_v13 = vld [vmem:[%s4290_s27 + $0x2260] sm:$0xff] }
 0x155   : > { %2632 = vmatpush.msra.mxu2 %v1356_v31  ;;  %2651 = vmatpush.msra.mxu3 %v1390_v32  ;;  %v1382_v14 = vld [vmem:[%s4290_s27 + $0x2370] sm:$0xff]  ;;  %v1316_v17 = vld [vmem:[%s4290_s27 + $0x2160] sm:$0xff] }
 0x156   : > { %2593 = vmatpush.msra.mxu0 %v1290_v33  ;;  %2612 = vmatpush.msra.mxu1 %v1324_v34  ;;  %v1282_v15 = vld [vmem:[%s4290_s27 + $0x2050] sm:$0xff]  ;;  %v1380_v21 = vld [vmem:[%s4290_s27 + $0x2360] sm:$0xff] }
 0x157   : > { %2633 = vmatpush.msra.mxu2 %v1354_v37  ;;  %2652 = vmatpush.msra.mxu3 %v1388_v38  ;;  %v1346_v20 = vld [vmem:[%s4290_s27 + $0x2250] sm:$0xff]  ;;  %v1280_v22 = vld [vmem:[%s4290_s27 + $0x2040] sm:$0xff] }
 0x158   : > { %2594 = vmatpush.msra.mxu0 %v1288_v39  ;;  %2613 = vmatpush.msra.mxu1 %v1322_v50  ;;  %v1314_v23 = vld [vmem:[%s4290_s27 + $0x2150] sm:$0xff]  ;;  %v1344_v26 = vld [vmem:[%s4290_s27 + $0x2240] sm:$0xff] }
 0x159   : > { %2634 = vmatpush.msra.mxu2 %v1352_v53  ;;  %2653 = vmatpush.msra.mxu3 %v1386_v54  ;;  %v1378_v27 = vld [vmem:[%s4290_s27 + $0x2350] sm:$0xff]  ;;  %v1312_v16 = vld [vmem:[%s4290_s27 + $0x2140] sm:$0xff] }
 0x15a   : > { %2595 = vmatpush.msra.mxu0 %v1286_v2  ;;  %2614 = vmatpush.msra.mxu1 %v1320_v3  ;;  %v1278_v28 = vld [vmem:[%s4290_s27 + $0x2030] sm:$0xff]  ;;  %v1376_v30 = vld [vmem:[%s4290_s27 + $0x2340] sm:$0xff] }
 0x15b   : > { %2635 = vmatpush.msra.mxu2 %v1350_v4  ;;  %2654 = vmatpush.msra.mxu3 %v1384_v10  ;;  %v1342_v57 = vld [vmem:[%s4290_s27 + $0x2230] sm:$0xff]  ;;  %v1276_v32 = vld [vmem:[%s4290_s27 + $0x2020] sm:$0xff] }
 0x15c   : > { %2596 = vmatpush.msra.mxu0 %v1284_v11  ;;  %2615 = vmatpush.msra.mxu1 %v1318_v12  ;;  %v1310_v33 = vld [vmem:[%s4290_s27 + $0x2130] sm:$0xff]  ;;  %v1340_v34 = vld [vmem:[%s4290_s27 + $0x2220] sm:$0xff] }
 0x15d   : > { %2636 = vmatpush.msra.mxu2 %v1348_v13  ;;  %2655 = vmatpush.msra.mxu3 %v1382_v14  ;;  %v1374_v37 = vld [vmem:[%s4290_s27 + $0x2330] sm:$0xff]  ;;  %v1308_v50 = vld [vmem:[%s4290_s27 + $0x2120] sm:$0xff]  ;;  %v5012_v14 = vld.sshfl [vmem:[#allocation1] sm:$0xff pattern:$0x73625140] }
 0x15e   : > { %2597 = vmatpush.msra.mxu0 %v1282_v15  ;;  %2616 = vmatpush.msra.mxu1 %v1316_v17  ;;  %v1274_v39 = vld [vmem:[%s4290_s27 + $0x2010] sm:$0xff]  ;;  %v244_v53 = vld [vmem:[%s6141_s0 + $0x48] sm:$0xff]  ;;  %v5014_v15 = vld.sshfl [vmem:[#allocation1 + $0x10] sm:$0xff pattern:$0x73625140] }
 0x15f   : > { %2637 = vmatpush.msra.mxu2 %v1346_v20  ;;  %2656 = vmatpush.msra.mxu3 %v1380_v21  ;;  %v2284_v29 = vpop.f32.mrf.mxu0  ;;  %v1338_v54 = vld [vmem:[%s4290_s27 + $0x2210] sm:$0xff]  ;;  %v1372_v2 = vld [vmem:[%s4290_s27 + $0x2320] sm:$0xff]  ;;  %1877 = vst [vmem:[#allocation1 + $0x20] ss:$4 sm:$0xff] %v244_v53 }
 0x160   : > { %2598 = vmatpush.msra.mxu0 %v1280_v22  ;;  %2617 = vmatpush.msra.mxu1 %v1314_v23  ;;  %v2285_v31 = vadd.f32 %v2284_v29, %v4938_v5  ;;  %v1272_v3 = vld [vmem:[%s4290_s27 + $0x2000] sm:$0xff]  ;;  %v1306_v4 = vld [vmem:[%s4290_s27 + $0x2110] sm:$0xff] }
 0x161   : > { %2638 = vmatpush.msra.mxu2 %v1344_v26  ;;  %2657 = vmatpush.msra.mxu3 %v1378_v27  ;;  %v1336_v11 = vld [vmem:[%s4290_s27 + $0x2200] sm:$0xff]  ;;  %v1370_v12 = vld [vmem:[%s4290_s27 + $0x2310] sm:$0xff] }
 0x162   : > { %2599 = vmatpush.msra.mxu0 %v1278_v28  ;;  %2618 = vmatpush.msra.mxu1 %v1312_v16  ;;  %v2304_v38 = vpop.f32.mrf.mxu1  ;;  %v1430_v17 = vld [vmem:[%s4290_s27 + $0x24f0] sm:$0xff]  ;;  %v1304_v22 = vld [vmem:[%s4290_s27 + $0x2100] sm:$0xff] }
 0x163   : > { %2639 = vmatpush.msra.mxu2 %v1342_v57  ;;  %2658 = vmatpush.msra.mxu3 %v1376_v30  ;;  %v2305_v5 = vadd.f32 %v2304_v38, %v2285_v31  ;;  %v1494_v20 = vld [vmem:[%s4290_s27 + $0x26f0] sm:$0xff]  ;;  %v1368_v23 = vld [vmem:[%s4290_s27 + $0x2300] sm:$0xff] }
 0x164   : > { %2600 = vmatpush.msra.mxu0 %v1276_v32  ;;  %2619 = vmatpush.msra.mxu1 %v1310_v33  ;;  %v5024_v27 = vld.sshfl [vmem:[#allocation1 + $0x8] sm:$0xff pattern:$0x73625140]  ;;  %v5026_v28 = vld.sshfl [vmem:[#allocation1 + $0x18] sm:$0xff pattern:$0x73625140] }
 0x165   : > { %2640 = vmatpush.msra.mxu2 %v1340_v34  ;;  %2659 = vmatpush.msra.mxu3 %v1374_v37  ;;  %v2324_v10 = vpop.f32.mrf.mxu2  ;;  %v1428_v16 = vld [vmem:[%s4290_s27 + $0x24e0] sm:$0xff]  ;;  %v1462_v29 = vld [vmem:[%s4290_s27 + $0x25f0] sm:$0xff] }
 0x166   : > { %2601 = vmatpush.msra.mxu0 %v1274_v39  ;;  %2620 = vmatpush.msra.mxu1 %v1308_v50  ;;  %v2325_v13 = vadd.f32 %v2324_v10, %v2305_v5  ;;  %v1492_v57 = vld [vmem:[%s4290_s27 + $0x26e0] sm:$0xff]  ;;  %v1526_v30 = vld [vmem:[%s4290_s27 + $0x27f0] sm:$0xff] }
 0x167   : > { %2641 = vmatpush.msra.mxu2 %v1338_v54  ;;  %2660 = vmatpush.msra.mxu3 %v1372_v2  ;;  %v1426_v31 = vld [vmem:[%s4290_s27 + $0x24d0] sm:$0xff]  ;;  %v1460_v32 = vld [vmem:[%s4290_s27 + $0x25e0] sm:$0xff] }
 0x168   : > { %2602 = vmatpush.msra.mxu0 %v1272_v3  ;;  %2621 = vmatpush.msra.mxu1 %v1306_v4  ;;  %v2344_v21 = vpop.f32.mrf.mxu3  ;;  %v1490_v33 = vld [vmem:[%s4290_s27 + $0x26d0] sm:$0xff]  ;;  %v1524_v34 = vld [vmem:[%s4290_s27 + $0x27e0] sm:$0xff] }
 0x169   : > { %2642 = vmatpush.msra.mxu2 %v1336_v11  ;;  %2661 = vmatpush.msra.mxu3 %v1370_v12  ;;  %v5020_v26 = vadd.f32 %v2344_v21, %v2325_v13  ;;  %v1424_v37 = vld [vmem:[%s4290_s27 + $0x24c0] sm:$0xff]  ;;  %v1458_v38 = vld [vmem:[%s4290_s27 + $0x25d0] sm:$0xff] }
 0x16a   : > { %2603 = vmatmul.f32.vlgmr.msra.gmra.mxu0 %v5012_v14  ;;  %2643 = vmatmul.f32.vlgmr.msra.gmra.mxu2 %v5014_v15  ;;  %v1488_v39 = vld [vmem:[%s4290_s27 + $0x26c0] sm:$0xff]  ;;  %v1522_v50 = vld [vmem:[%s4290_s27 + $0x27d0] sm:$0xff] }
 0x16b   : > { %2667 = vmatpush.msrb.mxu0 %v1430_v17  ;;  %2707 = vmatpush.msrb.mxu2 %v1494_v20  ;;  %v1422_v5 = vld [vmem:[%s4290_s27 + $0x24b0] sm:$0xff]  ;;  %v1456_v53 = vld [vmem:[%s4290_s27 + $0x25c0] sm:$0xff] }
 0x16c   : > { %2622 = vmatpush.msra.mxu1 %v1304_v22  ;;  %2662 = vmatpush.msra.mxu3 %v1368_v23  ;;  %v1486_v54 = vld [vmem:[%s4290_s27 + $0x26b0] sm:$0xff]  ;;  %v1520_v2 = vld [vmem:[%s4290_s27 + $0x27c0] sm:$0xff] }
 0x16d   : > { %2623 = vmatmul.f32.vlgmr.msra.gmra.mxu1 %v5024_v27  ;;  %2663 = vmatmul.f32.vlgmr.msra.gmra.mxu3 %v5026_v28  ;;  %v1420_v3 = vld [vmem:[%s4290_s27 + $0x24a0] sm:$0xff]  ;;  %v1454_v4 = vld [vmem:[%s4290_s27 + $0x25b0] sm:$0xff] }
 0x16e   : > { %2668 = vmatpush.msrb.mxu0 %v1428_v16  ;;  %2687 = vmatpush.msrb.mxu1 %v1462_v29  ;;  %v1484_v10 = vld [vmem:[%s4290_s27 + $0x26a0] sm:$0xff]  ;;  %v1518_v11 = vld [vmem:[%s4290_s27 + $0x27b0] sm:$0xff] }
 0x16f   : > { %2708 = vmatpush.msrb.mxu2 %v1492_v57  ;;  %2727 = vmatpush.msrb.mxu3 %v1526_v30  ;;  %v1418_v12 = vld [vmem:[%s4290_s27 + $0x2490] sm:$0xff]  ;;  %v1452_v13 = vld [vmem:[%s4290_s27 + $0x25a0] sm:$0xff] }
 0x170   : > { %2669 = vmatpush.msrb.mxu0 %v1426_v31  ;;  %2688 = vmatpush.msrb.mxu1 %v1460_v32  ;;  %v1482_v17 = vld [vmem:[%s4290_s27 + $0x2690] sm:$0xff]  ;;  %v1516_v20 = vld [vmem:[%s4290_s27 + $0x27a0] sm:$0xff] }
 0x171   : > { %2709 = vmatpush.msrb.mxu2 %v1490_v33  ;;  %2728 = vmatpush.msrb.mxu3 %v1524_v34  ;;  %v1416_v21 = vld [vmem:[%s4290_s27 + $0x2480] sm:$0xff]  ;;  %v1450_v22 = vld [vmem:[%s4290_s27 + $0x2590] sm:$0xff] }
 0x172   : > { %2670 = vmatpush.msrb.mxu0 %v1424_v37  ;;  %2689 = vmatpush.msrb.mxu1 %v1458_v38  ;;  %v1480_v23 = vld [vmem:[%s4290_s27 + $0x2680] sm:$0xff]  ;;  %v1514_v16 = vld [vmem:[%s4290_s27 + $0x2790] sm:$0xff] }
 0x173   : > { %2710 = vmatpush.msrb.mxu2 %v1488_v39  ;;  %2729 = vmatpush.msrb.mxu3 %v1522_v50  ;;  %v1414_v29 = vld [vmem:[%s4290_s27 + $0x2470] sm:$0xff]  ;;  %v1448_v57 = vld [vmem:[%s4290_s27 + $0x2580] sm:$0xff] }
 0x174   : > { %2671 = vmatpush.msrb.mxu0 %v1422_v5  ;;  %2690 = vmatpush.msrb.mxu1 %v1456_v53  ;;  %v1478_v30 = vld [vmem:[%s4290_s27 + $0x2670] sm:$0xff]  ;;  %v1512_v31 = vld [vmem:[%s4290_s27 + $0x2780] sm:$0xff] }
 0x175   : > { %2711 = vmatpush.msrb.mxu2 %v1486_v54  ;;  %2730 = vmatpush.msrb.mxu3 %v1520_v2  ;;  %v1412_v32 = vld [vmem:[%s4290_s27 + $0x2460] sm:$0xff]  ;;  %v1446_v33 = vld [vmem:[%s4290_s27 + $0x2570] sm:$0xff] }
 0x176   : > { %2672 = vmatpush.msrb.mxu0 %v1420_v3  ;;  %2691 = vmatpush.msrb.mxu1 %v1454_v4  ;;  %v1476_v34 = vld [vmem:[%s4290_s27 + $0x2660] sm:$0xff]  ;;  %v1510_v37 = vld [vmem:[%s4290_s27 + $0x2770] sm:$0xff] }
 0x177   : > { %2712 = vmatpush.msrb.mxu2 %v1484_v10  ;;  %2731 = vmatpush.msrb.mxu3 %v1518_v11  ;;  %v1410_v38 = vld [vmem:[%s4290_s27 + $0x2450] sm:$0xff]  ;;  %v1444_v39 = vld [vmem:[%s4290_s27 + $0x2560] sm:$0xff] }
 0x178   : > { %2673 = vmatpush.msrb.mxu0 %v1418_v12  ;;  %2692 = vmatpush.msrb.mxu1 %v1452_v13  ;;  %v1474_v50 = vld [vmem:[%s4290_s27 + $0x2650] sm:$0xff]  ;;  %v1508_v5 = vld [vmem:[%s4290_s27 + $0x2760] sm:$0xff] }
 0x179   : > { %2713 = vmatpush.msrb.mxu2 %v1482_v17  ;;  %2732 = vmatpush.msrb.mxu3 %v1516_v20  ;;  %v1408_v53 = vld [vmem:[%s4290_s27 + $0x2440] sm:$0xff]  ;;  %v1442_v54 = vld [vmem:[%s4290_s27 + $0x2550] sm:$0xff] }
 0x17a   : > { %2674 = vmatpush.msrb.mxu0 %v1416_v21  ;;  %2693 = vmatpush.msrb.mxu1 %v1450_v22  ;;  %v1472_v2 = vld [vmem:[%s4290_s27 + $0x2640] sm:$0xff]  ;;  %v1506_v3 = vld [vmem:[%s4290_s27 + $0x2750] sm:$0xff] }
 0x17b   : > { %2714 = vmatpush.msrb.mxu2 %v1480_v23  ;;  %2733 = vmatpush.msrb.mxu3 %v1514_v16  ;;  %v1406_v4 = vld [vmem:[%s4290_s27 + $0x2430] sm:$0xff]  ;;  %v1440_v10 = vld [vmem:[%s4290_s27 + $0x2540] sm:$0xff] }
 0x17c   : > { %2675 = vmatpush.msrb.mxu0 %v1414_v29  ;;  %2694 = vmatpush.msrb.mxu1 %v1448_v57  ;;  %v1470_v12 = vld [vmem:[%s4290_s27 + $0x2630] sm:$0xff]  ;;  %v1504_v13 = vld [vmem:[%s4290_s27 + $0x2740] sm:$0xff] }
 0x17d   : > { %2715 = vmatpush.msrb.mxu2 %v1478_v30  ;;  %2734 = vmatpush.msrb.mxu3 %v1512_v31  ;;  %v1404_v20 = vld [vmem:[%s4290_s27 + $0x2420] sm:$0xff]  ;;  %v1438_v21 = vld [vmem:[%s4290_s27 + $0x2530] sm:$0xff]  ;;  %v245_v30 = vld [vmem:[%s6141_s0 + $0x50] sm:$0xff] }
 0x17e   : > { %2676 = vmatpush.msrb.mxu0 %v1412_v32  ;;  %2695 = vmatpush.msrb.mxu1 %v1446_v33  ;;  %v1468_v22 = vld [vmem:[%s4290_s27 + $0x2620] sm:$0xff]  ;;  %v1502_v23 = vld [vmem:[%s4290_s27 + $0x2730] sm:$0xff]  ;;  %1886 = vst [vmem:[#allocation1] ss:$4 sm:$0xff] %v245_v30 }
 0x17f   : > { %2716 = vmatpush.msrb.mxu2 %v1476_v34  ;;  %2735 = vmatpush.msrb.mxu3 %v1510_v37  ;;  %v1402_v29 = vld [vmem:[%s4290_s27 + $0x2410] sm:$0xff]  ;;  %v1436_v57 = vld [vmem:[%s4290_s27 + $0x2520] sm:$0xff] }
 0x180   : > { %2677 = vmatpush.msrb.mxu0 %v1410_v38  ;;  %2696 = vmatpush.msrb.mxu1 %v1444_v39  ;;  %v1466_v31 = vld [vmem:[%s4290_s27 + $0x2610] sm:$0xff]  ;;  %v1500_v32 = vld [vmem:[%s4290_s27 + $0x2720] sm:$0xff] }
 0x181   : > { %2717 = vmatpush.msrb.mxu2 %v1474_v50  ;;  %2736 = vmatpush.msrb.mxu3 %v1508_v5  ;;  %v2364_v11 = vpop.f32.mrf.mxu0  ;;  %v1400_v33 = vld [vmem:[%s4290_s27 + $0x2400] sm:$0xff]  ;;  %v1434_v34 = vld [vmem:[%s4290_s27 + $0x2510] sm:$0xff]  ;;  %v5094_v5 = vld.sshfl [vmem:[#allocation1 + $0x20] sm:$0xff pattern:$0x73625140] }
 0x182   : > { %2678 = vmatpush.msrb.mxu0 %v1408_v53  ;;  %2697 = vmatpush.msrb.mxu1 %v1442_v54  ;;  %v2365_v17 = vadd.f32 %v2364_v11, %v5020_v26  ;;  %v1464_v38 = vld [vmem:[%s4290_s27 + $0x2600] sm:$0xff]  ;;  %v1498_v39 = vld [vmem:[%s4290_s27 + $0x2710] sm:$0xff]  ;;  %v5096_v53 = vld.sshfl [vmem:[#allocation1 + $0x30] sm:$0xff pattern:$0x73625140] }
 0x183   : > { %2718 = vmatpush.msrb.mxu2 %v1472_v2  ;;  %2737 = vmatpush.msrb.mxu3 %v1506_v3  ;;  %v1558_v54 = vld [vmem:[%s4290_s27 + $0x28f0] sm:$0xff] }
 0x184   : > { %2679 = vmatpush.msrb.mxu0 %v1406_v4  ;;  %2698 = vmatpush.msrb.mxu1 %v1440_v10  ;;  %v2384_v16 = vpop.f32.mrf.mxu1  ;;  %v1622_v2 = vld [vmem:[%s4290_s27 + $0x2af0] sm:$0xff]  ;;  %v1432_v4 = vld [vmem:[%s4290_s27 + $0x2500] sm:$0xff] }
 0x185   : > { %2719 = vmatpush.msrb.mxu2 %v1470_v12  ;;  %2738 = vmatpush.msrb.mxu3 %v1504_v13  ;;  %v2385_v26 = vadd.f32 %v2384_v16, %v2365_v17  ;;  %v1496_v10 = vld [vmem:[%s4290_s27 + $0x2700] sm:$0xff]  ;;  %v5108_v13 = vld.sshfl [vmem:[#allocation1 + $0x38] sm:$0xff pattern:$0x73625140] }
 0x186   : > { %2680 = vmatpush.msrb.mxu0 %v1404_v20  ;;  %2699 = vmatpush.msrb.mxu1 %v1438_v21  ;;  %v5106_v12 = vld.sshfl [vmem:[#allocation1 + $0x28] sm:$0xff pattern:$0x73625140]  ;;  %v1590_v20 = vld [vmem:[%s4290_s27 + $0x29f0] sm:$0xff] }
 0x187   : > { %2720 = vmatpush.msrb.mxu2 %v1468_v22  ;;  %2739 = vmatpush.msrb.mxu3 %v1502_v23  ;;  %v2404_v37 = vpop.f32.mrf.mxu2  ;;  %v1556_v17 = vld [vmem:[%s4290_s27 + $0x28e0] sm:$0xff]  ;;  %v1654_v22 = vld [vmem:[%s4290_s27 + $0x2bf0] sm:$0xff] }
 0x188   : > { %2681 = vmatpush.msrb.mxu0 %v1402_v29  ;;  %2700 = vmatpush.msrb.mxu1 %v1436_v57  ;;  %v2405_v50 = vadd.f32 %v2404_v37, %v2385_v26  ;;  %v1620_v21 = vld [vmem:[%s4290_s27 + $0x2ae0] sm:$0xff]  ;;  %v1554_v23 = vld [vmem:[%s4290_s27 + $0x28d0] sm:$0xff] }
 0x189   : > { %2721 = vmatpush.msrb.mxu2 %v1466_v31  ;;  %2740 = vmatpush.msrb.mxu3 %v1500_v32  ;;  %v1588_v16 = vld [vmem:[%s4290_s27 + $0x29e0] sm:$0xff]  ;;  %v1618_v29 = vld [vmem:[%s4290_s27 + $0x2ad0] sm:$0xff] }
 0x18a   : > { %2682 = vmatpush.msrb.mxu0 %v1400_v33  ;;  %2701 = vmatpush.msrb.mxu1 %v1434_v34  ;;  %v2424_v3 = vpop.f32.mrf.mxu3  ;;  %v1652_v57 = vld [vmem:[%s4290_s27 + $0x2be0] sm:$0xff]  ;;  %v1586_v30 = vld [vmem:[%s4290_s27 + $0x29d0] sm:$0xff] }
 0x18b   : > { %2722 = vmatpush.msrb.mxu2 %v1464_v38  ;;  %2741 = vmatpush.msrb.mxu3 %v1498_v39  ;;  %v5102_v11 = vadd.f32 %v2424_v3, %v2405_v50  ;;  %v1552_v26 = vld [vmem:[%s4290_s27 + $0x28c0] sm:$0xff]  ;;  %v1650_v32 = vld [vmem:[%s4290_s27 + $0x2bd0] sm:$0xff] }
 0x18c   : > { %2683 = vmatmul.f32.vlgmr.msrb.gmra.mxu0 %v5094_v5  ;;  %2723 = vmatmul.f32.vlgmr.msrb.gmra.mxu2 %v5096_v53  ;;  %v1616_v31 = vld [vmem:[%s4290_s27 + $0x2ac0] sm:$0xff]  ;;  %v1550_v33 = vld [vmem:[%s4290_s27 + $0x28b0] sm:$0xff] }
 0x18d   : > { %2747 = vmatpush.msra.mxu0 %v1558_v54  ;;  %2787 = vmatpush.msra.mxu2 %v1622_v2  ;;  %v1584_v34 = vld [vmem:[%s4290_s27 + $0x29c0] sm:$0xff]  ;;  %v1614_v37 = vld [vmem:[%s4290_s27 + $0x2ab0] sm:$0xff] }
 0x18e   : > { %2702 = vmatpush.msrb.mxu1 %v1432_v4  ;;  %2742 = vmatpush.msrb.mxu3 %v1496_v10  ;;  %v1648_v38 = vld [vmem:[%s4290_s27 + $0x2bc0] sm:$0xff]  ;;  %v1582_v50 = vld [vmem:[%s4290_s27 + $0x29b0] sm:$0xff] }
 0x18f   : > { %2703 = vmatmul.f32.vlgmr.msrb.gmra.mxu1 %v5106_v12  ;;  %2743 = vmatmul.f32.vlgmr.msrb.gmra.mxu3 %v5108_v13  ;;  %v1548_v39 = vld [vmem:[%s4290_s27 + $0x28a0] sm:$0xff]  ;;  %v1646_v2 = vld [vmem:[%s4290_s27 + $0x2bb0] sm:$0xff] }
 0x190   : > { %2748 = vmatpush.msra.mxu0 %v1556_v17  ;;  %2767 = vmatpush.msra.mxu1 %v1590_v20  ;;  %v1612_v54 = vld [vmem:[%s4290_s27 + $0x2aa0] sm:$0xff]  ;;  %v1546_v3 = vld [vmem:[%s4290_s27 + $0x2890] sm:$0xff] }
 0x191   : > { %2788 = vmatpush.msra.mxu2 %v1620_v21  ;;  %2807 = vmatpush.msra.mxu3 %v1654_v22  ;;  %v1580_v4 = vld [vmem:[%s4290_s27 + $0x29a0] sm:$0xff]  ;;  %v1610_v10 = vld [vmem:[%s4290_s27 + $0x2a90] sm:$0xff] }
 0x192   : > { %2749 = vmatpush.msra.mxu0 %v1554_v23  ;;  %2768 = vmatpush.msra.mxu1 %v1588_v16  ;;  %v1644_v17 = vld [vmem:[%s4290_s27 + $0x2ba0] sm:$0xff]  ;;  %v1578_v21 = vld [vmem:[%s4290_s27 + $0x2990] sm:$0xff] }
 0x193   : > { %2789 = vmatpush.msra.mxu2 %v1618_v29  ;;  %2808 = vmatpush.msra.mxu3 %v1652_v57  ;;  %v1544_v20 = vld [vmem:[%s4290_s27 + $0x2880] sm:$0xff]  ;;  %v1642_v23 = vld [vmem:[%s4290_s27 + $0x2b90] sm:$0xff] }
 0x194   : > { %2750 = vmatpush.msra.mxu0 %v1552_v26  ;;  %2769 = vmatpush.msra.mxu1 %v1586_v30  ;;  %v1608_v22 = vld [vmem:[%s4290_s27 + $0x2a80] sm:$0xff]  ;;  %v1542_v16 = vld [vmem:[%s4290_s27 + $0x2870] sm:$0xff] }
 0x195   : > { %2790 = vmatpush.msra.mxu2 %v1616_v31  ;;  %2809 = vmatpush.msra.mxu3 %v1650_v32  ;;  %v1576_v29 = vld [vmem:[%s4290_s27 + $0x2980] sm:$0xff]  ;;  %v1606_v57 = vld [vmem:[%s4290_s27 + $0x2a70] sm:$0xff] }
 0x196   : > { %2751 = vmatpush.msra.mxu0 %v1550_v33  ;;  %2770 = vmatpush.msra.mxu1 %v1584_v34  ;;  %v1640_v26 = vld [vmem:[%s4290_s27 + $0x2b80] sm:$0xff]  ;;  %v1574_v31 = vld [vmem:[%s4290_s27 + $0x2970] sm:$0xff] }
 0x197   : > { %2791 = vmatpush.msra.mxu2 %v1614_v37  ;;  %2810 = vmatpush.msra.mxu3 %v1648_v38  ;;  %v1540_v30 = vld [vmem:[%s4290_s27 + $0x2860] sm:$0xff]  ;;  %v1638_v33 = vld [vmem:[%s4290_s27 + $0x2b70] sm:$0xff] }
 0x198   : > { %2752 = vmatpush.msra.mxu0 %v1548_v39  ;;  %2771 = vmatpush.msra.mxu1 %v1582_v50  ;;  %v1604_v32 = vld [vmem:[%s4290_s27 + $0x2a60] sm:$0xff]  ;;  %v1538_v34 = vld [vmem:[%s4290_s27 + $0x2850] sm:$0xff] }
 0x199   : > { %2792 = vmatpush.msra.mxu2 %v1612_v54  ;;  %2811 = vmatpush.msra.mxu3 %v1646_v2  ;;  %v1572_v37 = vld [vmem:[%s4290_s27 + $0x2960] sm:$0xff]  ;;  %v1602_v38 = vld [vmem:[%s4290_s27 + $0x2a50] sm:$0xff] }
 0x19a   : > { %2753 = vmatpush.msra.mxu0 %v1546_v3  ;;  %2772 = vmatpush.msra.mxu1 %v1580_v4  ;;  %v1636_v39 = vld [vmem:[%s4290_s27 + $0x2b60] sm:$0xff]  ;;  %v1570_v54 = vld [vmem:[%s4290_s27 + $0x2950] sm:$0xff] }
 0x19b   : > { %2793 = vmatpush.msra.mxu2 %v1610_v10  ;;  %2812 = vmatpush.msra.mxu3 %v1644_v17  ;;  %v1536_v50 = vld [vmem:[%s4290_s27 + $0x2840] sm:$0xff]  ;;  %v1634_v3 = vld [vmem:[%s4290_s27 + $0x2b50] sm:$0xff] }
 0x19c   : > { %2754 = vmatpush.msra.mxu0 %v1544_v20  ;;  %2773 = vmatpush.msra.mxu1 %v1578_v21  ;;  %v1600_v2 = vld [vmem:[%s4290_s27 + $0x2a40] sm:$0xff]  ;;  %v1534_v4 = vld [vmem:[%s4290_s27 + $0x2830] sm:$0xff] }
 0x19d   : > { %2794 = vmatpush.msra.mxu2 %v1608_v22  ;;  %2813 = vmatpush.msra.mxu3 %v1642_v23  ;;  %v1568_v10 = vld [vmem:[%s4290_s27 + $0x2940] sm:$0xff]  ;;  %v1598_v20 = vld [vmem:[%s4290_s27 + $0x2a30] sm:$0xff] }
 0x19e   : > { %2755 = vmatpush.msra.mxu0 %v1542_v16  ;;  %2774 = vmatpush.msra.mxu1 %v1576_v29  ;;  %v1632_v21 = vld [vmem:[%s4290_s27 + $0x2b40] sm:$0xff]  ;;  %v1566_v16 = vld [vmem:[%s4290_s27 + $0x2930] sm:$0xff] }
 0x19f   : > { %2795 = vmatpush.msra.mxu2 %v1606_v57  ;;  %2814 = vmatpush.msra.mxu3 %v1640_v26  ;;  %v1532_v23 = vld [vmem:[%s4290_s27 + $0x2820] sm:$0xff]  ;;  %v1630_v57 = vld [vmem:[%s4290_s27 + $0x2b30] sm:$0xff] }
 0x1a0   : > { %2756 = vmatpush.msra.mxu0 %v1540_v30  ;;  %2775 = vmatpush.msra.mxu1 %v1574_v31  ;;  %v1596_v29 = vld [vmem:[%s4290_s27 + $0x2a20] sm:$0xff]  ;;  %v1530_v30 = vld [vmem:[%s4290_s27 + $0x2810] sm:$0xff] }
 0x1a1   : > { %2796 = vmatpush.msra.mxu2 %v1604_v32  ;;  %2815 = vmatpush.msra.mxu3 %v1638_v33  ;;  %v1564_v31 = vld [vmem:[%s4290_s27 + $0x2920] sm:$0xff]  ;;  %v246_v32 = vld [vmem:[%s6141_s0 + $0x58] sm:$0xff] }
 0x1a2   : > { %2757 = vmatpush.msra.mxu0 %v1538_v34  ;;  %2776 = vmatpush.msra.mxu1 %v1572_v37  ;;  %v1594_v33 = vld [vmem:[%s4290_s27 + $0x2a10] sm:$0xff]  ;;  %v1628_v34 = vld [vmem:[%s4290_s27 + $0x2b20] sm:$0xff]  ;;  %1887 = vst [vmem:[#allocation1 + $0x20] ss:$4 sm:$0xff] %v246_v32 }
 0x1a3   : > { %2797 = vmatpush.msra.mxu2 %v1602_v38  ;;  %2816 = vmatpush.msra.mxu3 %v1636_v39  ;;  %v2444_v17 = vpop.f32.mrf.mxu0  ;;  %v1528_v37 = vld [vmem:[%s4290_s27 + $0x2800] sm:$0xff]  ;;  %v1562_v38 = vld [vmem:[%s4290_s27 + $0x2910] sm:$0xff] }
 0x1a4   : > { %2758 = vmatpush.msra.mxu0 %v1536_v50  ;;  %2777 = vmatpush.msra.mxu1 %v1570_v54  ;;  %v2445_v22 = vadd.f32 %v2444_v17, %v5102_v11  ;;  %v1592_v50 = vld [vmem:[%s4290_s27 + $0x2a00] sm:$0xff]  ;;  %v1626_v54 = vld [vmem:[%s4290_s27 + $0x2b10] sm:$0xff] }
 0x1a5   : > { %2798 = vmatpush.msra.mxu2 %v1600_v2  ;;  %2817 = vmatpush.msra.mxu3 %v1634_v3  ;;  %v5176_v3 = vld.sshfl [vmem:[#allocation1] sm:$0xff pattern:$0x73625140]  ;;  %v1750_v17 = vld [vmem:[%s4290_s27 + $0x2ef0] sm:$0xff]  ;;  %v1716_v32 = vld [vmem:[%s4290_s27 + $0x2de0] sm:$0xff] }
 0x1a6   : > { %2759 = vmatpush.msra.mxu0 %v1534_v4  ;;  %2778 = vmatpush.msra.mxu1 %v1568_v10  ;;  %v2464_v26 = vpop.f32.mrf.mxu1  ;;  %v5178_v4 = vld.sshfl [vmem:[#allocation1 + $0x10] sm:$0xff pattern:$0x73625140]  ;;  %v1686_v10 = vld [vmem:[%s4290_s27 + $0x2cf0] sm:$0xff] }
 0x1a7   : > { %2799 = vmatpush.msra.mxu2 %v1598_v20  ;;  %2818 = vmatpush.msra.mxu3 %v1632_v21  ;;  %v2465_v11 = vadd.f32 %v2464_v26, %v2445_v22  ;;  %v1560_v21 = vld [vmem:[%s4290_s27 + $0x2900] sm:$0xff]  ;;  %v1718_v26 = vld [vmem:[%s4290_s27 + $0x2df0] sm:$0xff] }
 0x1a8   : > { %2760 = vmatpush.msra.mxu0 %v1532_v23  ;;  %2779 = vmatpush.msra.mxu1 %v1566_v16  ;;  %v1624_v22 = vld [vmem:[%s4290_s27 + $0x2b00] sm:$0xff] }
 0x1a9   : > { %2800 = vmatpush.msra.mxu2 %v1596_v29  ;;  %2819 = vmatpush.msra.mxu3 %v1630_v57  ;;  %v2484_v39 = vpop.f32.mrf.mxu2  ;;  %v5188_v16 = vld.sshfl [vmem:[#allocation1 + $0x8] sm:$0xff pattern:$0x73625140]  ;;  %v5190_v29 = vld.sshfl [vmem:[#allocation1 + $0x18] sm:$0xff pattern:$0x73625140] }
 0x1aa   : > { %2761 = vmatpush.msra.mxu0 %v1530_v30  ;;  %2780 = vmatpush.msra.mxu1 %v1564_v31  ;;  %v2485_v2 = vadd.f32 %v2484_v39, %v2465_v11  ;;  %v1684_v57 = vld [vmem:[%s4290_s27 + $0x2ce0] sm:$0xff]  ;;  %v1782_v31 = vld [vmem:[%s4290_s27 + $0x2ff0] sm:$0xff] }
 0x1ab   : > { %2801 = vmatpush.msra.mxu2 %v1594_v33  ;;  %2820 = vmatpush.msra.mxu3 %v1628_v34  ;;  %v1748_v30 = vld [vmem:[%s4290_s27 + $0x2ee0] sm:$0xff]  ;;  %v1682_v11 = vld [vmem:[%s4290_s27 + $0x2cd0] sm:$0xff] }
 0x1ac   : > { %2762 = vmatpush.msra.mxu0 %v1528_v37  ;;  %2781 = vmatpush.msra.mxu1 %v1562_v38  ;;  %v2504_v20 = vpop.f32.mrf.mxu3  ;;  %v1746_v33 = vld [vmem:[%s4290_s27 + $0x2ed0] sm:$0xff]  ;;  %v1780_v34 = vld [vmem:[%s4290_s27 + $0x2fe0] sm:$0xff] }
 0x1ad   : > { %2802 = vmatpush.msra.mxu2 %v1592_v50  ;;  %2821 = vmatpush.msra.mxu3 %v1626_v54  ;;  %v5184_v23 = vadd.f32 %v2504_v20, %v2485_v2  ;;  %v1680_v37 = vld [vmem:[%s4290_s27 + $0x2cc0] sm:$0xff]  ;;  %v1714_v38 = vld [vmem:[%s4290_s27 + $0x2dd0] sm:$0xff] }
 0x1ae   : > { %2763 = vmatmul.f32.vlgmr.msra.gmra.mxu0 %v5176_v3  ;;  %2803 = vmatmul.f32.vlgmr.msra.gmra.mxu2 %v5178_v4  ;;  %v1744_v39 = vld [vmem:[%s4290_s27 + $0x2ec0] sm:$0xff]  ;;  %v1778_v50 = vld [vmem:[%s4290_s27 + $0x2fd0] sm:$0xff] }
 0x1af   : > { %2827 = vmatpush.msrb.mxu0 %v1686_v10  ;;  %2867 = vmatpush.msrb.mxu2 %v1750_v17  ;;  %v1678_v54 = vld [vmem:[%s4290_s27 + $0x2cb0] sm:$0xff]  ;;  %v1712_v2 = vld [vmem:[%s4290_s27 + $0x2dc0] sm:$0xff] }
 0x1b0   : > { %2782 = vmatpush.msra.mxu1 %v1560_v21  ;;  %2822 = vmatpush.msra.mxu3 %v1624_v22  ;;  %v1742_v10 = vld [vmem:[%s4290_s27 + $0x2eb0] sm:$0xff]  ;;  %v1776_v17 = vld [vmem:[%s4290_s27 + $0x2fc0] sm:$0xff] }
 0x1b1   : > { %2783 = vmatmul.f32.vlgmr.msra.gmra.mxu1 %v5188_v16  ;;  %2823 = vmatmul.f32.vlgmr.msra.gmra.mxu3 %v5190_v29  ;;  %v1676_v20 = vld [vmem:[%s4290_s27 + $0x2ca0] sm:$0xff]  ;;  %v1710_v21 = vld [vmem:[%s4290_s27 + $0x2db0] sm:$0xff] }
 0x1b2   : > { %2828 = vmatpush.msrb.mxu0 %v1684_v57  ;;  %2847 = vmatpush.msrb.mxu1 %v1718_v26  ;;  %v1740_v22 = vld [vmem:[%s4290_s27 + $0x2ea0] sm:$0xff]  ;;  %v1774_v57 = vld [vmem:[%s4290_s27 + $0x2fb0] sm:$0xff] }
 0x1b3   : > { %2868 = vmatpush.msrb.mxu2 %v1748_v30  ;;  %2887 = vmatpush.msrb.mxu3 %v1782_v31  ;;  %v1674_v26 = vld [vmem:[%s4290_s27 + $0x2c90] sm:$0xff]  ;;  %v1708_v30 = vld [vmem:[%s4290_s27 + $0x2da0] sm:$0xff] }
 0x1b4   : > { %2829 = vmatpush.msrb.mxu0 %v1682_v11  ;;  %2848 = vmatpush.msrb.mxu1 %v1716_v32  ;;  %v1738_v31 = vld [vmem:[%s4290_s27 + $0x2e90] sm:$0xff]  ;;  %v1772_v11 = vld [vmem:[%s4290_s27 + $0x2fa0] sm:$0xff] }
 0x1b5   : > { %2869 = vmatpush.msrb.mxu2 %v1746_v33  ;;  %2888 = vmatpush.msrb.mxu3 %v1780_v34  ;;  %v1672_v32 = vld [vmem:[%s4290_s27 + $0x2c80] sm:$0xff]  ;;  %v1706_v33 = vld [vmem:[%s4290_s27 + $0x2d90] sm:$0xff] }
 0x1b6   : > { %2830 = vmatpush.msrb.mxu0 %v1680_v37  ;;  %2849 = vmatpush.msrb.mxu1 %v1714_v38  ;;  %v1736_v34 = vld [vmem:[%s4290_s27 + $0x2e80] sm:$0xff]  ;;  %v1770_v37 = vld [vmem:[%s4290_s27 + $0x2f90] sm:$0xff] }
 0x1b7   : > { %2870 = vmatpush.msrb.mxu2 %v1744_v39  ;;  %2889 = vmatpush.msrb.mxu3 %v1778_v50  ;;  %v1670_v38 = vld [vmem:[%s4290_s27 + $0x2c70] sm:$0xff]  ;;  %v1704_v39 = vld [vmem:[%s4290_s27 + $0x2d80] sm:$0xff] }
 0x1b8   : > { %2831 = vmatpush.msrb.mxu0 %v1678_v54  ;;  %2850 = vmatpush.msrb.mxu1 %v1712_v2  ;;  %v1734_v50 = vld [vmem:[%s4290_s27 + $0x2e70] sm:$0xff]  ;;  %v1768_v54 = vld [vmem:[%s4290_s27 + $0x2f80] sm:$0xff] }
 0x1b9   : > { %2871 = vmatpush.msrb.mxu2 %v1742_v10  ;;  %2890 = vmatpush.msrb.mxu3 %v1776_v17  ;;  %v1668_v2 = vld [vmem:[%s4290_s27 + $0x2c60] sm:$0xff]  ;;  %v1702_v10 = vld [vmem:[%s4290_s27 + $0x2d70] sm:$0xff] }
 0x1ba   : > { %2832 = vmatpush.msrb.mxu0 %v1676_v20  ;;  %2851 = vmatpush.msrb.mxu1 %v1710_v21  ;;  %v1732_v17 = vld [vmem:[%s4290_s27 + $0x2e60] sm:$0xff]  ;;  %v1766_v20 = vld [vmem:[%s4290_s27 + $0x2f70] sm:$0xff] }
 0x1bb   : > { %2872 = vmatpush.msrb.mxu2 %v1740_v22  ;;  %2891 = vmatpush.msrb.mxu3 %v1774_v57  ;;  %v1666_v21 = vld [vmem:[%s4290_s27 + $0x2c50] sm:$0xff]  ;;  %v1700_v22 = vld [vmem:[%s4290_s27 + $0x2d60] sm:$0xff] }
 0x1bc   : > { %2833 = vmatpush.msrb.mxu0 %v1674_v26  ;;  %2852 = vmatpush.msrb.mxu1 %v1708_v30  ;;  %v1730_v57 = vld [vmem:[%s4290_s27 + $0x2e50] sm:$0xff]  ;;  %v1764_v26 = vld [vmem:[%s4290_s27 + $0x2f60] sm:$0xff] }
 0x1bd   : > { %2873 = vmatpush.msrb.mxu2 %v1738_v31  ;;  %2892 = vmatpush.msrb.mxu3 %v1772_v11  ;;  %v1664_v30 = vld [vmem:[%s4290_s27 + $0x2c40] sm:$0xff]  ;;  %v1698_v31 = vld [vmem:[%s4290_s27 + $0x2d50] sm:$0xff] }
 0x1be   : > { %2834 = vmatpush.msrb.mxu0 %v1672_v32  ;;  %2853 = vmatpush.msrb.mxu1 %v1706_v33  ;;  %v1728_v11 = vld [vmem:[%s4290_s27 + $0x2e40] sm:$0xff]  ;;  %v1762_v32 = vld [vmem:[%s4290_s27 + $0x2f50] sm:$0xff] }
 0x1bf   : > { %2874 = vmatpush.msrb.mxu2 %v1736_v34  ;;  %2893 = vmatpush.msrb.mxu3 %v1770_v37  ;;  %v1662_v33 = vld [vmem:[%s4290_s27 + $0x2c30] sm:$0xff]  ;;  %v1696_v34 = vld [vmem:[%s4290_s27 + $0x2d40] sm:$0xff] }
 0x1c0   : > { %2835 = vmatpush.msrb.mxu0 %v1670_v38  ;;  %2854 = vmatpush.msrb.mxu1 %v1704_v39  ;;  %v1726_v38 = vld [vmem:[%s4290_s27 + $0x2e30] sm:$0xff]  ;;  %v1760_v39 = vld [vmem:[%s4290_s27 + $0x2f40] sm:$0xff] }
 0x1c1   : > { %2875 = vmatpush.msrb.mxu2 %v1734_v50  ;;  %2894 = vmatpush.msrb.mxu3 %v1768_v54  ;;  %v1660_v54 = vld [vmem:[%s4290_s27 + $0x2c20] sm:$0xff] }
 0x1c2   : > { %2836 = vmatpush.msrb.mxu0 %v1668_v2  ;;  %2855 = vmatpush.msrb.mxu1 %v1702_v10  ;;  %v1694_v2 = vld [vmem:[%s4290_s27 + $0x2d30] sm:$0xff]  ;;  %v1724_v10 = vld [vmem:[%s4290_s27 + $0x2e20] sm:$0xff] }
 0x1c3   : > { %2876 = vmatpush.msrb.mxu2 %v1732_v17  ;;  %2895 = vmatpush.msrb.mxu3 %v1766_v20  ;;  %v1758_v17 = vld [vmem:[%s4290_s27 + $0x2f30] sm:$0xff] }
 0x1c4   : > { %2837 = vmatpush.msrb.mxu0 %v1666_v21  ;;  %2856 = vmatpush.msrb.mxu1 %v1700_v22  ;;  %v1658_v21 = vld [vmem:[%s4290_s27 + $0x2c10] sm:$0xff]  ;;  %v1692_v22 = vld [vmem:[%s4290_s27 + $0x2d20] sm:$0xff] }
 0x1c5   : > { %2877 = vmatpush.msrb.mxu2 %v1730_v57  ;;  %2896 = vmatpush.msrb.mxu3 %v1764_v26  ;;  %v2524_v37 = vpop.f32.mrf.mxu0  ;;  %v247_v57 = vld [vmem:[%s6141_s0 + $0x60] sm:$0x3]  ;;  %v1722_v26 = vld [vmem:[%s4290_s27 + $0x2e10] sm:$0xff] }
 0x1c6   : > { %2838 = vmatpush.msrb.mxu0 %v1664_v30  ;;  %2857 = vmatpush.msrb.mxu1 %v1698_v31  ;;  %v2525_v50 = vadd.f32 %v2524_v37, %v5184_v23  ;;  %v1756_v30 = vld [vmem:[%s4290_s27 + $0x2f20] sm:$0xff]  ;;  %1896 = vst [vmem:[#allocation1] ss:$4 sm:$0xff] %v247_v57  ;;  %v279_v57 = vld [vmem:[%s4290_s27 + $0xf8] sm:$0xff] }
 0x1c7   : > { %2878 = vmatpush.msrb.mxu2 %v1728_v11  ;;  %2897 = vmatpush.msrb.mxu3 %v1762_v32  ;;  %v1656_v31 = vld [vmem:[%s4290_s27 + $0x2c00] sm:$0xff]  ;;  %v1690_v11 = vld [vmem:[%s4290_s27 + $0x2d10] sm:$0xff] }
 0x1c8   : > { %2839 = vmatpush.msrb.mxu0 %v1662_v33  ;;  %2858 = vmatpush.msrb.mxu1 %v1696_v34  ;;  %v2544_v20 = vpop.f32.mrf.mxu1  ;;  %v1720_v33 = vld [vmem:[%s4290_s27 + $0x2e00] sm:$0xff]  ;;  %v1754_v34 = vld [vmem:[%s4290_s27 + $0x2f10] sm:$0xff] }
 0x1c9   : > { %2879 = vmatpush.msrb.mxu2 %v1726_v38  ;;  %2898 = vmatpush.msrb.mxu3 %v1760_v39  ;;  %v2545_v23 = vadd.f32 %v2544_v20, %v2525_v50  ;;  %v1892_v38 = vld.sshfl [vmem:[#allocation1 + $0x20] sm:$0xff pattern:$0x73625140]  ;;  %v1894_v39 = vld.sshfl [vmem:[#allocation1 + $0x30] sm:$0xff pattern:$0x73625140] }
 0x1ca   : > { %2840 = vmatpush.msrb.mxu0 %v1660_v54  ;;  %2859 = vmatpush.msrb.mxu1 %v1694_v2  ;;  %v1814_v50 = vld [vmem:[%s4290_s27 + $0x30f0] sm:$0xff]  ;;  %v311_v54 = vld [vmem:[%s4290_s27 + $0x1f8] sm:$0xff] }
 0x1cb   : > { %2880 = vmatpush.msrb.mxu2 %v1724_v10  ;;  %2899 = vmatpush.msrb.mxu3 %v1758_v17  ;;  %v2564_v32 = vpop.f32.mrf.mxu2  ;;  %v1688_v10 = vld [vmem:[%s4290_s27 + $0x2d00] sm:$0xff] }
 0x1cc   : > { %2841 = vmatpush.msrb.mxu0 %v1658_v21  ;;  %2860 = vmatpush.msrb.mxu1 %v1692_v22  ;;  %v2565_v37 = vadd.f32 %v2564_v32, %v2545_v23  ;;  %v1752_v17 = vld [vmem:[%s4290_s27 + $0x2f00] sm:$0xff]  ;;  %v1895_v22 = vld.sshfl [vmem:[#allocation1 + $0x38] sm:$0xff pattern:$0x73625140]  ;;  %v307_v32 = vld [vmem:[%s4290_s27 + $0x1d8] sm:$0xff] }
 0x1cd   : > { %2881 = vmatpush.msrb.mxu2 %v1722_v26  ;;  %2900 = vmatpush.msrb.mxu3 %v1756_v30  ;;  %v1893_v21 = vld.sshfl [vmem:[#allocation1 + $0x28] sm:$0xff pattern:$0x73625140]  ;;  %v309_v26 = vld [vmem:[%s4290_s27 + $0x1e8] sm:$0xff]  ;;  %v343_v30 = vld [vmem:[%s4290_s27 + $0x2f8] sm:$0xff] }
 0x1ce   : > { %2842 = vmatpush.msrb.mxu0 %v1656_v31  ;;  %2861 = vmatpush.msrb.mxu1 %v1690_v11  ;;  %v2584_v2 = vpop.f32.mrf.mxu3  ;;  %v1812_v23 = vld [vmem:[%s4290_s27 + $0x30e0] sm:$0xff]  ;;  %v1810_v31 = vld [vmem:[%s4290_s27 + $0x30d0] sm:$0xff]  ;;  %v277_v11 = vld [vmem:[%s4290_s27 + $0xe8] sm:$0xff] }
 0x1cf   : > { %2882 = vmatpush.msrb.mxu2 %v1720_v33  ;;  %2901 = vmatpush.msrb.mxu3 %v1754_v34  ;;  %v5262_v20 = vadd.f32 %v2584_v2, %v2565_v37  ;;  %v341_v33 = vld [vmem:[%s4290_s27 + $0x2e8] sm:$0xff]  ;;  %v1808_v34 = vld [vmem:[%s4290_s27 + $0x30c0] sm:$0xff]  ;;  %v275_v37 = vld [vmem:[%s4290_s27 + $0xd8] sm:$0xff] }
 0x1d0   : > { %2843 = vmatmul.f32.vlgmr.msrb.gmra.mxu0 %v1892_v38  ;;  %2883 = vmatmul.f32.vlgmr.msrb.gmra.mxu2 %v1894_v39  ;;  %v305_v38 = vld [vmem:[%s4290_s27 + $0x1c8] sm:$0xff]  ;;  %v339_v39 = vld [vmem:[%s4290_s27 + $0x2d8] sm:$0xff] }
 0x1d1   : > { %2907 = vmatpush.msra.mxu0 %v1814_v50  ;;  %2947 = vmatpush.msra.mxu2 %v311_v54  ;;  %v1806_v50 = vld [vmem:[%s4290_s27 + $0x30b0] sm:$0xff]  ;;  %v273_v54 = vld [vmem:[%s4290_s27 + $0xc8] sm:$0xff]  ;;  %v303_v2 = vld [vmem:[%s4290_s27 + $0x1b8] sm:$0xff] }
 0x1d2   : > { %2862 = vmatpush.msrb.mxu1 %v1688_v10  ;;  %2902 = vmatpush.msrb.mxu3 %v1752_v17  ;;  %v337_v10 = vld [vmem:[%s4290_s27 + $0x2c8] sm:$0xff]  ;;  %v1804_v17 = vld [vmem:[%s4290_s27 + $0x30a0] sm:$0xff] }
 0x1d3   : > { %2863 = vmatmul.f32.vlgmr.msrb.gmra.mxu1 %v1893_v21  ;;  %2903 = vmatmul.f32.vlgmr.msrb.gmra.mxu3 %v1895_v22  ;;  %v271_v21 = vld [vmem:[%s4290_s27 + $0xb8] sm:$0xff]  ;;  %v301_v22 = vld [vmem:[%s4290_s27 + $0x1a8] sm:$0xff] }
 0x1d4   : > { %2908 = vmatpush.msra.mxu0 %v1812_v23  ;;  %2927 = vmatpush.msra.mxu1 %v279_v57  ;;  %v335_v23 = vld [vmem:[%s4290_s27 + $0x2b8] sm:$0xff]  ;;  %v1802_v57 = vld [vmem:[%s4290_s27 + $0x3090] sm:$0xff] }
 0x1d5   : > { %2948 = vmatpush.msra.mxu2 %v309_v26  ;;  %2967 = vmatpush.msra.mxu3 %v343_v30  ;;  %v269_v26 = vld [vmem:[%s4290_s27 + $0xa8] sm:$0xff]  ;;  %v299_v30 = vld [vmem:[%s4290_s27 + $0x198] sm:$0xff] }
 0x1d6   : > { %2909 = vmatpush.msra.mxu0 %v1810_v31  ;;  %2928 = vmatpush.msra.mxu1 %v277_v11  ;;  %v333_v31 = vld [vmem:[%s4290_s27 + $0x2a8] sm:$0xff]  ;;  %v1800_v11 = vld [vmem:[%s4290_s27 + $0x3080] sm:$0xff] }
 0x1d7   : > { %2949 = vmatpush.msra.mxu2 %v307_v32  ;;  %2968 = vmatpush.msra.mxu3 %v341_v33  ;;  %v267_v32 = vld [vmem:[%s4290_s27 + $0x98] sm:$0xff]  ;;  %v297_v33 = vld [vmem:[%s4290_s27 + $0x188] sm:$0xff] }
 0x1d8   : > { %2910 = vmatpush.msra.mxu0 %v1808_v34  ;;  %2929 = vmatpush.msra.mxu1 %v275_v37  ;;  %v331_v34 = vld [vmem:[%s4290_s27 + $0x298] sm:$0xff]  ;;  %v1798_v37 = vld [vmem:[%s4290_s27 + $0x3070] sm:$0xff] }
 0x1d9   : > { %2950 = vmatpush.msra.mxu2 %v305_v38  ;;  %2969 = vmatpush.msra.mxu3 %v339_v39  ;;  %v265_v38 = vld [vmem:[%s4290_s27 + $0x88] sm:$0xff]  ;;  %v295_v39 = vld [vmem:[%s4290_s27 + $0x178] sm:$0xff] }
 0x1da   : > { %2911 = vmatpush.msra.mxu0 %v1806_v50  ;;  %2930 = vmatpush.msra.mxu1 %v273_v54  ;;  %v329_v50 = vld [vmem:[%s4290_s27 + $0x288] sm:$0xff]  ;;  %v1796_v54 = vld [vmem:[%s4290_s27 + $0x3060] sm:$0xff] }
 0x1db   : > { %2951 = vmatpush.msra.mxu2 %v303_v2  ;;  %2970 = vmatpush.msra.mxu3 %v337_v10  ;;  %v263_v2 = vld [vmem:[%s4290_s27 + $0x78] sm:$0xff]  ;;  %v293_v10 = vld [vmem:[%s4290_s27 + $0x168] sm:$0xff] }
 0x1dc   : > { %2912 = vmatpush.msra.mxu0 %v1804_v17  ;;  %2931 = vmatpush.msra.mxu1 %v271_v21  ;;  %v327_v17 = vld [vmem:[%s4290_s27 + $0x278] sm:$0xff]  ;;  %v1794_v21 = vld [vmem:[%s4290_s27 + $0x3050] sm:$0xff] }
 0x1dd   : > { %2952 = vmatpush.msra.mxu2 %v301_v22  ;;  %2971 = vmatpush.msra.mxu3 %v335_v23  ;;  %v261_v22 = vld [vmem:[%s4290_s27 + $0x68] sm:$0xff]  ;;  %v291_v23 = vld [vmem:[%s4290_s27 + $0x158] sm:$0xff] }
 0x1de   : > { %2913 = vmatpush.msra.mxu0 %v1802_v57  ;;  %2932 = vmatpush.msra.mxu1 %v269_v26  ;;  %v325_v57 = vld [vmem:[%s4290_s27 + $0x268] sm:$0xff]  ;;  %v1792_v26 = vld [vmem:[%s4290_s27 + $0x3040] sm:$0xff] }
 0x1df   : > { %2953 = vmatpush.msra.mxu2 %v299_v30  ;;  %2972 = vmatpush.msra.mxu3 %v333_v31  ;;  %v259_v30 = vld [vmem:[%s4290_s27 + $0x58] sm:$0xff]  ;;  %v289_v31 = vld [vmem:[%s4290_s27 + $0x148] sm:$0xff] }
 0x1e0   : > { %2914 = vmatpush.msra.mxu0 %v1800_v11  ;;  %2933 = vmatpush.msra.mxu1 %v267_v32  ;;  %v323_v11 = vld [vmem:[%s4290_s27 + $0x258] sm:$0xff]  ;;  %v1790_v32 = vld [vmem:[%s4290_s27 + $0x3030] sm:$0xff] }
 0x1e1   : > { %2954 = vmatpush.msra.mxu2 %v297_v33  ;;  %2973 = vmatpush.msra.mxu3 %v331_v34  ;;  %v257_v33 = vld [vmem:[%s4290_s27 + $0x48] sm:$0xff] }
 0x1e2   : > { %2915 = vmatpush.msra.mxu0 %v1798_v37  ;;  %2934 = vmatpush.msra.mxu1 %v265_v38  ;;  %v287_v37 = vld [vmem:[%s4290_s27 + $0x138] sm:$0xff]  ;;  %v321_v38 = vld [vmem:[%s4290_s27 + $0x248] sm:$0xff] }
 0x1e3   : > { %2955 = vmatpush.msra.mxu2 %v295_v39  ;;  %2974 = vmatpush.msra.mxu3 %v329_v50  ;;  %v1788_v50 = vld [vmem:[%s4290_s27 + $0x3020] sm:$0xff] }
 0x1e4   : > { %2916 = vmatpush.msra.mxu0 %v1796_v54  ;;  %2935 = vmatpush.msra.mxu1 %v263_v2  ;;  %v255_v54 = vld [vmem:[%s4290_s27 + $0x38] sm:$0xff]  ;;  %v285_v2 = vld [vmem:[%s4290_s27 + $0x128] sm:$0xff] }
 0x1e5   : > { %2956 = vmatpush.msra.mxu2 %v293_v10  ;;  %2975 = vmatpush.msra.mxu3 %v327_v17  ;;  %v319_v10 = vld [vmem:[%s4290_s27 + $0x238] sm:$0xff] }
 0x1e6   : > { %2917 = vmatpush.msra.mxu0 %v1794_v21  ;;  %2936 = vmatpush.msra.mxu1 %v261_v22  ;;  %v1786_v21 = vld [vmem:[%s4290_s27 + $0x3010] sm:$0xff]  ;;  %v253_v22 = vld [vmem:[%s4290_s27 + $0x28] sm:$0xff] }
 0x1e7   : > { %2957 = vmatpush.msra.mxu2 %v291_v23  ;;  %2976 = vmatpush.msra.mxu3 %v325_v57  ;;  %v2604_v34 = vpop.f32.mrf.mxu0  ;;  %v283_v23 = vld [vmem:[%s4290_s27 + $0x118] sm:$0xff]  ;;  %v317_v57 = vld [vmem:[%s4290_s27 + $0x228] sm:$0xff] }
 0x1e8   : > { %2918 = vmatpush.msra.mxu0 %v1792_v26  ;;  %2937 = vmatpush.msra.mxu1 %v259_v30  ;;  %v2605_v39 = vadd.f32 %v2604_v34, %v5262_v20  ;;  %v1784_v26 = vld [vmem:[%s4290_s27 + $0x3000] sm:$0xff]  ;;  %v251_v30 = vld [vmem:[%s4290_s27 + $0x18] sm:$0xff] }
 0x1e9   : > { %2958 = vmatpush.msra.mxu2 %v289_v31  ;;  %2977 = vmatpush.msra.mxu3 %v323_v11  ;;  %v281_v11 = vld [vmem:[%s4290_s27 + $0x108] sm:$0xff]  ;;  %v1897_v34 = vld.sshfl [vmem:[#allocation1] sm:$0xff pattern:$0x73625140] }
 0x1ea   : > { %2919 = vmatpush.msra.mxu0 %v1790_v32  ;;  %2938 = vmatpush.msra.mxu1 %v257_v33  ;;  %v2624_v17 = vpop.f32.mrf.mxu1  ;;  %v315_v32 = vld [vmem:[%s4290_s27 + $0x218] sm:$0xff] }
 0x1eb   : > { %2959 = vmatpush.msra.mxu2 %v287_v37  ;;  %2978 = vmatpush.msra.mxu3 %v321_v38  ;;  %v2625_v20 = vadd.f32 %v2624_v17, %v2605_v39  ;;  %v439_v37 = vld [vmem:[%s4290_s27 + $0x5f8] sm:$0xff]  ;;  %v249_v39 = vld [vmem:[%s4290_s27 + $0x8] sm:$0xff] }
 0x1ec   : > { %2920 = vmatpush.msra.mxu0 %v1788_v50  ;;  %2939 = vmatpush.msra.mxu1 %v255_v54  ;;  %v375_v38 = vld [vmem:[%s4290_s27 + $0x3f8] sm:$0xff]  ;;  %v313_v54 = vld [vmem:[%s4290_s27 + $0x208] sm:$0xff] }
 0x1ed   : > { %2960 = vmatpush.msra.mxu2 %v285_v2  ;;  %2979 = vmatpush.msra.mxu3 %v319_v10  ;;  %v2644_v31 = vpop.f32.mrf.mxu2  ;;  %v407_v2 = vld [vmem:[%s4290_s27 + $0x4f8] sm:$0xff]  ;;  %v373_v17 = vld [vmem:[%s4290_s27 + $0x3e8] sm:$0xff] }
 0x1ee   : > { %2921 = vmatpush.msra.mxu0 %v1786_v21  ;;  %2940 = vmatpush.msra.mxu1 %v253_v22  ;;  %v2645_v33 = vadd.f32 %v2644_v31, %v2625_v20  ;;  %v437_v21 = vld [vmem:[%s4290_s27 + $0x5e8] sm:$0xff]  ;;  %v471_v22 = vld [vmem:[%s4290_s27 + $0x6f8] sm:$0xff] }
 0x1ef   : > { %2961 = vmatpush.msra.mxu2 %v283_v23  ;;  %2980 = vmatpush.msra.mxu3 %v317_v57  ;;  %v405_v20 = vld [vmem:[%s4290_s27 + $0x4e8] sm:$0xff]  ;;  %v371_v23 = vld [vmem:[%s4290_s27 + $0x3d8] sm:$0xff] }
 0x1f0   : > { %2922 = vmatpush.msra.mxu0 %v1784_v26  ;;  %2941 = vmatpush.msra.mxu1 %v251_v30  ;;  %v2664_v50 = vpop.f32.mrf.mxu3  ;;  %v435_v57 = vld [vmem:[%s4290_s27 + $0x5d8] sm:$0xff]  ;;  %v469_v26 = vld [vmem:[%s4290_s27 + $0x6e8] sm:$0xff] }
 0x1f1   : > { %2962 = vmatpush.msra.mxu2 %v281_v11  ;;  %2981 = vmatpush.msra.mxu3 %v315_v32  ;;  %v5330_v10 = vadd.f32 %v2664_v50, %v2645_v33  ;;  %v403_v30 = vld [vmem:[%s4290_s27 + $0x4d8] sm:$0xff]  ;;  %v369_v31 = vld [vmem:[%s4290_s27 + $0x3c8] sm:$0xff] }
 0x1f2   : > { %2923 = vmatmul.f32.vlgmr.msra.gmra.mxu0 %v1897_v34  ;;  %2942 = vmatpush.msra.mxu1 %v249_v39  ;;  %v433_v11 = vld [vmem:[%s4290_s27 + $0x5c8] sm:$0xff]  ;;  %v467_v32 = vld [vmem:[%s4290_s27 + $0x6d8] sm:$0xff] }
 0x1f3   : > { %3027 = vmatpush.msrb.mxu2 %v439_v37  ;;  %2987 = vmatpush.msrb.mxu0 %v375_v38  ;;  %v401_v33 = vld [vmem:[%s4290_s27 + $0x4c8] sm:$0xff]  ;;  %v367_v34 = vld [vmem:[%s4290_s27 + $0x3b8] sm:$0xff] }
 0x1f4   : > { %2982 = vmatpush.msra.mxu3 %v313_v54  ;;  %3007 = vmatpush.msrb.mxu1 %v407_v2  ;;  %v431_v37 = vld [vmem:[%s4290_s27 + $0x5b8] sm:$0xff]  ;;  %v465_v38 = vld [vmem:[%s4290_s27 + $0x6c8] sm:$0xff] }
 0x1f5   : > { %2988 = vmatpush.msrb.mxu0 %v373_v17  ;;  %3028 = vmatpush.msrb.mxu2 %v437_v21  ;;  %v399_v39 = vld [vmem:[%s4290_s27 + $0x4b8] sm:$0xff]  ;;  %v365_v50 = vld [vmem:[%s4290_s27 + $0x3a8] sm:$0xff] }
 0x1f6   : > { %3047 = vmatpush.msrb.mxu3 %v471_v22  ;;  %3008 = vmatpush.msrb.mxu1 %v405_v20  ;;  %v429_v54 = vld [vmem:[%s4290_s27 + $0x5a8] sm:$0xff]  ;;  %v463_v2 = vld [vmem:[%s4290_s27 + $0x6b8] sm:$0xff] }
 0x1f7   : > { %2989 = vmatpush.msrb.mxu0 %v371_v23  ;;  %3029 = vmatpush.msrb.mxu2 %v435_v57  ;;  %v397_v17 = vld [vmem:[%s4290_s27 + $0x4a8] sm:$0xff]  ;;  %v363_v21 = vld [vmem:[%s4290_s27 + $0x398] sm:$0xff] }
 0x1f8   : > { %3048 = vmatpush.msrb.mxu3 %v469_v26  ;;  %3009 = vmatpush.msrb.mxu1 %v403_v30  ;;  %v427_v22 = vld [vmem:[%s4290_s27 + $0x598] sm:$0xff]  ;;  %v461_v20 = vld [vmem:[%s4290_s27 + $0x6a8] sm:$0xff] }
 0x1f9   : > { %2990 = vmatpush.msrb.mxu0 %v369_v31  ;;  %3030 = vmatpush.msrb.mxu2 %v433_v11  ;;  %v395_v23 = vld [vmem:[%s4290_s27 + $0x498] sm:$0xff]  ;;  %v361_v57 = vld [vmem:[%s4290_s27 + $0x388] sm:$0xff] }
 0x1fa   : > { %3049 = vmatpush.msrb.mxu3 %v467_v32  ;;  %3010 = vmatpush.msrb.mxu1 %v401_v33  ;;  %v425_v26 = vld [vmem:[%s4290_s27 + $0x588] sm:$0xff]  ;;  %v459_v30 = vld [vmem:[%s4290_s27 + $0x698] sm:$0xff] }
 0x1fb   : > { %2991 = vmatpush.msrb.mxu0 %v367_v34  ;;  %3031 = vmatpush.msrb.mxu2 %v431_v37  ;;  %v393_v31 = vld [vmem:[%s4290_s27 + $0x488] sm:$0xff]  ;;  %v359_v11 = vld [vmem:[%s4290_s27 + $0x378] sm:$0xff] }
 0x1fc   : > { %3050 = vmatpush.msrb.mxu3 %v465_v38  ;;  %3011 = vmatpush.msrb.mxu1 %v399_v39  ;;  %v423_v32 = vld [vmem:[%s4290_s27 + $0x578] sm:$0xff]  ;;  %v457_v33 = vld [vmem:[%s4290_s27 + $0x688] sm:$0xff] }
 0x1fd   : > { %2992 = vmatpush.msrb.mxu0 %v365_v50  ;;  %3032 = vmatpush.msrb.mxu2 %v429_v54  ;;  %v391_v34 = vld [vmem:[%s4290_s27 + $0x478] sm:$0xff]  ;;  %v357_v37 = vld [vmem:[%s4290_s27 + $0x368] sm:$0xff] }
 0x1fe   : > { %3051 = vmatpush.msrb.mxu3 %v463_v2  ;;  %3012 = vmatpush.msrb.mxu1 %v397_v17  ;;  %v421_v38 = vld [vmem:[%s4290_s27 + $0x568] sm:$0xff]  ;;  %v455_v39 = vld [vmem:[%s4290_s27 + $0x678] sm:$0xff] }
 0x1ff   : > { %2993 = vmatpush.msrb.mxu0 %v363_v21  ;;  %3033 = vmatpush.msrb.mxu2 %v427_v22  ;;  %v389_v50 = vld [vmem:[%s4290_s27 + $0x468] sm:$0xff]  ;;  %v355_v54 = vld [vmem:[%s4290_s27 + $0x358] sm:$0xff] }
 0x200   : > { %3052 = vmatpush.msrb.mxu3 %v461_v20  ;;  %3013 = vmatpush.msrb.mxu1 %v395_v23  ;;  %v419_v2 = vld [vmem:[%s4290_s27 + $0x558] sm:$0xff]  ;;  %v453_v17 = vld [vmem:[%s4290_s27 + $0x668] sm:$0xff] }
 0x201   : > { %2994 = vmatpush.msrb.mxu0 %v361_v57  ;;  %3034 = vmatpush.msrb.mxu2 %v425_v26  ;;  %v387_v21 = vld [vmem:[%s4290_s27 + $0x458] sm:$0xff]  ;;  %v353_v22 = vld [vmem:[%s4290_s27 + $0x348] sm:$0xff] }
 0x202   : > { %3053 = vmatpush.msrb.mxu3 %v459_v30  ;;  %3014 = vmatpush.msrb.mxu1 %v393_v31  ;;  %v417_v20 = vld [vmem:[%s4290_s27 + $0x548] sm:$0xff]  ;;  %v451_v23 = vld [vmem:[%s4290_s27 + $0x658] sm:$0xff] }
 0x203   : > { %2995 = vmatpush.msrb.mxu0 %v359_v11  ;;  %3035 = vmatpush.msrb.mxu2 %v423_v32  ;;  %v385_v57 = vld [vmem:[%s4290_s27 + $0x448] sm:$0xff]  ;;  %v351_v26 = vld [vmem:[%s4290_s27 + $0x338] sm:$0xff] }
 0x204   : > { %3054 = vmatpush.msrb.mxu3 %v457_v33  ;;  %3015 = vmatpush.msrb.mxu1 %v391_v34  ;;  %v415_v30 = vld [vmem:[%s4290_s27 + $0x538] sm:$0xff]  ;;  %v449_v31 = vld [vmem:[%s4290_s27 + $0x648] sm:$0xff] }
 0x205   : > { %2996 = vmatpush.msrb.mxu0 %v357_v37  ;;  %3036 = vmatpush.msrb.mxu2 %v421_v38  ;;  %v383_v11 = vld [vmem:[%s4290_s27 + $0x438] sm:$0xff]  ;;  %v349_v33 = vld [vmem:[%s4290_s27 + $0x328] sm:$0xff] }
 0x206   : > { %3055 = vmatpush.msrb.mxu3 %v455_v39  ;;  %3016 = vmatpush.msrb.mxu1 %v389_v50  ;;  %v413_v34 = vld [vmem:[%s4290_s27 + $0x528] sm:$0xff]  ;;  %v447_v38 = vld [vmem:[%s4290_s27 + $0x638] sm:$0xff] }
 0x207   : > { %2997 = vmatpush.msrb.mxu0 %v355_v54  ;;  %3037 = vmatpush.msrb.mxu2 %v419_v2  ;;  %v381_v39 = vld [vmem:[%s4290_s27 + $0x428] sm:$0xff]  ;;  %v347_v50 = vld [vmem:[%s4290_s27 + $0x318] sm:$0xff] }
 0x208   : > { %3056 = vmatpush.msrb.mxu3 %v453_v17  ;;  %3017 = vmatpush.msrb.mxu1 %v387_v21  ;;  %v411_v54 = vld [vmem:[%s4290_s27 + $0x518] sm:$0xff]  ;;  %v445_v17 = vld [vmem:[%s4290_s27 + $0x628] sm:$0xff] }
 0x209   : > { %2998 = vmatpush.msrb.mxu0 %v353_v22  ;;  %3038 = vmatpush.msrb.mxu2 %v417_v20  ;;  %v2684_v32 = vpop.f32.mrf.mxu0  ;;  %v379_v22 = vld [vmem:[%s4290_s27 + $0x418] sm:$0xff]  ;;  %v409_v20 = vld [vmem:[%s4290_s27 + $0x508] sm:$0xff] }
 0x20a   : > { %3057 = vmatpush.msrb.mxu3 %v451_v23  ;;  %3018 = vmatpush.msrb.mxu1 %v385_v57  ;;  %v2685_v37 = vadd.f32 %v2684_v32, %v5330_v10  ;;  %v345_v10 = vld [vmem:[%s4290_s27 + $0x308] sm:$0xff]  ;;  %v443_v23 = vld [vmem:[%s4290_s27 + $0x618] sm:$0xff] }
 0x20b   : > { %2999 = vmatpush.msrb.mxu0 %v351_v26  ;;  %3039 = vmatpush.msrb.mxu2 %v415_v30  ;;  %v503_v26 = vld [vmem:[%s4290_s27 + $0x7f8] sm:$0xff]  ;;  %v441_v32 = vld [vmem:[%s4290_s27 + $0x608] sm:$0xff] }
 0x20c   : > { %3058 = vmatpush.msrb.mxu3 %v449_v31  ;;  %3019 = vmatpush.msrb.mxu1 %v383_v11  ;;  %v2704_v2 = vpop.f32.mrf.mxu1  ;;  %v567_v31 = vld [vmem:[%s4290_s27 + $0x9f8] sm:$0xff]  ;;  %v377_v11 = vld [vmem:[%s4290_s27 + $0x408] sm:$0xff] }
 0x20d   : > { %3000 = vmatpush.msrb.mxu0 %v349_v33  ;;  %3040 = vmatpush.msrb.mxu2 %v413_v34  ;;  %v2705_v21 = vadd.f32 %v2704_v2, %v2685_v37  ;;  %v535_v34 = vld [vmem:[%s4290_s27 + $0x8f8] sm:$0xff]  ;;  %v597_v2 = vld [vmem:[%s4290_s27 + $0xae8] sm:$0xff] }
 0x20e   : > { %3059 = vmatpush.msrb.mxu3 %v447_v38  ;;  %3020 = vmatpush.msrb.mxu1 %v381_v39  ;;  %v565_v38 = vld [vmem:[%s4290_s27 + $0x9e8] sm:$0xff]  ;;  %v599_v39 = vld [vmem:[%s4290_s27 + $0xaf8] sm:$0xff] }
 0x20f   : > { %3001 = vmatpush.msrb.mxu0 %v347_v50  ;;  %3041 = vmatpush.msrb.mxu2 %v411_v54  ;;  %v2724_v57 = vpop.f32.mrf.mxu2  ;;  %v499_v50 = vld [vmem:[%s4290_s27 + $0x7d8] sm:$0xff]  ;;  %v533_v54 = vld [vmem:[%s4290_s27 + $0x8e8] sm:$0xff] }
 0x210   : > { %3060 = vmatpush.msrb.mxu3 %v445_v17  ;;  %2963 = vmatmul.f32.vlgmr.msra.gmra.mxu2 %v4422_v47  ;;  %v2725_v30 = vadd.f32 %v2724_v57, %v2705_v21  ;;  %v501_v47 = vld [vmem:[%s4290_s27 + $0x7e8] sm:$0xff]  ;;  %v531_v21 = vld [vmem:[%s4290_s27 + $0x8d8] sm:$0xff] }
 0x211   : > { %3002 = vmatpush.msrb.mxu0 %v345_v10  ;;  %3021 = vmatpush.msrb.mxu1 %v379_v22  ;;  %v497_v17 = vld [vmem:[%s4290_s27 + $0x7c8] sm:$0xff]  ;;  %v495_v22 = vld [vmem:[%s4290_s27 + $0x7b8] sm:$0xff] }
 0x212   : > { %3042 = vmatpush.msrb.mxu2 %v409_v20  ;;  %3061 = vmatpush.msrb.mxu3 %v443_v23  ;;  %v2744_v33 = vpop.f32.mrf.mxu3  ;;  %v561_v10 = vld [vmem:[%s4290_s27 + $0x9c8] sm:$0xff]  ;;  %v559_v23 = vld [vmem:[%s4290_s27 + $0x9b8] sm:$0xff] }
 0x213   : > { %2983 = vmatmul.f32.vlgmr.msra.gmra.mxu3 %v4416_v44  ;;  %3067 = vmatpush.msra.mxu0 %v503_v26  ;;  %v5400_v37 = vadd.f32 %v2744_v33, %v2725_v30  ;;  %v563_v44 = vld [vmem:[%s4290_s27 + $0x9d8] sm:$0xff]  ;;  %v529_v20 = vld [vmem:[%s4290_s27 + $0x8c8] sm:$0xff] }
 0x214   : > { %3107 = vmatpush.msra.mxu2 %v567_v31  ;;  %3022 = vmatpush.msrb.mxu1 %v377_v11  ;;  %v593_v57 = vld [vmem:[%s4290_s27 + $0xac8] sm:$0xff]  ;;  %v527_v26 = vld [vmem:[%s4290_s27 + $0x8b8] sm:$0xff] }
 0x215   : > { %3062 = vmatpush.msrb.mxu3 %v441_v32  ;;  %2943 = vmatmul.f32.vlgmr.msra.gmra.mxu1 %v4418_v45  ;;  %v595_v45 = vld [vmem:[%s4290_s27 + $0xad8] sm:$0xff]  ;;  %v557_v30 = vld [vmem:[%s4290_s27 + $0x9a8] sm:$0xff] }
 0x216   : > { %3068 = vmatpush.msra.mxu0 %v501_v47  ;;  %3087 = vmatpush.msra.mxu1 %v535_v34  ;;  %v591_v31 = vld [vmem:[%s4290_s27 + $0xab8] sm:$0xff]  ;;  %v525_v11 = vld [vmem:[%s4290_s27 + $0x8a8] sm:$0xff] }
 0x217   : > { %3108 = vmatpush.msra.mxu2 %v565_v38  ;;  %3127 = vmatpush.msra.mxu3 %v599_v39  ;;  %v589_v32 = vld [vmem:[%s4290_s27 + $0xaa8] sm:$0xff]  ;;  %v523_v47 = vld [vmem:[%s4290_s27 + $0x898] sm:$0xff] }
 0x218   : > { %3069 = vmatpush.msra.mxu0 %v499_v50  ;;  %3088 = vmatpush.msra.mxu1 %v533_v54  ;;  %v489_v33 = vld [vmem:[%s4290_s27 + $0x788] sm:$0xff]  ;;  %v487_v38 = vld [vmem:[%s4290_s27 + $0x778] sm:$0xff] }
 0x219   : > { %3109 = vmatpush.msra.mxu2 %v563_v44  ;;  %3128 = vmatpush.msra.mxu3 %v597_v2  ;;  %v553_v34 = vld [vmem:[%s4290_s27 + $0x988] sm:$0xff]  ;;  %v551_v50 = vld [vmem:[%s4290_s27 + $0x978] sm:$0xff] }
 0x21a   : > { %3043 = vmatmul.f32.vlgmr.msrb.gmra.mxu2 %v4444_v63  ;;  %3070 = vmatpush.msra.mxu0 %v497_v17  ;;  %v493_v63 = vld [vmem:[%s4290_s27 + $0x7a8] sm:$0xff]  ;;  %v519_v2 = vld [vmem:[%s4290_s27 + $0x878] sm:$0xff] }
 0x21b   : > { %3089 = vmatpush.msra.mxu1 %v531_v21  ;;  %3110 = vmatpush.msra.mxu2 %v561_v10  ;;  %v521_v39 = vld [vmem:[%s4290_s27 + $0x888] sm:$0xff]  ;;  %v583_v21 = vld [vmem:[%s4290_s27 + $0xa78] sm:$0xff] }
 0x21c   : > { %3129 = vmatpush.msra.mxu3 %v595_v45  ;;  %3003 = vmatmul.f32.vlgmr.msrb.gmra.mxu0 %v4420_v46  ;;  %v491_v46 = vld [vmem:[%s4290_s27 + $0x798] sm:$0xff]  ;;  %v585_v54 = vld [vmem:[%s4290_s27 + $0xa88] sm:$0xff] }
 0x21d   : > { %3063 = vmatmul.f32.vlgmr.msrb.gmra.mxu3 %v4438_v60  ;;  %3071 = vmatpush.msra.mxu0 %v495_v22  ;;  %v555_v60 = vld [vmem:[%s4290_s27 + $0x998] sm:$0xff]  ;;  %v485_v44 = vld [vmem:[%s4290_s27 + $0x768] sm:$0xff] }
 0x21e   : > { %3090 = vmatpush.msra.mxu1 %v529_v20  ;;  %3111 = vmatpush.msra.mxu2 %v559_v23  ;;  %v549_v17 = vld [vmem:[%s4290_s27 + $0x968] sm:$0xff]  ;;  %v483_v10 = vld [vmem:[%s4290_s27 + $0x758] sm:$0xff] }
 0x21f   : > { %3130 = vmatpush.msra.mxu3 %v593_v57  ;;  %3023 = vmatmul.f32.vlgmr.msrb.gmra.mxu1 %v4440_v61  ;;  %v587_v61 = vld [vmem:[%s4290_s27 + $0xa98] sm:$0xff]  ;;  %v517_v45 = vld [vmem:[%s4290_s27 + $0x868] sm:$0xff] }
 0x220   : > { %3072 = vmatpush.msra.mxu0 %v493_v63  ;;  %3091 = vmatpush.msra.mxu1 %v527_v26  ;;  %v547_v22 = vld [vmem:[%s4290_s27 + $0x958] sm:$0xff]  ;;  %v581_v20 = vld [vmem:[%s4290_s27 + $0xa68] sm:$0xff] }
 0x221   : > { %3112 = vmatpush.msra.mxu2 %v557_v30  ;;  %3131 = vmatpush.msra.mxu3 %v591_v31  ;;  %v481_v23 = vld [vmem:[%s4290_s27 + $0x748] sm:$0xff]  ;;  %v515_v57 = vld [vmem:[%s4290_s27 + $0x858] sm:$0xff] }
 0x222   : > { %3073 = vmatpush.msra.mxu0 %v491_v46  ;;  %3092 = vmatpush.msra.mxu1 %v525_v11  ;;  %v545_v63 = vld [vmem:[%s4290_s27 + $0x948] sm:$0xff]  ;;  %v579_v26 = vld [vmem:[%s4290_s27 + $0xa58] sm:$0xff] }
 0x223   : > { %3113 = vmatpush.msra.mxu2 %v555_v60  ;;  %3132 = vmatpush.msra.mxu3 %v589_v32  ;;  %v479_v30 = vld [vmem:[%s4290_s27 + $0x738] sm:$0xff]  ;;  %v513_v31 = vld [vmem:[%s4290_s27 + $0x848] sm:$0xff] }
 0x224   : > { %3074 = vmatpush.msra.mxu0 %v489_v33  ;;  %3093 = vmatpush.msra.mxu1 %v523_v47  ;;  %v543_v11 = vld [vmem:[%s4290_s27 + $0x938] sm:$0xff]  ;;  %v577_v60 = vld [vmem:[%s4290_s27 + $0xa48] sm:$0xff] }
 0x225   : > { %3114 = vmatpush.msra.mxu2 %v553_v34  ;;  %3133 = vmatpush.msra.mxu3 %v587_v61  ;;  %v477_v33 = vld [vmem:[%s4290_s27 + $0x728] sm:$0xff]  ;;  %v511_v47 = vld [vmem:[%s4290_s27 + $0x838] sm:$0xff] }
 0x226   : > { %3075 = vmatpush.msra.mxu0 %v487_v38  ;;  %3094 = vmatpush.msra.mxu1 %v521_v39  ;;  %v541_v34 = vld [vmem:[%s4290_s27 + $0x928] sm:$0xff]  ;;  %v575_v61 = vld [vmem:[%s4290_s27 + $0xa38] sm:$0xff] }
 0x227   : > { %3115 = vmatpush.msra.mxu2 %v551_v50  ;;  %3134 = vmatpush.msra.mxu3 %v585_v54  ;;  %v475_v39 = vld [vmem:[%s4290_s27 + $0x718] sm:$0xff]  ;;  %v509_v50 = vld [vmem:[%s4290_s27 + $0x828] sm:$0xff] }
 0x228   : > { %3076 = vmatpush.msra.mxu0 %v485_v44  ;;  %3095 = vmatpush.msra.mxu1 %v519_v2  ;;  %v539_v54 = vld [vmem:[%s4290_s27 + $0x918] sm:$0xff]  ;;  %v573_v44 = vld [vmem:[%s4290_s27 + $0xa28] sm:$0xff] }
 0x229   : > { %3116 = vmatpush.msra.mxu2 %v549_v17  ;;  %3135 = vmatpush.msra.mxu3 %v583_v21  ;;  %v473_v2 = vld [vmem:[%s4290_s27 + $0x708] sm:$0xff]  ;;  %v507_v17 = vld [vmem:[%s4290_s27 + $0x818] sm:$0xff] }
 0x22a   : > { %3077 = vmatpush.msra.mxu0 %v483_v10  ;;  %3096 = vmatpush.msra.mxu1 %v517_v45  ;;  %v537_v10 = vld [vmem:[%s4290_s27 + $0x908] sm:$0xff]  ;;  %v571_v45 = vld [vmem:[%s4290_s27 + $0xa18] sm:$0xff] }
 0x22b   : > { %3117 = vmatpush.msra.mxu2 %v547_v22  ;;  %3136 = vmatpush.msra.mxu3 %v581_v20  ;;  %v2764_v46 = vpop.f32.mrf.mxu0  ;;  %v631_v20 = vld [vmem:[%s4290_s27 + $0xbf8] sm:$0xff] }
 0x22c   : > { %3078 = vmatpush.msra.mxu0 %v481_v23  ;;  %3097 = vmatpush.msra.mxu1 %v515_v57  ;;  %v2765_v32 = vadd.f32 %v2764_v46, %v5400_v37  ;;  %v695_v23 = vld [vmem:[%s4290_s27 + $0xdf8] sm:$0xff] }
 0x22d   : > { %3118 = vmatpush.msra.mxu2 %v545_v63  ;;  %3137 = vmatpush.msra.mxu3 %v579_v26  ;;  %v505_v63 = vld [vmem:[%s4290_s27 + $0x808] sm:$0xff]  ;;  %v663_v46 = vld [vmem:[%s4290_s27 + $0xcf8] sm:$0xff] }
 0x22e   : > { %3079 = vmatpush.msra.mxu0 %v479_v30  ;;  %3098 = vmatpush.msra.mxu1 %v513_v31  ;;  %v2784_v38 = vpop.f32.mrf.mxu1  ;;  %v569_v26 = vld [vmem:[%s4290_s27 + $0xa08] sm:$0xff] }
 0x22f   : > { %3119 = vmatpush.msra.mxu2 %v543_v11  ;;  %3138 = vmatpush.msra.mxu3 %v577_v60  ;;  %v2785_v37 = vadd.f32 %v2784_v38, %v2765_v32  ;;  %v629_v31 = vld [vmem:[%s4290_s27 + $0xbe8] sm:$0xff]  ;;  %v727_v60 = vld [vmem:[%s4290_s27 + $0xef8] sm:$0xff] }
 0x230   : > { %3080 = vmatpush.msra.mxu0 %v477_v33  ;;  %3099 = vmatpush.msra.mxu1 %v511_v47  ;;  %v693_v11 = vld [vmem:[%s4290_s27 + $0xde8] sm:$0xff]  ;;  %v691_v32 = vld [vmem:[%s4290_s27 + $0xdd8] sm:$0xff] }
 0x231   : > { %3120 = vmatpush.msra.mxu2 %v541_v34  ;;  %3139 = vmatpush.msra.mxu3 %v575_v61  ;;  %v2804_v21 = vpop.f32.mrf.mxu2  ;;  %v725_v33 = vld [vmem:[%s4290_s27 + $0xee8] sm:$0xff]  ;;  %v659_v34 = vld [vmem:[%s4290_s27 + $0xcd8] sm:$0xff] }
 0x232   : > { %3081 = vmatpush.msra.mxu0 %v475_v39  ;;  %3100 = vmatpush.msra.mxu1 %v509_v50  ;;  %v2805_v22 = vadd.f32 %v2804_v21, %v2785_v37  ;;  %v625_v47 = vld [vmem:[%s4290_s27 + $0xbc8] sm:$0xff]  ;;  %v623_v61 = vld [vmem:[%s4290_s27 + $0xbb8] sm:$0xff] }
 0x233   : > { %3121 = vmatpush.msra.mxu2 %v539_v54  ;;  %3140 = vmatpush.msra.mxu3 %v573_v44  ;;  %v657_v38 = vld [vmem:[%s4290_s27 + $0xcc8] sm:$0xff]  ;;  %v687_v39 = vld [vmem:[%s4290_s27 + $0xdb8] sm:$0xff] }
 0x234   : > { %3082 = vmatpush.msra.mxu0 %v473_v2  ;;  %3101 = vmatpush.msra.mxu1 %v507_v17  ;;  %v2824_v57 = vpop.f32.mrf.mxu3  ;;  %v721_v50 = vld [vmem:[%s4290_s27 + $0xec8] sm:$0xff]  ;;  %v655_v54 = vld [vmem:[%s4290_s27 + $0xcb8] sm:$0xff] }
 0x235   : > { %3122 = vmatpush.msra.mxu2 %v537_v10  ;;  %3141 = vmatpush.msra.mxu3 %v571_v45  ;;  %v5470_v30 = vadd.f32 %v2824_v57, %v2805_v22  ;;  %v621_v37 = vld [vmem:[%s4290_s27 + $0xba8] sm:$0xff]  ;;  %v719_v2 = vld [vmem:[%s4290_s27 + $0xeb8] sm:$0xff] }
 0x236   : > { %3083 = vmatmul.f32.vlgmr.msra.gmra.mxu0 %v4442_v62  ;;  %3123 = vmatmul.f32.vlgmr.msra.gmra.mxu2 %v4538_v24  ;;  %v627_v62 = vld [vmem:[%s4290_s27 + $0xbd8] sm:$0xff]  ;;  %v661_v24 = vld [vmem:[%s4290_s27 + $0xce8] sm:$0xff] }
 0x237   : > { %3147 = vmatpush.msrb.mxu0 %v631_v20  ;;  %3187 = vmatpush.msrb.mxu2 %v695_v23  ;;  %v685_v44 = vld [vmem:[%s4290_s27 + $0xda8] sm:$0xff]  ;;  %v619_v17 = vld [vmem:[%s4290_s27 + $0xb98] sm:$0xff] }
 0x238   : > { %3102 = vmatpush.msra.mxu1 %v505_v63  ;;  %3142 = vmatpush.msra.mxu3 %v569_v26  ;;  %v653_v21 = vld [vmem:[%s4290_s27 + $0xca8] sm:$0xff]  ;;  %v683_v10 = vld [vmem:[%s4290_s27 + $0xd98] sm:$0xff] }
 0x239   : > { %3103 = vmatmul.f32.vlgmr.msra.gmra.mxu1 %v4528_v18  ;;  %3143 = vmatmul.f32.vlgmr.msra.gmra.mxu3 %v4530_v19  ;;  %v689_v18 = vld [vmem:[%s4290_s27 + $0xdc8] sm:$0xff]  ;;  %v723_v19 = vld [vmem:[%s4290_s27 + $0xed8] sm:$0xff] }
 0x23a   : > { %3148 = vmatpush.msrb.mxu0 %v629_v31  ;;  %3167 = vmatpush.msrb.mxu1 %v663_v46  ;;  %v717_v45 = vld [vmem:[%s4290_s27 + $0xea8] sm:$0xff]  ;;  %v651_v20 = vld [vmem:[%s4290_s27 + $0xc98] sm:$0xff] }
 0x23b   : > { %3188 = vmatpush.msrb.mxu2 %v693_v11  ;;  %3207 = vmatpush.msrb.mxu3 %v727_v60  ;;  %v617_v22 = vld [vmem:[%s4290_s27 + $0xb88] sm:$0xff]  ;;  %v715_v57 = vld [vmem:[%s4290_s27 + $0xe98] sm:$0xff] }
 0x23c   : > { %3149 = vmatpush.msrb.mxu0 %v627_v62  ;;  %3168 = vmatpush.msrb.mxu1 %v661_v24  ;;  %v681_v23 = vld [vmem:[%s4290_s27 + $0xd88] sm:$0xff]  ;;  %v615_v63 = vld [vmem:[%s4290_s27 + $0xb78] sm:$0xff] }
 0x23d   : > { %3189 = vmatpush.msrb.mxu2 %v691_v32  ;;  %3208 = vmatpush.msrb.mxu3 %v725_v33  ;;  %v649_v26 = vld [vmem:[%s4290_s27 + $0xc88] sm:$0xff]  ;;  %v679_v31 = vld [vmem:[%s4290_s27 + $0xd78] sm:$0xff] }
 0x23e   : > { %3150 = vmatpush.msrb.mxu0 %v625_v47  ;;  %3169 = vmatpush.msrb.mxu1 %v659_v34  ;;  %v713_v46 = vld [vmem:[%s4290_s27 + $0xe88] sm:$0xff]  ;;  %v647_v60 = vld [vmem:[%s4290_s27 + $0xc78] sm:$0xff] }
 0x23f   : > { %3190 = vmatpush.msrb.mxu2 %v689_v18  ;;  %3209 = vmatpush.msrb.mxu3 %v723_v19  ;;  %v613_v11 = vld [vmem:[%s4290_s27 + $0xb68] sm:$0xff]  ;;  %v711_v24 = vld [vmem:[%s4290_s27 + $0xe78] sm:$0xff] }
 0x240   : > { %3151 = vmatpush.msrb.mxu0 %v623_v61  ;;  %3170 = vmatpush.msrb.mxu1 %v657_v38  ;;  %v677_v62 = vld [vmem:[%s4290_s27 + $0xd68] sm:$0xff]  ;;  %v611_v32 = vld [vmem:[%s4290_s27 + $0xb58] sm:$0xff] }
 0x241   : > { %3191 = vmatpush.msrb.mxu2 %v687_v39  ;;  %3210 = vmatpush.msrb.mxu3 %v721_v50  ;;  %v645_v33 = vld [vmem:[%s4290_s27 + $0xc68] sm:$0xff]  ;;  %v675_v47 = vld [vmem:[%s4290_s27 + $0xd58] sm:$0xff] }
 0x242   : > { %3152 = vmatpush.msrb.mxu0 %v621_v37  ;;  %3171 = vmatpush.msrb.mxu1 %v655_v54  ;;  %v709_v34 = vld [vmem:[%s4290_s27 + $0xe68] sm:$0xff]  ;;  %v643_v19 = vld [vmem:[%s4290_s27 + $0xc58] sm:$0xff] }
 0x243   : > { %3192 = vmatpush.msrb.mxu2 %v685_v44  ;;  %3211 = vmatpush.msrb.mxu3 %v719_v2  ;;  %v609_v18 = vld [vmem:[%s4290_s27 + $0xb48] sm:$0xff]  ;;  %v707_v38 = vld [vmem:[%s4290_s27 + $0xe58] sm:$0xff] }
 0x244   : > { %3153 = vmatpush.msrb.mxu0 %v619_v17  ;;  %3172 = vmatpush.msrb.mxu1 %v653_v21  ;;  %v673_v61 = vld [vmem:[%s4290_s27 + $0xd48] sm:$0xff]  ;;  %v607_v39 = vld [vmem:[%s4290_s27 + $0xb38] sm:$0xff] }
 0x245   : > { %3193 = vmatpush.msrb.mxu2 %v683_v10  ;;  %3212 = vmatpush.msrb.mxu3 %v717_v45  ;;  %v641_v50 = vld [vmem:[%s4290_s27 + $0xc48] sm:$0xff]  ;;  %v671_v54 = vld [vmem:[%s4290_s27 + $0xd38] sm:$0xff] }
 0x246   : > { %3154 = vmatpush.msrb.mxu0 %v617_v22  ;;  %3173 = vmatpush.msrb.mxu1 %v651_v20  ;;  %v705_v44 = vld [vmem:[%s4290_s27 + $0xe48] sm:$0xff]  ;;  %v639_v21 = vld [vmem:[%s4290_s27 + $0xc38] sm:$0xff] }
 0x247   : > { %3194 = vmatpush.msrb.mxu2 %v681_v23  ;;  %3213 = vmatpush.msrb.mxu3 %v715_v57  ;;  %v605_v17 = vld [vmem:[%s4290_s27 + $0xb28] sm:$0xff]  ;;  %v703_v45 = vld [vmem:[%s4290_s27 + $0xe38] sm:$0xff] }
 0x248   : > { %3155 = vmatpush.msrb.mxu0 %v615_v63  ;;  %3174 = vmatpush.msrb.mxu1 %v649_v26  ;;  %v669_v10 = vld [vmem:[%s4290_s27 + $0xd28] sm:$0xff]  ;;  %v603_v20 = vld [vmem:[%s4290_s27 + $0xb18] sm:$0xff] }
 0x249   : > { %3195 = vmatpush.msrb.mxu2 %v679_v31  ;;  %3214 = vmatpush.msrb.mxu3 %v713_v46  ;;  %v637_v23 = vld [vmem:[%s4290_s27 + $0xc28] sm:$0xff]  ;;  %v635_v31 = vld [vmem:[%s4290_s27 + $0xc18] sm:$0xff] }
 0x24a   : > { %3156 = vmatpush.msrb.mxu0 %v613_v11  ;;  %3175 = vmatpush.msrb.mxu1 %v647_v60  ;;  %v701_v57 = vld [vmem:[%s4290_s27 + $0xe28] sm:$0xff]  ;;  %v699_v60 = vld [vmem:[%s4290_s27 + $0xe18] sm:$0xff] }
 0x24b   : > { %3196 = vmatpush.msrb.mxu2 %v677_v62  ;;  %3215 = vmatpush.msrb.mxu3 %v711_v24  ;;  %v601_v26 = vld [vmem:[%s4290_s27 + $0xb08] sm:$0xff]  ;;  %v759_v24 = vld [vmem:[%s4290_s27 + $0xff8] sm:$0xff] }
 0x24c   : > { %3157 = vmatpush.msrb.mxu0 %v611_v32  ;;  %3176 = vmatpush.msrb.mxu1 %v645_v33  ;;  %v665_v11 = vld [vmem:[%s4290_s27 + $0xd08] sm:$0xff]  ;;  %v823_v32 = vld [vmem:[%s4290_s27 + $0x11f8] sm:$0xff] }
 0x24d   : > { %3197 = vmatpush.msrb.mxu2 %v675_v47  ;;  %3216 = vmatpush.msrb.mxu3 %v709_v34  ;;  %v2844_v37 = vpop.f32.mrf.mxu0  ;;  %v633_v47 = vld [vmem:[%s4290_s27 + $0xc08] sm:$0xff] }
 0x24e   : > { %3158 = vmatpush.msrb.mxu0 %v609_v18  ;;  %3177 = vmatpush.msrb.mxu1 %v643_v19  ;;  %v2845_v2 = vadd.f32 %v2844_v37, %v5470_v30  ;;  %v667_v30 = vld [vmem:[%s4290_s27 + $0xd18] sm:$0xff]  ;;  %v697_v34 = vld [vmem:[%s4290_s27 + $0xe08] sm:$0xff] }
 0x24f   : > { %3198 = vmatpush.msrb.mxu2 %v673_v61  ;;  %3217 = vmatpush.msrb.mxu3 %v707_v38  ;;  %v757_v19 = vld [vmem:[%s4290_s27 + $0xfe8] sm:$0xff]  ;;  %v791_v61 = vld [vmem:[%s4290_s27 + $0x10f8] sm:$0xff] }
 0x250   : > { %3159 = vmatpush.msrb.mxu0 %v607_v39  ;;  %3178 = vmatpush.msrb.mxu1 %v641_v50  ;;  %v2864_v22 = vpop.f32.mrf.mxu1  ;;  %v821_v38 = vld [vmem:[%s4290_s27 + $0x11e8] sm:$0xff]  ;;  %v855_v39 = vld [vmem:[%s4290_s27 + $0x12f8] sm:$0xff] }
 0x251   : > { %3199 = vmatpush.msrb.mxu2 %v671_v54  ;;  %3218 = vmatpush.msrb.mxu3 %v705_v44  ;;  %v2865_v63 = vadd.f32 %v2864_v22, %v2845_v2  ;;  %v819_v50 = vld [vmem:[%s4290_s27 + $0x11d8] sm:$0xff]  ;;  %v853_v37 = vld [vmem:[%s4290_s27 + $0x12e8] sm:$0xff] }
 0x252   : > { %3160 = vmatpush.msrb.mxu0 %v605_v17  ;;  %3179 = vmatpush.msrb.mxu1 %v639_v21  ;;  %v753_v54 = vld [vmem:[%s4290_s27 + $0xfc8] sm:$0xff]  ;;  %v787_v44 = vld [vmem:[%s4290_s27 + $0x10d8] sm:$0xff] }
 0x253   : > { %3200 = vmatpush.msrb.mxu2 %v669_v10  ;;  %3219 = vmatpush.msrb.mxu3 %v703_v45  ;;  %v2884_v46 = vpop.f32.mrf.mxu2  ;;  %v751_v2 = vld [vmem:[%s4290_s27 + $0xfb8] sm:$0xff]  ;;  %v785_v17 = vld [vmem:[%s4290_s27 + $0x10c8] sm:$0xff] }
 0x254   : > { %3161 = vmatpush.msrb.mxu0 %v603_v20  ;;  %3180 = vmatpush.msrb.mxu1 %v637_v23  ;;  %v2885_v62 = vadd.f32 %v2884_v46, %v2865_v63  ;;  %v815_v21 = vld [vmem:[%s4290_s27 + $0x11b8] sm:$0xff]  ;;  %v849_v10 = vld [vmem:[%s4290_s27 + $0x12c8] sm:$0xff] }
 0x255   : > { %3201 = vmatpush.msrb.mxu2 %v667_v30  ;;  %3220 = vmatpush.msrb.mxu3 %v701_v57  ;;  %v749_v45 = vld [vmem:[%s4290_s27 + $0xfa8] sm:$0xff]  ;;  %v783_v22 = vld [vmem:[%s4290_s27 + $0x10b8] sm:$0xff] }
 0x256   : > { %3162 = vmatpush.msrb.mxu0 %v601_v26  ;;  %3181 = vmatpush.msrb.mxu1 %v635_v31  ;;  %v2904_v33 = vpop.f32.mrf.mxu3  ;;  %v813_v20 = vld [vmem:[%s4290_s27 + $0x11a8] sm:$0xff]  ;;  %v847_v23 = vld [vmem:[%s4290_s27 + $0x12b8] sm:$0xff] }
 0x257   : > { %3202 = vmatpush.msrb.mxu2 %v665_v11  ;;  %3221 = vmatpush.msrb.mxu3 %v699_v60  ;;  %v5541_v18 = vadd.f32 %v2904_v33, %v2885_v62  ;;  %v747_v30 = vld [vmem:[%s4290_s27 + $0xf98] sm:$0xff]  ;;  %v781_v57 = vld [vmem:[%s4290_s27 + $0x10a8] sm:$0xff] }
 0x258   : > { %3163 = vmatmul.f32.vlgmr.msrb.gmra.mxu0 %v4540_v25  ;;  %3203 = vmatmul.f32.vlgmr.msrb.gmra.mxu2 %v4617_v41  ;;  %v755_v25 = vld [vmem:[%s4290_s27 + $0xfd8] sm:$0xff]  ;;  %v789_v41 = vld [vmem:[%s4290_s27 + $0x10e8] sm:$0xff] }
 0x259   : > { %3227 = vmatpush.msra.mxu0 %v759_v24  ;;  %3267 = vmatpush.msra.mxu2 %v823_v32  ;;  %v811_v63 = vld [vmem:[%s4290_s27 + $0x1198] sm:$0xff]  ;;  %v845_v26 = vld [vmem:[%s4290_s27 + $0x12a8] sm:$0xff] }
 0x25a   : > { %3182 = vmatpush.msrb.mxu1 %v633_v47  ;;  %3222 = vmatpush.msrb.mxu3 %v697_v34  ;;  %v745_v31 = vld [vmem:[%s4290_s27 + $0xf88] sm:$0xff]  ;;  %v779_v46 = vld [vmem:[%s4290_s27 + $0x1098] sm:$0xff] }
 0x25b   : > { %3183 = vmatmul.f32.vlgmr.msrb.gmra.mxu1 %v4607_v35  ;;  %3223 = vmatmul.f32.vlgmr.msrb.gmra.mxu3 %v4609_v36  ;;  %v817_v35 = vld [vmem:[%s4290_s27 + $0x11c8] sm:$0xff]  ;;  %v851_v36 = vld [vmem:[%s4290_s27 + $0x12d8] sm:$0xff] }
 0x25c   : > { %3228 = vmatpush.msra.mxu0 %v757_v19  ;;  %3247 = vmatpush.msra.mxu1 %v791_v61  ;;  %v809_v11 = vld [vmem:[%s4290_s27 + $0x1188] sm:$0xff]  ;;  %v843_v60 = vld [vmem:[%s4290_s27 + $0x1298] sm:$0xff] }
 0x25d   : > { %3268 = vmatpush.msra.mxu2 %v821_v38  ;;  %3287 = vmatpush.msra.mxu3 %v855_v39  ;;  %v743_v62 = vld [vmem:[%s4290_s27 + $0xf78] sm:$0xff]  ;;  %v777_v24 = vld [vmem:[%s4290_s27 + $0x1088] sm:$0xff] }
 0x25e   : > { %3229 = vmatpush.msra.mxu0 %v755_v25  ;;  %3248 = vmatpush.msra.mxu1 %v789_v41  ;;  %v807_v32 = vld [vmem:[%s4290_s27 + $0x1178] sm:$0xff]  ;;  %v841_v33 = vld [vmem:[%s4290_s27 + $0x1288] sm:$0xff] }
 0x25f   : > { %3269 = vmatpush.msra.mxu2 %v819_v50  ;;  %3288 = vmatpush.msra.mxu3 %v853_v37  ;;  %v741_v47 = vld [vmem:[%s4290_s27 + $0xf68] sm:$0xff]  ;;  %v775_v34 = vld [vmem:[%s4290_s27 + $0x1078] sm:$0xff] }
 0x260   : > { %3230 = vmatpush.msra.mxu0 %v753_v54  ;;  %3249 = vmatpush.msra.mxu1 %v787_v44  ;;  %v805_v19 = vld [vmem:[%s4290_s27 + $0x1168] sm:$0xff]  ;;  %v839_v61 = vld [vmem:[%s4290_s27 + $0x1278] sm:$0xff] }
 0x261   : > { %3270 = vmatpush.msra.mxu2 %v817_v35  ;;  %3289 = vmatpush.msra.mxu3 %v851_v36  ;;  %v739_v38 = vld [vmem:[%s4290_s27 + $0xf58] sm:$0xff]  ;;  %v773_v39 = vld [vmem:[%s4290_s27 + $0x1068] sm:$0xff] }
 0x262   : > { %3231 = vmatpush.msra.mxu0 %v751_v2  ;;  %3250 = vmatpush.msra.mxu1 %v785_v17  ;;  %v803_v25 = vld [vmem:[%s4290_s27 + $0x1158] sm:$0xff]  ;;  %v837_v41 = vld [vmem:[%s4290_s27 + $0x1268] sm:$0xff] }
 0x263   : > { %3271 = vmatpush.msra.mxu2 %v815_v21  ;;  %3290 = vmatpush.msra.mxu3 %v849_v10  ;;  %v737_v50 = vld [vmem:[%s4290_s27 + $0xf48] sm:$0xff]  ;;  %v771_v37 = vld [vmem:[%s4290_s27 + $0x1058] sm:$0xff] }
 0x264   : > { %3232 = vmatpush.msra.mxu0 %v749_v45  ;;  %3251 = vmatpush.msra.mxu1 %v783_v22  ;;  %v801_v54 = vld [vmem:[%s4290_s27 + $0x1148] sm:$0xff]  ;;  %v835_v44 = vld [vmem:[%s4290_s27 + $0x1258] sm:$0xff] }
 0x265   : > { %3272 = vmatpush.msra.mxu2 %v813_v20  ;;  %3291 = vmatpush.msra.mxu3 %v847_v23  ;;  %v735_v35 = vld [vmem:[%s4290_s27 + $0xf38] sm:$0xff]  ;;  %v769_v36 = vld [vmem:[%s4290_s27 + $0x1048] sm:$0xff] }
 0x266   : > { %3233 = vmatpush.msra.mxu0 %v747_v30  ;;  %3252 = vmatpush.msra.mxu1 %v781_v57  ;;  %v799_v17 = vld [vmem:[%s4290_s27 + $0x1138] sm:$0xff]  ;;  %v833_v21 = vld [vmem:[%s4290_s27 + $0x1248] sm:$0xff] }
 0x267   : > { %3273 = vmatpush.msra.mxu2 %v811_v63  ;;  %3292 = vmatpush.msra.mxu3 %v845_v26  ;;  %v733_v45 = vld [vmem:[%s4290_s27 + $0xf28] sm:$0xff]  ;;  %v767_v22 = vld [vmem:[%s4290_s27 + $0x1038] sm:$0xff] }
 0x268   : > { %3234 = vmatpush.msra.mxu0 %v745_v31  ;;  %3253 = vmatpush.msra.mxu1 %v779_v46  ;;  %v797_v20 = vld [vmem:[%s4290_s27 + $0x1128] sm:$0xff]  ;;  %v831_v23 = vld [vmem:[%s4290_s27 + $0x1238] sm:$0xff] }
 0x269   : > { %3274 = vmatpush.msra.mxu2 %v809_v11  ;;  %3293 = vmatpush.msra.mxu3 %v843_v60  ;;  %v731_v30 = vld [vmem:[%s4290_s27 + $0xf18] sm:$0xff]  ;;  %v765_v57 = vld [vmem:[%s4290_s27 + $0x1028] sm:$0xff] }
 0x26a   : > { %3235 = vmatpush.msra.mxu0 %v743_v62  ;;  %3254 = vmatpush.msra.mxu1 %v777_v24  ;;  %v829_v63 = vld [vmem:[%s4290_s27 + $0x1228] sm:$0xff]  ;;  %v763_v31 = vld [vmem:[%s4290_s27 + $0x1018] sm:$0xff] }
 0x26b   : > { %3275 = vmatpush.msra.mxu2 %v807_v32  ;;  %3294 = vmatpush.msra.mxu3 %v841_v33  ;;  %v729_v26 = vld [vmem:[%s4290_s27 + $0xf08] sm:$0xff]  ;;  %v827_v11 = vld [vmem:[%s4290_s27 + $0x1218] sm:$0xff] }
 0x26c   : > { %3236 = vmatpush.msra.mxu0 %v741_v47  ;;  %3255 = vmatpush.msra.mxu1 %v775_v34  ;;  %v793_v46 = vld [vmem:[%s4290_s27 + $0x1108] sm:$0xff]  ;;  %v887_v60 = vld [vmem:[%s4290_s27 + $0x13f8] sm:$0xff] }
 0x26d   : > { %3276 = vmatpush.msra.mxu2 %v805_v19  ;;  %3295 = vmatpush.msra.mxu3 %v839_v61  ;;  %v951_v62 = vld [vmem:[%s4290_s27 + $0x15f8] sm:$0xff]  ;;  %v761_v24 = vld [vmem:[%s4290_s27 + $0x1008] sm:$0xff] }
 0x26e   : > { %3237 = vmatpush.msra.mxu0 %v739_v38  ;;  %3256 = vmatpush.msra.mxu1 %v773_v39  ;;  %v825_v32 = vld [vmem:[%s4290_s27 + $0x1208] sm:$0xff]  ;;  %v919_v47 = vld [vmem:[%s4290_s27 + $0x14f8] sm:$0xff] }
 0x26f   : > { %3277 = vmatpush.msra.mxu2 %v803_v25  ;;  %3296 = vmatpush.msra.mxu3 %v837_v41  ;;  %v2924_v2 = vpop.f32.mrf.mxu0  ;;  %v885_v33 = vld [vmem:[%s4290_s27 + $0x13e8] sm:$0xff]  ;;  %v983_v19 = vld [vmem:[%s4290_s27 + $0x16f8] sm:$0xff] }
 0x270   : > { %3238 = vmatpush.msra.mxu0 %v737_v50  ;;  %3257 = vmatpush.msra.mxu1 %v771_v37  ;;  %v5596_v10 = vadd.f32 %v2924_v2, %v5541_v18  ;;  %v795_v18 = vld [vmem:[%s4290_s27 + $0x1118] sm:$0xff]  ;;  %v949_v34 = vld [vmem:[%s4290_s27 + $0x15e8] sm:$0xff] }
 0x271   : > { %3278 = vmatpush.msra.mxu2 %v801_v54  ;;  %3297 = vmatpush.msra.mxu3 %v835_v44  ;;  %v947_v61 = vld [vmem:[%s4290_s27 + $0x15d8] sm:$0xff]  ;;  %v981_v38 = vld [vmem:[%s4290_s27 + $0x16e8] sm:$0xff] }
 0x272   : > { %3239 = vmatpush.msra.mxu0 %v735_v35  ;;  %3258 = vmatpush.msra.mxu1 %v769_v36  ;;  %v881_v39 = vld [vmem:[%s4290_s27 + $0x13c8] sm:$0xff]  ;;  %v915_v25 = vld [vmem:[%s4290_s27 + $0x14d8] sm:$0xff] }
 0x273   : > { %3279 = vmatpush.msra.mxu2 %v799_v17  ;;  %3298 = vmatpush.msra.mxu3 %v833_v21  ;;  %v879_v41 = vld [vmem:[%s4290_s27 + $0x13b8] sm:$0xff]  ;;  %v913_v50 = vld [vmem:[%s4290_s27 + $0x14c8] sm:$0xff] }
 0x274   : > { %3240 = vmatpush.msra.mxu0 %v733_v45  ;;  %3259 = vmatpush.msra.mxu1 %v767_v22  ;;  %v943_v37 = vld [vmem:[%s4290_s27 + $0x15b8] sm:$0xff]  ;;  %v977_v54 = vld [vmem:[%s4290_s27 + $0x16c8] sm:$0xff] }
 0x275   : > { %3280 = vmatpush.msra.mxu2 %v797_v20  ;;  %3299 = vmatpush.msra.mxu3 %v831_v23  ;;  %v877_v44 = vld [vmem:[%s4290_s27 + $0x13a8] sm:$0xff]  ;;  %v911_v35 = vld [vmem:[%s4290_s27 + $0x14b8] sm:$0xff] }
 0x276   : > { %3241 = vmatpush.msra.mxu0 %v731_v30  ;;  %3260 = vmatpush.msra.mxu1 %v765_v57  ;;  %v941_v36 = vld [vmem:[%s4290_s27 + $0x15a8] sm:$0xff]  ;;  %v975_v2 = vld [vmem:[%s4290_s27 + $0x16b8] sm:$0xff] }
 0x277   : > { %3281 = vmatpush.msra.mxu2 %v795_v18  ;;  %3300 = vmatpush.msra.mxu3 %v829_v63  ;;  %v875_v17 = vld [vmem:[%s4290_s27 + $0x1398] sm:$0xff]  ;;  %v909_v21 = vld [vmem:[%s4290_s27 + $0x14a8] sm:$0xff] }
 0x278   : > { %3242 = vmatpush.msra.mxu0 %v729_v26  ;;  %3261 = vmatpush.msra.mxu1 %v763_v31  ;;  %v939_v45 = vld [vmem:[%s4290_s27 + $0x1598] sm:$0xff]  ;;  %v973_v22 = vld [vmem:[%s4290_s27 + $0x16a8] sm:$0xff] }
 0x279   : > { %3282 = vmatpush.msra.mxu2 %v793_v46  ;;  %3301 = vmatpush.msra.mxu3 %v827_v11  ;;  %v873_v20 = vld [vmem:[%s4290_s27 + $0x1388] sm:$0xff]  ;;  %v907_v23 = vld [vmem:[%s4290_s27 + $0x1498] sm:$0xff] }
 0x27a   : > { %3243 = vmatmul.f32.vlgmr.msra.gmra.mxu0 %v4619_v42  ;;  %3283 = vmatmul.f32.vlgmr.msra.gmra.mxu2 %v4696_v6  ;;  %v883_v42 = vld [vmem:[%s4290_s27 + $0x13d8] sm:$0xff]  ;;  %v917_v6 = vld [vmem:[%s4290_s27 + $0x14e8] sm:$0xff] }
 0x27b   : > { %3307 = vmatpush.msrb.mxu0 %v887_v60  ;;  %3347 = vmatpush.msrb.mxu2 %v951_v62  ;;  %v937_v30 = vld [vmem:[%s4290_s27 + $0x1588] sm:$0xff]  ;;  %v971_v57 = vld [vmem:[%s4290_s27 + $0x1698] sm:$0xff] }
 0x27c   : > { %3262 = vmatpush.msra.mxu1 %v761_v24  ;;  %3302 = vmatpush.msra.mxu3 %v825_v32  ;;  %v871_v18 = vld [vmem:[%s4290_s27 + $0x1378] sm:$0xff]  ;;  %v905_v63 = vld [vmem:[%s4290_s27 + $0x1488] sm:$0xff] }
 0x27d   : > { %3263 = vmatmul.f32.vlgmr.msra.gmra.mxu1 %v4686_v0  ;;  %3303 = vmatmul.f32.vlgmr.msra.gmra.mxu3 %v4688_v1  ;;  %v945_v0 = vld [vmem:[%s4290_s27 + $0x15c8] sm:$0xff]  ;;  %v979_v1 = vld [vmem:[%s4290_s27 + $0x16d8] sm:$0xff] }
 0x27e   : > { %3308 = vmatpush.msrb.mxu0 %v885_v33  ;;  %3327 = vmatpush.msrb.mxu1 %v919_v47  ;;  %v935_v26 = vld [vmem:[%s4290_s27 + $0x1578] sm:$0xff]  ;;  %v969_v31 = vld [vmem:[%s4290_s27 + $0x1688] sm:$0xff] }
 0x27f   : > { %3348 = vmatpush.msrb.mxu2 %v949_v34  ;;  %3367 = vmatpush.msrb.mxu3 %v983_v19  ;;  %v869_v46 = vld [vmem:[%s4290_s27 + $0x1368] sm:$0xff]  ;;  %v903_v11 = vld [vmem:[%s4290_s27 + $0x1478] sm:$0xff] }
 0x280   : > { %3309 = vmatpush.msrb.mxu0 %v883_v42  ;;  %3328 = vmatpush.msrb.mxu1 %v917_v6  ;;  %v933_v60 = vld [vmem:[%s4290_s27 + $0x1568] sm:$0xff]  ;;  %v967_v62 = vld [vmem:[%s4290_s27 + $0x1678] sm:$0xff] }
 0x281   : > { %3349 = vmatpush.msrb.mxu2 %v947_v61  ;;  %3368 = vmatpush.msrb.mxu3 %v981_v38  ;;  %v867_v24 = vld [vmem:[%s4290_s27 + $0x1358] sm:$0xff]  ;;  %v901_v32 = vld [vmem:[%s4290_s27 + $0x1468] sm:$0xff] }
 0x282   : > { %3310 = vmatpush.msrb.mxu0 %v881_v39  ;;  %3329 = vmatpush.msrb.mxu1 %v915_v25  ;;  %v931_v33 = vld [vmem:[%s4290_s27 + $0x1558] sm:$0xff]  ;;  %v965_v47 = vld [vmem:[%s4290_s27 + $0x1668] sm:$0xff] }
 0x283   : > { %3350 = vmatpush.msrb.mxu2 %v945_v0  ;;  %3369 = vmatpush.msrb.mxu3 %v979_v1  ;;  %v865_v34 = vld [vmem:[%s4290_s27 + $0x1348] sm:$0xff]  ;;  %v899_v19 = vld [vmem:[%s4290_s27 + $0x1458] sm:$0xff] }
 0x284   : > { %3311 = vmatpush.msrb.mxu0 %v879_v41  ;;  %3330 = vmatpush.msrb.mxu1 %v913_v50  ;;  %v929_v42 = vld [vmem:[%s4290_s27 + $0x1548] sm:$0xff]  ;;  %v963_v6 = vld [vmem:[%s4290_s27 + $0x1658] sm:$0xff] }
 0x285   : > { %3351 = vmatpush.msrb.mxu2 %v943_v37  ;;  %3370 = vmatpush.msrb.mxu3 %v977_v54  ;;  %v863_v61 = vld [vmem:[%s4290_s27 + $0x1338] sm:$0xff]  ;;  %v897_v38 = vld [vmem:[%s4290_s27 + $0x1448] sm:$0xff] }
 0x286   : > { %3312 = vmatpush.msrb.mxu0 %v877_v44  ;;  %3331 = vmatpush.msrb.mxu1 %v911_v35  ;;  %v927_v39 = vld [vmem:[%s4290_s27 + $0x1538] sm:$0xff]  ;;  %v961_v25 = vld [vmem:[%s4290_s27 + $0x1648] sm:$0xff] }
 0x287   : > { %3352 = vmatpush.msrb.mxu2 %v941_v36  ;;  %3371 = vmatpush.msrb.mxu3 %v975_v2  ;;  %v861_v0 = vld [vmem:[%s4290_s27 + $0x1328] sm:$0xff]  ;;  %v895_v1 = vld [vmem:[%s4290_s27 + $0x1438] sm:$0xff] }
 0x288   : > { %3313 = vmatpush.msrb.mxu0 %v875_v17  ;;  %3332 = vmatpush.msrb.mxu1 %v909_v21  ;;  %v925_v41 = vld [vmem:[%s4290_s27 + $0x1528] sm:$0xff]  ;;  %v959_v50 = vld [vmem:[%s4290_s27 + $0x1638] sm:$0xff] }
 0x289   : > { %3353 = vmatpush.msrb.mxu2 %v939_v45  ;;  %3372 = vmatpush.msrb.mxu3 %v973_v22  ;;  %v859_v37 = vld [vmem:[%s4290_s27 + $0x1318] sm:$0xff]  ;;  %v893_v54 = vld [vmem:[%s4290_s27 + $0x1428] sm:$0xff] }
 0x28a   : > { %3314 = vmatpush.msrb.mxu0 %v873_v20  ;;  %3333 = vmatpush.msrb.mxu1 %v907_v23  ;;  %v923_v44 = vld [vmem:[%s4290_s27 + $0x1518] sm:$0xff]  ;;  %v957_v35 = vld [vmem:[%s4290_s27 + $0x1628] sm:$0xff] }
 0x28b   : > { %3354 = vmatpush.msrb.mxu2 %v937_v30  ;;  %3373 = vmatpush.msrb.mxu3 %v971_v57  ;;  %v857_v36 = vld [vmem:[%s4290_s27 + $0x1308] sm:$0xff]  ;;  %v891_v2 = vld [vmem:[%s4290_s27 + $0x1418] sm:$0xff] }
 0x28c   : > { %3315 = vmatpush.msrb.mxu0 %v871_v18  ;;  %3334 = vmatpush.msrb.mxu1 %v905_v63  ;;  %v921_v17 = vld [vmem:[%s4290_s27 + $0x1508] sm:$0xff]  ;;  %v955_v21 = vld [vmem:[%s4290_s27 + $0x1618] sm:$0xff] }
 0x28d   : > { %3355 = vmatpush.msrb.mxu2 %v935_v26  ;;  %3374 = vmatpush.msrb.mxu3 %v969_v31  ;;  %v1015_v45 = vld [vmem:[%s4290_s27 + $0x17f8] sm:$0xff]  ;;  %v889_v20 = vld [vmem:[%s4290_s27 + $0x1408] sm:$0xff] }
 0x28e   : > { %3316 = vmatpush.msrb.mxu0 %v869_v46  ;;  %3335 = vmatpush.msrb.mxu1 %v903_v11  ;;  %v1079_v22 = vld [vmem:[%s4290_s27 + $0x19f8] sm:$0xff]  ;;  %v953_v23 = vld [vmem:[%s4290_s27 + $0x1608] sm:$0xff] }
 0x28f   : > { %3356 = vmatpush.msrb.mxu2 %v933_v60  ;;  %3375 = vmatpush.msrb.mxu3 %v967_v62  ;;  %v1013_v30 = vld [vmem:[%s4290_s27 + $0x17e8] sm:$0xff]  ;;  %v1047_v57 = vld [vmem:[%s4290_s27 + $0x18f8] sm:$0xff] }
 0x290   : > { %3317 = vmatpush.msrb.mxu0 %v867_v24  ;;  %3336 = vmatpush.msrb.mxu1 %v901_v32  ;;  %v1077_v18 = vld [vmem:[%s4290_s27 + $0x19e8] sm:$0xff]  ;;  %v1111_v63 = vld [vmem:[%s4290_s27 + $0x1af8] sm:$0xff] }
 0x291   : > { %3357 = vmatpush.msrb.mxu2 %v931_v33  ;;  %3376 = vmatpush.msrb.mxu3 %v965_v47  ;;  %v1075_v26 = vld [vmem:[%s4290_s27 + $0x19d8] sm:$0xff]  ;;  %v1109_v31 = vld [vmem:[%s4290_s27 + $0x1ae8] sm:$0xff] }
 0x292   : > { %3318 = vmatpush.msrb.mxu0 %v865_v34  ;;  %3337 = vmatpush.msrb.mxu1 %v899_v19  ;;  %v1009_v46 = vld [vmem:[%s4290_s27 + $0x17c8] sm:$0xff]  ;;  %v1043_v11 = vld [vmem:[%s4290_s27 + $0x18d8] sm:$0xff] }
 0x293   : > { %3358 = vmatpush.msrb.mxu2 %v929_v42  ;;  %3377 = vmatpush.msrb.mxu3 %v963_v6  ;;  %v1007_v60 = vld [vmem:[%s4290_s27 + $0x17b8] sm:$0xff]  ;;  %v1041_v62 = vld [vmem:[%s4290_s27 + $0x18c8] sm:$0xff] }
 0x294   : > { %3319 = vmatpush.msrb.mxu0 %v863_v61  ;;  %3338 = vmatpush.msrb.mxu1 %v897_v38  ;;  %v1071_v24 = vld [vmem:[%s4290_s27 + $0x19b8] sm:$0xff]  ;;  %v1105_v32 = vld [vmem:[%s4290_s27 + $0x1ac8] sm:$0xff] }
 0x295   : > { %3359 = vmatpush.msrb.mxu2 %v927_v39  ;;  %3378 = vmatpush.msrb.mxu3 %v961_v25  ;;  %v1005_v33 = vld [vmem:[%s4290_s27 + $0x17a8] sm:$0xff]  ;;  %v1039_v47 = vld [vmem:[%s4290_s27 + $0x18b8] sm:$0xff] }
 0x296   : > { %3320 = vmatpush.msrb.mxu0 %v861_v0  ;;  %3339 = vmatpush.msrb.mxu1 %v895_v1  ;;  %v1069_v34 = vld [vmem:[%s4290_s27 + $0x19a8] sm:$0xff]  ;;  %v1103_v19 = vld [vmem:[%s4290_s27 + $0x1ab8] sm:$0xff] }
 0x297   : > { %3360 = vmatpush.msrb.mxu2 %v925_v41  ;;  %3379 = vmatpush.msrb.mxu3 %v959_v50  ;;  %v1003_v42 = vld [vmem:[%s4290_s27 + $0x1798] sm:$0xff]  ;;  %v1037_v6 = vld [vmem:[%s4290_s27 + $0x18a8] sm:$0xff] }
 0x298   : > { %3321 = vmatpush.msrb.mxu0 %v859_v37  ;;  %3340 = vmatpush.msrb.mxu1 %v893_v54  ;;  %v1067_v61 = vld [vmem:[%s4290_s27 + $0x1998] sm:$0xff]  ;;  %v1101_v38 = vld [vmem:[%s4290_s27 + $0x1aa8] sm:$0xff] }
 0x299   : > { %3361 = vmatpush.msrb.mxu2 %v923_v44  ;;  %3380 = vmatpush.msrb.mxu3 %v957_v35  ;;  %v1001_v39 = vld [vmem:[%s4290_s27 + $0x1788] sm:$0xff]  ;;  %v1035_v25 = vld [vmem:[%s4290_s27 + $0x1898] sm:$0xff] }
 0x29a   : > { %3322 = vmatpush.msrb.mxu0 %v857_v36  ;;  %3341 = vmatpush.msrb.mxu1 %v891_v2  ;;  %v1065_v0 = vld [vmem:[%s4290_s27 + $0x1988] sm:$0xff]  ;;  %v1099_v1 = vld [vmem:[%s4290_s27 + $0x1a98] sm:$0xff] }
 0x29b   : > { %3362 = vmatpush.msrb.mxu2 %v921_v17  ;;  %3381 = vmatpush.msrb.mxu3 %v955_v21  ;;  %v999_v41 = vld [vmem:[%s4290_s27 + $0x1778] sm:$0xff]  ;;  %v1033_v50 = vld [vmem:[%s4290_s27 + $0x1888] sm:$0xff] }
 0x29c   : > { %3323 = vmatmul.f32.vlgmr.msrb.gmra.mxu0 %v4698_v7  ;;  %3363 = vmatmul.f32.vlgmr.msrb.gmra.mxu2 %v4776_v55  ;;  %v1011_v7 = vld [vmem:[%s4290_s27 + $0x17d8] sm:$0xff]  ;;  %v1045_v55 = vld [vmem:[%s4290_s27 + $0x18e8] sm:$0xff] }
 0x29d   : > { %3387 = vmatpush.msra.mxu0 %v1015_v45  ;;  %3427 = vmatpush.msra.mxu2 %v1079_v22  ;;  %v1063_v37 = vld [vmem:[%s4290_s27 + $0x1978] sm:$0xff]  ;;  %v1097_v54 = vld [vmem:[%s4290_s27 + $0x1a88] sm:$0xff] }
 0x29e   : > { %3342 = vmatpush.msrb.mxu1 %v889_v20  ;;  %3382 = vmatpush.msrb.mxu3 %v953_v23  ;;  %v997_v44 = vld [vmem:[%s4290_s27 + $0x1768] sm:$0xff]  ;;  %v1031_v35 = vld [vmem:[%s4290_s27 + $0x1878] sm:$0xff] }
 0x29f   : > { %3343 = vmatmul.f32.vlgmr.msrb.gmra.mxu1 %v4766_v43  ;;  %3383 = vmatmul.f32.vlgmr.msrb.gmra.mxu3 %v4768_v48  ;;  %v1073_v43 = vld [vmem:[%s4290_s27 + $0x19c8] sm:$0xff]  ;;  %v1107_v48 = vld [vmem:[%s4290_s27 + $0x1ad8] sm:$0xff] }
 0x2a0   : > { %3388 = vmatpush.msra.mxu0 %v1013_v30  ;;  %3407 = vmatpush.msra.mxu1 %v1047_v57  ;;  %v1061_v36 = vld [vmem:[%s4290_s27 + $0x1968] sm:$0xff]  ;;  %v1095_v2 = vld [vmem:[%s4290_s27 + $0x1a78] sm:$0xff] }
 0x2a1   : > { %3428 = vmatpush.msra.mxu2 %v1077_v18  ;;  %3447 = vmatpush.msra.mxu3 %v1111_v63  ;;  %v995_v17 = vld [vmem:[%s4290_s27 + $0x1758] sm:$0xff]  ;;  %v1029_v21 = vld [vmem:[%s4290_s27 + $0x1868] sm:$0xff] }
 0x2a2   : > { %3389 = vmatpush.msra.mxu0 %v1011_v7  ;;  %3408 = vmatpush.msra.mxu1 %v1045_v55  ;;  %v1059_v45 = vld [vmem:[%s4290_s27 + $0x1958] sm:$0xff]  ;;  %v1093_v22 = vld [vmem:[%s4290_s27 + $0x1a68] sm:$0xff] }
 0x2a3   : > { %3429 = vmatpush.msra.mxu2 %v1075_v26  ;;  %3448 = vmatpush.msra.mxu3 %v1109_v31  ;;  %v993_v20 = vld [vmem:[%s4290_s27 + $0x1748] sm:$0xff]  ;;  %v1027_v23 = vld [vmem:[%s4290_s27 + $0x1858] sm:$0xff] }
 0x2a4   : > { %3390 = vmatpush.msra.mxu0 %v1009_v46  ;;  %3409 = vmatpush.msra.mxu1 %v1043_v11  ;;  %v1057_v30 = vld [vmem:[%s4290_s27 + $0x1948] sm:$0xff]  ;;  %v1091_v57 = vld [vmem:[%s4290_s27 + $0x1a58] sm:$0xff] }
 0x2a5   : > { %3430 = vmatpush.msra.mxu2 %v1073_v43  ;;  %3449 = vmatpush.msra.mxu3 %v1107_v48  ;;  %v991_v18 = vld [vmem:[%s4290_s27 + $0x1738] sm:$0xff]  ;;  %v1025_v63 = vld [vmem:[%s4290_s27 + $0x1848] sm:$0xff] }
 0x2a6   : > { %3391 = vmatpush.msra.mxu0 %v1007_v60  ;;  %3410 = vmatpush.msra.mxu1 %v1041_v62  ;;  %v1055_v7 = vld [vmem:[%s4290_s27 + $0x1938] sm:$0xff]  ;;  %v1089_v55 = vld [vmem:[%s4290_s27 + $0x1a48] sm:$0xff] }
 0x2a7   : > { %3431 = vmatpush.msra.mxu2 %v1071_v24  ;;  %3450 = vmatpush.msra.mxu3 %v1105_v32  ;;  %v989_v26 = vld [vmem:[%s4290_s27 + $0x1728] sm:$0xff]  ;;  %v1023_v31 = vld [vmem:[%s4290_s27 + $0x1838] sm:$0xff] }
 0x2a8   : > { %3392 = vmatpush.msra.mxu0 %v1005_v33  ;;  %3411 = vmatpush.msra.mxu1 %v1039_v47  ;;  %v1053_v46 = vld [vmem:[%s4290_s27 + $0x1928] sm:$0xff]  ;;  %v1087_v11 = vld [vmem:[%s4290_s27 + $0x1a38] sm:$0xff] }
 0x2a9   : > { %3432 = vmatpush.msra.mxu2 %v1069_v34  ;;  %3451 = vmatpush.msra.mxu3 %v1103_v19  ;;  %v987_v43 = vld [vmem:[%s4290_s27 + $0x1718] sm:$0xff]  ;;  %v1021_v48 = vld [vmem:[%s4290_s27 + $0x1828] sm:$0xff] }
 0x2aa   : > { %3393 = vmatpush.msra.mxu0 %v1003_v42  ;;  %3412 = vmatpush.msra.mxu1 %v1037_v6  ;;  %v1051_v60 = vld [vmem:[%s4290_s27 + $0x1918] sm:$0xff]  ;;  %v1085_v62 = vld [vmem:[%s4290_s27 + $0x1a28] sm:$0xff] }
 0x2ab   : > { %3433 = vmatpush.msra.mxu2 %v1067_v61  ;;  %3452 = vmatpush.msra.mxu3 %v1101_v38  ;;  %v985_v24 = vld [vmem:[%s4290_s27 + $0x1708] sm:$0xff]  ;;  %v1019_v32 = vld [vmem:[%s4290_s27 + $0x1818] sm:$0xff] }
 0x2ac   : > { %3394 = vmatpush.msra.mxu0 %v1001_v39  ;;  %3413 = vmatpush.msra.mxu1 %v1035_v25  ;;  %v1049_v33 = vld [vmem:[%s4290_s27 + $0x1908] sm:$0xff]  ;;  %v1083_v47 = vld [vmem:[%s4290_s27 + $0x1a18] sm:$0xff] }
 0x2ad   : > { %3434 = vmatpush.msra.mxu2 %v1065_v0  ;;  %3453 = vmatpush.msra.mxu3 %v1099_v1  ;;  %v1143_v34 = vld [vmem:[%s4290_s27 + $0x1bf8] sm:$0xff]  ;;  %v1017_v42 = vld [vmem:[%s4290_s27 + $0x1808] sm:$0xff] }
 0x2ae   : > { %3395 = vmatpush.msra.mxu0 %v999_v41  ;;  %3414 = vmatpush.msra.mxu1 %v1033_v50  ;;  %v1207_v19 = vld [vmem:[%s4290_s27 + $0x1df8] sm:$0xff]  ;;  %v1081_v6 = vld [vmem:[%s4290_s27 + $0x1a08] sm:$0xff] }
 0x2af   : > { %3435 = vmatpush.msra.mxu2 %v1063_v37  ;;  %3454 = vmatpush.msra.mxu3 %v1097_v54  ;;  %v1141_v61 = vld [vmem:[%s4290_s27 + $0x1be8] sm:$0xff]  ;;  %v1175_v38 = vld [vmem:[%s4290_s27 + $0x1cf8] sm:$0xff] }
 0x2b0   : > { %3396 = vmatpush.msra.mxu0 %v997_v44  ;;  %3415 = vmatpush.msra.mxu1 %v1031_v35  ;;  %v1205_v39 = vld [vmem:[%s4290_s27 + $0x1de8] sm:$0xff]  ;;  %v1239_v25 = vld [vmem:[%s4290_s27 + $0x1ef8] sm:$0xff] }
 0x2b1   : > { %3436 = vmatpush.msra.mxu2 %v1061_v36  ;;  %3455 = vmatpush.msra.mxu3 %v1095_v2  ;;  %v1203_v0 = vld [vmem:[%s4290_s27 + $0x1dd8] sm:$0xff]  ;;  %v1237_v1 = vld [vmem:[%s4290_s27 + $0x1ee8] sm:$0xff] }
 0x2b2   : > { %3397 = vmatpush.msra.mxu0 %v995_v17  ;;  %3416 = vmatpush.msra.mxu1 %v1029_v21  ;;  %v1137_v41 = vld [vmem:[%s4290_s27 + $0x1bc8] sm:$0xff]  ;;  %v1171_v50 = vld [vmem:[%s4290_s27 + $0x1cd8] sm:$0xff] }
 0x2b3   : > { %3437 = vmatpush.msra.mxu2 %v1059_v45  ;;  %3456 = vmatpush.msra.mxu3 %v1093_v22  ;;  %v1135_v37 = vld [vmem:[%s4290_s27 + $0x1bb8] sm:$0xff]  ;;  %v1169_v54 = vld [vmem:[%s4290_s27 + $0x1cc8] sm:$0xff] }
 0x2b4   : > { %3398 = vmatpush.msra.mxu0 %v993_v20  ;;  %3417 = vmatpush.msra.mxu1 %v1027_v23  ;;  %v1199_v44 = vld [vmem:[%s4290_s27 + $0x1db8] sm:$0xff]  ;;  %v1233_v35 = vld [vmem:[%s4290_s27 + $0x1ec8] sm:$0xff] }
 0x2b5   : > { %3438 = vmatpush.msra.mxu2 %v1057_v30  ;;  %3457 = vmatpush.msra.mxu3 %v1091_v57  ;;  %v1133_v36 = vld [vmem:[%s4290_s27 + $0x1ba8] sm:$0xff]  ;;  %v1167_v2 = vld [vmem:[%s4290_s27 + $0x1cb8] sm:$0xff] }
 0x2b6   : > { %3399 = vmatpush.msra.mxu0 %v991_v18  ;;  %3418 = vmatpush.msra.mxu1 %v1025_v63  ;;  %v1197_v17 = vld [vmem:[%s4290_s27 + $0x1da8] sm:$0xff]  ;;  %v1231_v21 = vld [vmem:[%s4290_s27 + $0x1eb8] sm:$0xff] }
 0x2b7   : > { %3439 = vmatpush.msra.mxu2 %v1055_v7  ;;  %3458 = vmatpush.msra.mxu3 %v1089_v55  ;;  %v1131_v45 = vld [vmem:[%s4290_s27 + $0x1b98] sm:$0xff]  ;;  %v1165_v22 = vld [vmem:[%s4290_s27 + $0x1ca8] sm:$0xff] }
 0x2b8   : > { %3400 = vmatpush.msra.mxu0 %v989_v26  ;;  %3419 = vmatpush.msra.mxu1 %v1023_v31  ;;  %v1195_v20 = vld [vmem:[%s4290_s27 + $0x1d98] sm:$0xff]  ;;  %v1229_v23 = vld [vmem:[%s4290_s27 + $0x1ea8] sm:$0xff] }
 0x2b9   : > { %3440 = vmatpush.msra.mxu2 %v1053_v46  ;;  %3459 = vmatpush.msra.mxu3 %v1087_v11  ;;  %v1129_v30 = vld [vmem:[%s4290_s27 + $0x1b88] sm:$0xff]  ;;  %v1163_v57 = vld [vmem:[%s4290_s27 + $0x1c98] sm:$0xff] }
 0x2ba   : > { %3401 = vmatpush.msra.mxu0 %v987_v43  ;;  %3420 = vmatpush.msra.mxu1 %v1021_v48  ;;  %v1193_v18 = vld [vmem:[%s4290_s27 + $0x1d88] sm:$0xff]  ;;  %v1227_v63 = vld [vmem:[%s4290_s27 + $0x1e98] sm:$0xff] }
 0x2bb   : > { %3441 = vmatpush.msra.mxu2 %v1051_v60  ;;  %3460 = vmatpush.msra.mxu3 %v1085_v62  ;;  %v1127_v7 = vld [vmem:[%s4290_s27 + $0x1b78] sm:$0xff]  ;;  %v1161_v55 = vld [vmem:[%s4290_s27 + $0x1c88] sm:$0xff] }
 0x2bc   : > { %3402 = vmatpush.msra.mxu0 %v985_v24  ;;  %3421 = vmatpush.msra.mxu1 %v1019_v32  ;;  %v1191_v26 = vld [vmem:[%s4290_s27 + $0x1d78] sm:$0xff]  ;;  %v1225_v31 = vld [vmem:[%s4290_s27 + $0x1e88] sm:$0xff] }
 0x2bd   : > { %3442 = vmatpush.msra.mxu2 %v1049_v33  ;;  %3461 = vmatpush.msra.mxu3 %v1083_v47  ;;  %v1125_v46 = vld [vmem:[%s4290_s27 + $0x1b68] sm:$0xff]  ;;  %v1159_v11 = vld [vmem:[%s4290_s27 + $0x1c78] sm:$0xff] }
 0x2be   : > { %3403 = vmatmul.f32.vlgmr.msra.gmra.mxu0 %v4778_v56  ;;  %3443 = vmatmul.f32.vlgmr.msra.gmra.mxu2 %v4860_v58  ;;  %v1139_v56 = vld [vmem:[%s4290_s27 + $0x1bd8] sm:$0xff]  ;;  %v1173_v58 = vld [vmem:[%s4290_s27 + $0x1ce8] sm:$0xff] }
 0x2bf   : > { %3467 = vmatpush.msrb.mxu0 %v1143_v34  ;;  %3507 = vmatpush.msrb.mxu2 %v1207_v19  ;;  %v1189_v43 = vld [vmem:[%s4290_s27 + $0x1d68] sm:$0xff]  ;;  %v1223_v48 = vld [vmem:[%s4290_s27 + $0x1e78] sm:$0xff] }
 0x2c0   : > { %3422 = vmatpush.msra.mxu1 %v1017_v42  ;;  %3462 = vmatpush.msra.mxu3 %v1081_v6  ;;  %v1123_v60 = vld [vmem:[%s4290_s27 + $0x1b58] sm:$0xff]  ;;  %v1157_v62 = vld [vmem:[%s4290_s27 + $0x1c68] sm:$0xff] }
 0x2c1   : > { %3423 = vmatmul.f32.vlgmr.msra.gmra.mxu1 %v4848_v40  ;;  %3463 = vmatmul.f32.vlgmr.msra.gmra.mxu3 %v4850_v49  ;;  %v1201_v40 = vld [vmem:[%s4290_s27 + $0x1dc8] sm:$0xff]  ;;  %v1235_v49 = vld [vmem:[%s4290_s27 + $0x1ed8] sm:$0xff] }
 0x2c2   : > { %3468 = vmatpush.msrb.mxu0 %v1141_v61  ;;  %3487 = vmatpush.msrb.mxu1 %v1175_v38  ;;  %v1187_v24 = vld [vmem:[%s4290_s27 + $0x1d58] sm:$0xff]  ;;  %v1221_v32 = vld [vmem:[%s4290_s27 + $0x1e68] sm:$0xff] }
 0x2c3   : > { %3508 = vmatpush.msrb.mxu2 %v1205_v39  ;;  %3527 = vmatpush.msrb.mxu3 %v1239_v25  ;;  %v1121_v33 = vld [vmem:[%s4290_s27 + $0x1b48] sm:$0xff]  ;;  %v1155_v47 = vld [vmem:[%s4290_s27 + $0x1c58] sm:$0xff] }
 0x2c4   : > { %3469 = vmatpush.msrb.mxu0 %v1139_v56  ;;  %3488 = vmatpush.msrb.mxu1 %v1173_v58  ;;  %v1185_v34 = vld [vmem:[%s4290_s27 + $0x1d48] sm:$0xff]  ;;  %v1219_v19 = vld [vmem:[%s4290_s27 + $0x1e58] sm:$0xff] }
 0x2c5   : > { %3509 = vmatpush.msrb.mxu2 %v1203_v0  ;;  %3528 = vmatpush.msrb.mxu3 %v1237_v1  ;;  %v1119_v42 = vld [vmem:[%s4290_s27 + $0x1b38] sm:$0xff]  ;;  %v1153_v6 = vld [vmem:[%s4290_s27 + $0x1c48] sm:$0xff] }
 0x2c6   : > { %3470 = vmatpush.msrb.mxu0 %v1137_v41  ;;  %3489 = vmatpush.msrb.mxu1 %v1171_v50  ;;  %v1183_v61 = vld [vmem:[%s4290_s27 + $0x1d38] sm:$0xff]  ;;  %v1217_v38 = vld [vmem:[%s4290_s27 + $0x1e48] sm:$0xff] }
 0x2c7   : > { %3510 = vmatpush.msrb.mxu2 %v1201_v40  ;;  %3529 = vmatpush.msrb.mxu3 %v1235_v49  ;;  %v1117_v39 = vld [vmem:[%s4290_s27 + $0x1b28] sm:$0xff]  ;;  %v1151_v25 = vld [vmem:[%s4290_s27 + $0x1c38] sm:$0xff] }
 0x2c8   : > { %3471 = vmatpush.msrb.mxu0 %v1135_v37  ;;  %3490 = vmatpush.msrb.mxu1 %v1169_v54  ;;  %v1181_v56 = vld [vmem:[%s4290_s27 + $0x1d28] sm:$0xff]  ;;  %v1215_v58 = vld [vmem:[%s4290_s27 + $0x1e38] sm:$0xff] }
 0x2c9   : > { %3511 = vmatpush.msrb.mxu2 %v1199_v44  ;;  %3530 = vmatpush.msrb.mxu3 %v1233_v35  ;;  %v1115_v0 = vld [vmem:[%s4290_s27 + $0x1b18] sm:$0xff]  ;;  %v1149_v1 = vld [vmem:[%s4290_s27 + $0x1c28] sm:$0xff] }
 0x2ca   : > { %3472 = vmatpush.msrb.mxu0 %v1133_v36  ;;  %3491 = vmatpush.msrb.mxu1 %v1167_v2  ;;  %v1179_v41 = vld [vmem:[%s4290_s27 + $0x1d18] sm:$0xff]  ;;  %v1213_v50 = vld [vmem:[%s4290_s27 + $0x1e28] sm:$0xff] }
 0x2cb   : > { %3512 = vmatpush.msrb.mxu2 %v1197_v17  ;;  %3531 = vmatpush.msrb.mxu3 %v1231_v21  ;;  %v1113_v40 = vld [vmem:[%s4290_s27 + $0x1b08] sm:$0xff]  ;;  %v1147_v49 = vld [vmem:[%s4290_s27 + $0x1c18] sm:$0xff] }
 0x2cc   : > { %3473 = vmatpush.msrb.mxu0 %v1131_v45  ;;  %3492 = vmatpush.msrb.mxu1 %v1165_v22  ;;  %v1177_v37 = vld [vmem:[%s4290_s27 + $0x1d08] sm:$0xff]  ;;  %v1211_v54 = vld [vmem:[%s4290_s27 + $0x1e18] sm:$0xff] }
 0x2cd   : > { %3513 = vmatpush.msrb.mxu2 %v1195_v20  ;;  %3532 = vmatpush.msrb.mxu3 %v1229_v23  ;;  %v1271_v44 = vld [vmem:[%s4290_s27 + $0x1ff8] sm:$0xff]  ;;  %v1145_v36 = vld [vmem:[%s4290_s27 + $0x1c08] sm:$0xff] }
 0x2ce   : > { %3474 = vmatpush.msrb.mxu0 %v1129_v30  ;;  %3493 = vmatpush.msrb.mxu1 %v1163_v57  ;;  %v1335_v35 = vld [vmem:[%s4290_s27 + $0x21f8] sm:$0xff]  ;;  %v1209_v2 = vld [vmem:[%s4290_s27 + $0x1e08] sm:$0xff] }
 0x2cf   : > { %3514 = vmatpush.msrb.mxu2 %v1193_v18  ;;  %3533 = vmatpush.msrb.mxu3 %v1227_v63  ;;  %v1269_v17 = vld [vmem:[%s4290_s27 + $0x1fe8] sm:$0xff]  ;;  %v1303_v21 = vld [vmem:[%s4290_s27 + $0x20f8] sm:$0xff] }
 0x2d0   : > { %3475 = vmatpush.msrb.mxu0 %v1127_v7  ;;  %3494 = vmatpush.msrb.mxu1 %v1161_v55  ;;  %v1333_v45 = vld [vmem:[%s4290_s27 + $0x21e8] sm:$0xff]  ;;  %v1367_v22 = vld [vmem:[%s4290_s27 + $0x22f8] sm:$0xff] }
 0x2d1   : > { %3515 = vmatpush.msrb.mxu2 %v1191_v26  ;;  %3534 = vmatpush.msrb.mxu3 %v1225_v31  ;;  %v1331_v20 = vld [vmem:[%s4290_s27 + $0x21d8] sm:$0xff]  ;;  %v1365_v23 = vld [vmem:[%s4290_s27 + $0x22e8] sm:$0xff] }
 0x2d2   : > { %3476 = vmatpush.msrb.mxu0 %v1125_v46  ;;  %3495 = vmatpush.msrb.mxu1 %v1159_v11  ;;  %v1265_v30 = vld [vmem:[%s4290_s27 + $0x1fc8] sm:$0xff]  ;;  %v1299_v57 = vld [vmem:[%s4290_s27 + $0x20d8] sm:$0xff] }
 0x2d3   : > { %3516 = vmatpush.msrb.mxu2 %v1189_v43  ;;  %3535 = vmatpush.msrb.mxu3 %v1223_v48  ;;  %v1263_v18 = vld [vmem:[%s4290_s27 + $0x1fb8] sm:$0xff]  ;;  %v1297_v63 = vld [vmem:[%s4290_s27 + $0x20c8] sm:$0xff] }
 0x2d4   : > { %3477 = vmatpush.msrb.mxu0 %v1123_v60  ;;  %3496 = vmatpush.msrb.mxu1 %v1157_v62  ;;  %v1327_v7 = vld [vmem:[%s4290_s27 + $0x21b8] sm:$0xff]  ;;  %v1361_v55 = vld [vmem:[%s4290_s27 + $0x22c8] sm:$0xff] }
 0x2d5   : > { %3517 = vmatpush.msrb.mxu2 %v1187_v24  ;;  %3536 = vmatpush.msrb.mxu3 %v1221_v32  ;;  %v1261_v26 = vld [vmem:[%s4290_s27 + $0x1fa8] sm:$0xff]  ;;  %v1295_v31 = vld [vmem:[%s4290_s27 + $0x20b8] sm:$0xff] }
 0x2d6   : > { %3478 = vmatpush.msrb.mxu0 %v1121_v33  ;;  %3497 = vmatpush.msrb.mxu1 %v1155_v47  ;;  %v1325_v46 = vld [vmem:[%s4290_s27 + $0x21a8] sm:$0xff]  ;;  %v1359_v11 = vld [vmem:[%s4290_s27 + $0x22b8] sm:$0xff] }
 0x2d7   : > { %3518 = vmatpush.msrb.mxu2 %v1185_v34  ;;  %3537 = vmatpush.msrb.mxu3 %v1219_v19  ;;  %v1259_v43 = vld [vmem:[%s4290_s27 + $0x1f98] sm:$0xff]  ;;  %v1293_v48 = vld [vmem:[%s4290_s27 + $0x20a8] sm:$0xff] }
 0x2d8   : > { %3479 = vmatpush.msrb.mxu0 %v1119_v42  ;;  %3498 = vmatpush.msrb.mxu1 %v1153_v6  ;;  %v1323_v60 = vld [vmem:[%s4290_s27 + $0x2198] sm:$0xff]  ;;  %v1357_v62 = vld [vmem:[%s4290_s27 + $0x22a8] sm:$0xff] }
 0x2d9   : > { %3519 = vmatpush.msrb.mxu2 %v1183_v61  ;;  %3538 = vmatpush.msrb.mxu3 %v1217_v38  ;;  %v1257_v24 = vld [vmem:[%s4290_s27 + $0x1f88] sm:$0xff]  ;;  %v1291_v32 = vld [vmem:[%s4290_s27 + $0x2098] sm:$0xff] }
 0x2da   : > { %3480 = vmatpush.msrb.mxu0 %v1117_v39  ;;  %3499 = vmatpush.msrb.mxu1 %v1151_v25  ;;  %v1321_v33 = vld [vmem:[%s4290_s27 + $0x2188] sm:$0xff]  ;;  %v1355_v47 = vld [vmem:[%s4290_s27 + $0x2298] sm:$0xff] }
 0x2db   : > { %3520 = vmatpush.msrb.mxu2 %v1181_v56  ;;  %3539 = vmatpush.msrb.mxu3 %v1215_v58  ;;  %v1255_v34 = vld [vmem:[%s4290_s27 + $0x1f78] sm:$0xff]  ;;  %v1289_v19 = vld [vmem:[%s4290_s27 + $0x2088] sm:$0xff] }
 0x2dc   : > { %3481 = vmatpush.msrb.mxu0 %v1115_v0  ;;  %3500 = vmatpush.msrb.mxu1 %v1149_v1  ;;  %v1319_v42 = vld [vmem:[%s4290_s27 + $0x2178] sm:$0xff]  ;;  %v1353_v6 = vld [vmem:[%s4290_s27 + $0x2288] sm:$0xff] }
 0x2dd   : > { %3521 = vmatpush.msrb.mxu2 %v1179_v41  ;;  %3540 = vmatpush.msrb.mxu3 %v1213_v50  ;;  %v1253_v61 = vld [vmem:[%s4290_s27 + $0x1f68] sm:$0xff]  ;;  %v1287_v38 = vld [vmem:[%s4290_s27 + $0x2078] sm:$0xff] }
 0x2de   : > { %3482 = vmatpush.msrb.mxu0 %v1113_v40  ;;  %3501 = vmatpush.msrb.mxu1 %v1147_v49  ;;  %v1317_v39 = vld [vmem:[%s4290_s27 + $0x2168] sm:$0xff]  ;;  %v1351_v25 = vld [vmem:[%s4290_s27 + $0x2278] sm:$0xff] }
 0x2df   : > { %3522 = vmatpush.msrb.mxu2 %v1177_v37  ;;  %3541 = vmatpush.msrb.mxu3 %v1211_v54  ;;  %v1251_v56 = vld [vmem:[%s4290_s27 + $0x1f58] sm:$0xff]  ;;  %v1285_v58 = vld [vmem:[%s4290_s27 + $0x2068] sm:$0xff] }
 0x2e0   : > { %3483 = vmatmul.f32.vlgmr.msrb.gmra.mxu0 %v4862_v59  ;;  %3523 = vmatmul.f32.vlgmr.msrb.gmra.mxu2 %v4942_v8  ;;  %v1267_v59 = vld [vmem:[%s4290_s27 + $0x1fd8] sm:$0xff]  ;;  %v1301_v8 = vld [vmem:[%s4290_s27 + $0x20e8] sm:$0xff] }
 0x2e1   : > { %3547 = vmatpush.msra.mxu0 %v1271_v44  ;;  %3587 = vmatpush.msra.mxu2 %v1335_v35  ;;  %v1315_v0 = vld [vmem:[%s4290_s27 + $0x2158] sm:$0xff]  ;;  %v1349_v1 = vld [vmem:[%s4290_s27 + $0x2268] sm:$0xff] }
 0x2e2   : > { %3502 = vmatpush.msrb.mxu1 %v1145_v36  ;;  %3542 = vmatpush.msrb.mxu3 %v1209_v2  ;;  %v1249_v41 = vld [vmem:[%s4290_s27 + $0x1f48] sm:$0xff]  ;;  %v1283_v50 = vld [vmem:[%s4290_s27 + $0x2058] sm:$0xff] }
 0x2e3   : > { %3503 = vmatmul.f32.vlgmr.msrb.gmra.mxu1 %v4930_v51  ;;  %3543 = vmatmul.f32.vlgmr.msrb.gmra.mxu3 %v4932_v52  ;;  %v1329_v51 = vld [vmem:[%s4290_s27 + $0x21c8] sm:$0xff]  ;;  %v1363_v52 = vld [vmem:[%s4290_s27 + $0x22d8] sm:$0xff] }
 0x2e4   : > { %3548 = vmatpush.msra.mxu0 %v1269_v17  ;;  %3567 = vmatpush.msra.mxu1 %v1303_v21  ;;  %v1313_v40 = vld [vmem:[%s4290_s27 + $0x2148] sm:$0xff]  ;;  %v1347_v49 = vld [vmem:[%s4290_s27 + $0x2258] sm:$0xff] }
 0x2e5   : > { %3588 = vmatpush.msra.mxu2 %v1333_v45  ;;  %3607 = vmatpush.msra.mxu3 %v1367_v22  ;;  %v1247_v37 = vld [vmem:[%s4290_s27 + $0x1f38] sm:$0xff]  ;;  %v1281_v54 = vld [vmem:[%s4290_s27 + $0x2048] sm:$0xff] }
 0x2e6   : > { %3549 = vmatpush.msra.mxu0 %v1267_v59  ;;  %3568 = vmatpush.msra.mxu1 %v1301_v8  ;;  %v1311_v44 = vld [vmem:[%s4290_s27 + $0x2138] sm:$0xff]  ;;  %v1345_v35 = vld [vmem:[%s4290_s27 + $0x2248] sm:$0xff] }
 0x2e7   : > { %3589 = vmatpush.msra.mxu2 %v1331_v20  ;;  %3608 = vmatpush.msra.mxu3 %v1365_v23  ;;  %v1245_v36 = vld [vmem:[%s4290_s27 + $0x1f28] sm:$0xff]  ;;  %v1279_v2 = vld [vmem:[%s4290_s27 + $0x2038] sm:$0xff] }
 0x2e8   : > { %3550 = vmatpush.msra.mxu0 %v1265_v30  ;;  %3569 = vmatpush.msra.mxu1 %v1299_v57  ;;  %v1309_v17 = vld [vmem:[%s4290_s27 + $0x2128] sm:$0xff]  ;;  %v1343_v21 = vld [vmem:[%s4290_s27 + $0x2238] sm:$0xff] }
 0x2e9   : > { %3590 = vmatpush.msra.mxu2 %v1329_v51  ;;  %3609 = vmatpush.msra.mxu3 %v1363_v52  ;;  %v1243_v45 = vld [vmem:[%s4290_s27 + $0x1f18] sm:$0xff]  ;;  %v1277_v22 = vld [vmem:[%s4290_s27 + $0x2028] sm:$0xff] }
 0x2ea   : > { %3551 = vmatpush.msra.mxu0 %v1263_v18  ;;  %3570 = vmatpush.msra.mxu1 %v1297_v63  ;;  %v1307_v59 = vld [vmem:[%s4290_s27 + $0x2118] sm:$0xff]  ;;  %v1341_v8 = vld [vmem:[%s4290_s27 + $0x2228] sm:$0xff] }
 0x2eb   : > { %3591 = vmatpush.msra.mxu2 %v1327_v7  ;;  %3610 = vmatpush.msra.mxu3 %v1361_v55  ;;  %v1241_v20 = vld [vmem:[%s4290_s27 + $0x1f08] sm:$0xff]  ;;  %v1275_v23 = vld [vmem:[%s4290_s27 + $0x2018] sm:$0xff] }
 0x2ec   : > { %3552 = vmatpush.msra.mxu0 %v1261_v26  ;;  %3571 = vmatpush.msra.mxu1 %v1295_v31  ;;  %v1305_v30 = vld [vmem:[%s4290_s27 + $0x2108] sm:$0xff]  ;;  %v1339_v57 = vld [vmem:[%s4290_s27 + $0x2218] sm:$0xff] }
 0x2ed   : > { %3592 = vmatpush.msra.mxu2 %v1325_v46  ;;  %3611 = vmatpush.msra.mxu3 %v1359_v11  ;;  %v1399_v51 = vld [vmem:[%s4290_s27 + $0x23f8] sm:$0xff]  ;;  %v1273_v18 = vld [vmem:[%s4290_s27 + $0x2008] sm:$0xff] }
 0x2ee   : > { %3553 = vmatpush.msra.mxu0 %v1259_v43  ;;  %3572 = vmatpush.msra.mxu1 %v1293_v48  ;;  %v1463_v52 = vld [vmem:[%s4290_s27 + $0x25f8] sm:$0xff]  ;;  %v1337_v63 = vld [vmem:[%s4290_s27 + $0x2208] sm:$0xff] }
 0x2ef   : > { %3593 = vmatpush.msra.mxu2 %v1323_v60  ;;  %3612 = vmatpush.msra.mxu3 %v1357_v62  ;;  %v1397_v7 = vld [vmem:[%s4290_s27 + $0x23e8] sm:$0xff]  ;;  %v1431_v55 = vld [vmem:[%s4290_s27 + $0x24f8] sm:$0xff] }
 0x2f0   : > { %3554 = vmatpush.msra.mxu0 %v1257_v24  ;;  %3573 = vmatpush.msra.mxu1 %v1291_v32  ;;  %v1461_v26 = vld [vmem:[%s4290_s27 + $0x25e8] sm:$0xff]  ;;  %v1495_v31 = vld [vmem:[%s4290_s27 + $0x26f8] sm:$0xff] }
 0x2f1   : > { %3594 = vmatpush.msra.mxu2 %v1321_v33  ;;  %3613 = vmatpush.msra.mxu3 %v1355_v47  ;;  %v1459_v46 = vld [vmem:[%s4290_s27 + $0x25d8] sm:$0xff]  ;;  %v1493_v11 = vld [vmem:[%s4290_s27 + $0x26e8] sm:$0xff] }
 0x2f2   : > { %3555 = vmatpush.msra.mxu0 %v1255_v34  ;;  %3574 = vmatpush.msra.mxu1 %v1289_v19  ;;  %v1393_v43 = vld [vmem:[%s4290_s27 + $0x23c8] sm:$0xff]  ;;  %v1427_v48 = vld [vmem:[%s4290_s27 + $0x24d8] sm:$0xff] }
 0x2f3   : > { %3595 = vmatpush.msra.mxu2 %v1319_v42  ;;  %3614 = vmatpush.msra.mxu3 %v1353_v6  ;;  %v1391_v60 = vld [vmem:[%s4290_s27 + $0x23b8] sm:$0xff]  ;;  %v1425_v62 = vld [vmem:[%s4290_s27 + $0x24c8] sm:$0xff] }
 0x2f4   : > { %3556 = vmatpush.msra.mxu0 %v1253_v61  ;;  %3575 = vmatpush.msra.mxu1 %v1287_v38  ;;  %v1455_v24 = vld [vmem:[%s4290_s27 + $0x25b8] sm:$0xff]  ;;  %v1489_v32 = vld [vmem:[%s4290_s27 + $0x26c8] sm:$0xff] }
 0x2f5   : > { %3596 = vmatpush.msra.mxu2 %v1317_v39  ;;  %3615 = vmatpush.msra.mxu3 %v1351_v25  ;;  %v1389_v33 = vld [vmem:[%s4290_s27 + $0x23a8] sm:$0xff]  ;;  %v1423_v47 = vld [vmem:[%s4290_s27 + $0x24b8] sm:$0xff] }
 0x2f6   : > { %3557 = vmatpush.msra.mxu0 %v1251_v56  ;;  %3576 = vmatpush.msra.mxu1 %v1285_v58  ;;  %v1453_v34 = vld [vmem:[%s4290_s27 + $0x25a8] sm:$0xff]  ;;  %v1487_v19 = vld [vmem:[%s4290_s27 + $0x26b8] sm:$0xff] }
 0x2f7   : > { %3597 = vmatpush.msra.mxu2 %v1315_v0  ;;  %3616 = vmatpush.msra.mxu3 %v1349_v1  ;;  %v1387_v42 = vld [vmem:[%s4290_s27 + $0x2398] sm:$0xff]  ;;  %v1421_v6 = vld [vmem:[%s4290_s27 + $0x24a8] sm:$0xff] }
 0x2f8   : > { %3558 = vmatpush.msra.mxu0 %v1249_v41  ;;  %3577 = vmatpush.msra.mxu1 %v1283_v50  ;;  %v1451_v61 = vld [vmem:[%s4290_s27 + $0x2598] sm:$0xff]  ;;  %v1485_v38 = vld [vmem:[%s4290_s27 + $0x26a8] sm:$0xff] }
 0x2f9   : > { %3598 = vmatpush.msra.mxu2 %v1313_v40  ;;  %3617 = vmatpush.msra.mxu3 %v1347_v49  ;;  %v1385_v39 = vld [vmem:[%s4290_s27 + $0x2388] sm:$0xff]  ;;  %v1419_v25 = vld [vmem:[%s4290_s27 + $0x2498] sm:$0xff] }
 0x2fa   : > { %3559 = vmatpush.msra.mxu0 %v1247_v37  ;;  %3578 = vmatpush.msra.mxu1 %v1281_v54  ;;  %v1449_v56 = vld [vmem:[%s4290_s27 + $0x2588] sm:$0xff]  ;;  %v1483_v58 = vld [vmem:[%s4290_s27 + $0x2698] sm:$0xff] }
 0x2fb   : > { %3599 = vmatpush.msra.mxu2 %v1311_v44  ;;  %3618 = vmatpush.msra.mxu3 %v1345_v35  ;;  %v1383_v0 = vld [vmem:[%s4290_s27 + $0x2378] sm:$0xff]  ;;  %v1417_v1 = vld [vmem:[%s4290_s27 + $0x2488] sm:$0xff] }
 0x2fc   : > { %3560 = vmatpush.msra.mxu0 %v1245_v36  ;;  %3579 = vmatpush.msra.mxu1 %v1279_v2  ;;  %v1447_v41 = vld [vmem:[%s4290_s27 + $0x2578] sm:$0xff]  ;;  %v1481_v50 = vld [vmem:[%s4290_s27 + $0x2688] sm:$0xff] }
 0x2fd   : > { %3600 = vmatpush.msra.mxu2 %v1309_v17  ;;  %3619 = vmatpush.msra.mxu3 %v1343_v21  ;;  %v1381_v40 = vld [vmem:[%s4290_s27 + $0x2368] sm:$0xff]  ;;  %v1415_v49 = vld [vmem:[%s4290_s27 + $0x2478] sm:$0xff] }
 0x2fe   : > { %3561 = vmatpush.msra.mxu0 %v1243_v45  ;;  %3580 = vmatpush.msra.mxu1 %v1277_v22  ;;  %v1445_v37 = vld [vmem:[%s4290_s27 + $0x2568] sm:$0xff]  ;;  %v1479_v54 = vld [vmem:[%s4290_s27 + $0x2678] sm:$0xff] }
 0x2ff   : > { %3601 = vmatpush.msra.mxu2 %v1307_v59  ;;  %3620 = vmatpush.msra.mxu3 %v1341_v8  ;;  %v1379_v44 = vld [vmem:[%s4290_s27 + $0x2358] sm:$0xff]  ;;  %v1413_v35 = vld [vmem:[%s4290_s27 + $0x2468] sm:$0xff] }
 0x300   : > { %3562 = vmatpush.msra.mxu0 %v1241_v20  ;;  %3581 = vmatpush.msra.mxu1 %v1275_v23  ;;  %v1443_v36 = vld [vmem:[%s4290_s27 + $0x2558] sm:$0xff]  ;;  %v1477_v2 = vld [vmem:[%s4290_s27 + $0x2668] sm:$0xff] }
 0x301   : > { %3602 = vmatpush.msra.mxu2 %v1305_v30  ;;  %3621 = vmatpush.msra.mxu3 %v1339_v57  ;;  %v1377_v17 = vld [vmem:[%s4290_s27 + $0x2348] sm:$0xff]  ;;  %v1411_v21 = vld [vmem:[%s4290_s27 + $0x2458] sm:$0xff] }
 0x302   : > { %3563 = vmatmul.f32.vlgmr.msra.gmra.mxu0 %v4944_v9  ;;  %3603 = vmatmul.f32.vlgmr.msra.gmra.mxu2 %v5024_v27  ;;  %v1395_v9 = vld [vmem:[%s4290_s27 + $0x23d8] sm:$0xff]  ;;  %v1429_v27 = vld [vmem:[%s4290_s27 + $0x24e8] sm:$0xff] }
 0x303   : > { %3627 = vmatpush.msrb.mxu0 %v1399_v51  ;;  %3667 = vmatpush.msrb.mxu2 %v1463_v52  ;;  %v1441_v45 = vld [vmem:[%s4290_s27 + $0x2548] sm:$0xff]  ;;  %v1475_v22 = vld [vmem:[%s4290_s27 + $0x2658] sm:$0xff] }
 0x304   : > { %3582 = vmatpush.msra.mxu1 %v1273_v18  ;;  %3622 = vmatpush.msra.mxu3 %v1337_v63  ;;  %v1375_v59 = vld [vmem:[%s4290_s27 + $0x2338] sm:$0xff]  ;;  %v1409_v8 = vld [vmem:[%s4290_s27 + $0x2448] sm:$0xff] }
 0x305   : > { %3583 = vmatmul.f32.vlgmr.msra.gmra.mxu1 %v5012_v14  ;;  %3623 = vmatmul.f32.vlgmr.msra.gmra.mxu3 %v5014_v15  ;;  %v1457_v14 = vld [vmem:[%s4290_s27 + $0x25c8] sm:$0xff]  ;;  %v1491_v15 = vld [vmem:[%s4290_s27 + $0x26d8] sm:$0xff] }
 0x306   : > { %3628 = vmatpush.msrb.mxu0 %v1397_v7  ;;  %3647 = vmatpush.msrb.mxu1 %v1431_v55  ;;  %v1439_v20 = vld [vmem:[%s4290_s27 + $0x2538] sm:$0xff]  ;;  %v1473_v23 = vld [vmem:[%s4290_s27 + $0x2648] sm:$0xff] }
 0x307   : > { %3668 = vmatpush.msrb.mxu2 %v1461_v26  ;;  %3687 = vmatpush.msrb.mxu3 %v1495_v31  ;;  %v1373_v30 = vld [vmem:[%s4290_s27 + $0x2328] sm:$0xff]  ;;  %v1407_v57 = vld [vmem:[%s4290_s27 + $0x2438] sm:$0xff] }
 0x308   : > { %3629 = vmatpush.msrb.mxu0 %v1395_v9  ;;  %3648 = vmatpush.msrb.mxu1 %v1429_v27  ;;  %v1437_v51 = vld [vmem:[%s4290_s27 + $0x2528] sm:$0xff]  ;;  %v1471_v52 = vld [vmem:[%s4290_s27 + $0x2638] sm:$0xff] }
 0x309   : > { %3669 = vmatpush.msrb.mxu2 %v1459_v46  ;;  %3688 = vmatpush.msrb.mxu3 %v1493_v11  ;;  %v1371_v18 = vld [vmem:[%s4290_s27 + $0x2318] sm:$0xff]  ;;  %v1405_v63 = vld [vmem:[%s4290_s27 + $0x2428] sm:$0xff] }
 0x30a   : > { %3630 = vmatpush.msrb.mxu0 %v1393_v43  ;;  %3649 = vmatpush.msrb.mxu1 %v1427_v48  ;;  %v1435_v7 = vld [vmem:[%s4290_s27 + $0x2518] sm:$0xff]  ;;  %v1469_v55 = vld [vmem:[%s4290_s27 + $0x2628] sm:$0xff] }
 0x30b   : > { %3670 = vmatpush.msrb.mxu2 %v1457_v14  ;;  %3689 = vmatpush.msrb.mxu3 %v1491_v15  ;;  %v1369_v26 = vld [vmem:[%s4290_s27 + $0x2308] sm:$0xff]  ;;  %v1403_v31 = vld [vmem:[%s4290_s27 + $0x2418] sm:$0xff] }
 0x30c   : > { %3631 = vmatpush.msrb.mxu0 %v1391_v60  ;;  %3650 = vmatpush.msrb.mxu1 %v1425_v62  ;;  %v1433_v9 = vld [vmem:[%s4290_s27 + $0x2508] sm:$0xff]  ;;  %v1467_v27 = vld [vmem:[%s4290_s27 + $0x2618] sm:$0xff] }
 0x30d   : > { %3671 = vmatpush.msrb.mxu2 %v1455_v24  ;;  %3690 = vmatpush.msrb.mxu3 %v1489_v32  ;;  %v1527_v46 = vld [vmem:[%s4290_s27 + $0x27f8] sm:$0xff]  ;;  %v1401_v43 = vld [vmem:[%s4290_s27 + $0x2408] sm:$0xff] }
 0x30e   : > { %3632 = vmatpush.msrb.mxu0 %v1389_v33  ;;  %3651 = vmatpush.msrb.mxu1 %v1423_v47  ;;  %v1591_v11 = vld [vmem:[%s4290_s27 + $0x29f8] sm:$0xff]  ;;  %v1465_v48 = vld [vmem:[%s4290_s27 + $0x2608] sm:$0xff] }
 0x30f   : > { %3672 = vmatpush.msrb.mxu2 %v1453_v34  ;;  %3691 = vmatpush.msrb.mxu3 %v1487_v19  ;;  %v1525_v14 = vld [vmem:[%s4290_s27 + $0x27e8] sm:$0xff]  ;;  %v1559_v15 = vld [vmem:[%s4290_s27 + $0x28f8] sm:$0xff] }
 0x310   : > { %3633 = vmatpush.msrb.mxu0 %v1387_v42  ;;  %3652 = vmatpush.msrb.mxu1 %v1421_v6  ;;  %v1589_v60 = vld [vmem:[%s4290_s27 + $0x29e8] sm:$0xff]  ;;  %v1623_v62 = vld [vmem:[%s4290_s27 + $0x2af8] sm:$0xff] }
 0x311   : > { %3673 = vmatpush.msrb.mxu2 %v1451_v61  ;;  %3692 = vmatpush.msrb.mxu3 %v1485_v38  ;;  %v1587_v24 = vld [vmem:[%s4290_s27 + $0x29d8] sm:$0xff]  ;;  %v1621_v32 = vld [vmem:[%s4290_s27 + $0x2ae8] sm:$0xff] }
 0x312   : > { %3634 = vmatpush.msrb.mxu0 %v1385_v39  ;;  %3653 = vmatpush.msrb.mxu1 %v1419_v25  ;;  %v1521_v33 = vld [vmem:[%s4290_s27 + $0x27c8] sm:$0xff]  ;;  %v1555_v47 = vld [vmem:[%s4290_s27 + $0x28d8] sm:$0xff] }
 0x313   : > { %3674 = vmatpush.msrb.mxu2 %v1449_v56  ;;  %3693 = vmatpush.msrb.mxu3 %v1483_v58  ;;  %v1519_v34 = vld [vmem:[%s4290_s27 + $0x27b8] sm:$0xff]  ;;  %v1553_v19 = vld [vmem:[%s4290_s27 + $0x28c8] sm:$0xff] }
 0x314   : > { %3635 = vmatpush.msrb.mxu0 %v1383_v0  ;;  %3654 = vmatpush.msrb.mxu1 %v1417_v1  ;;  %v1583_v42 = vld [vmem:[%s4290_s27 + $0x29b8] sm:$0xff]  ;;  %v1617_v6 = vld [vmem:[%s4290_s27 + $0x2ac8] sm:$0xff] }
 0x315   : > { %3675 = vmatpush.msrb.mxu2 %v1447_v41  ;;  %3694 = vmatpush.msrb.mxu3 %v1481_v50  ;;  %v1517_v61 = vld [vmem:[%s4290_s27 + $0x27a8] sm:$0xff]  ;;  %v1551_v38 = vld [vmem:[%s4290_s27 + $0x28b8] sm:$0xff] }
 0x316   : > { %3636 = vmatpush.msrb.mxu0 %v1381_v40  ;;  %3655 = vmatpush.msrb.mxu1 %v1415_v49  ;;  %v1581_v39 = vld [vmem:[%s4290_s27 + $0x29a8] sm:$0xff]  ;;  %v1615_v25 = vld [vmem:[%s4290_s27 + $0x2ab8] sm:$0xff] }
 0x317   : > { %3676 = vmatpush.msrb.mxu2 %v1445_v37  ;;  %3695 = vmatpush.msrb.mxu3 %v1479_v54  ;;  %v1515_v56 = vld [vmem:[%s4290_s27 + $0x2798] sm:$0xff]  ;;  %v1549_v58 = vld [vmem:[%s4290_s27 + $0x28a8] sm:$0xff] }
 0x318   : > { %3637 = vmatpush.msrb.mxu0 %v1379_v44  ;;  %3656 = vmatpush.msrb.mxu1 %v1413_v35  ;;  %v1579_v0 = vld [vmem:[%s4290_s27 + $0x2998] sm:$0xff]  ;;  %v1613_v1 = vld [vmem:[%s4290_s27 + $0x2aa8] sm:$0xff] }
 0x319   : > { %3677 = vmatpush.msrb.mxu2 %v1443_v36  ;;  %3696 = vmatpush.msrb.mxu3 %v1477_v2  ;;  %v1513_v41 = vld [vmem:[%s4290_s27 + $0x2788] sm:$0xff]  ;;  %v1547_v50 = vld [vmem:[%s4290_s27 + $0x2898] sm:$0xff] }
 0x31a   : > { %3638 = vmatpush.msrb.mxu0 %v1377_v17  ;;  %3657 = vmatpush.msrb.mxu1 %v1411_v21  ;;  %v1577_v40 = vld [vmem:[%s4290_s27 + $0x2988] sm:$0xff]  ;;  %v1611_v49 = vld [vmem:[%s4290_s27 + $0x2a98] sm:$0xff] }
 0x31b   : > { %3678 = vmatpush.msrb.mxu2 %v1441_v45  ;;  %3697 = vmatpush.msrb.mxu3 %v1475_v22  ;;  %v1511_v37 = vld [vmem:[%s4290_s27 + $0x2778] sm:$0xff]  ;;  %v1545_v54 = vld [vmem:[%s4290_s27 + $0x2888] sm:$0xff] }
 0x31c   : > { %3639 = vmatpush.msrb.mxu0 %v1375_v59  ;;  %3658 = vmatpush.msrb.mxu1 %v1409_v8  ;;  %v1575_v44 = vld [vmem:[%s4290_s27 + $0x2978] sm:$0xff]  ;;  %v1609_v35 = vld [vmem:[%s4290_s27 + $0x2a88] sm:$0xff] }
 0x31d   : > { %3679 = vmatpush.msrb.mxu2 %v1439_v20  ;;  %3698 = vmatpush.msrb.mxu3 %v1473_v23  ;;  %v1509_v36 = vld [vmem:[%s4290_s27 + $0x2768] sm:$0xff]  ;;  %v1543_v2 = vld [vmem:[%s4290_s27 + $0x2878] sm:$0xff] }
 0x31e   : > { %3640 = vmatpush.msrb.mxu0 %v1373_v30  ;;  %3659 = vmatpush.msrb.mxu1 %v1407_v57  ;;  %v1573_v17 = vld [vmem:[%s4290_s27 + $0x2968] sm:$0xff]  ;;  %v1607_v21 = vld [vmem:[%s4290_s27 + $0x2a78] sm:$0xff] }
 0x31f   : > { %3680 = vmatpush.msrb.mxu2 %v1437_v51  ;;  %3699 = vmatpush.msrb.mxu3 %v1471_v52  ;;  %v1507_v45 = vld [vmem:[%s4290_s27 + $0x2758] sm:$0xff]  ;;  %v1541_v22 = vld [vmem:[%s4290_s27 + $0x2868] sm:$0xff] }
 0x320   : > { %3641 = vmatpush.msrb.mxu0 %v1371_v18  ;;  %3660 = vmatpush.msrb.mxu1 %v1405_v63  ;;  %v1571_v59 = vld [vmem:[%s4290_s27 + $0x2958] sm:$0xff]  ;;  %v1605_v8 = vld [vmem:[%s4290_s27 + $0x2a68] sm:$0xff] }
 0x321   : > { %3681 = vmatpush.msrb.mxu2 %v1435_v7  ;;  %3700 = vmatpush.msrb.mxu3 %v1469_v55  ;;  %v1505_v20 = vld [vmem:[%s4290_s27 + $0x2748] sm:$0xff]  ;;  %v1539_v23 = vld [vmem:[%s4290_s27 + $0x2858] sm:$0xff] }
 0x322   : > { %3642 = vmatpush.msrb.mxu0 %v1369_v26  ;;  %3661 = vmatpush.msrb.mxu1 %v1403_v31  ;;  %v1569_v30 = vld [vmem:[%s4290_s27 + $0x2948] sm:$0xff]  ;;  %v1603_v57 = vld [vmem:[%s4290_s27 + $0x2a58] sm:$0xff] }
 0x323   : > { %3682 = vmatpush.msrb.mxu2 %v1433_v9  ;;  %3701 = vmatpush.msrb.mxu3 %v1467_v27  ;;  %v1503_v51 = vld [vmem:[%s4290_s27 + $0x2738] sm:$0xff]  ;;  %v1537_v52 = vld [vmem:[%s4290_s27 + $0x2848] sm:$0xff] }
 0x324   : > { %3643 = vmatmul.f32.vlgmr.msrb.gmra.mxu0 %v5026_v28  ;;  %3683 = vmatmul.f32.vlgmr.msrb.gmra.mxu2 %v5106_v12  ;;  %v1523_v28 = vld [vmem:[%s4290_s27 + $0x27d8] sm:$0xff]  ;;  %v1557_v12 = vld [vmem:[%s4290_s27 + $0x28e8] sm:$0xff] }
 0x325   : > { %3707 = vmatpush.msra.mxu0 %v1527_v46  ;;  %3747 = vmatpush.msra.mxu2 %v1591_v11  ;;  %v1567_v18 = vld [vmem:[%s4290_s27 + $0x2938] sm:$0xff]  ;;  %v1601_v63 = vld [vmem:[%s4290_s27 + $0x2a48] sm:$0xff] }
 0x326   : > { %3662 = vmatpush.msrb.mxu1 %v1401_v43  ;;  %3702 = vmatpush.msrb.mxu3 %v1465_v48  ;;  %v1501_v7 = vld [vmem:[%s4290_s27 + $0x2728] sm:$0xff]  ;;  %v1535_v55 = vld [vmem:[%s4290_s27 + $0x2838] sm:$0xff] }
 0x327   : > { %3663 = vmatmul.f32.vlgmr.msrb.gmra.mxu1 %v5094_v5  ;;  %3703 = vmatmul.f32.vlgmr.msrb.gmra.mxu3 %v5096_v53  ;;  %v1585_v5 = vld [vmem:[%s4290_s27 + $0x29c8] sm:$0xff]  ;;  %v1619_v53 = vld [vmem:[%s4290_s27 + $0x2ad8] sm:$0xff] }
 0x328   : > { %3708 = vmatpush.msra.mxu0 %v1525_v14  ;;  %3727 = vmatpush.msra.mxu1 %v1559_v15  ;;  %v1565_v26 = vld [vmem:[%s4290_s27 + $0x2928] sm:$0xff]  ;;  %v1599_v31 = vld [vmem:[%s4290_s27 + $0x2a38] sm:$0xff] }
 0x329   : > { %3748 = vmatpush.msra.mxu2 %v1589_v60  ;;  %3767 = vmatpush.msra.mxu3 %v1623_v62  ;;  %v1499_v9 = vld [vmem:[%s4290_s27 + $0x2718] sm:$0xff]  ;;  %v1533_v27 = vld [vmem:[%s4290_s27 + $0x2828] sm:$0xff] }
 0x32a   : > { %3709 = vmatpush.msra.mxu0 %v1523_v28  ;;  %3728 = vmatpush.msra.mxu1 %v1557_v12  ;;  %v1563_v46 = vld [vmem:[%s4290_s27 + $0x2918] sm:$0xff]  ;;  %v1597_v11 = vld [vmem:[%s4290_s27 + $0x2a28] sm:$0xff] }
 0x32b   : > { %3749 = vmatpush.msra.mxu2 %v1587_v24  ;;  %3768 = vmatpush.msra.mxu3 %v1621_v32  ;;  %v1497_v43 = vld [vmem:[%s4290_s27 + $0x2708] sm:$0xff]  ;;  %v1531_v48 = vld [vmem:[%s4290_s27 + $0x2818] sm:$0xff] }
 0x32c   : > { %3710 = vmatpush.msra.mxu0 %v1521_v33  ;;  %3729 = vmatpush.msra.mxu1 %v1555_v47  ;;  %v1561_v14 = vld [vmem:[%s4290_s27 + $0x2908] sm:$0xff]  ;;  %v1595_v15 = vld [vmem:[%s4290_s27 + $0x2a18] sm:$0xff] }
 0x32d   : > { %3750 = vmatpush.msra.mxu2 %v1585_v5  ;;  %3769 = vmatpush.msra.mxu3 %v1619_v53  ;;  %v1655_v60 = vld [vmem:[%s4290_s27 + $0x2bf8] sm:$0xff]  ;;  %v1529_v28 = vld [vmem:[%s4290_s27 + $0x2808] sm:$0xff] }
 0x32e   : > { %3711 = vmatpush.msra.mxu0 %v1519_v34  ;;  %3730 = vmatpush.msra.mxu1 %v1553_v19  ;;  %v1719_v62 = vld [vmem:[%s4290_s27 + $0x2df8] sm:$0xff]  ;;  %v1593_v12 = vld [vmem:[%s4290_s27 + $0x2a08] sm:$0xff] }
 0x32f   : > { %3751 = vmatpush.msra.mxu2 %v1583_v42  ;;  %3770 = vmatpush.msra.mxu3 %v1617_v6  ;;  %v1653_v24 = vld [vmem:[%s4290_s27 + $0x2be8] sm:$0xff]  ;;  %v1687_v32 = vld [vmem:[%s4290_s27 + $0x2cf8] sm:$0xff] }
 0x330   : > { %3712 = vmatpush.msra.mxu0 %v1517_v61  ;;  %3731 = vmatpush.msra.mxu1 %v1551_v38  ;;  %v1717_v33 = vld [vmem:[%s4290_s27 + $0x2de8] sm:$0xff]  ;;  %v1751_v47 = vld [vmem:[%s4290_s27 + $0x2ef8] sm:$0xff] }
 0x331   : > { %3752 = vmatpush.msra.mxu2 %v1581_v39  ;;  %3771 = vmatpush.msra.mxu3 %v1615_v25  ;;  %v1715_v5 = vld [vmem:[%s4290_s27 + $0x2dd8] sm:$0xff]  ;;  %v1749_v53 = vld [vmem:[%s4290_s27 + $0x2ee8] sm:$0xff] }
 0x332   : > { %3713 = vmatpush.msra.mxu0 %v1515_v56  ;;  %3732 = vmatpush.msra.mxu1 %v1549_v58  ;;  %v1649_v34 = vld [vmem:[%s4290_s27 + $0x2bc8] sm:$0xff]  ;;  %v1683_v19 = vld [vmem:[%s4290_s27 + $0x2cd8] sm:$0xff] }
 0x333   : > { %3753 = vmatpush.msra.mxu2 %v1579_v0  ;;  %3772 = vmatpush.msra.mxu3 %v1613_v1  ;;  %v1647_v42 = vld [vmem:[%s4290_s27 + $0x2bb8] sm:$0xff]  ;;  %v1681_v6 = vld [vmem:[%s4290_s27 + $0x2cc8] sm:$0xff] }
 0x334   : > { %3714 = vmatpush.msra.mxu0 %v1513_v41  ;;  %3733 = vmatpush.msra.mxu1 %v1547_v50  ;;  %v1711_v61 = vld [vmem:[%s4290_s27 + $0x2db8] sm:$0xff]  ;;  %v1745_v38 = vld [vmem:[%s4290_s27 + $0x2ec8] sm:$0xff] }
 0x335   : > { %3754 = vmatpush.msra.mxu2 %v1577_v40  ;;  %3773 = vmatpush.msra.mxu3 %v1611_v49  ;;  %v1645_v39 = vld [vmem:[%s4290_s27 + $0x2ba8] sm:$0xff]  ;;  %v1679_v25 = vld [vmem:[%s4290_s27 + $0x2cb8] sm:$0xff] }
 0x336   : > { %3715 = vmatpush.msra.mxu0 %v1511_v37  ;;  %3734 = vmatpush.msra.mxu1 %v1545_v54  ;;  %v1709_v56 = vld [vmem:[%s4290_s27 + $0x2da8] sm:$0xff]  ;;  %v1743_v58 = vld [vmem:[%s4290_s27 + $0x2eb8] sm:$0xff] }
 0x337   : > { %3755 = vmatpush.msra.mxu2 %v1575_v44  ;;  %3774 = vmatpush.msra.mxu3 %v1609_v35  ;;  %v1643_v0 = vld [vmem:[%s4290_s27 + $0x2b98] sm:$0xff]  ;;  %v1677_v1 = vld [vmem:[%s4290_s27 + $0x2ca8] sm:$0xff] }
 0x338   : > { %3716 = vmatpush.msra.mxu0 %v1509_v36  ;;  %3735 = vmatpush.msra.mxu1 %v1543_v2  ;;  %v1707_v41 = vld [vmem:[%s4290_s27 + $0x2d98] sm:$0xff]  ;;  %v1741_v50 = vld [vmem:[%s4290_s27 + $0x2ea8] sm:$0xff] }
 0x339   : > { %3756 = vmatpush.msra.mxu2 %v1573_v17  ;;  %3775 = vmatpush.msra.mxu3 %v1607_v21  ;;  %v1641_v40 = vld [vmem:[%s4290_s27 + $0x2b88] sm:$0xff]  ;;  %v1675_v49 = vld [vmem:[%s4290_s27 + $0x2c98] sm:$0xff] }
 0x33a   : > { %3717 = vmatpush.msra.mxu0 %v1507_v45  ;;  %3736 = vmatpush.msra.mxu1 %v1541_v22  ;;  %v1705_v37 = vld [vmem:[%s4290_s27 + $0x2d88] sm:$0xff]  ;;  %v1739_v54 = vld [vmem:[%s4290_s27 + $0x2e98] sm:$0xff] }
 0x33b   : > { %3757 = vmatpush.msra.mxu2 %v1571_v59  ;;  %3776 = vmatpush.msra.mxu3 %v1605_v8  ;;  %v1639_v44 = vld [vmem:[%s4290_s27 + $0x2b78] sm:$0xff]  ;;  %v1673_v35 = vld [vmem:[%s4290_s27 + $0x2c88] sm:$0xff] }
 0x33c   : > { %3718 = vmatpush.msra.mxu0 %v1505_v20  ;;  %3737 = vmatpush.msra.mxu1 %v1539_v23  ;;  %v1703_v36 = vld [vmem:[%s4290_s27 + $0x2d78] sm:$0xff]  ;;  %v1737_v2 = vld [vmem:[%s4290_s27 + $0x2e88] sm:$0xff] }
 0x33d   : > { %3758 = vmatpush.msra.mxu2 %v1569_v30  ;;  %3777 = vmatpush.msra.mxu3 %v1603_v57  ;;  %v1637_v17 = vld [vmem:[%s4290_s27 + $0x2b68] sm:$0xff]  ;;  %v1671_v21 = vld [vmem:[%s4290_s27 + $0x2c78] sm:$0xff] }
 0x33e   : > { %3719 = vmatpush.msra.mxu0 %v1503_v51  ;;  %3738 = vmatpush.msra.mxu1 %v1537_v52  ;;  %v1701_v45 = vld [vmem:[%s4290_s27 + $0x2d68] sm:$0xff]  ;;  %v1735_v22 = vld [vmem:[%s4290_s27 + $0x2e78] sm:$0xff] }
 0x33f   : > { %3759 = vmatpush.msra.mxu2 %v1567_v18  ;;  %3778 = vmatpush.msra.mxu3 %v1601_v63  ;;  %v1635_v59 = vld [vmem:[%s4290_s27 + $0x2b58] sm:$0xff]  ;;  %v1669_v8 = vld [vmem:[%s4290_s27 + $0x2c68] sm:$0xff] }
 0x340   : > { %3720 = vmatpush.msra.mxu0 %v1501_v7  ;;  %3739 = vmatpush.msra.mxu1 %v1535_v55  ;;  %v1699_v20 = vld [vmem:[%s4290_s27 + $0x2d58] sm:$0xff]  ;;  %v1733_v23 = vld [vmem:[%s4290_s27 + $0x2e68] sm:$0xff] }
 0x341   : > { %3760 = vmatpush.msra.mxu2 %v1565_v26  ;;  %3779 = vmatpush.msra.mxu3 %v1599_v31  ;;  %v1633_v30 = vld [vmem:[%s4290_s27 + $0x2b48] sm:$0xff]  ;;  %v1667_v57 = vld [vmem:[%s4290_s27 + $0x2c58] sm:$0xff] }
 0x342   : > { %3721 = vmatpush.msra.mxu0 %v1499_v9  ;;  %3740 = vmatpush.msra.mxu1 %v1533_v27  ;;  %v1697_v51 = vld [vmem:[%s4290_s27 + $0x2d48] sm:$0xff]  ;;  %v1731_v52 = vld [vmem:[%s4290_s27 + $0x2e58] sm:$0xff] }
 0x343   : > { %3761 = vmatpush.msra.mxu2 %v1563_v46  ;;  %3780 = vmatpush.msra.mxu3 %v1597_v11  ;;  %v1631_v18 = vld [vmem:[%s4290_s27 + $0x2b38] sm:$0xff]  ;;  %v1665_v63 = vld [vmem:[%s4290_s27 + $0x2c48] sm:$0xff] }
 0x344   : > { %3722 = vmatpush.msra.mxu0 %v1497_v43  ;;  %3741 = vmatpush.msra.mxu1 %v1531_v48  ;;  %v1695_v7 = vld [vmem:[%s4290_s27 + $0x2d38] sm:$0xff]  ;;  %v1729_v55 = vld [vmem:[%s4290_s27 + $0x2e48] sm:$0xff] }
 0x345   : > { %3762 = vmatpush.msra.mxu2 %v1561_v14  ;;  %3781 = vmatpush.msra.mxu3 %v1595_v15  ;;  %v1629_v26 = vld [vmem:[%s4290_s27 + $0x2b28] sm:$0xff]  ;;  %v1663_v31 = vld [vmem:[%s4290_s27 + $0x2c38] sm:$0xff] }
 0x346   : > { %3723 = vmatmul.f32.vlgmr.msra.gmra.mxu0 %v5108_v13  ;;  %3763 = vmatmul.f32.vlgmr.msra.gmra.mxu2 %v5188_v16  ;;  %v1651_v13 = vld [vmem:[%s4290_s27 + $0x2bd8] sm:$0xff]  ;;  %v1685_v16 = vld [vmem:[%s4290_s27 + $0x2ce8] sm:$0xff] }
 0x347   : > { %3787 = vmatpush.msrb.mxu0 %v1655_v60  ;;  %3827 = vmatpush.msrb.mxu2 %v1719_v62  ;;  %v1693_v9 = vld [vmem:[%s4290_s27 + $0x2d28] sm:$0xff]  ;;  %v1727_v27 = vld [vmem:[%s4290_s27 + $0x2e38] sm:$0xff] }
 0x348   : > { %3742 = vmatpush.msra.mxu1 %v1529_v28  ;;  %3782 = vmatpush.msra.mxu3 %v1593_v12  ;;  %v1627_v46 = vld [vmem:[%s4290_s27 + $0x2b18] sm:$0xff]  ;;  %v1661_v11 = vld [vmem:[%s4290_s27 + $0x2c28] sm:$0xff] }
 0x349   : > { %3743 = vmatmul.f32.vlgmr.msra.gmra.mxu1 %v5176_v3  ;;  %3783 = vmatmul.f32.vlgmr.msra.gmra.mxu3 %v5178_v4  ;;  %v1713_v3 = vld [vmem:[%s4290_s27 + $0x2dc8] sm:$0xff]  ;;  %v1747_v4 = vld [vmem:[%s4290_s27 + $0x2ed8] sm:$0xff] }
 0x34a   : > { %3788 = vmatpush.msrb.mxu0 %v1653_v24  ;;  %3807 = vmatpush.msrb.mxu1 %v1687_v32  ;;  %v1691_v43 = vld [vmem:[%s4290_s27 + $0x2d18] sm:$0xff]  ;;  %v1725_v48 = vld [vmem:[%s4290_s27 + $0x2e28] sm:$0xff]  ;;  %v4070_v32 = vld.sshfl [vmem:[#allocation1 + $0x28] sm:$0xff pattern:$0x73625140] }
 0x34b   : > { %3828 = vmatpush.msrb.mxu2 %v1717_v33  ;;  %3847 = vmatpush.msrb.mxu3 %v1751_v47  ;;  %v1625_v14 = vld [vmem:[%s4290_s27 + $0x2b08] sm:$0xff]  ;;  %v1659_v15 = vld [vmem:[%s4290_s27 + $0x2c18] sm:$0xff] }
 0x34c   : > { %3789 = vmatpush.msrb.mxu0 %v1651_v13  ;;  %3808 = vmatpush.msrb.mxu1 %v1685_v16  ;;  %v1689_v60 = vld [vmem:[%s4290_s27 + $0x2d08] sm:$0xff]  ;;  %v1723_v62 = vld [vmem:[%s4290_s27 + $0x2e18] sm:$0xff] }
 0x34d   : > { %3829 = vmatpush.msrb.mxu2 %v1715_v5  ;;  %3848 = vmatpush.msrb.mxu3 %v1749_v53  ;;  %v1783_v28 = vld [vmem:[%s4290_s27 + $0x2ff8] sm:$0xff]  ;;  %v1657_v12 = vld [vmem:[%s4290_s27 + $0x2c08] sm:$0xff] }
 0x34e   : > { %3790 = vmatpush.msrb.mxu0 %v1649_v34  ;;  %3809 = vmatpush.msrb.mxu1 %v1683_v19  ;;  %v1721_v24 = vld [vmem:[%s4290_s27 + $0x2e08] sm:$0xff]  ;;  %v1815_v47 = vld [vmem:[%s4290_s27 + $0x30f8] sm:$0xff] }
 0x34f   : > { %3830 = vmatpush.msrb.mxu2 %v1713_v3  ;;  %3849 = vmatpush.msrb.mxu3 %v1747_v4  ;;  %v1781_v33 = vld [vmem:[%s4290_s27 + $0x2fe8] sm:$0xff]  ;;  %v4071_v13 = vld.sshfl [vmem:[#allocation1 + $0x20] sm:$0xff pattern:$0x73625140]  ;;  %v4073_v4 = vld [vmem:[%s4296_s25] sm:$0x3] }
 0x350   : > { %3791 = vmatpush.msrb.mxu0 %v1647_v42  ;;  %3810 = vmatpush.msrb.mxu1 %v1681_v6  ;;  %v1779_v16 = vld [vmem:[%s4290_s27 + $0x2fd8] sm:$0xff]  ;;  %v4072_v5 = vld.sshfl [vmem:[#allocation1 + $0x30] sm:$0xff pattern:$0x73625140]  ;;  %v1819_v42 = vperm.slane %v4073_v4, 1 }
 0x351   : > { %3831 = vmatpush.msrb.mxu2 %v1711_v61  ;;  %3850 = vmatpush.msrb.mxu3 %v1745_v38  ;;  %v1777_v53 = vld [vmem:[%s4290_s27 + $0x2fc8] sm:$0xff]  ;;  %v1811_v34 = vld [vmem:[%s4290_s27 + $0x30d8] sm:$0xff]  ;;  %v2944_v61 = vpop.f32.mrf.mxu1 }
 0x352   : > { %3792 = vmatpush.msrb.mxu0 %v1645_v39  ;;  %3811 = vmatpush.msrb.mxu1 %v1679_v25  ;;  %v1775_v19 = vld [vmem:[%s4290_s27 + $0x2fb8] sm:$0xff]  ;;  %v1809_v3 = vld [vmem:[%s4290_s27 + $0x30c8] sm:$0xff] }
 0x353   : > { %3832 = vmatpush.msrb.mxu2 %v1709_v56  ;;  %3851 = vmatpush.msrb.mxu3 %v1743_v58  ;;  %v1773_v6 = vld [vmem:[%s4290_s27 + $0x2fa8] sm:$0xff]  ;;  %v1807_v38 = vld [vmem:[%s4290_s27 + $0x30b8] sm:$0xff]  ;;  %v2945_v56 = vadd.f32 %v2944_v61, %v1819_v42 }
 0x354   : > { %3793 = vmatpush.msrb.mxu0 %v1643_v0  ;;  %3812 = vmatpush.msrb.mxu1 %v1677_v1  ;;  %v1771_v39 = vld [vmem:[%s4290_s27 + $0x2f98] sm:$0xff]  ;;  %v1805_v25 = vld [vmem:[%s4290_s27 + $0x30a8] sm:$0xff]  ;;  %v2964_v0 = vpop.f32.mrf.mxu2 }
 0x355   : > { %3833 = vmatpush.msrb.mxu2 %v1707_v41  ;;  %3852 = vmatpush.msrb.mxu3 %v1741_v50  ;;  %v1769_v58 = vld [vmem:[%s4290_s27 + $0x2f88] sm:$0xff]  ;;  %v1803_v1 = vld [vmem:[%s4290_s27 + $0x3098] sm:$0xff] }
 0x356   : > { %3794 = vmatpush.msrb.mxu0 %v1641_v40  ;;  %3813 = vmatpush.msrb.mxu1 %v1675_v49  ;;  %v1767_v41 = vld [vmem:[%s4290_s27 + $0x2f78] sm:$0xff]  ;;  %v1801_v50 = vld [vmem:[%s4290_s27 + $0x3088] sm:$0xff]  ;;  %v2965_v40 = vadd.f32 %v2964_v0, %v2945_v56 }
 0x357   : > { %3834 = vmatpush.msrb.mxu2 %v1705_v37  ;;  %3853 = vmatpush.msrb.mxu3 %v1739_v54  ;;  %v1765_v49 = vld [vmem:[%s4290_s27 + $0x2f68] sm:$0xff]  ;;  %v2984_v37 = vpop.f32.mrf.mxu3  ;;  %v1799_v54 = vld [vmem:[%s4290_s27 + $0x3078] sm:$0xff] }
 0x358   : > { %3795 = vmatpush.msrb.mxu0 %v1639_v44  ;;  %3814 = vmatpush.msrb.mxu1 %v1673_v35  ;;  %v1763_v44 = vld [vmem:[%s4290_s27 + $0x2f58] sm:$0xff]  ;;  %v1797_v35 = vld [vmem:[%s4290_s27 + $0x3068] sm:$0xff] }
 0x359   : > { %3835 = vmatpush.msrb.mxu2 %v1703_v36  ;;  %3854 = vmatpush.msrb.mxu3 %v1737_v2  ;;  %v2985_v36 = vadd.f32 %v2984_v37, %v2965_v40  ;;  %v1761_v2 = vld [vmem:[%s4290_s27 + $0x2f48] sm:$0xff] }
 0x35a   : > { %3796 = vmatpush.msrb.mxu0 %v1637_v17  ;;  %3815 = vmatpush.msrb.mxu1 %v1671_v21  ;;  %v3004_v17 = vpop.f32.mrf.mxu0  ;;  %v1795_v21 = vld [vmem:[%s4290_s27 + $0x3058] sm:$0xff] }
 0x35b   : > { %3836 = vmatpush.msrb.mxu2 %v1701_v45  ;;  %3855 = vmatpush.msrb.mxu3 %v1735_v22  ;;  %v1759_v45 = vld [vmem:[%s4290_s27 + $0x2f38] sm:$0xff]  ;;  %v1793_v22 = vld [vmem:[%s4290_s27 + $0x3048] sm:$0xff] }
 0x35c   : > { %3797 = vmatpush.msrb.mxu0 %v1635_v59  ;;  %3816 = vmatpush.msrb.mxu1 %v1669_v8  ;;  %v3005_v59 = vadd.f32 %v3004_v17, %v2985_v36  ;;  %v1757_v8 = vld [vmem:[%s4290_s27 + $0x2f28] sm:$0xff] }
 0x35d   : > { %3837 = vmatpush.msrb.mxu2 %v1699_v20  ;;  %3856 = vmatpush.msrb.mxu3 %v1733_v23  ;;  %v3024_v20 = vpop.f32.mrf.mxu1  ;;  %v1791_v23 = vld [vmem:[%s4290_s27 + $0x3038] sm:$0xff] }
 0x35e   : > { %3798 = vmatpush.msrb.mxu0 %v1633_v30  ;;  %3817 = vmatpush.msrb.mxu1 %v1667_v57  ;;  %v1755_v30 = vld [vmem:[%s4290_s27 + $0x2f18] sm:$0xff]  ;;  %v1789_v57 = vld [vmem:[%s4290_s27 + $0x3028] sm:$0xff] }
 0x35f   : > { %3838 = vmatpush.msrb.mxu2 %v1697_v51  ;;  %3857 = vmatpush.msrb.mxu3 %v1731_v52  ;;  %v3025_v51 = vadd.f32 %v3024_v20, %v3005_v59  ;;  %v1753_v52 = vld [vmem:[%s4290_s27 + $0x2f08] sm:$0xff] }
 0x360   : > { %3799 = vmatpush.msrb.mxu0 %v1631_v18  ;;  %3818 = vmatpush.msrb.mxu1 %v1665_v63  ;;  %v3044_v18 = vpop.f32.mrf.mxu2  ;;  %v1787_v63 = vld [vmem:[%s4290_s27 + $0x3018] sm:$0xff] }
 0x361   : > { %3839 = vmatpush.msrb.mxu2 %v1695_v7  ;;  %3858 = vmatpush.msrb.mxu3 %v1729_v55  ;;  %v1785_v7 = vld [vmem:[%s4290_s27 + $0x3008] sm:$0xff]  ;;  %v3045_v55 = vadd.f32 %v3044_v18, %v3025_v51 }
 0x362   : > { %3800 = vmatpush.msrb.mxu0 %v1629_v26  ;;  %3819 = vmatpush.msrb.mxu1 %v1663_v31  ;;  %v4074_v26 = vld.sshfl [vmem:[#allocation1 + $0x38] sm:$0xff pattern:$0x73625140]  ;;  %v3064_v31 = vpop.f32.mrf.mxu3 }
 0x363   : > { %3840 = vmatpush.msrb.mxu2 %v1693_v9  ;;  %3859 = vmatpush.msrb.mxu3 %v1727_v27  ;;  %v3084_v9 = vpop.f32.mrf.mxu0  ;;  %v4075_v27 = vld.sshfl [vmem:[#allocation1] sm:$0xff pattern:$0x73625140] }
 0x364   : > { %3801 = vmatpush.msrb.mxu0 %v1627_v46  ;;  %3820 = vmatpush.msrb.mxu1 %v1661_v11  ;;  %v3065_v46 = vadd.f32 %v3064_v31, %v3045_v55 }
 0x365   : > { %3841 = vmatpush.msrb.mxu2 %v1691_v43  ;;  %3860 = vmatpush.msrb.mxu3 %v1725_v48  ;;  %v3104_v43 = vpop.f32.mrf.mxu1 }
 0x366   : > { %3802 = vmatpush.msrb.mxu0 %v1625_v14  ;;  %3821 = vmatpush.msrb.mxu1 %v1659_v15  ;;  %v3085_v11 = vadd.f32 %v3084_v9, %v3065_v46 }
 0x367   : > { %3842 = vmatpush.msrb.mxu2 %v1689_v60  ;;  %3861 = vmatpush.msrb.mxu3 %v1723_v62 }
 0x368   : > { %3803 = vmatmul.f32.vlgmr.msrb.gmra.mxu0 %v5190_v29  ;;  %3843 = vmatmul.f32.vlgmr.msrb.gmra.mxu2 %v4070_v32  ;;  %v1813_v29 = vld [vmem:[%s4290_s27 + $0x30e8] sm:$0xff]  ;;  %v3124_v48 = vpop.f32.mrf.mxu2  ;;  %v3105_v14 = vadd.f32 %v3104_v43, %v3085_v11  ;;  %s4016_s27 = sshll.u32 %s4006_s16, 1 }
 0x369   : > { %3867 = vmatpush.msra.mxu0 %v1783_v28  ;;  %3822 = vmatpush.msrb.mxu1 %v1657_v12  ;;  %p230_p7 = scmp.lt.s32.totalorder %s4016_s27, 7 }
 0x36a   : > { %3862 = vmatpush.msrb.mxu3 %v1721_v24  ;;  %3823 = vmatmul.f32.vlgmr.msrb.gmra.mxu1 %v4071_v13  ;;  %v3125_v15 = vadd.f32 %v3124_v48, %v3105_v14  ;;  %v3144_v60 = vpop.f32.mrf.mxu3 }
 0x36b   : > { %3863 = vmatmul.f32.vlgmr.msrb.gmra.mxu3 %v4072_v5  ;;  %3868 = vmatpush.msra.mxu0 %v1781_v33  ;;  %v3164_v62 = vpop.f32.mrf.mxu0  ;;  %s6153_s27 = smov (!%p230_p7, %s4016_s27), 7 }
 0x36c   : > { %3887 = vmatpush.msra.mxu1 %v1815_v47  ;;  %v3145_v28 = vadd.f32 %v3144_v60, %v3125_v15  ;;  %s4017_s25 = sshll.u32 %s6153_s27, 1 }
 0x36d   : > { %3869 = vmatpush.msra.mxu0 %v1779_v16  ;;  %v3184_v24 = vpop.f32.mrf.mxu1  ;;  %s233_s5 = scalar_lea.vmem %s6144_s3, %s4017_s25 }
 0x36e   : > { %3888 = vmatpush.msra.mxu1 %v1813_v29  ;;  %v3165_v12 = vadd.f32 %v3164_v62, %v3145_v28 }
 0x36f   : > { %3870 = vmatpush.msra.mxu0 %v1777_v53 }
 0x370   : > { %3889 = vmatpush.msra.mxu1 %v1811_v34  ;;  %v3204_v32 = vpop.f32.mrf.mxu2  ;;  %v3185_v33 = vadd.f32 %v3184_v24, %v3165_v12 }
 0x371   : > { %3871 = vmatpush.msra.mxu0 %v1775_v19 }
 0x372   : > { %3890 = vmatpush.msra.mxu1 %v1809_v3  ;;  %v3205_v47 = vadd.f32 %v3204_v32, %v3185_v33  ;;  %v3224_v13 = vpop.f32.mrf.mxu3 }
 0x373   : > { %3872 = vmatpush.msra.mxu0 %v1773_v6  ;;  %v3244_v16 = vpop.f32.mrf.mxu0 }
 0x374   : > { %3891 = vmatpush.msra.mxu1 %v1807_v38  ;;  %v3225_v5 = vadd.f32 %v3224_v13, %v3205_v47 }
 0x375   : > { %3873 = vmatpush.msra.mxu0 %v1771_v39  ;;  %v3264_v53 = vpop.f32.mrf.mxu1 }
 0x376   : > { %3892 = vmatpush.msra.mxu1 %v1805_v25  ;;  %v3245_v29 = vadd.f32 %v3244_v16, %v3225_v5 }
 0x377   : > { %3874 = vmatpush.msra.mxu0 %v1769_v58 }
 0x378   : > { %3893 = vmatpush.msra.mxu1 %v1803_v1  ;;  %v3284_v34 = vpop.f32.mrf.mxu2  ;;  %v3265_v19 = vadd.f32 %v3264_v53, %v3245_v29 }
 0x379   : > { %3875 = vmatpush.msra.mxu0 %v1767_v41 }
 0x37a   : > { %3894 = vmatpush.msra.mxu1 %v1801_v50  ;;  %v3285_v3 = vadd.f32 %v3284_v34, %v3265_v19  ;;  %v3304_v4 = vpop.f32.mrf.mxu3 }
 0x37b   : > { %3876 = vmatpush.msra.mxu0 %v1765_v49  ;;  %v3324_v42 = vpop.f32.mrf.mxu0 }
 0x37c   : > { %3895 = vmatpush.msra.mxu1 %v1799_v54  ;;  %v3305_v6 = vadd.f32 %v3304_v4, %v3285_v3  ;;  %v3907_v4 = vmax.f32 %v5596_v10, 0.0 }
 0x37d   : > { %3877 = vmatpush.msra.mxu0 %v1763_v44  ;;  %v3344_v38 = vpop.f32.mrf.mxu1 }
 0x37e   : > { %3896 = vmatpush.msra.mxu1 %v1797_v35  ;;  %v3325_v61 = vadd.f32 %v3324_v42, %v3305_v6 }
 0x37f   : > { %3878 = vmatpush.msra.mxu0 %v1761_v2 }
 0x380   : > { %3897 = vmatpush.msra.mxu1 %v1795_v21  ;;  %v3364_v39 = vpop.f32.mrf.mxu2  ;;  %v3345_v25 = vadd.f32 %v3344_v38, %v3325_v61 }
 0x381   : > { %3879 = vmatpush.msra.mxu0 %v1759_v45 }
 0x382   : > { %3898 = vmatpush.msra.mxu1 %v1793_v22  ;;  %v3365_v56 = vadd.f32 %v3364_v39, %v3345_v25  ;;  %v3384_v58 = vpop.f32.mrf.mxu3 }
 0x383   : > { %3880 = vmatpush.msra.mxu0 %v1757_v8  ;;  %v3404_v0 = vpop.f32.mrf.mxu0 }
 0x384   : > { %3899 = vmatpush.msra.mxu1 %v1791_v23  ;;  %v3385_v1 = vadd.f32 %v3384_v58, %v3365_v56 }
 0x385   : > { %3881 = vmatpush.msra.mxu0 %v1755_v30  ;;  %v3424_v50 = vpop.f32.mrf.mxu1 }
 0x386   : > { %3900 = vmatpush.msra.mxu1 %v1789_v57  ;;  %v3405_v41 = vadd.f32 %v3404_v0, %v3385_v1 }
 0x387   : > { %3882 = vmatpush.msra.mxu0 %v1753_v52 }
 0x388   : > { %3901 = vmatpush.msra.mxu1 %v1787_v63  ;;  %3883 = vmatmul.f32.vlgmr.msra.gmra.mxu0 %v4074_v26  ;;  %v3444_v40 = vpop.f32.mrf.mxu2  ;;  %v3425_v49 = vadd.f32 %v3424_v50, %v3405_v41 }
 0x38a   : > { %3902 = vmatpush.msra.mxu1 %v1785_v7  ;;  %v3445_v37 = vadd.f32 %v3444_v40, %v3425_v49  ;;  %v3464_v54 = vpop.f32.mrf.mxu3 }
 0x38b   : > { %3903 = vmatmul.f32.vlgmr.msra.gmra.mxu1 %v4075_v27  ;;  %v3484_v44 = vpop.f32.mrf.mxu0 }
 0x38c   : > { %v3465_v35 = vadd.f32 %v3464_v54, %v3445_v37 }
 0x38d   : > { %v3504_v2 = vpop.f32.mrf.mxu1 }
 0x38e   : > { %v3485_v36 = vadd.f32 %v3484_v44, %v3465_v35 }
 0x390   : > { %v3524_v17 = vpop.f32.mrf.mxu2  ;;  %v3505_v21 = vadd.f32 %v3504_v2, %v3485_v36 }
 0x392   : > { %v3525_v45 = vadd.f32 %v3524_v17, %v3505_v21  ;;  %v3544_v22 = vpop.f32.mrf.mxu3 }
 0x393   : > { %v3564_v59 = vpop.f32.mrf.mxu0 }
 0x394   : > { %v3545_v8 = vadd.f32 %v3544_v22, %v3525_v45 }
 0x395   : > { %v3584_v23 = vpop.f32.mrf.mxu1 }
 0x396   : > { %v3565_v20 = vadd.f32 %v3564_v59, %v3545_v8 }
 0x398   : > { %v3604_v30 = vpop.f32.mrf.mxu2  ;;  %v3585_v57 = vadd.f32 %v3584_v23, %v3565_v20 }
 0x39a   : > { %v3605_v51 = vadd.f32 %v3604_v30, %v3585_v57  ;;  %v3624_v52 = vpop.f32.mrf.mxu3 }
 0x39c   : > { %v3625_v63 = vadd.f32 %v3624_v52, %v3605_v51 }
 0x3a1   : > { %v3644_v18 = vpop.f32.mrf.mxu0 }
 0x3a2   : > { %v3645_v7 = vadd.f32 %v3644_v18, %v3625_v63 }
 0x3a4   : > { %v3664_v55 = vpop.f32.mrf.mxu1 }
 0x3a5   : > { %v3665_v31 = vadd.f32 %v3664_v55, %v3645_v7 }
 0x3a7   : > { %v3684_v26 = vpop.f32.mrf.mxu2 }
 0x3a8   : > { %v3685_v9 = vadd.f32 %v3684_v26, %v3665_v31 }
 0x3aa   : > { %v3704_v27 = vpop.f32.mrf.mxu3 }
 0x3ab   : > { %v3705_v11 = vadd.f32 %v3704_v27, %v3685_v9 }
 0x3c3   : > { %v3724_v46 = vpop.f32.mrf.mxu0 }
 0x3c4   : > { %v3725_v43 = vadd.f32 %v3724_v46, %v3705_v11 }
 0x3c6   : > { %v3744_v48 = vpop.f32.mrf.mxu1 }
 0x3c7   : > { %v3745_v15 = vadd.f32 %v3744_v48, %v3725_v43 }
 0x3c9   : > { %v3764_v14 = vpop.f32.mrf.mxu2 }
 0x3ca   : > { %v3765_v60 = vadd.f32 %v3764_v14, %v3745_v15 }
 0x3cc   : > { %v3784_v62 = vpop.f32.mrf.mxu3 }
 0x3cd   : > { %v3785_v12 = vadd.f32 %v3784_v62, %v3765_v60 }
 0x3e5   : > { %v3804_v28 = vpop.f32.mrf.mxu0 }
 0x3e6   : > { %v3805_v24 = vadd.f32 %v3804_v28, %v3785_v12 }
 0x3e7   : > { %v3824_v32 = vpop.f32.mrf.mxu1 }
 0x3e8   : > { %v3825_v47 = vadd.f32 %v3824_v32, %v3805_v24 }
 0x3eb   : > { %v3844_v33 = vpop.f32.mrf.mxu2 }
 0x3ec   : > { %v3845_v13 = vadd.f32 %v3844_v33, %v3825_v47 }
 0x3ee   : > { %v3864_v16 = vpop.f32.mrf.mxu3 }
 0x3ef   : > { %v3865_v5 = vadd.f32 %v3864_v16, %v3845_v13 }
 0x405   : > { %v3884_v29 = vpop.f32.mrf.mxu0 }
 0x406   : > { %v3885_v53 = vadd.f32 %v3884_v29, %v3865_v5 }
 0x408   : > { %v3904_v34 = vpop.f32.mrf.mxu1 }
 0x409   : > { %v3905_v19 = vadd.f32 %v3904_v34, %v3885_v53 }
 0x40b   : > { %v3908_v3 = vmax.f32 %v3905_v19, 0.0 }
 0x40d   : > { %v3911_v42 = vrot.slane %v3908_v3, 6 }
 0x40f   : > { %v3913_v6 = vsel %vm3912_vm0, %v3907_v4, %v3911_v42 }
 0x410   : > { %3915 = vst [vmem:[%s233_s5] sm:$0xf] %v3913_v6 }
 0x411 PF: > { %p16_p8 = scmp.ge.s32.totalorder %s4219_s17, 6   ;;  %s6148_s12 = smov %s4166_s13 }
 0x412   : > { %s6149_s13 = smov %s4170_s14  ;;  %s6150_s14 = smov %s4229_s20 }
 0x413   : > { %s6151_s15 = smov %s4219_s17  ;;  %18 = sbr.rel (!%p16_p8) target bundleno = 5 (0x5), region = 86 }
 0x418   :  { %3938 = vsyncpa [#allocation3], 1 }
 0x419   :  { %3940 = vsyncpa [#allocation3 + $0x1], 1 }
 0x41a   :  { %3941 = vsyncpa [#allocation5], 1 }
 0x41b   :  { %3943 = vsyncpa [#allocation5 + $0x1], 1 }

</bundles_post_ra>
